<compile_context>
chip_gen: v6e
topology: v6e:2x2x1
jax: 0.10.0
libtpu: 0.0.40
codegen_flags: <defaults>
</compile_context>

<pallas_src>
import math

import numpy as np
import jax
import jax.numpy as jnp
from jax import lax
from jax.experimental import pallas as pl
from jax.experimental.pallas import tpu as pltpu

EPS = 1e-5


# --------------------------------------------------------------------------
# Fused kernel: conv1 -> BN -> ReLU -> pool -> conv2 -> BN -> ReLU -> pool ->
#               Linear(+BN1d) -> sigmoid -> Linear -> tanh
# All four matmuls are single MXU ops; both pools are aligned lane-chunk maxes.
# --------------------------------------------------------------------------
def codegen_kernel(x_ref, t1_ref, s1_ref, b1_ref, t2_ref, s2_ref, b2_ref,
                   lw1_ref, ls_ref, lb_ref, lw2_ref, lb2_ref, o_ref):
    # conv1 (block-Toeplitz matmul) + folded BN + ReLU; columns (qh,qw,h2,w2,c)
    a1 = jnp.dot(x_ref[...], t1_ref[...], preferred_element_type=jnp.float32)
    a1 = jnp.maximum(a1 * s1_ref[...] + b1_ref[...], 0.0)
    # 2x2 max-pool == max over the four 128-aligned quadrant chunks
    q1 = a1.shape[1] // 4
    p1 = jnp.maximum(jnp.maximum(a1[:, :q1], a1[:, q1:2 * q1]),
                     jnp.maximum(a1[:, 2 * q1:3 * q1], a1[:, 3 * q1:]))
    # (Dropout2d is identity at inference.)

    # conv2 (block-Toeplitz matmul) + folded BN + ReLU
    a2 = jnp.dot(p1.astype(jnp.bfloat16), t2_ref[...],
                 preferred_element_type=jnp.float32)
    a2 = jnp.maximum(a2 * s2_ref[...] + b2_ref[...], 0.0)
    q2 = a2.shape[1] // 4
    p2 = jnp.maximum(jnp.maximum(a2[:, :q2], a2[:, q2:2 * q2]),
                     jnp.maximum(a2[:, 2 * q2:3 * q2], a2[:, 3 * q2:]))

    # head: Linear(+folded BN1d) -> sigmoid -> Linear -> tanh
    h = jnp.dot(p2.astype(jnp.bfloat16), lw1_ref[...],
                preferred_element_type=jnp.float32)
    h = h * ls_ref[...] + lb_ref[...]
    h = pl.reciprocal(1.0 + jnp.exp(-h), approx=True)        # sigmoid (EUP)
    y = jnp.dot(h.astype(jnp.bfloat16), lw2_ref[...],
                preferred_element_type=jnp.float32) + lb2_ref[...]
    o_ref[...] = jnp.tanh(y)


# --------------------------------------------------------------------------
# Wrapper helpers: BN folding + block-Toeplitz construction (cheap XLA ops,
# constant-shaped, run once per call under jit).
# --------------------------------------------------------------------------
def _fold_bn(lin_bias, gamma, beta, mean, var):
    inv = gamma / jnp.sqrt(var + EPS)
    scale = inv.astype(jnp.float32)
    bias = ((lin_bias - mean) * inv + beta).astype(jnp.float32)
    return scale, bias


def _shift_select(size, ksize, pad):
    """S[i_in, k, i_out] = 1 iff i_in == i_out + k - pad (SAME conv tap map)."""
    s = np.zeros((size, ksize, size), np.float32)
    for k in range(ksize):
        for o in range(size):
            i = o + k - pad
            if 0 <= i < size:
                s[i, k, o] = 1.0
    return jnp.asarray(s)


def _conv_toeplitz(w_hwio, hw, cout_pad):
    """SAME conv on an (hw, hw, Cin) map as a single matmul.

    Rows are ordered (h, w, cin); output columns are ordered
    (qh, qw, h//2, w//2, cout_pad) so the following 2x2 max-pool is a max over
    four 128-aligned lane chunks.  Zero-padding of the conv input is folded
    into the Toeplitz (out-of-bounds taps simply have no weight entry).
    """
    kh, kw, cin, cout = w_hwio.shape
    sh = _shift_select(hw, kh, kh // 2)
    sw = _shift_select(hw, kw, kw // 2)
    t = jnp.einsum("ikh,jlw,klcd->ijchwd", sh, sw, w_hwio,
                   precision=lax.Precision.HIGHEST)   # (hw,hw,cin,hw,hw,cout)
    if cout_pad > cout:
        t = jnp.pad(t, ((0, 0),) * 5 + ((0, cout_pad - cout),))
    t = t.reshape(hw, hw, cin, hw // 2, 2, hw // 2, 2, cout_pad)
    t = t.transpose(0, 1, 2, 4, 6, 3, 5, 7)   # rows (h,w,c) | cols (qh,qw,h2,w2,c)
    return t.reshape(hw * hw * cin, 4 * (hw // 2) * (hw // 2) * cout_pad)


def _lane_pad_to(c, pos):
    """Smallest padded channel count so that pos * c_pad is a multiple of 128."""
    step = 128 // math.gcd(128, pos)
    return ((c + step - 1) // step) * step


# --------------------------------------------------------------------------
# Forward wrapper
# --------------------------------------------------------------------------
def codegen_forward(x_nchw, p, *, batch_block=256):
    """CodeGen.forward: x is the BasicExt output, NCHW = (B, 16, S, S)."""
    B, C0, S, _ = x_nchw.shape
    assert S % 4 == 0, "two 2x2 max-pools require the spatial size % 4 == 0"
    C1 = p["w1"].shape[-1]                        # 32
    C2 = p["w2"].shape[-1]                        # 80
    H2, H3 = S // 2, S // 4
    pos1, pos2 = H2 * H2, H3 * H3
    C1P = _lane_pad_to(C1, pos1)                  # 32 (already aligned)
    C2P = _lane_pad_to(C2, pos2)                  # 96 -> 384-lane pool chunks
    N1 = p["lw1"].shape[1]                        # 200
    N1P = ((N1 + 127) // 128) * 128               # 256
    NH = p["lw2"].shape[-1]                       # hash_size
    NHP = ((NH + 127) // 128) * 128               # 128 (lane-dense output)

    # conv weights -> block-Toeplitz matmul operands (bf16)
    t1 = _conv_toeplitz(p["w1"], S, C1P).astype(jnp.bfloat16)
    w2p = jnp.pad(p["w2"], ((0, 0), (0, 0), (0, C1P - C1), (0, 0)))
    t2 = _conv_toeplitz(w2p, H2, C2P).astype(jnp.bfloat16)

    # folded BN scale/bias, tiled to the lane-dense column order (c innermost)
    s1, b1 = _fold_bn(p["b1"], p["g1"], p["be1"], p["m1"], p["v1"])
    s1v = jnp.tile(jnp.pad(s1, (0, C1P - C1)), 4 * pos1).reshape(1, -1)
    b1v = jnp.tile(jnp.pad(b1, (0, C1P - C1)), 4 * pos1).reshape(1, -1)
    s2, b2 = _fold_bn(p["b2"], p["g2"], p["be2"], p["m2"], p["v2"])
    s2v = jnp.tile(jnp.pad(s2, (0, C2P - C2)), 4 * pos2).reshape(1, -1)
    b2v = jnp.tile(jnp.pad(b2, (0, C2P - C2)), 4 * pos2).reshape(1, -1)

    # l1: rows from torch's NCHW flatten order (c2,h3,w3) -> (h3,w3,c2) blocks
    # with zero rows for the 80->96 channel pad; hidden padded 200 -> 256.
    lw1 = p["lw1"].reshape(C2, H3, H3, N1).transpose(1, 2, 0, 3)
    lw1 = jnp.pad(lw1, ((0, 0), (0, 0), (0, C2P - C2), (0, 0)))
    lw1 = jnp.pad(lw1.reshape(pos2 * C2P, N1),
                  ((0, 0), (0, N1P - N1))).astype(jnp.bfloat16)
    ls, lb = _fold_bn(p["lb1"], p["lg"], p["lbe"], p["lm"], p["lv"])
    lsv = jnp.pad(ls, (0, N1P - N1)).reshape(1, -1)
    lbv = jnp.pad(lb, (0, N1P - N1)).reshape(1, -1)
    # zero pad ROWS of lw2 absorb sigmoid(0)=0.5 from the padded hidden lanes;
    # zero pad COLS / bias lanes are sliced off below.
    lw2 = jnp.pad(p["lw2"], ((0, N1P - N1), (0, NHP - NH))).astype(jnp.bfloat16)
    lb2 = jnp.pad(p["lb2"], (0, NHP - NH)).reshape(1, -1).astype(jnp.float32)

    # NCHW -> NHWC -> (B, S*S*C0) bf16: the single cast of the activation input
    xf = jnp.transpose(x_nchw, (0, 2, 3, 1)).reshape(B, S * S * C0)
    xf = xf.astype(jnp.bfloat16)

    # batch grid axis (block sized for v7x's 64 MiB VMEM; weights stay resident)
    BB = B if B <= batch_block else batch_block
    Bp = ((B + BB - 1) // BB) * BB
    if Bp != B:
        xf = jnp.pad(xf, ((0, Bp - B), (0, 0)))

    weights = (t1, s1v, b1v, t2, s2v, b2v, lw1, lsv, lbv, lw2, lb2)
    w_specs = [pl.BlockSpec(w.shape, lambda i: (0, 0)) for w in weights]

    out = pl.pallas_call(
        codegen_kernel,
        grid=(Bp // BB,),
        in_specs=[pl.BlockSpec((BB, xf.shape[1]), lambda i: (i, 0))] + w_specs,
        out_specs=pl.BlockSpec((BB, NHP), lambda i: (i, 0)),
        out_shape=jax.ShapeDtypeStruct((Bp, NHP), jnp.float32),
        compiler_params=pltpu.CompilerParams(
            dimension_semantics=("parallel",),
            vmem_limit_bytes=48 * 1024 * 1024),
    )(xf, *weights)
    return out[:B, :NH]


# --------------------------------------------------------------------------
# Pure-JAX reference (correctness check only)
# --------------------------------------------------------------------------
def reference_forward(x_nchw, p):
    x = jnp.transpose(x_nchw, (0, 2, 3, 1))

    def block(x, w, b, g, be, m, v):
        y = lax.conv_general_dilated(
            x, w, (1, 1), "SAME",
            dimension_numbers=("NHWC", "HWIO", "NHWC"),
            precision=lax.Precision.HIGHEST) + b
        y = (y - m) / jnp.sqrt(v + EPS) * g + be
        y = jnp.maximum(y, 0.0)
        B, H, W, C = y.shape
        return y.reshape(B, H // 2, 2, W // 2, 2, C).max(axis=(2, 4))

    c1 = block(x, p["w1"], p["b1"], p["g1"], p["be1"], p["m1"], p["v1"])
    c2 = block(c1, p["w2"], p["b2"], p["g2"], p["be2"], p["m2"], p["v2"])
    feat = jnp.transpose(c2, (0, 3, 1, 2)).reshape(c2.shape[0], -1)
    h = jnp.dot(feat, p["lw1"], precision=lax.Precision.HIGHEST) + p["lb1"]
    h = (h - p["lm"]) / jnp.sqrt(p["lv"] + EPS) * p["lg"] + p["lbe"]
    h = jax.nn.sigmoid(h)
    return jnp.tanh(jnp.dot(h, p["lw2"], precision=lax.Precision.HIGHEST)
                    + p["lb2"])


# --------------------------------------------------------------------------
# Deterministic synthetic parameters & demo
# --------------------------------------------------------------------------
def make_params(key, image_scale=16, hash_size=32):
    s2 = image_scale // 2                       # CodeGen input spatial size
    feat_dim = 80 * (s2 // 4) * (s2 // 4)       # after two conv+pool blocks
    ks = jax.random.split(key, 20)
    n = jax.random.normal
    u = jax.random.uniform
    return {
        # conv1: Conv2d(16, 32, k=5, p=2) + BN(32)
        "w1": 0.05 * n(ks[0], (5, 5, 16, 32), jnp.float32),
        "b1": 0.10 * n(ks[1], (32,), jnp.float32),
        "g1": u(ks[2], (32,), jnp.float32, 0.8, 1.2),
        "be1": 0.10 * n(ks[3], (32,), jnp.float32),
        "m1": 0.10 * n(ks[4], (32,), jnp.float32),
        "v1": u(ks[5], (32,), jnp.float32, 0.5, 1.5),
        # conv2: Conv2d(32, 80, k=5, p=2) + BN(80)
        "w2": 0.05 * n(ks[6], (5, 5, 32, 80), jnp.float32),
        "b2": 0.10 * n(ks[7], (80,), jnp.float32),
        "g2": u(ks[8], (80,), jnp.float32, 0.8, 1.2),
        "be2": 0.10 * n(ks[9], (80,), jnp.float32),
        "m2": 0.10 * n(ks[10], (80,), jnp.float32),
        "v2": u(ks[11], (80,), jnp.float32, 0.5, 1.5),
        # l1: Linear(feat_dim, 200) + BatchNorm1d(200)
        "lw1": 0.03 * n(ks[12], (feat_dim, 200), jnp.float32),
        "lb1": 0.10 * n(ks[13], (200,), jnp.float32),
        "lg": u(ks[14], (200,), jnp.float32, 0.8, 1.2),
        "lbe": 0.10 * n(ks[15], (200,), jnp.float32),
        "lm": 0.10 * n(ks[16], (200,), jnp.float32),
        "lv": u(ks[17], (200,), jnp.float32, 0.5, 1.5),
        # l2: Linear(200, hash_size)
        "lw2": 0.05 * n(ks[18], (200, hash_size), jnp.float32),
        "lb2": 0.10 * n(ks[19], (hash_size,), jnp.float32),
    }


if __name__ == "__main__":
    key = jax.random.PRNGKey(0)
    kx, kp = jax.random.split(key)

    image_scale, hash_size, batch = 16, 32, 2
    params = make_params(kp, image_scale=image_scale, hash_size=hash_size)

    # CodeGen's input x is the BasicExt feature map: (B, 16, S/2, S/2), NCHW.
    x = jax.random.normal(kx, (batch, 16, image_scale // 2, image_scale // 2),
                          jnp.float32)

    fwd = jax.jit(codegen_forward)
    out = jax.block_until_ready(fwd(x, params))
    ref = jax.block_until_ready(reference_forward(x, params))

    assert out.shape == (batch, hash_size), out.shape
    assert bool(jnp.all(jnp.isfinite(out)))
    # bf16 MXU operands (f32 accumulation) vs an all-f32 reference.
    assert jnp.allclose(out, ref, atol=3e-2, rtol=3e-2), (
        float(jnp.max(jnp.abs(out - ref))))

    print("KERNEL_OK")
</pallas_src>

<mosaic_0001>
module attributes {stable_mosaic.version = 11 : i64} {
  func.func @codegen_kernel(%arg0: i32, %arg1: memref<2x1024xbf16, #tpu.memory_space<vmem>>, %arg2: memref<1024x2048xbf16, #tpu.memory_space<vmem>>, %arg3: memref<1x2048xf32, #tpu.memory_space<vmem>>, %arg4: memref<1x2048xf32, #tpu.memory_space<vmem>>, %arg5: memref<512x1536xbf16, #tpu.memory_space<vmem>>, %arg6: memref<1x1536xf32, #tpu.memory_space<vmem>>, %arg7: memref<1x1536xf32, #tpu.memory_space<vmem>>, %arg8: memref<384x256xbf16, #tpu.memory_space<vmem>>, %arg9: memref<1x256xf32, #tpu.memory_space<vmem>>, %arg10: memref<1x256xf32, #tpu.memory_space<vmem>>, %arg11: memref<256x128xbf16, #tpu.memory_space<vmem>>, %arg12: memref<1x128xf32, #tpu.memory_space<vmem>>, %arg13: memref<2x128xf32, #tpu.memory_space<vmem>>) attributes {dimension_semantics = [#tpu.dimension_semantics<parallel>], iteration_bounds = array<i64: 1>, scalar_prefetch = 0 : i64, scratch_operands = 0 : i64, tpu.core_type = #tpu.core_type<tc>, window_params = [{transform_indices = @transform_0, window_bounds = array<i64: 2, 1024>}, {pipeline_mode = #tpu.pipeline_mode<synchronous>, transform_indices = @transform_1, window_bounds = array<i64: 1024, 2048>}, {pipeline_mode = #tpu.pipeline_mode<synchronous>, transform_indices = @transform_2, window_bounds = array<i64: 1, 2048>}, {pipeline_mode = #tpu.pipeline_mode<synchronous>, transform_indices = @transform_3, window_bounds = array<i64: 1, 2048>}, {pipeline_mode = #tpu.pipeline_mode<synchronous>, transform_indices = @transform_4, window_bounds = array<i64: 512, 1536>}, {pipeline_mode = #tpu.pipeline_mode<synchronous>, transform_indices = @transform_5, window_bounds = array<i64: 1, 1536>}, {pipeline_mode = #tpu.pipeline_mode<synchronous>, transform_indices = @transform_6, window_bounds = array<i64: 1, 1536>}, {pipeline_mode = #tpu.pipeline_mode<synchronous>, transform_indices = @transform_7, window_bounds = array<i64: 384, 256>}, {pipeline_mode = #tpu.pipeline_mode<synchronous>, transform_indices = @transform_8, window_bounds = array<i64: 1, 256>}, {pipeline_mode = #tpu.pipeline_mode<synchronous>, transform_indices = @transform_9, window_bounds = array<i64: 1, 256>}, {pipeline_mode = #tpu.pipeline_mode<synchronous>, transform_indices = @transform_10, window_bounds = array<i64: 256, 128>}, {pipeline_mode = #tpu.pipeline_mode<synchronous>, transform_indices = @transform_11, window_bounds = array<i64: 1, 128>}, {transform_indices = @transform_12, window_bounds = array<i64: 2, 128>}]} {
    %c0 = arith.constant 0 : index
    %c0_0 = arith.constant 0 : index
    %0 = vector.load %arg1[%c0, %c0_0] : memref<2x1024xbf16, #tpu.memory_space<vmem>>, vector<2x1024xbf16>
    %c0_1 = arith.constant 0 : index
    %c0_2 = arith.constant 0 : index
    %1 = vector.load %arg2[%c0_1, %c0_2] : memref<1024x2048xbf16, #tpu.memory_space<vmem>>, vector<1024x2048xbf16>
    %cst = arith.constant dense<0.000000e+00> : vector<2x2048xf32>
    %2 = tpu.matmul %0, %1, %cst {dimension_numbers = #tpu.dot_dimension_numbers<[1], [0], [0], [1], [0, 0, 1, 1], [], []>} : vector<2x1024xbf16>, vector<1024x2048xbf16>, vector<2x2048xf32> -> vector<2x2048xf32>
    %c0_3 = arith.constant 0 : index
    %c0_4 = arith.constant 0 : index
    %3 = vector.load %arg3[%c0_3, %c0_4] : memref<1x2048xf32, #tpu.memory_space<vmem>>, vector<1x2048xf32>
    %4 = vector.broadcast %3 : vector<1x2048xf32> to vector<2x2048xf32>
    %5 = arith.mulf %2, %4 : vector<2x2048xf32>
    %c0_5 = arith.constant 0 : index
    %c0_6 = arith.constant 0 : index
    %6 = vector.load %arg4[%c0_5, %c0_6] : memref<1x2048xf32, #tpu.memory_space<vmem>>, vector<1x2048xf32>
    %7 = vector.broadcast %6 : vector<1x2048xf32> to vector<2x2048xf32>
    %8 = arith.addf %5, %7 : vector<2x2048xf32>
    %cst_7 = arith.constant 0.000000e+00 : f32
    %9 = vector.broadcast %cst_7 : f32 to vector<2x2048xf32>
    %10 = arith.maximumf %8, %9 : vector<2x2048xf32>
    %11 = vector.extract_strided_slice %10 {offsets = [0, 0], sizes = [2, 512], strides = [1, 1]} : vector<2x2048xf32> to vector<2x512xf32>
    %12 = vector.extract_strided_slice %10 {offsets = [0, 512], sizes = [2, 512], strides = [1, 1]} : vector<2x2048xf32> to vector<2x512xf32>
    %13 = arith.maximumf %11, %12 : vector<2x512xf32>
    %14 = vector.extract_strided_slice %10 {offsets = [0, 1024], sizes = [2, 512], strides = [1, 1]} : vector<2x2048xf32> to vector<2x512xf32>
    %15 = vector.extract_strided_slice %10 {offsets = [0, 1536], sizes = [2, 512], strides = [1, 1]} : vector<2x2048xf32> to vector<2x512xf32>
    %16 = arith.maximumf %14, %15 : vector<2x512xf32>
    %17 = arith.maximumf %13, %16 : vector<2x512xf32>
    %18 = arith.truncf %17 : vector<2x512xf32> to vector<2x512xbf16>
    %c0_8 = arith.constant 0 : index
    %c0_9 = arith.constant 0 : index
    %19 = vector.load %arg5[%c0_8, %c0_9] : memref<512x1536xbf16, #tpu.memory_space<vmem>>, vector<512x1536xbf16>
    %cst_10 = arith.constant dense<0.000000e+00> : vector<2x1536xf32>
    %20 = tpu.matmul %18, %19, %cst_10 {dimension_numbers = #tpu.dot_dimension_numbers<[1], [0], [0], [1], [0, 0, 1, 1], [], []>} : vector<2x512xbf16>, vector<512x1536xbf16>, vector<2x1536xf32> -> vector<2x1536xf32>
    %c0_11 = arith.constant 0 : index
    %c0_12 = arith.constant 0 : index
    %21 = vector.load %arg6[%c0_11, %c0_12] : memref<1x1536xf32, #tpu.memory_space<vmem>>, vector<1x1536xf32>
    %22 = vector.broadcast %21 : vector<1x1536xf32> to vector<2x1536xf32>
    %23 = arith.mulf %20, %22 : vector<2x1536xf32>
    %c0_13 = arith.constant 0 : index
    %c0_14 = arith.constant 0 : index
    %24 = vector.load %arg7[%c0_13, %c0_14] : memref<1x1536xf32, #tpu.memory_space<vmem>>, vector<1x1536xf32>
    %25 = vector.broadcast %24 : vector<1x1536xf32> to vector<2x1536xf32>
    %26 = arith.addf %23, %25 : vector<2x1536xf32>
    %cst_15 = arith.constant 0.000000e+00 : f32
    %27 = vector.broadcast %cst_15 : f32 to vector<2x1536xf32>
    %28 = arith.maximumf %26, %27 : vector<2x1536xf32>
    %29 = vector.extract_strided_slice %28 {offsets = [0, 0], sizes = [2, 384], strides = [1, 1]} : vector<2x1536xf32> to vector<2x384xf32>
    %30 = vector.extract_strided_slice %28 {offsets = [0, 384], sizes = [2, 384], strides = [1, 1]} : vector<2x1536xf32> to vector<2x384xf32>
    %31 = arith.maximumf %29, %30 : vector<2x384xf32>
    %32 = vector.extract_strided_slice %28 {offsets = [0, 768], sizes = [2, 384], strides = [1, 1]} : vector<2x1536xf32> to vector<2x384xf32>
    %33 = vector.extract_strided_slice %28 {offsets = [0, 1152], sizes = [2, 384], strides = [1, 1]} : vector<2x1536xf32> to vector<2x384xf32>
    %34 = arith.maximumf %32, %33 : vector<2x384xf32>
    %35 = arith.maximumf %31, %34 : vector<2x384xf32>
    %36 = arith.truncf %35 : vector<2x384xf32> to vector<2x384xbf16>
    %c0_16 = arith.constant 0 : index
    %c0_17 = arith.constant 0 : index
    %37 = vector.load %arg8[%c0_16, %c0_17] : memref<384x256xbf16, #tpu.memory_space<vmem>>, vector<384x256xbf16>
    %cst_18 = arith.constant dense<0.000000e+00> : vector<2x256xf32>
    %38 = tpu.matmul %36, %37, %cst_18 {dimension_numbers = #tpu.dot_dimension_numbers<[1], [0], [0], [1], [0, 0, 1, 1], [], []>} : vector<2x384xbf16>, vector<384x256xbf16>, vector<2x256xf32> -> vector<2x256xf32>
    %c0_19 = arith.constant 0 : index
    %c0_20 = arith.constant 0 : index
    %39 = vector.load %arg9[%c0_19, %c0_20] : memref<1x256xf32, #tpu.memory_space<vmem>>, vector<1x256xf32>
    %40 = vector.broadcast %39 : vector<1x256xf32> to vector<2x256xf32>
    %41 = arith.mulf %38, %40 : vector<2x256xf32>
    %c0_21 = arith.constant 0 : index
    %c0_22 = arith.constant 0 : index
    %42 = vector.load %arg10[%c0_21, %c0_22] : memref<1x256xf32, #tpu.memory_space<vmem>>, vector<1x256xf32>
    %43 = vector.broadcast %42 : vector<1x256xf32> to vector<2x256xf32>
    %44 = arith.addf %41, %43 : vector<2x256xf32>
    %cst_23 = arith.constant 0.000000e+00 : f32
    %45 = vector.broadcast %cst_23 : f32 to vector<2x256xf32>
    %46 = arith.subf %45, %44 : vector<2x256xf32>
    %47 = math.exp %46 : vector<2x256xf32>
    %cst_24 = arith.constant 1.000000e+00 : f32
    %48 = vector.broadcast %cst_24 : f32 to vector<2x256xf32>
    %49 = arith.addf %48, %47 : vector<2x256xf32>
    %50 = tpu.reciprocal %49 {approx = true} : vector<2x256xf32> -> vector<2x256xf32>
    %51 = arith.truncf %50 : vector<2x256xf32> to vector<2x256xbf16>
    %c0_25 = arith.constant 0 : index
    %c0_26 = arith.constant 0 : index
    %52 = vector.load %arg11[%c0_25, %c0_26] : memref<256x128xbf16, #tpu.memory_space<vmem>>, vector<256x128xbf16>
    %cst_27 = arith.constant dense<0.000000e+00> : vector<2x128xf32>
    %53 = tpu.matmul %51, %52, %cst_27 {dimension_numbers = #tpu.dot_dimension_numbers<[1], [0], [0], [1], [0, 0, 1, 1], [], []>} : vector<2x256xbf16>, vector<256x128xbf16>, vector<2x128xf32> -> vector<2x128xf32>
    %c0_28 = arith.constant 0 : index
    %c0_29 = arith.constant 0 : index
    %54 = vector.load %arg12[%c0_28, %c0_29] : memref<1x128xf32, #tpu.memory_space<vmem>>, vector<1x128xf32>
    %55 = vector.broadcast %54 : vector<1x128xf32> to vector<2x128xf32>
    %56 = arith.addf %53, %55 : vector<2x128xf32>
    %57 = math.tanh %56 : vector<2x128xf32>
    %c0_30 = arith.constant 0 : index
    %c0_31 = arith.constant 0 : index
    %58 = vector.load %arg13[%c0_30, %c0_31] : memref<2x128xf32, #tpu.memory_space<vmem>>, vector<2x128xf32>
    tpu.vector_store %arg13[%c0_30, %c0_31], %57 {strides = array<i32>} : memref<2x128xf32, #tpu.memory_space<vmem>>, vector<2x128xf32>,
    return
  }
  func.func @transform_0(%arg0: i32) -> (i32, i32) {
    %c0_i32 = arith.constant 0 : i32
    %c0_i32_0 = arith.constant 0 : i32
    return %arg0, %c0_i32 : i32, i32
  }
  func.func @transform_1(%arg0: i32) -> (i32, i32) {
    %c0_i32 = arith.constant 0 : i32
    %c0_i32_0 = arith.constant 0 : i32
    %c0_i32_1 = arith.constant 0 : i32
    return %c0_i32, %c0_i32_0 : i32, i32
  }
  func.func @transform_2(%arg0: i32) -> (i32, i32) {
    %c0_i32 = arith.constant 0 : i32
    %c0_i32_0 = arith.constant 0 : i32
    %c0_i32_1 = arith.constant 0 : i32
    return %c0_i32, %c0_i32_0 : i32, i32
  }
  func.func @transform_3(%arg0: i32) -> (i32, i32) {
    %c0_i32 = arith.constant 0 : i32
    %c0_i32_0 = arith.constant 0 : i32
    %c0_i32_1 = arith.constant 0 : i32
    return %c0_i32, %c0_i32_0 : i32, i32
  }
  func.func @transform_4(%arg0: i32) -> (i32, i32) {
    %c0_i32 = arith.constant 0 : i32
    %c0_i32_0 = arith.constant 0 : i32
    %c0_i32_1 = arith.constant 0 : i32
    return %c0_i32, %c0_i32_0 : i32, i32
  }
  func.func @transform_5(%arg0: i32) -> (i32, i32) {
    %c0_i32 = arith.constant 0 : i32
    %c0_i32_0 = arith.constant 0 : i32
    %c0_i32_1 = arith.constant 0 : i32
    return %c0_i32, %c0_i32_0 : i32, i32
  }
  func.func @transform_6(%arg0: i32) -> (i32, i32) {
    %c0_i32 = arith.constant 0 : i32
    %c0_i32_0 = arith.constant 0 : i32
    %c0_i32_1 = arith.constant 0 : i32
    return %c0_i32, %c0_i32_0 : i32, i32
  }
  func.func @transform_7(%arg0: i32) -> (i32, i32) {
    %c0_i32 = arith.constant 0 : i32
    %c0_i32_0 = arith.constant 0 : i32
    %c0_i32_1 = arith.constant 0 : i32
    return %c0_i32, %c0_i32_0 : i32, i32
  }
  func.func @transform_8(%arg0: i32) -> (i32, i32) {
    %c0_i32 = arith.constant 0 : i32
    %c0_i32_0 = arith.constant 0 : i32
    %c0_i32_1 = arith.constant 0 : i32
    return %c0_i32, %c0_i32_0 : i32, i32
  }
  func.func @transform_9(%arg0: i32) -> (i32, i32) {
    %c0_i32 = arith.constant 0 : i32
    %c0_i32_0 = arith.constant 0 : i32
    %c0_i32_1 = arith.constant 0 : i32
    return %c0_i32, %c0_i32_0 : i32, i32
  }
  func.func @transform_10(%arg0: i32) -> (i32, i32) {
    %c0_i32 = arith.constant 0 : i32
    %c0_i32_0 = arith.constant 0 : i32
    %c0_i32_1 = arith.constant 0 : i32
    return %c0_i32, %c0_i32_0 : i32, i32
  }
  func.func @transform_11(%arg0: i32) -> (i32, i32) {
    %c0_i32 = arith.constant 0 : i32
    %c0_i32_0 = arith.constant 0 : i32
    %c0_i32_1 = arith.constant 0 : i32
    return %c0_i32, %c0_i32_0 : i32, i32
  }
  func.func @transform_12(%arg0: i32) -> (i32, i32) {
    %c0_i32 = arith.constant 0 : i32
    %c0_i32_0 = arith.constant 0 : i32
    return %arg0, %c0_i32 : i32, i32
  }
}

</mosaic_0001>

<bundles_post_ra>
// kernel: tile.23
= control target key start
LH: loop header
LB: loop body
LE: loop exit
PB: predicated region body
PF: predicated region fallthrough
CT: control target
= control target key end

     0   :  { %s64_s0 = inlined_call_operand.vmem [shape: f32[32], index: 0, kind: input, shape index: {}]   ;;  %s65_s1 = inlined_call_operand.vmem [shape: f32[64,32], index: 1, kind: output, shape index: {}]  }
   0x1   :  { %v4_v0 = vld [vmem:[%s64_s0] ss:$0 sm:$0xff] }
   0x2   :  { %5 = vst [vmem:[%s65_s1] sm:$0xff] %v4_v0  ;;  %20 = vst [vmem:[%s65_s1 + $0x8] sm:$0xff] %v4_v0 }
   0x3   :  { %21 = vst [vmem:[%s65_s1 + $0x10] sm:$0xff] %v4_v0  ;;  %22 = vst [vmem:[%s65_s1 + $0x18] sm:$0xff] %v4_v0 }
   0x4   :  { %23 = vst [vmem:[%s65_s1 + $0x20] sm:$0xff] %v4_v0  ;;  %24 = vst [vmem:[%s65_s1 + $0x28] sm:$0xff] %v4_v0 }
   0x5   :  { %25 = vst [vmem:[%s65_s1 + $0x30] sm:$0xff] %v4_v0  ;;  %26 = vst [vmem:[%s65_s1 + $0x38] sm:$0xff] %v4_v0 }

// kernel: tile.24
= control target key start
LH: loop header
LB: loop body
LE: loop exit
PB: predicated region body
PF: predicated region fallthrough
CT: control target
= control target key end

     0   :  { %s212_s10 = smov 64   ;;  %s213_s11 = smov 96   ;;  %vm3_vm0 = vcmask 261120   ;;  %vm17_vm1 = vcmask 1048320   ;;  %vm33_vm2 = vcmask 785920   ;;  %vm49_vm3 = vcmask 523520   ;;  %s297_s0 = inlined_call_operand.vmem [shape: f32[64,32], index: 0, kind: input, shape index: {}]   ;;  %s298_s1 = inlined_call_operand.vmem [shape: f32[1,2048], index: 1, kind: output, shape index: {}]  }
   0x1   :  { %v190_v0 = vld [vmem:[%s297_s0 + $0x2] ss:$4 sm:$0xff]   ;;  %v188_v1 = vld [vmem:[%s297_s0 + $0x3] ss:$4 sm:$0xff]   ;;  %v2_v4 = vld [vmem:[%s297_s0] ss:$4 sm:$0xff]  }
   0x2   :  { %31 = vrot.lane.b32.xlu1 %v190_v0, %s212_s10  ;;  %15 = vrot.lane.b32.xlu0 %v188_v1, %s213_s11  ;;  %v191_v2 = vld [vmem:[%s297_s0 + $0x22] ss:$4 sm:$0xff]   ;;  %v189_v3 = vld [vmem:[%s297_s0 + $0x23] ss:$4 sm:$0xff]  }
   0x3   :  { %v187_v5 = vld [vmem:[%s297_s0 + $0x20] ss:$4 sm:$0xff]   ;;  %4 = vst.msk [vmem:[#allocation0] ss:$8 sm:$0xf] %vm3_vm0, %v2_v4  }
   0x4   :  { %5 = vst.msk [vmem:[#allocation0] ss:$8 sm:$0xf0] %vm3_vm0, %v2_v4   ;;  %10 = vst.msk [vmem:[#allocation0 + $0x40] ss:$8 sm:$0xf] %vm3_vm0, %v187_v5  }
   0x5   :  { %12 = vst.msk [vmem:[#allocation0 + $0x40] ss:$8 sm:$0xf0] %vm3_vm0, %v187_v5   ;;  %v193_v6 = vld [vmem:[%s297_s0 + $0x21] ss:$4 sm:$0xff]  }
   0x6   :  { %38 = vrot.lane.b32.xlu1 %v191_v2, %s212_s10  ;;  %22 = vrot.lane.b32.xlu0 %v189_v3, %s213_s11  ;;  %v192_v7 = vld [vmem:[%s297_s0 + $0x1] ss:$4 sm:$0xff]   ;;  %s214_s0 = smov 32  }
   0xa   :  { %54 = vrot.lane.b32.xlu1 %v193_v6, %s214_s0  ;;  %47 = vrot.lane.b32.xlu0 %v192_v7, %s214_s0 }
  0x74   :  { %v32_v8 = vpop.permute.xlu1 %31   ;;  %v16_v9 = vpop.permute.xlu0 %15  }
  0x75   :  { %18 = vst.msk [vmem:[#allocation0] ss:$8 sm:$0xf] %vm17_vm1, %v16_v9   ;;  %19 = vst.msk [vmem:[#allocation0] ss:$8 sm:$0xf0] %vm17_vm1, %v16_v9  }
  0x76   :  { %34 = vst.msk [vmem:[#allocation0] ss:$8 sm:$0xf] %vm33_vm2, %v32_v8   ;;  %35 = vst.msk [vmem:[#allocation0] ss:$8 sm:$0xf0] %vm33_vm2, %v32_v8  }
  0x78   :  { %v39_v10 = vpop.permute.xlu1 %38   ;;  %v23_v11 = vpop.permute.xlu0 %22  }
  0x79   :  { %26 = vst.msk [vmem:[#allocation0 + $0x40] ss:$8 sm:$0xf] %vm17_vm1, %v23_v11   ;;  %28 = vst.msk [vmem:[#allocation0 + $0x40] ss:$8 sm:$0xf0] %vm17_vm1, %v23_v11  }
  0x7a   :  { %42 = vst.msk [vmem:[#allocation0 + $0x40] ss:$8 sm:$0xf] %vm33_vm2, %v39_v10   ;;  %44 = vst.msk [vmem:[#allocation0 + $0x40] ss:$8 sm:$0xf0] %vm33_vm2, %v39_v10  }
  0x7c   :  { %v55_v12 = vpop.permute.xlu1 %54   ;;  %v48_v13 = vpop.permute.xlu0 %47  }
  0x7d   :  { %58 = vst.msk [vmem:[#allocation0 + $0x40] ss:$8 sm:$0xf] %vm49_vm3, %v55_v12   ;;  %60 = vst.msk [vmem:[#allocation0 + $0x40] ss:$8 sm:$0xf0] %vm49_vm3, %v55_v12  }
  0x7e   :  { %50 = vst.msk [vmem:[#allocation0] ss:$8 sm:$0xf] %vm49_vm3, %v48_v13   ;;  %51 = vst.msk [vmem:[#allocation0] ss:$8 sm:$0xf0] %vm49_vm3, %v48_v13  }
  0x84   :  { %v118_v14 = vld [vmem:[#allocation0 + $0x40] sm:$0x1]  ;;  %v125_v15 = vld [vmem:[#allocation0 + $0x48] sm:$0x1]  ;;  %v132_v16 = vld [vmem:[#allocation0 + $0x50] sm:$0x1] }
  0x85   :  { %201 = vst [vmem:[%s298_s1 + $0x8] sm:$0x1] %v118_v14  ;;  %202 = vst [vmem:[%s298_s1 + $0x9] sm:$0x1] %v125_v15  ;;  %v139_v17 = vld [vmem:[#allocation0 + $0x58] sm:$0x1] }
  0x86   :  { %203 = vst [vmem:[%s298_s1 + $0xa] sm:$0x1] %v132_v16  ;;  %v146_v18 = vld [vmem:[#allocation0 + $0x60] sm:$0x1]  ;;  %v153_v19 = vld [vmem:[#allocation0 + $0x68] sm:$0x1] }
  0x87   :  { %204 = vst [vmem:[%s298_s1 + $0xb] sm:$0x1] %v139_v17  ;;  %205 = vst [vmem:[%s298_s1 + $0xc] sm:$0x1] %v146_v18  ;;  %v160_v20 = vld [vmem:[#allocation0 + $0x70] sm:$0x1] }
  0x88   :  { %206 = vst [vmem:[%s298_s1 + $0xd] sm:$0x1] %v153_v19  ;;  %v167_v21 = vld [vmem:[#allocation0 + $0x78] sm:$0x1]  ;;  %v65_v22 = vld [vmem:[#allocation0] sm:$0x1] }
  0x89   :  { %207 = vst [vmem:[%s298_s1 + $0xe] sm:$0x1] %v160_v20  ;;  %208 = vst [vmem:[%s298_s1 + $0xf] sm:$0x1] %v167_v21  ;;  %v70_v23 = vld [vmem:[#allocation0 + $0x8] sm:$0x1] }
  0x8a   :  { %68 = vst [vmem:[%s298_s1] sm:$0x1] %v65_v22  ;;  %v76_v24 = vld [vmem:[#allocation0 + $0x10] sm:$0x1]  ;;  %v83_v25 = vld [vmem:[#allocation0 + $0x18] sm:$0x1] }
  0x8b   :  { %194 = vst [vmem:[%s298_s1 + $0x1] sm:$0x1] %v70_v23  ;;  %195 = vst [vmem:[%s298_s1 + $0x2] sm:$0x1] %v76_v24  ;;  %v90_v26 = vld [vmem:[#allocation0 + $0x20] sm:$0x1] }
  0x8c   :  { %196 = vst [vmem:[%s298_s1 + $0x3] sm:$0x1] %v83_v25  ;;  %v97_v27 = vld [vmem:[#allocation0 + $0x28] sm:$0x1]  ;;  %v104_v28 = vld [vmem:[#allocation0 + $0x30] sm:$0x1] }
  0x8d   :  { %197 = vst [vmem:[%s298_s1 + $0x4] sm:$0x1] %v90_v26  ;;  %198 = vst [vmem:[%s298_s1 + $0x5] sm:$0x1] %v97_v27  ;;  %v111_v29 = vld [vmem:[#allocation0 + $0x38] sm:$0x1] }
  0x8e   :  { %199 = vst [vmem:[%s298_s1 + $0x6] sm:$0x1] %v104_v28  ;;  %200 = vst [vmem:[%s298_s1 + $0x7] sm:$0x1] %v111_v29 }

// kernel: tile.33
= control target key start
LH: loop header
LB: loop body
LE: loop exit
PB: predicated region body
PF: predicated region fallthrough
CT: control target
= control target key end

     0   :  { %s28_s0 = inlined_call_operand.vmem [shape: f32[96], index: 0, kind: input, shape index: {}]   ;;  %s29_s1 = inlined_call_operand.vmem [shape: f32[16,96], index: 1, kind: output, shape index: {}]  }
   0x1   :  { %v4_v0 = vld [vmem:[%s28_s0] ss:$0 sm:$0xff] }
   0x2   :  { %5 = vst [vmem:[%s29_s1] sm:$0xff] %v4_v0  ;;  %8 = vst [vmem:[%s29_s1 + $0x8] sm:$0xff] %v4_v0 }

// kernel: tile.34
= control target key start
LH: loop header
LB: loop body
LE: loop exit
PB: predicated region body
PF: predicated region fallthrough
CT: control target
= control target key end

     0   :  { %vm9_vm0 = vcmask 261120   ;;  %vm13_vm1 = vcmask 523264   ;;  %s162_s14 = smov 96   ;;  %vm3_vm2 = vcmask 785408   ;;  %s164_s19 = smov 64   ;;  %vm18_vm3 = vcmask 1048320   ;;  %s235_s0 = inlined_call_operand.vmem [shape: f32[16,96], index: 0, kind: input, shape index: {}]   ;;  %s236_s1 = inlined_call_operand.vmem [shape: f32[1,1536], index: 1, kind: output, shape index: {}]  }
   0x1   :  { %v143_v0 = vld.sshfl [vmem:[%s235_s0 + $0x1] sm:$0xff pattern:$0x88888c04]   ;;  %v145_v2 = vld.sshfl [vmem:[%s235_s0 + $0x2] sm:$0xff pattern:$0xccccc048]  }
   0x2   :  { %v144_v1 = vld.sshfl [vmem:[%s235_s0 + $0x1] sm:$0xff pattern:$0x444448c0]   ;;  %v146_v4 = vld.sshfl [vmem:[%s235_s0 + $0x2] sm:$0xff pattern:$0x88888c04]  }
   0x3   :  { %v10_v3 = vsel %vm9_vm0, %v144_v1, %v143_v0  ;;  %v147_v5 = vld.sshfl [vmem:[%s235_s0 + $0x3] sm:$0xff pattern:$0xccccc048]   ;;  %v2_v6 = vld [vmem:[%s235_s0] ss:$4 sm:$0xf]   ;;  %v27_v7 = vsel %vm13_vm1, %v146_v4, %v145_v2 }
   0x4   :  { %11 = vrot.lane.b32.xlu0 %v10_v3, %s162_s14  ;;  %s163_s0 = smov 32   ;;  %4 = vst.msk [vmem:[#allocation0] ss:$24 sm:$0xf] %vm3_vm2, %v2_v6   ;;  %vm35_vm4 = vcmask 1048064   ;;  %vm44_vm5 = vcmask 1047808  }
   0x5   :  { %42 = vrot.lane.b32.xlu1 %v147_v5, %s163_s0 }
   0x8   :  { %28 = vrot.lane.b32.xlu0 %v27_v7, %s164_s19 }
  0x76   :  { %v12_v8 = vpop.permute.xlu0 %11  }
  0x77   :  { %15 = vst.msk [vmem:[#allocation0 + $0x20] ss:$-24 sm:$0x3] %vm13_vm1, %v12_v8   ;;  %17 = vst.msk [vmem:[#allocation0 + $0x80] ss:$-24 sm:$0xc] %vm13_vm1, %v12_v8   ;;  %v43_v9 = vpop.permute.xlu1 %42  }
  0x78   :  { %19 = vst.msk [vmem:[#allocation0] ss:$72 sm:$0x3] %vm18_vm3, %v12_v8   ;;  %21 = vst.msk [vmem:[#allocation0 + $0x60] ss:$-24 sm:$0xc] %vm18_vm3, %v12_v8  }
  0x7a   :  { %v29_v10 = vpop.permute.xlu0 %28  }
  0x7b   :  { %32 = vst.msk [vmem:[#allocation0 + $0x40] ss:$-24 sm:$0x7] %vm9_vm0, %v29_v10   ;;  %34 = vst.msk [vmem:[#allocation0 + $0x55] sm:$0x8] %vm9_vm0, %v29_v10  }
  0x7c   :  { %37 = vst.msk [vmem:[#allocation0 + $0x20] ss:$-24 sm:$0x3] %vm35_vm4, %v29_v10   ;;  %39 = vst.msk [vmem:[#allocation0 + $0x80] ss:$-24 sm:$0xc] %vm35_vm4, %v29_v10  }
  0x7d   :  { %46 = vst.msk [vmem:[#allocation0 + $0x40] ss:$-24 sm:$0x7] %vm44_vm5, %v43_v9   ;;  %48 = vst.msk [vmem:[#allocation0 + $0x55] sm:$0x8] %vm44_vm5, %v43_v9  }
  0x7f   :  { %v53_v11 = vld [vmem:[#allocation0] sm:$0x1]  ;;  %v71_v12 = vld [vmem:[#allocation0 + $0x18] sm:$0x1]  ;;  %v92_v13 = vld [vmem:[#allocation0 + $0x30] sm:$0x1] }
  0x80   :  { %56 = vst [vmem:[%s236_s1] sm:$0x1] %v53_v11  ;;  %150 = vst [vmem:[%s236_s1 + $0x3] sm:$0x1] %v71_v12  ;;  %v113_v14 = vld [vmem:[#allocation0 + $0x48] sm:$0x1] }
  0x81   :  { %153 = vst [vmem:[%s236_s1 + $0x6] sm:$0x1] %v92_v13  ;;  %156 = vst [vmem:[%s236_s1 + $0x9] sm:$0x1] %v113_v14 }
  0x83   :  { %v58_v15 = vld [vmem:[#allocation0 + $0x8] sm:$0x1]  ;;  %v78_v16 = vld [vmem:[#allocation0 + $0x20] sm:$0x1]  ;;  %v99_v17 = vld [vmem:[#allocation0 + $0x38] sm:$0x1] }
  0x84   :  { %148 = vst [vmem:[%s236_s1 + $0x1] sm:$0x1] %v58_v15  ;;  %151 = vst [vmem:[%s236_s1 + $0x4] sm:$0x1] %v78_v16  ;;  %v120_v18 = vld [vmem:[#allocation0 + $0x50] sm:$0x1] }
  0x85   :  { %154 = vst [vmem:[%s236_s1 + $0x7] sm:$0x1] %v99_v17  ;;  %v64_v19 = vld [vmem:[#allocation0 + $0x10] sm:$0x1]  ;;  %v85_v20 = vld [vmem:[#allocation0 + $0x28] sm:$0x1] }
  0x86   :  { %157 = vst [vmem:[%s236_s1 + $0xa] sm:$0x1] %v120_v18  ;;  %149 = vst [vmem:[%s236_s1 + $0x2] sm:$0x1] %v64_v19  ;;  %v106_v21 = vld [vmem:[#allocation0 + $0x40] sm:$0x1] }
  0x87   :  { %152 = vst [vmem:[%s236_s1 + $0x5] sm:$0x1] %v85_v20  ;;  %v127_v22 = vld [vmem:[#allocation0 + $0x58] sm:$0x1]  ;;  %155 = vst [vmem:[%s236_s1 + $0x8] sm:$0x1] %v106_v21 }
  0x88   :  { %158 = vst [vmem:[%s236_s1 + $0xb] sm:$0x1] %v127_v22 }

// kernel: codegen_forward.1
= control target key start
LH: loop header
LB: loop body
LE: loop exit
PB: predicated region body
PF: predicated region fallthrough
CT: control target
= control target key end

     0   :  { %v13558_v32 = vmov 1966171168   ;;  %v1073_v34 = vlaneseq  ;;  %s18510_s0 = inlined_call_operand.vmem [shape: bf16[2,1024], index: 0, kind: input, shape index: {}]   ;;  %s18511_s1 = inlined_call_operand.vmem [shape: bf16[1024,2048], index: 1, kind: input, shape index: {}]   ;;  %s18512_s2 = inlined_call_operand.vmem [shape: f32[1,2048], index: 2, kind: input, shape index: {}]   ;;  %s18513_s3 = inlined_call_operand.vmem [shape: f32[1,2048], index: 3, kind: input, shape index: {}]   ;;  %s18514_s4 = inlined_call_operand.vmem [shape: bf16[512,1536], index: 4, kind: input, shape index: {}]   ;;  %s18515_s5 = inlined_call_operand.vmem [shape: f32[1,1536], index: 5, kind: input, shape index: {}]   ;;  %s18516_s6 = inlined_call_operand.vmem [shape: f32[1,1536], index: 6, kind: input, shape index: {}]   ;;  %s18517_s7 = inlined_call_operand.vmem [shape: bf16[384,256], index: 7, kind: input, shape index: {}]   ;;  %s18518_s8 = inlined_call_operand.vmem [shape: f32[1,256], index: 8, kind: input, shape index: {}]   ;;  %s18519_s9 = inlined_call_operand.vmem [shape: f32[1,256], index: 9, kind: input, shape index: {}]   ;;  %s18520_s10 = inlined_call_operand.vmem [shape: bf16[256,128], index: 10, kind: input, shape index: {}]   ;;  %s18521_s11 = inlined_call_operand.vmem [shape: f32[1,128], index: 11, kind: input, shape index: {}]   ;;  %s18522_s12 = inlined_call_operand.hbm [shape: f32[2,128], index: 12, kind: output, shape index: {}]  }
   0x1   :  { %v156_v0 = vld [vmem:[%s18511_s1 + $0x380] sm:$0xff]  ;;  %v1071_v33 = vunpack.c.l.s4 %v13558_v32 }
   0x2   :  { %v164_v1 = vld [vmem:[%s18511_s1 + $0x3c0] sm:$0xff]  ;;  %v13692_v44 = vshrl.u32 %v1073_v34, 7 }
   0x3   :  { %v412_v2 = vld [vmem:[%s18511_s1 + $0xb80] sm:$0xff]  ;;  %v11476_v3 = vcombine.high %v156_v0, %v164_v1  ;;  %v11475_v5 = vcombine.low %v156_v0, %v164_v1  ;;  %v1072_v43 = vunpack.c.0.s8 %v1071_v33 }
   0x4   :  { %v420_v4 = vld [vmem:[%s18511_s1 + $0xbc0] sm:$0xff] }
   0x5   :  { %v140_v6 = vld [vmem:[%s18511_s1 + $0x300] sm:$0xff]  ;;  %v11732_v8 = vcombine.high %v412_v2, %v420_v4  ;;  %v11731_v9 = vcombine.low %v412_v2, %v420_v4  ;;  %6246 = vmatprep.subr.bf16.mxu0 %v11476_v3  ;;  %v13707_v53 = vsub.s32 %v1072_v43, %v13692_v44 }
   0x6   :  { %v148_v7 = vld [vmem:[%s18511_s1 + $0x340] sm:$0xff]  ;;  %6247 = vmatpush1.bf16.msra.mxu0 %v11475_v5 }
   0x7   :  { %v11460_v10 = vcombine.high %v140_v6, %v148_v7  ;;  %v396_v11 = vld [vmem:[%s18511_s1 + $0xb00] sm:$0xff]  ;;  %6287 = vmatprep.subr.bf16.mxu1 %v11732_v8  ;;  %v11459_v18 = vcombine.low %v140_v6, %v148_v7 }
   0x8   :  { %v404_v12 = vld [vmem:[%s18511_s1 + $0xb40] sm:$0xff]  ;;  %6288 = vmatpush1.bf16.msra.mxu1 %v11731_v9 }
   0x9   :  { %v124_v13 = vld [vmem:[%s18511_s1 + $0x280] sm:$0xff]  ;;  %v11716_v14 = vcombine.high %v396_v11, %v404_v12  ;;  %6248 = vmatprep.subr.bf16.mxu0 %v11460_v10  ;;  %v11715_v19 = vcombine.low %v396_v11, %v404_v12 }
   0xa   :  { %v132_v15 = vld [vmem:[%s18511_s1 + $0x2c0] sm:$0xff]  ;;  %6249 = vmatpush1.bf16.msra.mxu0 %v11459_v18 }
   0xb   :  { %v380_v16 = vld [vmem:[%s18511_s1 + $0xa80] sm:$0xff]  ;;  %v11444_v20 = vcombine.high %v124_v13, %v132_v15  ;;  %6289 = vmatprep.subr.bf16.mxu1 %v11716_v14  ;;  %v11443_v26 = vcombine.low %v124_v13, %v132_v15 }
   0xc   :  { %v388_v17 = vld [vmem:[%s18511_s1 + $0xac0] sm:$0xff]  ;;  %6290 = vmatpush1.bf16.msra.mxu1 %v11715_v19 }
   0xd   :  { %v11700_v21 = vcombine.high %v380_v16, %v388_v17  ;;  %v108_v22 = vld [vmem:[%s18511_s1 + $0x200] sm:$0xff]  ;;  %6250 = vmatprep.subr.bf16.mxu0 %v11444_v20  ;;  %v11699_v27 = vcombine.low %v380_v16, %v388_v17 }
   0xe   :  { %v116_v23 = vld [vmem:[%s18511_s1 + $0x240] sm:$0xff]  ;;  %6251 = vmatpush1.bf16.msra.mxu0 %v11443_v26 }
   0xf   :  { %v364_v24 = vld [vmem:[%s18511_s1 + $0xa00] sm:$0xff]  ;;  %v11428_v28 = vcombine.high %v108_v22, %v116_v23  ;;  %6291 = vmatprep.subr.bf16.mxu1 %v11700_v21  ;;  %v11427_v37 = vcombine.low %v108_v22, %v116_v23 }
  0x10   :  { %v372_v25 = vld [vmem:[%s18511_s1 + $0xa40] sm:$0xff]  ;;  %6292 = vmatpush1.bf16.msra.mxu1 %v11699_v27 }
  0x11   :  { %v11684_v29 = vcombine.high %v364_v24, %v372_v25  ;;  %v92_v30 = vld [vmem:[%s18511_s1 + $0x180] sm:$0xff]  ;;  %6252 = vmatprep.subr.bf16.mxu0 %v11428_v28  ;;  %v11683_v38 = vcombine.low %v364_v24, %v372_v25 }
  0x12   :  { %v100_v31 = vld [vmem:[%s18511_s1 + $0x1c0] sm:$0xff]  ;;  %6253 = vmatpush1.bf16.msra.mxu0 %v11427_v37 }
  0x13   :  { %v348_v35 = vld [vmem:[%s18511_s1 + $0x980] sm:$0xff]  ;;  %v11412_v39 = vcombine.high %v92_v30, %v100_v31  ;;  %6293 = vmatprep.subr.bf16.mxu1 %v11684_v29  ;;  %v11411_v47 = vcombine.low %v92_v30, %v100_v31 }
  0x14   :  { %v356_v36 = vld [vmem:[%s18511_s1 + $0x9c0] sm:$0xff]  ;;  %6294 = vmatpush1.bf16.msra.mxu1 %v11683_v38 }
  0x15   :  { %v11668_v40 = vcombine.high %v348_v35, %v356_v36  ;;  %v76_v41 = vld [vmem:[%s18511_s1 + $0x100] sm:$0xff]  ;;  %6254 = vmatprep.subr.bf16.mxu0 %v11412_v39  ;;  %v11667_v48 = vcombine.low %v348_v35, %v356_v36 }
  0x16   :  { %v84_v42 = vld [vmem:[%s18511_s1 + $0x140] sm:$0xff]  ;;  %6255 = vmatpush1.bf16.msra.mxu0 %v11411_v47 }
  0x17   :  { %v332_v45 = vld [vmem:[%s18511_s1 + $0x900] sm:$0xff]  ;;  %v11396_v49 = vcombine.high %v76_v41, %v84_v42  ;;  %6295 = vmatprep.subr.bf16.mxu1 %v11668_v40  ;;  %v11395_v56 = vcombine.low %v76_v41, %v84_v42 }
  0x18   :  { %v340_v46 = vld [vmem:[%s18511_s1 + $0x940] sm:$0xff]  ;;  %6296 = vmatpush1.bf16.msra.mxu1 %v11667_v48 }
  0x19   :  { %v11652_v50 = vcombine.high %v332_v45, %v340_v46  ;;  %v60_v51 = vld [vmem:[%s18511_s1 + $0x80] sm:$0xff]  ;;  %6256 = vmatprep.subr.bf16.mxu0 %v11396_v49  ;;  %v11651_v57 = vcombine.low %v332_v45, %v340_v46 }
  0x1a   :  { %v68_v52 = vld [vmem:[%s18511_s1 + $0xc0] sm:$0xff]  ;;  %6257 = vmatpush1.bf16.msra.mxu0 %v11395_v56 }
  0x1b   :  { %v316_v54 = vld [vmem:[%s18511_s1 + $0x880] sm:$0xff]  ;;  %v11380_v58 = vcombine.high %v60_v51, %v68_v52  ;;  %6297 = vmatprep.subr.bf16.mxu1 %v11652_v50  ;;  %v11379_v2 = vcombine.low %v60_v51, %v68_v52 }
  0x1c   :  { %v324_v55 = vld [vmem:[%s18511_s1 + $0x8c0] sm:$0xff]  ;;  %6298 = vmatpush1.bf16.msra.mxu1 %v11651_v57 }
  0x1d   :  { %v43_v59 = vld [vmem:[%s18510_s0] sm:$0xff]  ;;  %v11636_v60 = vcombine.high %v316_v54, %v324_v55  ;;  %6258 = vmatprep.subr.bf16.mxu0 %v11380_v58  ;;  %v11635_v4 = vcombine.low %v316_v54, %v324_v55 }
  0x1e   :  { %v44_v61 = vld [vmem:[%s18511_s1] sm:$0xff]  ;;  %v13725_v63 = vrot.slane %v43_v59, %v13707_v53  ;;  %6259 = vmatpush1.bf16.msra.mxu0 %v11379_v2  ;;  %v1069_v19 = vcombine.high %v43_v59, %v43_v59 }
  0x1f   :  { %v52_v62 = vld [vmem:[%s18511_s1 + $0x40] sm:$0xff]  ;;  %6299 = vmatprep.subr.bf16.mxu1 %v11636_v60 }
  0x20   :  { %v300_v0 = vld [vmem:[%s18511_s1 + $0x800] sm:$0xff]  ;;  %v1084_v3 = vcombine.high %v13725_v63, %v13725_v63  ;;  %v11364_v5 = vcombine.high %v44_v61, %v52_v62  ;;  %v11363_v12 = vcombine.low %v44_v61, %v52_v62  ;;  %6300 = vmatpush1.bf16.msra.mxu1 %v11635_v4  ;;  %v13775_v28 = vrot.slane %v1069_v19, %v13707_v53 }
  0x21   :  { %v308_v1 = vld [vmem:[%s18511_s1 + $0x840] sm:$0xff] }
  0x22   :  { %v11620_v6 = vcombine.high %v300_v0, %v308_v1  ;;  %v284_v7 = vld [vmem:[%s18511_s1 + $0x780] sm:$0xff]  ;;  %v13742_v9 = vrot.slane %v1084_v3, %v13707_v53  ;;  %6260 = vmatprep.subr.bf16.mxu0 %v11364_v5  ;;  %v11619_v14 = vcombine.low %v300_v0, %v308_v1  ;;  %v13785_v32 = vrot.slane %v13775_v28, %v13707_v53 }
  0x23   :  { %v292_v8 = vld [vmem:[%s18511_s1 + $0x7c0] sm:$0xff]  ;;  %6261 = vmatpush1.bf16.msra.mxu0 %v11363_v12 }
  0x24   :  { %v540_v10 = vld [vmem:[%s18511_s1 + $0xf80] sm:$0xff]  ;;  %6278 = vmatprep.mubr.bf16.mxu0 %v13742_v9  ;;  %v13753_v13 = vcombine.high %v13742_v9, %v13742_v9  ;;  %v11604_v15 = vcombine.high %v284_v7, %v292_v8  ;;  %6301 = vmatprep.subr.bf16.mxu1 %v11620_v6  ;;  %v11603_v22 = vcombine.low %v284_v7, %v292_v8 }
  0x25   :  { %v548_v11 = vld [vmem:[%s18511_s1 + $0xfc0] sm:$0xff]  ;;  %6302 = vmatpush1.bf16.msra.mxu1 %v11619_v14 }
  0x26   :  { %v11860_v16 = vcombine.high %v540_v10, %v548_v11  ;;  %v268_v17 = vld [vmem:[%s18511_s1 + $0x700] sm:$0xff]  ;;  %6319 = vmatprep.mubr.bf16.mxu1 %v13753_v13  ;;  %6262 = vmatprep.subr.bf16.mxu0 %v11604_v15  ;;  %v11859_v23 = vcombine.low %v540_v10, %v548_v11 }
  0x27   :  { %v276_v18 = vld [vmem:[%s18511_s1 + $0x740] sm:$0xff]  ;;  %6263 = vmatpush2.bf16.msra.mxu0 %v11603_v22 }
  0x28   :  { %v524_v20 = vld [vmem:[%s18511_s1 + $0xf00] sm:$0xff]  ;;  %v11588_v24 = vcombine.high %v268_v17, %v276_v18  ;;  %6303 = vmatprep.subr.bf16.mxu1 %v11860_v16  ;;  %v11587_v31 = vcombine.low %v268_v17, %v276_v18 }
  0x29   :  { %v532_v21 = vld [vmem:[%s18511_s1 + $0xf40] sm:$0xff]  ;;  %6304 = vmatpush2.bf16.msra.mxu1 %v11859_v23  ;;  %v13863_v23 = vrot.slane %v13725_v63, %v13707_v53 }
  0x2a   :  { %v11844_v25 = vcombine.high %v524_v20, %v532_v21  ;;  %v252_v26 = vld [vmem:[%s18511_s1 + $0x680] sm:$0xff]  ;;  %6264 = vmatprep.subr.bf16.mxu0 %v11588_v24  ;;  %v11843_v33 = vcombine.low %v524_v20, %v532_v21  ;;  %v1085_v21 = vcombine.high %v13775_v28, %v13775_v28 }
  0x2b   :  { %v260_v27 = vld [vmem:[%s18511_s1 + $0x6c0] sm:$0xff]  ;;  %6265 = vmatpush2.bf16.msra.mxu0 %v11587_v31  ;;  %v13882_v31 = vcombine.high %v13863_v23, %v13863_v23 }
  0x2c   :  { %v508_v29 = vld [vmem:[%s18511_s1 + $0xe80] sm:$0xff]  ;;  %v11572_v34 = vcombine.high %v252_v26, %v260_v27  ;;  %6305 = vmatprep.subr.bf16.mxu1 %v11844_v25  ;;  %v11571_v40 = vcombine.low %v252_v26, %v260_v27 }
  0x2d   :  { %v516_v30 = vld [vmem:[%s18511_s1 + $0xec0] sm:$0xff]  ;;  %6306 = vmatpush2.bf16.msra.mxu1 %v11843_v33 }
  0x2e   :  { %v11828_v35 = vcombine.high %v508_v29, %v516_v30  ;;  %v236_v36 = vld [vmem:[%s18511_s1 + $0x600] sm:$0xff]  ;;  %6266 = vmatprep.subr.bf16.mxu0 %v11572_v34  ;;  %v11827_v41 = vcombine.low %v508_v29, %v516_v30  ;;  %v13878_v30 = vrot.slane %v1085_v21, %v13707_v53 }
  0x2f   :  { %v244_v37 = vld [vmem:[%s18511_s1 + $0x640] sm:$0xff]  ;;  %6267 = vmatpush2.bf16.msra.mxu0 %v11571_v40 }
  0x30   :  { %v492_v38 = vld [vmem:[%s18511_s1 + $0xe00] sm:$0xff]  ;;  %v11556_v42 = vcombine.high %v236_v36, %v244_v37  ;;  %6307 = vmatprep.subr.bf16.mxu1 %v11828_v35  ;;  %v11555_v49 = vcombine.low %v236_v36, %v244_v37  ;;  %v13899_v40 = vcombine.high %v13878_v30, %v13878_v30 }
  0x31   :  { %v500_v39 = vld [vmem:[%s18511_s1 + $0xe40] sm:$0xff]  ;;  %6308 = vmatpush2.bf16.msra.mxu1 %v11827_v41 }
  0x32   :  { %v11812_v43 = vcombine.high %v492_v38, %v500_v39  ;;  %v220_v45 = vld [vmem:[%s18511_s1 + $0x580] sm:$0xff]  ;;  %6268 = vmatprep.subr.bf16.mxu0 %v11556_v42  ;;  %v11811_v50 = vcombine.low %v492_v38, %v500_v39 }
  0x33   :  { %v228_v46 = vld [vmem:[%s18511_s1 + $0x5c0] sm:$0xff]  ;;  %6269 = vmatpush2.bf16.msra.mxu0 %v11555_v49 }
  0x34   :  { %v476_v47 = vld [vmem:[%s18511_s1 + $0xd80] sm:$0xff]  ;;  %v11540_v51 = vcombine.high %v220_v45, %v228_v46  ;;  %6309 = vmatprep.subr.bf16.mxu1 %v11812_v43  ;;  %v11539_v58 = vcombine.low %v220_v45, %v228_v46 }
  0x35   :  { %v484_v48 = vld [vmem:[%s18511_s1 + $0xdc0] sm:$0xff]  ;;  %6310 = vmatpush2.bf16.msra.mxu1 %v11811_v50 }
  0x36   :  { %v11796_v52 = vcombine.high %v476_v47, %v484_v48  ;;  %v204_v54 = vld [vmem:[%s18511_s1 + $0x500] sm:$0xff]  ;;  %6270 = vmatprep.subr.bf16.mxu0 %v11540_v51  ;;  %v11795_v59 = vcombine.low %v476_v47, %v484_v48 }
  0x37   :  { %v212_v55 = vld [vmem:[%s18511_s1 + $0x540] sm:$0xff]  ;;  %6271 = vmatpush2.bf16.msra.mxu0 %v11539_v58 }
  0x38   :  { %v460_v56 = vld [vmem:[%s18511_s1 + $0xd00] sm:$0xff]  ;;  %v11524_v60 = vcombine.high %v204_v54, %v212_v55  ;;  %6311 = vmatprep.subr.bf16.mxu1 %v11796_v52  ;;  %v11523_v3 = vcombine.low %v204_v54, %v212_v55 }
  0x39   :  { %v468_v57 = vld [vmem:[%s18511_s1 + $0xd40] sm:$0xff]  ;;  %6312 = vmatpush2.bf16.msra.mxu1 %v11795_v59 }
  0x3a   :  { %v11780_v61 = vcombine.high %v460_v56, %v468_v57  ;;  %v188_v62 = vld [vmem:[%s18511_s1 + $0x480] sm:$0xff]  ;;  %6272 = vmatprep.subr.bf16.mxu0 %v11524_v60  ;;  %v11779_v4 = vcombine.low %v460_v56, %v468_v57 }
  0x3b   :  { %v196_v0 = vld [vmem:[%s18511_s1 + $0x4c0] sm:$0xff]  ;;  %6273 = vmatpush2.bf16.msra.mxu0 %v11523_v3 }
  0x3c   :  { %v444_v1 = vld [vmem:[%s18511_s1 + $0xc80] sm:$0xff]  ;;  %v11508_v5 = vcombine.high %v188_v62, %v196_v0  ;;  %6313 = vmatprep.subr.bf16.mxu1 %v11780_v61  ;;  %v11507_v12 = vcombine.low %v188_v62, %v196_v0 }
  0x3d   :  { %v452_v2 = vld [vmem:[%s18511_s1 + $0xcc0] sm:$0xff]  ;;  %6314 = vmatpush2.bf16.msra.mxu1 %v11779_v4 }
  0x3e   :  { %v11764_v6 = vcombine.high %v444_v1, %v452_v2  ;;  %v172_v7 = vld [vmem:[%s18511_s1 + $0x400] sm:$0xff]  ;;  %6274 = vmatprep.subr.bf16.mxu0 %v11508_v5  ;;  %v11763_v14 = vcombine.low %v444_v1, %v452_v2 }
  0x3f   :  { %v180_v8 = vld [vmem:[%s18511_s1 + $0x440] sm:$0xff]  ;;  %6275 = vmatpush2.bf16.msra.mxu0 %v11507_v12 }
  0x40   :  { %v428_v10 = vld [vmem:[%s18511_s1 + $0xc00] sm:$0xff]  ;;  %v11492_v15 = vcombine.high %v172_v7, %v180_v8  ;;  %6315 = vmatprep.subr.bf16.mxu1 %v11764_v6  ;;  %v11491_v22 = vcombine.low %v172_v7, %v180_v8 }
  0x41   :  { %v436_v11 = vld [vmem:[%s18511_s1 + $0xc40] sm:$0xff]  ;;  %6316 = vmatpush2.bf16.msra.mxu1 %v11763_v14 }
  0x42   :  { %v11748_v16 = vcombine.high %v428_v10, %v436_v11  ;;  %v668_v17 = vld [vmem:[%s18511_s1 + $0x1380] sm:$0xff]  ;;  %6276 = vmatprep.subr.bf16.mxu0 %v11492_v15  ;;  %v11747_v24 = vcombine.low %v428_v10, %v436_v11 }
  0x43   :  { %v676_v18 = vld [vmem:[%s18511_s1 + $0x13c0] sm:$0xff]  ;;  %6277 = vmatpush2.bf16.msra.mxu0 %v11491_v22 }
  0x44   :  { %v924_v19 = vld [vmem:[%s18511_s1 + $0x1b80] sm:$0xff]  ;;  %v11988_v25 = vcombine.high %v668_v17, %v676_v18  ;;  %6317 = vmatprep.subr.bf16.mxu1 %v11748_v16  ;;  %v11987_v33 = vcombine.low %v668_v17, %v676_v18 }
  0x45   :  { %v932_v20 = vld [vmem:[%s18511_s1 + $0x1bc0] sm:$0xff]  ;;  %6318 = vmatpush2.bf16.msra.mxu1 %v11747_v24 }
  0x46   :  { %v12244_v26 = vcombine.high %v924_v19, %v932_v20  ;;  %v652_v27 = vld [vmem:[%s18511_s1 + $0x1300] sm:$0xff]  ;;  %6328 = vmatprep.subr.bf16.mxu0 %v11988_v25  ;;  %v12243_v34 = vcombine.low %v924_v19, %v932_v20  ;;  %6279 = vmatmul.mubr.bf16.vlgmr.msra.gmra.mxu0 %v13863_v23 }
  0x47   :  { %v660_v28 = vld [vmem:[%s18511_s1 + $0x1340] sm:$0xff]  ;;  %6329 = vmatpush1.bf16.msra.mxu0 %v11987_v33  ;;  %6360 = vmatprep.mubr.bf16.mxu0 %v13878_v30 }
  0x48   :  { %v908_v29 = vld [vmem:[%s18511_s1 + $0x1b00] sm:$0xff]  ;;  %v11972_v35 = vcombine.high %v652_v27, %v660_v28  ;;  %6369 = vmatprep.subr.bf16.mxu1 %v12244_v26  ;;  %6320 = vmatmul.mubr.bf16.vlgmr.msra.gmra.mxu1 %v13882_v31  ;;  %v11971_v41 = vcombine.low %v652_v27, %v660_v28 }
  0x49   :  { %v916_v63 = vld [vmem:[%s18511_s1 + $0x1b40] sm:$0xff]  ;;  %6370 = vmatpush1.bf16.msra.mxu1 %v12243_v34  ;;  %6401 = vmatprep.mubr.bf16.mxu1 %v13899_v40 }
  0x4a   :  { %v636_v36 = vld [vmem:[%s18511_s1 + $0x1280] sm:$0xff]  ;;  %v12228_v38 = vcombine.high %v908_v29, %v916_v63  ;;  %6330 = vmatprep.subr.bf16.mxu0 %v11972_v35  ;;  %v12227_v42 = vcombine.low %v908_v29, %v916_v63 }
  0x4b   :  { %v644_v37 = vld [vmem:[%s18511_s1 + $0x12c0] sm:$0xff]  ;;  %6331 = vmatpush1.bf16.msra.mxu0 %v11971_v41 }
  0x4c   :  { %v892_v53 = vld [vmem:[%s18511_s1 + $0x1a80] sm:$0xff]  ;;  %v11956_v43 = vcombine.high %v636_v36, %v644_v37  ;;  %6371 = vmatprep.subr.bf16.mxu1 %v12228_v38  ;;  %v11955_v50 = vcombine.low %v636_v36, %v644_v37 }
  0x4d   :  { %v900_v39 = vld [vmem:[%s18511_s1 + $0x1ac0] sm:$0xff]  ;;  %6372 = vmatpush1.bf16.msra.mxu1 %v12227_v42 }
  0x4e   :  { %v620_v45 = vld [vmem:[%s18511_s1 + $0x1200] sm:$0xff]  ;;  %v12212_v48 = vcombine.high %v892_v53, %v900_v39  ;;  %6332 = vmatprep.subr.bf16.mxu0 %v11956_v43  ;;  %v12211_v51 = vcombine.low %v892_v53, %v900_v39 }
  0x4f   :  { %v628_v46 = vld [vmem:[%s18511_s1 + $0x1240] sm:$0xff]  ;;  %6333 = vmatpush1.bf16.msra.mxu0 %v11955_v50 }
  0x50   :  { %v876_v47 = vld [vmem:[%s18511_s1 + $0x1a00] sm:$0xff]  ;;  %v11940_v52 = vcombine.high %v620_v45, %v628_v46  ;;  %6373 = vmatprep.subr.bf16.mxu1 %v12212_v48  ;;  %v11939_v59 = vcombine.low %v620_v45, %v628_v46 }
  0x51   :  { %v884_v49 = vld [vmem:[%s18511_s1 + $0x1a40] sm:$0xff]  ;;  %6374 = vmatpush1.bf16.msra.mxu1 %v12211_v51 }
  0x52   :  { %v604_v54 = vld [vmem:[%s18511_s1 + $0x1180] sm:$0xff]  ;;  %v12196_v57 = vcombine.high %v876_v47, %v884_v49  ;;  %6334 = vmatprep.subr.bf16.mxu0 %v11940_v52  ;;  %v12195_v60 = vcombine.low %v876_v47, %v884_v49 }
  0x53   :  { %v612_v55 = vld [vmem:[%s18511_s1 + $0x11c0] sm:$0xff]  ;;  %6335 = vmatpush1.bf16.msra.mxu0 %v11939_v59 }
  0x54   :  { %v860_v56 = vld [vmem:[%s18511_s1 + $0x1980] sm:$0xff]  ;;  %v11924_v61 = vcombine.high %v604_v54, %v612_v55  ;;  %6375 = vmatprep.subr.bf16.mxu1 %v12196_v57  ;;  %v11923_v4 = vcombine.low %v604_v54, %v612_v55 }
  0x55   :  { %v868_v58 = vld [vmem:[%s18511_s1 + $0x19c0] sm:$0xff]  ;;  %6376 = vmatpush1.bf16.msra.mxu1 %v12195_v60 }
  0x56   :  { %v588_v62 = vld [vmem:[%s18511_s1 + $0x1100] sm:$0xff]  ;;  %v12180_v2 = vcombine.high %v860_v56, %v868_v58  ;;  %6336 = vmatprep.subr.bf16.mxu0 %v11924_v61  ;;  %v12179_v5 = vcombine.low %v860_v56, %v868_v58 }
  0x57   :  { %v596_v0 = vld [vmem:[%s18511_s1 + $0x1140] sm:$0xff]  ;;  %6337 = vmatpush1.bf16.msra.mxu0 %v11923_v4 }
  0x58   :  { %v844_v1 = vld [vmem:[%s18511_s1 + $0x1900] sm:$0xff]  ;;  %v11908_v6 = vcombine.high %v588_v62, %v596_v0  ;;  %6377 = vmatprep.subr.bf16.mxu1 %v12180_v2  ;;  %v11907_v14 = vcombine.low %v588_v62, %v596_v0 }
  0x59   :  { %v852_v3 = vld [vmem:[%s18511_s1 + $0x1940] sm:$0xff]  ;;  %6378 = vmatpush1.bf16.msra.mxu1 %v12179_v5 }
  0x5a   :  { %v572_v7 = vld [vmem:[%s18511_s1 + $0x1080] sm:$0xff]  ;;  %v12164_v11 = vcombine.high %v844_v1, %v852_v3  ;;  %6338 = vmatprep.subr.bf16.mxu0 %v11908_v6  ;;  %v12163_v15 = vcombine.low %v844_v1, %v852_v3 }
  0x5b   :  { %v580_v8 = vld [vmem:[%s18511_s1 + $0x10c0] sm:$0xff]  ;;  %6339 = vmatpush1.bf16.msra.mxu0 %v11907_v14 }
  0x5c   :  { %v828_v10 = vld [vmem:[%s18511_s1 + $0x1880] sm:$0xff]  ;;  %v11892_v16 = vcombine.high %v572_v7, %v580_v8  ;;  %6379 = vmatprep.subr.bf16.mxu1 %v12164_v11  ;;  %v11891_v22 = vcombine.low %v572_v7, %v580_v8 }
  0x5d   :  { %v836_v12 = vld [vmem:[%s18511_s1 + $0x18c0] sm:$0xff]  ;;  %6380 = vmatpush1.bf16.msra.mxu1 %v12163_v15 }
  0x5e   :  { %v556_v17 = vld [vmem:[%s18511_s1 + $0x1000] sm:$0xff]  ;;  %v12148_v20 = vcombine.high %v828_v10, %v836_v12  ;;  %6340 = vmatprep.subr.bf16.mxu0 %v11892_v16  ;;  %v12147_v24 = vcombine.low %v828_v10, %v836_v12 }
  0x5f   :  { %v564_v18 = vld [vmem:[%s18511_s1 + $0x1040] sm:$0xff]  ;;  %6341 = vmatpush1.bf16.msra.mxu0 %v11891_v22 }
  0x60   :  { %v812_v19 = vld [vmem:[%s18511_s1 + $0x1800] sm:$0xff]  ;;  %v11876_v25 = vcombine.high %v556_v17, %v564_v18  ;;  %6381 = vmatprep.subr.bf16.mxu1 %v12148_v20  ;;  %v11875_v33 = vcombine.low %v556_v17, %v564_v18 }
  0x61   :  { %v820_v21 = vld [vmem:[%s18511_s1 + $0x1840] sm:$0xff]  ;;  %6382 = vmatpush1.bf16.msra.mxu1 %v12147_v24 }
  0x62   :  { %v796_v26 = vld [vmem:[%s18511_s1 + $0x1780] sm:$0xff]  ;;  %v12132_v29 = vcombine.high %v812_v19, %v820_v21  ;;  %6342 = vmatprep.subr.bf16.mxu0 %v11876_v25  ;;  %v12131_v34 = vcombine.low %v812_v19, %v820_v21 }
  0x63   :  { %v804_v27 = vld [vmem:[%s18511_s1 + $0x17c0] sm:$0xff]  ;;  %6343 = vmatpush1.bf16.msra.mxu0 %v11875_v33 }
  0x64   :  { %v1052_v28 = vld [vmem:[%s18511_s1 + $0x1f80] sm:$0xff]  ;;  %v12116_v35 = vcombine.high %v796_v26, %v804_v27  ;;  %6383 = vmatprep.subr.bf16.mxu1 %v12132_v29  ;;  %v12115_v41 = vcombine.low %v796_v26, %v804_v27 }
  0x65   :  { %v1060_v63 = vld [vmem:[%s18511_s1 + $0x1fc0] sm:$0xff]  ;;  %6384 = vmatpush1.bf16.msra.mxu1 %v12131_v34 }
  0x66   :  { %v780_v36 = vld [vmem:[%s18511_s1 + $0x1700] sm:$0xff]  ;;  %v12372_v38 = vcombine.high %v1052_v28, %v1060_v63  ;;  %6344 = vmatprep.subr.bf16.mxu0 %v12116_v35  ;;  %v12371_v42 = vcombine.low %v1052_v28, %v1060_v63 }
  0x67   :  { %v788_v37 = vld [vmem:[%s18511_s1 + $0x1740] sm:$0xff]  ;;  %6345 = vmatpush2.bf16.msra.mxu0 %v12115_v41 }
  0x68   :  { %v1036_v53 = vld [vmem:[%s18511_s1 + $0x1f00] sm:$0xff]  ;;  %v12100_v43 = vcombine.high %v780_v36, %v788_v37  ;;  %6385 = vmatprep.subr.bf16.mxu1 %v12372_v38  ;;  %v12099_v50 = vcombine.low %v780_v36, %v788_v37  ;;  %v157_v36 = vld [vmem:[%s18511_s1 + $0x388] sm:$0xff] }
  0x69   :  { %v1044_v39 = vld [vmem:[%s18511_s1 + $0x1f40] sm:$0xff]  ;;  %6386 = vmatpush2.bf16.msra.mxu1 %v12371_v42  ;;  %v165_v37 = vld [vmem:[%s18511_s1 + $0x3c8] sm:$0xff] }
  0x6a   :  { %v764_v45 = vld [vmem:[%s18511_s1 + $0x1680] sm:$0xff]  ;;  %v12356_v48 = vcombine.high %v1036_v53, %v1044_v39  ;;  %6346 = vmatprep.subr.bf16.mxu0 %v12100_v43  ;;  %v12355_v51 = vcombine.low %v1036_v53, %v1044_v39  ;;  %v413_v53 = vld [vmem:[%s18511_s1 + $0xb88] sm:$0xff]  ;;  %v11478_v43 = vcombine.high %v157_v36, %v165_v37 }
  0x6b   :  { %v772_v46 = vld [vmem:[%s18511_s1 + $0x16c0] sm:$0xff]  ;;  %6347 = vmatpush2.bf16.msra.mxu0 %v12099_v50  ;;  %v421_v39 = vld [vmem:[%s18511_s1 + $0xbc8] sm:$0xff]  ;;  %v14086_v50 = vcombine.high %v13785_v32, %v13785_v32 }
  0x6c   :  { %v1020_v47 = vld [vmem:[%s18511_s1 + $0x1e80] sm:$0xff]  ;;  %v12084_v52 = vcombine.high %v764_v45, %v772_v46  ;;  %6387 = vmatprep.subr.bf16.mxu1 %v12356_v48  ;;  %v12083_v59 = vcombine.low %v764_v45, %v772_v46  ;;  %v141_v45 = vld [vmem:[%s18511_s1 + $0x308] sm:$0xff]  ;;  %v11734_v48 = vcombine.high %v413_v53, %v421_v39 }
  0x6d   :  { %v1028_v49 = vld [vmem:[%s18511_s1 + $0x1ec0] sm:$0xff]  ;;  %6388 = vmatpush2.bf16.msra.mxu1 %v12355_v51  ;;  %v149_v46 = vld [vmem:[%s18511_s1 + $0x348] sm:$0xff]  ;;  %v11477_v51 = vcombine.low %v157_v36, %v165_v37 }
  0x6e   :  { %v748_v54 = vld [vmem:[%s18511_s1 + $0x1600] sm:$0xff]  ;;  %v12340_v57 = vcombine.high %v1020_v47, %v1028_v49  ;;  %6348 = vmatprep.subr.bf16.mxu0 %v12084_v52  ;;  %v12339_v60 = vcombine.low %v1020_v47, %v1028_v49  ;;  %v397_v47 = vld [vmem:[%s18511_s1 + $0xb08] sm:$0xff]  ;;  %v11733_v52 = vcombine.low %v413_v53, %v421_v39 }
  0x6f   :  { %v756_v55 = vld [vmem:[%s18511_s1 + $0x1640] sm:$0xff]  ;;  %6349 = vmatpush2.bf16.msra.mxu0 %v12083_v59  ;;  %v405_v49 = vld [vmem:[%s18511_s1 + $0xb48] sm:$0xff] }
  0x70   :  { %v1004_v56 = vld [vmem:[%s18511_s1 + $0x1e00] sm:$0xff]  ;;  %v12068_v61 = vcombine.high %v748_v54, %v756_v55  ;;  %6389 = vmatprep.subr.bf16.mxu1 %v12340_v57  ;;  %v12067_v4 = vcombine.low %v748_v54, %v756_v55  ;;  %v11462_v54 = vcombine.high %v141_v45, %v149_v46  ;;  %v125_v55 = vld [vmem:[%s18511_s1 + $0x288] sm:$0xff] }
  0x71   :  { %v1012_v58 = vld [vmem:[%s18511_s1 + $0x1e40] sm:$0xff]  ;;  %6390 = vmatpush2.bf16.msra.mxu1 %v12339_v60  ;;  %v381_v57 = vld [vmem:[%s18511_s1 + $0xa88] sm:$0xff]  ;;  %v11461_v60 = vcombine.low %v141_v45, %v149_v46 }
  0x72   :  { %v732_v62 = vld [vmem:[%s18511_s1 + $0x1580] sm:$0xff]  ;;  %v12324_v2 = vcombine.high %v1004_v56, %v1012_v58  ;;  %6350 = vmatprep.subr.bf16.mxu0 %v12068_v61  ;;  %v12323_v5 = vcombine.low %v1004_v56, %v1012_v58  ;;  %v133_v56 = vld [vmem:[%s18511_s1 + $0x2c8] sm:$0xff]  ;;  %v11718_v58 = vcombine.high %v397_v47, %v405_v49  ;;  %v11717_v61 = vcombine.low %v397_v47, %v405_v49 }
  0x73   :  { %v740_v0 = vld [vmem:[%s18511_s1 + $0x15c0] sm:$0xff]  ;;  %6351 = vmatpush2.bf16.msra.mxu0 %v12067_v4  ;;  %v389_v59 = vld [vmem:[%s18511_s1 + $0xac8] sm:$0xff] }
  0x74   :  { %v988_v1 = vld [vmem:[%s18511_s1 + $0x1d80] sm:$0xff]  ;;  %v12052_v6 = vcombine.high %v732_v62, %v740_v0  ;;  %6391 = vmatprep.subr.bf16.mxu1 %v12324_v2  ;;  %v12051_v14 = vcombine.low %v732_v62, %v740_v0  ;;  %v11446_v62 = vcombine.high %v125_v55, %v133_v56  ;;  %v109_v0 = vld [vmem:[%s18511_s1 + $0x208] sm:$0xff] }
  0x75   :  { %v996_v3 = vld [vmem:[%s18511_s1 + $0x1dc0] sm:$0xff]  ;;  %6392 = vmatpush2.bf16.msra.mxu1 %v12323_v5  ;;  %v365_v2 = vld [vmem:[%s18511_s1 + $0xa08] sm:$0xff]  ;;  %v11445_v5 = vcombine.low %v125_v55, %v133_v56 }
  0x76   :  { %v716_v7 = vld [vmem:[%s18511_s1 + $0x1500] sm:$0xff]  ;;  %v12308_v11 = vcombine.high %v988_v1, %v996_v3  ;;  %6352 = vmatprep.subr.bf16.mxu0 %v12052_v6  ;;  %v12307_v15 = vcombine.low %v988_v1, %v996_v3  ;;  %v117_v1 = vld [vmem:[%s18511_s1 + $0x248] sm:$0xff]  ;;  %v11702_v3 = vcombine.high %v381_v57, %v389_v59  ;;  %v11701_v6 = vcombine.low %v381_v57, %v389_v59 }
  0x77   :  { %v724_v8 = vld [vmem:[%s18511_s1 + $0x1540] sm:$0xff]  ;;  %6353 = vmatpush2.bf16.msra.mxu0 %v12051_v14  ;;  %v373_v4 = vld [vmem:[%s18511_s1 + $0xa48] sm:$0xff] }
  0x78   :  { %v972_v10 = vld [vmem:[%s18511_s1 + $0x1d00] sm:$0xff]  ;;  %v12036_v16 = vcombine.high %v716_v7, %v724_v8  ;;  %6393 = vmatprep.subr.bf16.mxu1 %v12308_v11  ;;  %v12035_v22 = vcombine.low %v716_v7, %v724_v8  ;;  %v11430_v7 = vcombine.high %v109_v0, %v117_v1  ;;  %v93_v8 = vld [vmem:[%s18511_s1 + $0x188] sm:$0xff] }
  0x79   :  { %v980_v12 = vld [vmem:[%s18511_s1 + $0x1d40] sm:$0xff]  ;;  %6394 = vmatpush2.bf16.msra.mxu1 %v12307_v15  ;;  %v349_v11 = vld [vmem:[%s18511_s1 + $0x988] sm:$0xff]  ;;  %v11429_v15 = vcombine.low %v109_v0, %v117_v1 }
  0x7a   :  { %v700_v17 = vld [vmem:[%s18511_s1 + $0x1480] sm:$0xff]  ;;  %v12292_v20 = vcombine.high %v972_v10, %v980_v12  ;;  %6354 = vmatprep.subr.bf16.mxu0 %v12036_v16  ;;  %v12291_v24 = vcombine.low %v972_v10, %v980_v12  ;;  %v101_v10 = vld [vmem:[%s18511_s1 + $0x1c8] sm:$0xff]  ;;  %v11686_v12 = vcombine.high %v365_v2, %v373_v4  ;;  %v11685_v16 = vcombine.low %v365_v2, %v373_v4 }
  0x7b   :  { %v708_v18 = vld [vmem:[%s18511_s1 + $0x14c0] sm:$0xff]  ;;  %6355 = vmatpush2.bf16.msra.mxu0 %v12035_v22  ;;  %v357_v14 = vld [vmem:[%s18511_s1 + $0x9c8] sm:$0xff] }
  0x7c   :  { %v956_v19 = vld [vmem:[%s18511_s1 + $0x1c80] sm:$0xff]  ;;  %v12020_v25 = vcombine.high %v700_v17, %v708_v18  ;;  %6395 = vmatprep.subr.bf16.mxu1 %v12292_v20  ;;  %v12019_v33 = vcombine.low %v700_v17, %v708_v18  ;;  %v11414_v17 = vcombine.high %v93_v8, %v101_v10  ;;  %v77_v18 = vld [vmem:[%s18511_s1 + $0x108] sm:$0xff] }
  0x7d   :  { %v964_v21 = vld [vmem:[%s18511_s1 + $0x1cc0] sm:$0xff]  ;;  %6396 = vmatpush2.bf16.msra.mxu1 %v12291_v24  ;;  %v333_v20 = vld [vmem:[%s18511_s1 + $0x908] sm:$0xff]  ;;  %v11413_v24 = vcombine.low %v93_v8, %v101_v10 }
  0x7e   :  { %v684_v26 = vld [vmem:[%s18511_s1 + $0x1400] sm:$0xff]  ;;  %v12276_v29 = vcombine.high %v956_v19, %v964_v21  ;;  %6356 = vmatprep.subr.bf16.mxu0 %v12020_v25  ;;  %v12275_v34 = vcombine.low %v956_v19, %v964_v21  ;;  %v85_v19 = vld [vmem:[%s18511_s1 + $0x148] sm:$0xff]  ;;  %v11670_v21 = vcombine.high %v349_v11, %v357_v14  ;;  %v11669_v25 = vcombine.low %v349_v11, %v357_v14 }
  0x7f   :  { %v692_v27 = vld [vmem:[%s18511_s1 + $0x1440] sm:$0xff]  ;;  %6357 = vmatpush2.bf16.msra.mxu0 %v12019_v33  ;;  %v341_v22 = vld [vmem:[%s18511_s1 + $0x948] sm:$0xff] }
  0x80   :  { %v940_v28 = vld [vmem:[%s18511_s1 + $0x1c00] sm:$0xff]  ;;  %v12004_v35 = vcombine.high %v684_v26, %v692_v27  ;;  %6397 = vmatprep.subr.bf16.mxu1 %v12276_v29  ;;  %v12003_v41 = vcombine.low %v684_v26, %v692_v27  ;;  %v11398_v26 = vcombine.high %v77_v18, %v85_v19  ;;  %v61_v27 = vld [vmem:[%s18511_s1 + $0x88] sm:$0xff] }
  0x81   :  { %v948_v63 = vld [vmem:[%s18511_s1 + $0x1c40] sm:$0xff]  ;;  %6398 = vmatpush2.bf16.msra.mxu1 %v12275_v34  ;;  %v317_v29 = vld [vmem:[%s18511_s1 + $0x888] sm:$0xff]  ;;  %v11397_v34 = vcombine.low %v77_v18, %v85_v19 }
  0x82   :  { %v12260_v38 = vcombine.high %v940_v28, %v948_v63  ;;  %6358 = vmatprep.subr.bf16.mxu0 %v12004_v35  ;;  %v12259_v42 = vcombine.low %v940_v28, %v948_v63  ;;  %v69_v28 = vld [vmem:[%s18511_s1 + $0xc8] sm:$0xff]  ;;  %v11654_v63 = vcombine.high %v333_v20, %v341_v22  ;;  %v11653_v35 = vcombine.low %v333_v20, %v341_v22 }
  0x83   :  { %6359 = vmatpush2.bf16.msra.mxu0 %v12003_v41  ;;  %v325_v33 = vld [vmem:[%s18511_s1 + $0x8c8] sm:$0xff]  ;;  %v11382_v36 = vcombine.high %v61_v27, %v69_v28 }
  0x84   :  { %6399 = vmatprep.subr.bf16.mxu1 %v12260_v38  ;;  %6410 = vmatprep.subr.bf16.mxu0 %v11478_v43  ;;  %v45_v37 = vld [vmem:[%s18511_s1 + $0x8] sm:$0xff]  ;;  %v11638_v39 = vcombine.high %v317_v29, %v325_v33  ;;  %v11637_v43 = vcombine.low %v317_v29, %v325_v33 }
  0x85   :  { %6400 = vmatpush2.bf16.msra.mxu1 %v12259_v42  ;;  %v53_v53 = vld [vmem:[%s18511_s1 + $0x48] sm:$0xff]  ;;  %v11381_v42 = vcombine.low %v61_v27, %v69_v28 }
  0x86   :  { %6451 = vmatprep.subr.bf16.mxu1 %v11734_v48  ;;  %6361 = vmatmul.mubr.bf16.vlgmr.msra.gmra.mxu0 %v13785_v32  ;;  %v301_v38 = vld [vmem:[%s18511_s1 + $0x808] sm:$0xff]  ;;  %v11366_v45 = vcombine.high %v45_v37, %v53_v53 }
  0x87   :  { %6411 = vmatpush1.bf16.msra.mxu0 %v11477_v51  ;;  %6442 = vmatprep.mubr.bf16.mxu0 %v13742_v9  ;;  %v309_v41 = vld [vmem:[%s18511_s1 + $0x848] sm:$0xff] }
  0x88   :  { %6402 = vmatmul.mubr.bf16.vlgmr.msra.gmra.mxu1 %v14086_v50  ;;  %6412 = vmatprep.subr.bf16.mxu0 %v11462_v54  ;;  %v285_v46 = vld [vmem:[%s18511_s1 + $0x788] sm:$0xff]  ;;  %v11622_v49 = vcombine.high %v301_v38, %v309_v41  ;;  %v11621_v54 = vcombine.low %v301_v38, %v309_v41 }
  0x89   :  { %6452 = vmatpush1.bf16.msra.mxu1 %v11733_v52  ;;  %6483 = vmatprep.mubr.bf16.mxu1 %v13753_v13  ;;  %v293_v47 = vld [vmem:[%s18511_s1 + $0x7c8] sm:$0xff]  ;;  %v11365_v52 = vcombine.low %v45_v37, %v53_v53 }
  0x8a   :  { %6453 = vmatprep.subr.bf16.mxu1 %v11718_v58  ;;  %v541_v48 = vld [vmem:[%s18511_s1 + $0xf88] sm:$0xff]  ;;  %v11606_v55 = vcombine.high %v285_v46, %v293_v47 }
  0x8b   :  { %6413 = vmatpush1.bf16.msra.mxu0 %v11461_v60  ;;  %v549_v51 = vld [vmem:[%s18511_s1 + $0xfc8] sm:$0xff] }
  0x8c   :  { %6414 = vmatprep.subr.bf16.mxu0 %v11446_v62  ;;  %v269_v56 = vld [vmem:[%s18511_s1 + $0x708] sm:$0xff]  ;;  %v11862_v59 = vcombine.high %v541_v48, %v549_v51  ;;  %v11861_v62 = vcombine.low %v541_v48, %v549_v51 }
  0x8d   :  { %6454 = vmatpush1.bf16.msra.mxu1 %v11717_v61  ;;  %v277_v57 = vld [vmem:[%s18511_s1 + $0x748] sm:$0xff]  ;;  %v11605_v61 = vcombine.low %v285_v46, %v293_v47 }
  0x8e   :  { %6455 = vmatprep.subr.bf16.mxu1 %v11702_v3  ;;  %v525_v58 = vld [vmem:[%s18511_s1 + $0xf08] sm:$0xff]  ;;  %v11590_v0 = vcombine.high %v269_v56, %v277_v57 }
  0x8f   :  { %6415 = vmatpush1.bf16.msra.mxu0 %v11445_v5  ;;  %v533_v60 = vld [vmem:[%s18511_s1 + $0xf48] sm:$0xff] }
  0x90   :  { %6416 = vmatprep.subr.bf16.mxu0 %v11430_v7  ;;  %v253_v1 = vld [vmem:[%s18511_s1 + $0x688] sm:$0xff]  ;;  %v11846_v4 = vcombine.high %v525_v58, %v533_v60  ;;  %v11845_v7 = vcombine.low %v525_v58, %v533_v60 }
  0x91   :  { %6456 = vmatpush1.bf16.msra.mxu1 %v11701_v6  ;;  %v261_v2 = vld [vmem:[%s18511_s1 + $0x6c8] sm:$0xff]  ;;  %v11589_v6 = vcombine.low %v269_v56, %v277_v57 }
  0x92   :  { %6457 = vmatprep.subr.bf16.mxu1 %v11686_v12  ;;  %v509_v3 = vld [vmem:[%s18511_s1 + $0xe88] sm:$0xff]  ;;  %v11574_v8 = vcombine.high %v253_v1, %v261_v2 }
  0x93   :  { %6417 = vmatpush1.bf16.msra.mxu0 %v11429_v15  ;;  %v517_v5 = vld [vmem:[%s18511_s1 + $0xec8] sm:$0xff] }
  0x94   :  { %6418 = vmatprep.subr.bf16.mxu0 %v11414_v17  ;;  %v237_v10 = vld [vmem:[%s18511_s1 + $0x608] sm:$0xff]  ;;  %v11830_v14 = vcombine.high %v509_v3, %v517_v5  ;;  %v11829_v17 = vcombine.low %v509_v3, %v517_v5 }
  0x95   :  { %6458 = vmatpush1.bf16.msra.mxu1 %v11685_v16  ;;  %v245_v11 = vld [vmem:[%s18511_s1 + $0x648] sm:$0xff]  ;;  %v11573_v16 = vcombine.low %v253_v1, %v261_v2 }
  0x96   :  { %6459 = vmatprep.subr.bf16.mxu1 %v11670_v21  ;;  %v493_v12 = vld [vmem:[%s18511_s1 + $0xe08] sm:$0xff]  ;;  %v11558_v18 = vcombine.high %v237_v10, %v245_v11 }
  0x97   :  { %6419 = vmatpush1.bf16.msra.mxu0 %v11413_v24  ;;  %v501_v15 = vld [vmem:[%s18511_s1 + $0xe48] sm:$0xff] }
  0x98   :  { %6420 = vmatprep.subr.bf16.mxu0 %v11398_v26  ;;  %v221_v19 = vld [vmem:[%s18511_s1 + $0x588] sm:$0xff]  ;;  %v11814_v22 = vcombine.high %v493_v12, %v501_v15  ;;  %v11813_v26 = vcombine.low %v493_v12, %v501_v15 }
  0x99   :  { %6460 = vmatpush1.bf16.msra.mxu1 %v11669_v25  ;;  %v229_v20 = vld [vmem:[%s18511_s1 + $0x5c8] sm:$0xff]  ;;  %v11557_v25 = vcombine.low %v237_v10, %v245_v11 }
  0x9a   :  { %6461 = vmatprep.subr.bf16.mxu1 %v11654_v63  ;;  %v477_v21 = vld [vmem:[%s18511_s1 + $0xd88] sm:$0xff]  ;;  %v11542_v27 = vcombine.high %v221_v19, %v229_v20 }
  0x9b   :  { %6421 = vmatpush1.bf16.msra.mxu0 %v11397_v34  ;;  %v485_v24 = vld [vmem:[%s18511_s1 + $0xdc8] sm:$0xff] }
  0x9c   :  { %6422 = vmatprep.subr.bf16.mxu0 %v11382_v36  ;;  %v205_v28 = vld [vmem:[%s18511_s1 + $0x508] sm:$0xff]  ;;  %v11798_v33 = vcombine.high %v477_v21, %v485_v24  ;;  %v11797_v36 = vcombine.low %v477_v21, %v485_v24 }
  0x9d   :  { %6462 = vmatpush1.bf16.msra.mxu1 %v11653_v35  ;;  %v213_v29 = vld [vmem:[%s18511_s1 + $0x548] sm:$0xff]  ;;  %v11541_v35 = vcombine.low %v221_v19, %v229_v20 }
  0x9e   :  { %6463 = vmatprep.subr.bf16.mxu1 %v11638_v39  ;;  %v461_v63 = vld [vmem:[%s18511_s1 + $0xd08] sm:$0xff]  ;;  %v11526_v37 = vcombine.high %v205_v28, %v213_v29 }
  0x9f   :  { %6423 = vmatpush1.bf16.msra.mxu0 %v11381_v42  ;;  %v469_v34 = vld [vmem:[%s18511_s1 + $0xd48] sm:$0xff] }
  0xa0   :  { %6424 = vmatprep.subr.bf16.mxu0 %v11366_v45  ;;  %v189_v53 = vld [vmem:[%s18511_s1 + $0x488] sm:$0xff]  ;;  %v11782_v41 = vcombine.high %v461_v63, %v469_v34  ;;  %v11781_v45 = vcombine.low %v461_v63, %v469_v34 }
  0xa1   :  { %6464 = vmatpush1.bf16.msra.mxu1 %v11637_v43  ;;  %v197_v38 = vld [vmem:[%s18511_s1 + $0x4c8] sm:$0xff]  ;;  %v11525_v43 = vcombine.low %v205_v28, %v213_v29 }
  0xa2   :  { %6465 = vmatprep.subr.bf16.mxu1 %v11622_v49  ;;  %v445_v39 = vld [vmem:[%s18511_s1 + $0xc88] sm:$0xff]  ;;  %v11510_v46 = vcombine.high %v189_v53, %v197_v38 }
  0xa3   :  { %6425 = vmatpush1.bf16.msra.mxu0 %v11365_v52  ;;  %v453_v42 = vld [vmem:[%s18511_s1 + $0xcc8] sm:$0xff] }
  0xa4   :  { %6426 = vmatprep.subr.bf16.mxu0 %v11606_v55  ;;  %v173_v47 = vld [vmem:[%s18511_s1 + $0x408] sm:$0xff]  ;;  %v11766_v51 = vcombine.high %v445_v39, %v453_v42  ;;  %v11765_v55 = vcombine.low %v445_v39, %v453_v42 }
  0xa5   :  { %6466 = vmatpush1.bf16.msra.mxu1 %v11621_v54  ;;  %v181_v48 = vld [vmem:[%s18511_s1 + $0x448] sm:$0xff]  ;;  %v11509_v54 = vcombine.low %v189_v53, %v197_v38 }
  0xa6   :  { %6467 = vmatprep.subr.bf16.mxu1 %v11862_v59  ;;  %v429_v49 = vld [vmem:[%s18511_s1 + $0xc08] sm:$0xff]  ;;  %v11494_v56 = vcombine.high %v173_v47, %v181_v48 }
  0xa7   :  { %6427 = vmatpush2.bf16.msra.mxu0 %v11605_v61  ;;  %v437_v52 = vld [vmem:[%s18511_s1 + $0xc48] sm:$0xff] }
  0xa8   :  { %6428 = vmatprep.subr.bf16.mxu0 %v11590_v0  ;;  %v669_v57 = vld [vmem:[%s18511_s1 + $0x1388] sm:$0xff]  ;;  %v11750_v60 = vcombine.high %v429_v49, %v437_v52  ;;  %v11749_v0 = vcombine.low %v429_v49, %v437_v52 }
  0xa9   :  { %6468 = vmatpush2.bf16.msra.mxu1 %v11861_v62  ;;  %v677_v58 = vld [vmem:[%s18511_s1 + $0x13c8] sm:$0xff]  ;;  %v11493_v62 = vcombine.low %v173_v47, %v181_v48 }
  0xaa   :  { %6469 = vmatprep.subr.bf16.mxu1 %v11846_v4  ;;  %v925_v59 = vld [vmem:[%s18511_s1 + $0x1b88] sm:$0xff]  ;;  %v11990_v1 = vcombine.high %v669_v57, %v677_v58 }
  0xab   :  { %6429 = vmatpush2.bf16.msra.mxu0 %v11589_v6  ;;  %v933_v61 = vld [vmem:[%s18511_s1 + $0x1bc8] sm:$0xff] }
  0xac   :  { %6430 = vmatprep.subr.bf16.mxu0 %v11574_v8  ;;  %v653_v2 = vld [vmem:[%s18511_s1 + $0x1308] sm:$0xff]  ;;  %v12246_v5 = vcombine.high %v925_v59, %v933_v61  ;;  %v12245_v8 = vcombine.low %v925_v59, %v933_v61 }
  0xad   :  { %6470 = vmatpush2.bf16.msra.mxu1 %v11845_v7  ;;  %v661_v3 = vld [vmem:[%s18511_s1 + $0x1348] sm:$0xff]  ;;  %v11989_v7 = vcombine.low %v669_v57, %v677_v58 }
  0xae   :  { %6471 = vmatprep.subr.bf16.mxu1 %v11830_v14  ;;  %v909_v4 = vld [vmem:[%s18511_s1 + $0x1b08] sm:$0xff]  ;;  %v11974_v10 = vcombine.high %v653_v2, %v661_v3 }
  0xaf   :  { %6431 = vmatpush2.bf16.msra.mxu0 %v11573_v16  ;;  %v917_v6 = vld [vmem:[%s18511_s1 + $0x1b48] sm:$0xff] }
  0xb0   :  { %6432 = vmatprep.subr.bf16.mxu0 %v11558_v18  ;;  %v637_v11 = vld [vmem:[%s18511_s1 + $0x1288] sm:$0xff]  ;;  %v12230_v15 = vcombine.high %v909_v4, %v917_v6  ;;  %v12229_v18 = vcombine.low %v909_v4, %v917_v6 }
  0xb1   :  { %6472 = vmatpush2.bf16.msra.mxu1 %v11829_v17  ;;  %v645_v12 = vld [vmem:[%s18511_s1 + $0x12c8] sm:$0xff]  ;;  %v11973_v17 = vcombine.low %v653_v2, %v661_v3 }
  0xb2   :  { %6473 = vmatprep.subr.bf16.mxu1 %v11814_v22  ;;  %v893_v14 = vld [vmem:[%s18511_s1 + $0x1a88] sm:$0xff]  ;;  %v11958_v19 = vcombine.high %v637_v11, %v645_v12 }
  0xb3   :  { %6433 = vmatpush2.bf16.msra.mxu0 %v11557_v25  ;;  %v901_v16 = vld [vmem:[%s18511_s1 + $0x1ac8] sm:$0xff] }
  0xb4   :  { %6434 = vmatprep.subr.bf16.mxu0 %v11542_v27  ;;  %v621_v20 = vld [vmem:[%s18511_s1 + $0x1208] sm:$0xff]  ;;  %v12214_v22 = vcombine.high %v893_v14, %v901_v16  ;;  %v12213_v27 = vcombine.low %v893_v14, %v901_v16 }
  0xb5   :  { %6474 = vmatpush2.bf16.msra.mxu1 %v11813_v26  ;;  %v629_v21 = vld [vmem:[%s18511_s1 + $0x1248] sm:$0xff]  ;;  %v11957_v26 = vcombine.low %v637_v11, %v645_v12 }
  0xb6   :  { %6475 = vmatprep.subr.bf16.mxu1 %v11798_v33  ;;  %v877_v24 = vld [vmem:[%s18511_s1 + $0x1a08] sm:$0xff]  ;;  %v11942_v28 = vcombine.high %v621_v20, %v629_v21 }
  0xb7   :  { %6435 = vmatpush2.bf16.msra.mxu0 %v11541_v35  ;;  %v885_v25 = vld [vmem:[%s18511_s1 + $0x1a48] sm:$0xff] }
  0xb8   :  { %6436 = vmatprep.subr.bf16.mxu0 %v11526_v37  ;;  %v605_v29 = vld [vmem:[%s18511_s1 + $0x1188] sm:$0xff]  ;;  %v12198_v34 = vcombine.high %v877_v24, %v885_v25  ;;  %v12197_v37 = vcombine.low %v877_v24, %v885_v25 }
  0xb9   :  { %6476 = vmatpush2.bf16.msra.mxu1 %v11797_v36  ;;  %v613_v63 = vld [vmem:[%s18511_s1 + $0x11c8] sm:$0xff]  ;;  %v11941_v36 = vcombine.low %v621_v20, %v629_v21 }
  0xba   :  { %6477 = vmatprep.subr.bf16.mxu1 %v11782_v41  ;;  %v861_v33 = vld [vmem:[%s18511_s1 + $0x1988] sm:$0xff]  ;;  %v11926_v53 = vcombine.high %v605_v29, %v613_v63 }
  0xbb   :  { %6437 = vmatpush2.bf16.msra.mxu0 %v11525_v43  ;;  %v869_v35 = vld [vmem:[%s18511_s1 + $0x19c8] sm:$0xff] }
  0xbc   :  { %6438 = vmatprep.subr.bf16.mxu0 %v11510_v46  ;;  %v589_v38 = vld [vmem:[%s18511_s1 + $0x1108] sm:$0xff]  ;;  %v12182_v42 = vcombine.high %v861_v33, %v869_v35  ;;  %v12181_v46 = vcombine.low %v861_v33, %v869_v35 }
  0xbd   :  { %6478 = vmatpush2.bf16.msra.mxu1 %v11781_v45  ;;  %v597_v39 = vld [vmem:[%s18511_s1 + $0x1148] sm:$0xff]  ;;  %v11925_v45 = vcombine.low %v605_v29, %v613_v63 }
  0xbe   :  { %6479 = vmatprep.subr.bf16.mxu1 %v11766_v51  ;;  %v845_v41 = vld [vmem:[%s18511_s1 + $0x1908] sm:$0xff]  ;;  %v11910_v47 = vcombine.high %v589_v38, %v597_v39 }
  0xbf   :  { %6439 = vmatpush2.bf16.msra.mxu0 %v11509_v54  ;;  %v853_v43 = vld [vmem:[%s18511_s1 + $0x1948] sm:$0xff] }
  0xc0   :  { %6440 = vmatprep.subr.bf16.mxu0 %v11494_v56  ;;  %v573_v48 = vld [vmem:[%s18511_s1 + $0x1088] sm:$0xff]  ;;  %v12166_v52 = vcombine.high %v845_v41, %v853_v43  ;;  %v12165_v56 = vcombine.low %v845_v41, %v853_v43 }
  0xc1   :  { %6480 = vmatpush2.bf16.msra.mxu1 %v11765_v55  ;;  %v581_v49 = vld [vmem:[%s18511_s1 + $0x10c8] sm:$0xff]  ;;  %v11909_v55 = vcombine.low %v589_v38, %v597_v39 }
  0xc2   :  { %6481 = vmatprep.subr.bf16.mxu1 %v11750_v60  ;;  %v829_v51 = vld [vmem:[%s18511_s1 + $0x1888] sm:$0xff]  ;;  %v11894_v57 = vcombine.high %v573_v48, %v581_v49 }
  0xc3   :  { %6441 = vmatpush2.bf16.msra.mxu0 %v11493_v62  ;;  %v837_v54 = vld [vmem:[%s18511_s1 + $0x18c8] sm:$0xff] }
  0xc4   :  { %6492 = vmatprep.subr.bf16.mxu0 %v11990_v1  ;;  %v557_v58 = vld [vmem:[%s18511_s1 + $0x1008] sm:$0xff]  ;;  %v12150_v61 = vcombine.high %v829_v51, %v837_v54  ;;  %v12149_v1 = vcombine.low %v829_v51, %v837_v54 }
  0xc5   :  { %6482 = vmatpush2.bf16.msra.mxu1 %v11749_v0  ;;  %v565_v59 = vld [vmem:[%s18511_s1 + $0x1048] sm:$0xff]  ;;  %v11893_v0 = vcombine.low %v573_v48, %v581_v49 }
  0xc6   :  { %6533 = vmatprep.subr.bf16.mxu1 %v12246_v5  ;;  %6443 = vmatmul.mubr.bf16.vlgmr.msra.gmra.mxu0 %v13863_v23  ;;  %v813_v60 = vld [vmem:[%s18511_s1 + $0x1808] sm:$0xff]  ;;  %v11878_v2 = vcombine.high %v557_v58, %v565_v59 }
  0xc7   :  { %6493 = vmatpush1.bf16.msra.mxu0 %v11989_v7  ;;  %6524 = vmatprep.mubr.bf16.mxu0 %v13878_v30  ;;  %v821_v62 = vld [vmem:[%s18511_s1 + $0x1848] sm:$0xff] }
  0xc8   :  { %6484 = vmatmul.mubr.bf16.vlgmr.msra.gmra.mxu1 %v13882_v31  ;;  %6494 = vmatprep.subr.bf16.mxu0 %v11974_v10  ;;  %v797_v3 = vld [vmem:[%s18511_s1 + $0x1788] sm:$0xff]  ;;  %v12134_v6 = vcombine.high %v813_v60, %v821_v62  ;;  %v12133_v10 = vcombine.low %v813_v60, %v821_v62 }
  0xc9   :  { %6534 = vmatpush1.bf16.msra.mxu1 %v12245_v8  ;;  %6565 = vmatprep.mubr.bf16.mxu1 %v13899_v40  ;;  %v805_v4 = vld [vmem:[%s18511_s1 + $0x17c8] sm:$0xff]  ;;  %v11877_v8 = vcombine.low %v557_v58, %v565_v59 }
  0xca   :  { %6535 = vmatprep.subr.bf16.mxu1 %v12230_v15  ;;  %v1053_v5 = vld [vmem:[%s18511_s1 + $0x1f88] sm:$0xff]  ;;  %v12118_v11 = vcombine.high %v797_v3, %v805_v4 }
  0xcb   :  { %6495 = vmatpush1.bf16.msra.mxu0 %v11973_v17  ;;  %v1061_v7 = vld [vmem:[%s18511_s1 + $0x1fc8] sm:$0xff] }
  0xcc   :  { %6496 = vmatprep.subr.bf16.mxu0 %v11958_v19  ;;  %v781_v12 = vld [vmem:[%s18511_s1 + $0x1708] sm:$0xff]  ;;  %v12374_v16 = vcombine.high %v1053_v5, %v1061_v7  ;;  %v12373_v19 = vcombine.low %v1053_v5, %v1061_v7 }
  0xcd   :  { %6536 = vmatpush1.bf16.msra.mxu1 %v12229_v18  ;;  %v789_v14 = vld [vmem:[%s18511_s1 + $0x1748] sm:$0xff]  ;;  %v12117_v18 = vcombine.low %v797_v3, %v805_v4 }
  0xce   :  { %6537 = vmatprep.subr.bf16.mxu1 %v12214_v22  ;;  %v1037_v15 = vld [vmem:[%s18511_s1 + $0x1f08] sm:$0xff]  ;;  %v12102_v20 = vcombine.high %v781_v12, %v789_v14 }
  0xcf   :  { %6497 = vmatpush1.bf16.msra.mxu0 %v11957_v26  ;;  %v1045_v17 = vld [vmem:[%s18511_s1 + $0x1f48] sm:$0xff] }
  0xd0   :  { %6498 = vmatprep.subr.bf16.mxu0 %v11942_v28  ;;  %v765_v21 = vld [vmem:[%s18511_s1 + $0x1688] sm:$0xff]  ;;  %v12358_v25 = vcombine.high %v1037_v15, %v1045_v17  ;;  %v12357_v28 = vcombine.low %v1037_v15, %v1045_v17  ;;  %v166_v15 = vld [vmem:[%s18511_s1 + $0x3d0] sm:$0xff] }
  0xd1   :  { %6538 = vmatpush1.bf16.msra.mxu1 %v12213_v27  ;;  %v773_v22 = vld [vmem:[%s18511_s1 + $0x16c8] sm:$0xff]  ;;  %v12101_v27 = vcombine.low %v781_v12, %v789_v14  ;;  %v158_v14 = vld [vmem:[%s18511_s1 + $0x390] sm:$0xff] }
  0xd2   :  { %6539 = vmatprep.subr.bf16.mxu1 %v12198_v34  ;;  %v1021_v24 = vld [vmem:[%s18511_s1 + $0x1e88] sm:$0xff]  ;;  %v12086_v29 = vcombine.high %v765_v21, %v773_v22 }
  0xd3   :  { %6499 = vmatpush1.bf16.msra.mxu0 %v11941_v36  ;;  %v1029_v26 = vld [vmem:[%s18511_s1 + $0x1ec8] sm:$0xff] }
  0xd4   :  { %6500 = vmatprep.subr.bf16.mxu0 %v11926_v53  ;;  %v749_v63 = vld [vmem:[%s18511_s1 + $0x1608] sm:$0xff]  ;;  %v12342_v35 = vcombine.high %v1021_v24, %v1029_v26  ;;  %v12341_v53 = vcombine.low %v1021_v24, %v1029_v26  ;;  %v150_v24 = vld [vmem:[%s18511_s1 + $0x350] sm:$0xff] }
  0xd5   :  { %6540 = vmatpush1.bf16.msra.mxu1 %v12197_v37  ;;  %v757_v33 = vld [vmem:[%s18511_s1 + $0x1648] sm:$0xff]  ;;  %v12085_v37 = vcombine.low %v765_v21, %v773_v22  ;;  %v11480_v21 = vcombine.high %v158_v14, %v166_v15  ;;  %v142_v22 = vld [vmem:[%s18511_s1 + $0x310] sm:$0xff] }
  0xd6   :  { %6541 = vmatprep.subr.bf16.mxu1 %v12182_v42  ;;  %v1005_v34 = vld [vmem:[%s18511_s1 + $0x1e08] sm:$0xff]  ;;  %v12070_v38 = vcombine.high %v749_v63, %v757_v33 }
  0xd7   :  { %6501 = vmatpush1.bf16.msra.mxu0 %v11925_v45  ;;  %v1013_v36 = vld [vmem:[%s18511_s1 + $0x1e48] sm:$0xff] }
  0xd8   :  { %6502 = vmatprep.subr.bf16.mxu0 %v11910_v47  ;;  %v733_v39 = vld [vmem:[%s18511_s1 + $0x1588] sm:$0xff]  ;;  %v12326_v43 = vcombine.high %v1005_v34, %v1013_v36  ;;  %v12325_v47 = vcombine.low %v1005_v34, %v1013_v36  ;;  %v134_v34 = vld [vmem:[%s18511_s1 + $0x2d0] sm:$0xff] }
  0xd9   :  { %6542 = vmatpush1.bf16.msra.mxu1 %v12181_v46  ;;  %v741_v41 = vld [vmem:[%s18511_s1 + $0x15c8] sm:$0xff]  ;;  %v12069_v46 = vcombine.low %v749_v63, %v757_v33  ;;  %v11464_v63 = vcombine.high %v142_v22, %v150_v24  ;;  %v126_v33 = vld [vmem:[%s18511_s1 + $0x290] sm:$0xff] }
  0xda   :  { %6543 = vmatprep.subr.bf16.mxu1 %v12166_v52  ;;  %v989_v42 = vld [vmem:[%s18511_s1 + $0x1d88] sm:$0xff]  ;;  %v12054_v48 = vcombine.high %v733_v39, %v741_v41 }
  0xdb   :  { %6503 = vmatpush1.bf16.msra.mxu0 %v11909_v55  ;;  %v997_v45 = vld [vmem:[%s18511_s1 + $0x1dc8] sm:$0xff] }
  0xdc   :  { %6504 = vmatprep.subr.bf16.mxu0 %v11894_v57  ;;  %v717_v49 = vld [vmem:[%s18511_s1 + $0x1508] sm:$0xff]  ;;  %v12310_v54 = vcombine.high %v989_v42, %v997_v45  ;;  %v12309_v57 = vcombine.low %v989_v42, %v997_v45  ;;  %v11448_v45 = vcombine.high %v126_v33, %v134_v34 }
  0xdd   :  { %6544 = vmatpush1.bf16.msra.mxu1 %v12165_v56  ;;  %v725_v51 = vld [vmem:[%s18511_s1 + $0x1548] sm:$0xff]  ;;  %v12053_v56 = vcombine.low %v733_v39, %v741_v41  ;;  %v11463_v39 = vcombine.low %v142_v22, %v150_v24 }
  0xde   :  { %6545 = vmatprep.subr.bf16.mxu1 %v12150_v61  ;;  %v973_v52 = vld [vmem:[%s18511_s1 + $0x1d08] sm:$0xff]  ;;  %v12038_v58 = vcombine.high %v717_v49, %v725_v51 }
  0xdf   :  { %6505 = vmatpush1.bf16.msra.mxu0 %v11893_v0  ;;  %v981_v55 = vld [vmem:[%s18511_s1 + $0x1d48] sm:$0xff] }
  0xe0   :  { %6506 = vmatprep.subr.bf16.mxu0 %v11878_v2  ;;  %v701_v59 = vld [vmem:[%s18511_s1 + $0x1488] sm:$0xff]  ;;  %v12294_v62 = vcombine.high %v973_v52, %v981_v55  ;;  %v12293_v2 = vcombine.low %v973_v52, %v981_v55  ;;  %v374_v52 = vld [vmem:[%s18511_s1 + $0xa50] sm:$0xff] }
  0xe1   :  { %6546 = vmatpush1.bf16.msra.mxu1 %v12149_v1  ;;  %v709_v60 = vld [vmem:[%s18511_s1 + $0x14c8] sm:$0xff]  ;;  %v12037_v1 = vcombine.low %v717_v49, %v725_v51 }
  0xe2   :  { %6547 = vmatprep.subr.bf16.mxu1 %v12134_v6  ;;  %v957_v61 = vld [vmem:[%s18511_s1 + $0x1c88] sm:$0xff]  ;;  %v12022_v3 = vcombine.high %v701_v59, %v709_v60 }
  0xe3   :  { %6507 = vmatpush1.bf16.msra.mxu0 %v11877_v8  ;;  %v965_v0 = vld [vmem:[%s18511_s1 + $0x1cc8] sm:$0xff] }
  0xe4   :  { %6508 = vmatprep.subr.bf16.mxu0 %v12118_v11  ;;  %v685_v4 = vld [vmem:[%s18511_s1 + $0x1408] sm:$0xff]  ;;  %v12278_v7 = vcombine.high %v957_v61, %v965_v0  ;;  %v12277_v11 = vcombine.low %v957_v61, %v965_v0  ;;  %v94_v61 = vld [vmem:[%s18511_s1 + $0x190] sm:$0xff] }
  0xe5   :  { %6548 = vmatpush1.bf16.msra.mxu1 %v12133_v10  ;;  %v693_v5 = vld [vmem:[%s18511_s1 + $0x1448] sm:$0xff]  ;;  %v12021_v10 = vcombine.low %v701_v59, %v709_v60  ;;  %v350_v0 = vld [vmem:[%s18511_s1 + $0x990] sm:$0xff] }
  0xe6   :  { %6549 = vmatprep.subr.bf16.mxu1 %v12374_v16  ;;  %v941_v6 = vld [vmem:[%s18511_s1 + $0x1c08] sm:$0xff]  ;;  %v12006_v12 = vcombine.high %v685_v4, %v693_v5  ;;  %v414_v16 = vld [vmem:[%s18511_s1 + $0xb90] sm:$0xff] }
  0xe7   :  { %6509 = vmatpush2.bf16.msra.mxu0 %v12117_v18  ;;  %v949_v8 = vld [vmem:[%s18511_s1 + $0x1c48] sm:$0xff]  ;;  %v422_v18 = vld [vmem:[%s18511_s1 + $0xbd0] sm:$0xff] }
  0xe8   :  { %6510 = vmatprep.subr.bf16.mxu0 %v12102_v20  ;;  %v12262_v17 = vcombine.high %v941_v6, %v949_v8  ;;  %v12261_v20 = vcombine.low %v941_v6, %v949_v8  ;;  %v11736_v26 = vcombine.high %v414_v16, %v422_v18  ;;  %v86_v8 = vld [vmem:[%s18511_s1 + $0x150] sm:$0xff] }
  0xe9   :  { %6550 = vmatpush2.bf16.msra.mxu1 %v12373_v19  ;;  %v12005_v19 = vcombine.low %v685_v4, %v693_v5 }
  0xea   :  { %6551 = vmatprep.subr.bf16.mxu1 %v12358_v25  ;;  %v398_v25 = vld [vmem:[%s18511_s1 + $0xb10] sm:$0xff] }
  0xeb   :  { %6511 = vmatpush2.bf16.msra.mxu0 %v12101_v27  ;;  %v406_v27 = vld [vmem:[%s18511_s1 + $0xb50] sm:$0xff] }
  0xec   :  { %6512 = vmatprep.subr.bf16.mxu0 %v12086_v29  ;;  %v11735_v29 = vcombine.low %v414_v16, %v422_v18  ;;  %v11720_v36 = vcombine.high %v398_v25, %v406_v27  ;;  %v70_v18 = vld [vmem:[%s18511_s1 + $0xd0] sm:$0xff] }
  0xed   :  { %6552 = vmatpush2.bf16.msra.mxu1 %v12357_v28  ;;  %v11479_v28 = vcombine.low %v158_v14, %v166_v15 }
  0xee   :  { %6553 = vmatprep.subr.bf16.mxu1 %v12342_v35  ;;  %v382_v35 = vld [vmem:[%s18511_s1 + $0xa90] sm:$0xff] }
  0xef   :  { %6513 = vmatpush2.bf16.msra.mxu0 %v12085_v37  ;;  %v390_v37 = vld [vmem:[%s18511_s1 + $0xad0] sm:$0xff] }
  0xf0   :  { %6514 = vmatprep.subr.bf16.mxu0 %v12070_v38  ;;  %v11704_v51 = vcombine.high %v382_v35, %v390_v37  ;;  %v11703_v59 = vcombine.low %v382_v35, %v390_v37  ;;  %v294_v37 = vld [vmem:[%s18511_s1 + $0x7d0] sm:$0xff] }
  0xf1   :  { %6554 = vmatpush2.bf16.msra.mxu1 %v12341_v53 }
  0xf2   :  { %6555 = vmatprep.subr.bf16.mxu1 %v12326_v43  ;;  %v11719_v43 = vcombine.low %v398_v25, %v406_v27  ;;  %v54_v27 = vld [vmem:[%s18511_s1 + $0x50] sm:$0xff] }
  0xf3   :  { %6515 = vmatpush2.bf16.msra.mxu0 %v12069_v46  ;;  %v110_v46 = vld [vmem:[%s18511_s1 + $0x210] sm:$0xff] }
  0xf4   :  { %6516 = vmatprep.subr.bf16.mxu0 %v12054_v48  ;;  %v366_v48 = vld [vmem:[%s18511_s1 + $0xa10] sm:$0xff] }
  0xf5   :  { %6556 = vmatpush2.bf16.msra.mxu1 %v12325_v47  ;;  %v118_v47 = vld [vmem:[%s18511_s1 + $0x250] sm:$0xff]  ;;  %v11687_v5 = vcombine.low %v366_v48, %v374_v52 }
  0xf6   :  { %6557 = vmatprep.subr.bf16.mxu1 %v12310_v54  ;;  %v11432_v60 = vcombine.high %v110_v46, %v118_v47  ;;  %v11431_v4 = vcombine.low %v110_v46, %v118_v47  ;;  %v270_v46 = vld [vmem:[%s18511_s1 + $0x710] sm:$0xff] }
  0xf7   :  { %6517 = vmatpush2.bf16.msra.mxu0 %v12053_v56  ;;  %v278_v47 = vld [vmem:[%s18511_s1 + $0x750] sm:$0xff] }
  0xf8   :  { %6518 = vmatprep.subr.bf16.mxu0 %v12038_v58 }
  0xf9   :  { %6558 = vmatpush2.bf16.msra.mxu1 %v12309_v57  ;;  %v11447_v57 = vcombine.low %v126_v33, %v134_v34 }
  0xfa   :  { %6559 = vmatprep.subr.bf16.mxu1 %v12294_v62  ;;  %v102_v62 = vld [vmem:[%s18511_s1 + $0x1d0] sm:$0xff] }
  0xfb   :  { %6519 = vmatpush2.bf16.msra.mxu0 %v12037_v1  ;;  %v11416_v6 = vcombine.high %v94_v61, %v102_v62  ;;  %v11415_v14 = vcombine.low %v94_v61, %v102_v62  ;;  %v518_v61 = vld [vmem:[%s18511_s1 + $0xed0] sm:$0xff]  ;;  %v11591_v62 = vcombine.low %v270_v46, %v278_v47 }
  0xfc   :  { %6520 = vmatprep.subr.bf16.mxu0 %v12022_v3  ;;  %v358_v3 = vld [vmem:[%s18511_s1 + $0x9d0] sm:$0xff] }
  0xfd   :  { %6560 = vmatpush2.bf16.msra.mxu1 %v12293_v2  ;;  %v11688_v2 = vcombine.high %v366_v48, %v374_v52  ;;  %v11671_v15 = vcombine.low %v350_v0, %v358_v3  ;;  %v526_v48 = vld [vmem:[%s18511_s1 + $0xf10] sm:$0xff] }
  0xfe   :  { %6561 = vmatprep.subr.bf16.mxu1 %v12278_v7  ;;  %v78_v7 = vld [vmem:[%s18511_s1 + $0x110] sm:$0xff] }
  0xff   :  { %6521 = vmatpush2.bf16.msra.mxu0 %v12021_v10  ;;  %v334_v10 = vld [vmem:[%s18511_s1 + $0x910] sm:$0xff]  ;;  %v11400_v16 = vcombine.high %v78_v7, %v86_v8  ;;  %v11399_v22 = vcombine.low %v78_v7, %v86_v8 }
 0x100   :  { %6522 = vmatprep.subr.bf16.mxu0 %v12006_v12  ;;  %v342_v12 = vld [vmem:[%s18511_s1 + $0x950] sm:$0xff] }
 0x101   :  { %6562 = vmatpush2.bf16.msra.mxu1 %v12277_v11  ;;  %v11672_v11 = vcombine.high %v350_v0, %v358_v3  ;;  %v11655_v24 = vcombine.low %v334_v10, %v342_v12  ;;  %v246_v3 = vld [vmem:[%s18511_s1 + $0x650] sm:$0xff] }
 0x102   :  { %6563 = vmatprep.subr.bf16.mxu1 %v12262_v17  ;;  %v62_v17 = vld [vmem:[%s18511_s1 + $0x90] sm:$0xff] }
 0x103   :  { %6523 = vmatpush2.bf16.msra.mxu0 %v12005_v19  ;;  %v318_v19 = vld [vmem:[%s18511_s1 + $0x890] sm:$0xff]  ;;  %v11384_v25 = vcombine.high %v62_v17, %v70_v18  ;;  %v11383_v33 = vcombine.low %v62_v17, %v70_v18 }
 0x104   :  { %6574 = vmatprep.subr.bf16.mxu0 %v11480_v21  ;;  %v326_v21 = vld [vmem:[%s18511_s1 + $0x8d0] sm:$0xff] }
 0x105   :  { %6564 = vmatpush2.bf16.msra.mxu1 %v12261_v20  ;;  %v11656_v20 = vcombine.high %v334_v10, %v342_v12  ;;  %v11639_v34 = vcombine.low %v318_v19, %v326_v21  ;;  %v222_v12 = vld [vmem:[%s18511_s1 + $0x590] sm:$0xff] }
 0x106   :  { %6615 = vmatprep.subr.bf16.mxu1 %v11736_v26  ;;  %v6280_v53 = vpop.f32.mrf.mxu0  ;;  %6525 = vmatmul.mubr.bf16.vlgmr.msra.gmra.mxu0 %v13785_v32  ;;  %v46_v26 = vld [vmem:[%s18511_s1 + $0x10] sm:$0xff] }
 0x107   :  { %6575 = vmatpush1.bf16.msra.mxu0 %v11479_v28  ;;  %6606 = vmatprep.mubr.bf16.mxu0 %v13742_v9  ;;  %v302_v28 = vld [vmem:[%s18511_s1 + $0x810] sm:$0xff]  ;;  %v11368_v35 = vcombine.high %v46_v26, %v54_v27 }
 0x108   :  { %v6321_v38 = vpop.f32.mrf.mxu1  ;;  %6566 = vmatmul.mubr.bf16.vlgmr.msra.gmra.mxu1 %v14086_v50  ;;  %v6282_v42 = vpop.f32.mrf.mxu0  ;;  %6576 = vmatprep.subr.bf16.mxu0 %v11464_v63  ;;  %v310_v63 = vld [vmem:[%s18511_s1 + $0x850] sm:$0xff] }
 0x109   :  { %v14494_v41 = vadd.f32 %v6321_v38, %v6280_v53  ;;  %6616 = vmatpush1.bf16.msra.mxu1 %v11735_v29  ;;  %6647 = vmatprep.mubr.bf16.mxu1 %v13753_v13  ;;  %v11640_v29 = vcombine.high %v318_v19, %v326_v21  ;;  %v542_v53 = vld [vmem:[%s18511_s1 + $0xf90] sm:$0xff]  ;;  %v11624_v38 = vcombine.high %v302_v28, %v310_v63 }
 0x10a   :  { %v6323_v49 = vpop.f32.mrf.mxu1  ;;  %6617 = vmatprep.subr.bf16.mxu1 %v11720_v36  ;;  %v6284_v55 = vpop.f32.mrf.mxu0  ;;  %v286_v36 = vld [vmem:[%s18511_s1 + $0x790] sm:$0xff] }
 0x10b   :  { %v14509_v54 = vadd.f32 %v6323_v49, %v6282_v42  ;;  %6577 = vmatpush1.bf16.msra.mxu0 %v11463_v39  ;;  %v550_v39 = vld [vmem:[%s18511_s1 + $0xfd0] sm:$0xff]  ;;  %v11367_v42 = vcombine.low %v46_v26, %v54_v27  ;;  %v11607_v52 = vcombine.low %v286_v36, %v294_v37 }
 0x10c   :  { %v6325_v56 = vpop.f32.mrf.mxu1  ;;  %v6285_v58 = vpop.f32.mrf.mxu0  ;;  %6578 = vmatprep.subr.bf16.mxu0 %v11448_v45  ;;  %v11608_v45 = vcombine.high %v286_v36, %v294_v37  ;;  %v11864_v49 = vcombine.high %v542_v53, %v550_v39  ;;  %v11863_v55 = vcombine.low %v542_v53, %v550_v39 }
 0x10d   :  { %6618 = vmatpush1.bf16.msra.mxu1 %v11719_v43  ;;  %v11623_v43 = vcombine.low %v302_v28, %v310_v63  ;;  %v11592_v56 = vcombine.high %v270_v46, %v278_v47  ;;  %v262_v58 = vld [vmem:[%s18511_s1 + $0x6d0] sm:$0xff] }
 0x10e   :  { %v6326_v1 = vpop.f32.mrf.mxu1  ;;  %6619 = vmatprep.subr.bf16.mxu1 %v11704_v51  ;;  %v534_v51 = vld [vmem:[%s18511_s1 + $0xf50] sm:$0xff] }
 0x10f   :  { %6579 = vmatpush1.bf16.msra.mxu0 %v11447_v57  ;;  %v254_v57 = vld [vmem:[%s18511_s1 + $0x690] sm:$0xff]  ;;  %v11847_v0 = vcombine.low %v526_v48, %v534_v51 }
 0x110   :  { %6580 = vmatprep.subr.bf16.mxu0 %v11432_v60  ;;  %v11848_v60 = vcombine.high %v526_v48, %v534_v51  ;;  %v11576_v1 = vcombine.high %v254_v57, %v262_v58  ;;  %v11575_v7 = vcombine.low %v254_v57, %v262_v58 }
 0x111   :  { %6620 = vmatpush1.bf16.msra.mxu1 %v11703_v59  ;;  %v510_v59 = vld [vmem:[%s18511_s1 + $0xe90] sm:$0xff] }
 0x112   :  { %6621 = vmatprep.subr.bf16.mxu1 %v11688_v2  ;;  %v238_v2 = vld [vmem:[%s18511_s1 + $0x610] sm:$0xff]  ;;  %v11831_v8 = vcombine.low %v510_v59, %v518_v61 }
 0x113   :  { %6581 = vmatpush1.bf16.msra.mxu0 %v11431_v4  ;;  %v494_v4 = vld [vmem:[%s18511_s1 + $0xe10] sm:$0xff]  ;;  %v11560_v10 = vcombine.high %v238_v2, %v246_v3 }
 0x114   :  { %6582 = vmatprep.subr.bf16.mxu0 %v11416_v6  ;;  %v502_v6 = vld [vmem:[%s18511_s1 + $0xe50] sm:$0xff] }
 0x115   :  { %6622 = vmatpush1.bf16.msra.mxu1 %v11687_v5  ;;  %v11832_v5 = vcombine.high %v510_v59, %v518_v61 }
 0x116   :  { %6623 = vmatprep.subr.bf16.mxu1 %v11672_v11  ;;  %v11816_v11 = vcombine.high %v494_v4, %v502_v6 }
 0x117   :  { %6583 = vmatpush1.bf16.msra.mxu0 %v11415_v14  ;;  %v230_v14 = vld [vmem:[%s18511_s1 + $0x5d0] sm:$0xff] }
 0x118   :  { %6584 = vmatprep.subr.bf16.mxu0 %v11400_v16 }
 0x119   :  { %6624 = vmatpush1.bf16.msra.mxu1 %v11671_v15 }
 0x11a   :  { %6625 = vmatprep.subr.bf16.mxu1 %v11656_v20 }
 0x11b   :  { %6585 = vmatpush1.bf16.msra.mxu0 %v11399_v22 }
 0x11c   :  { %6586 = vmatprep.subr.bf16.mxu0 %v11384_v25 }
 0x11d   :  { %6626 = vmatpush1.bf16.msra.mxu1 %v11655_v24 }
 0x11e   :  { %6627 = vmatprep.subr.bf16.mxu1 %v11640_v29 }
 0x11f   :  { %6587 = vmatpush1.bf16.msra.mxu0 %v11383_v33 }
 0x120   :  { %6588 = vmatprep.subr.bf16.mxu0 %v11368_v35 }
 0x121   :  { %6628 = vmatpush1.bf16.msra.mxu1 %v11639_v34 }
 0x122   :  { %6629 = vmatprep.subr.bf16.mxu1 %v11624_v38 }
 0x123   :  { %6589 = vmatpush1.bf16.msra.mxu0 %v11367_v42 }
 0x124   :  { %6590 = vmatprep.subr.bf16.mxu0 %v11608_v45 }
 0x125   :  { %6630 = vmatpush1.bf16.msra.mxu1 %v11623_v43 }
 0x126   :  { %6631 = vmatprep.subr.bf16.mxu1 %v11864_v49 }
 0x127   :  { %6591 = vmatpush2.bf16.msra.mxu0 %v11607_v52 }
 0x128   :  { %6592 = vmatprep.subr.bf16.mxu0 %v11592_v56 }
 0x129   :  { %6632 = vmatpush2.bf16.msra.mxu1 %v11863_v55 }
 0x12a   :  { %6633 = vmatprep.subr.bf16.mxu1 %v11848_v60 }
 0x12b   :  { %6593 = vmatpush2.bf16.msra.mxu0 %v11591_v62 }
 0x12c   :  { %6594 = vmatprep.subr.bf16.mxu0 %v11576_v1 }
 0x12d   :  { %6634 = vmatpush2.bf16.msra.mxu1 %v11847_v0 }
 0x12e   :  { %6635 = vmatprep.subr.bf16.mxu1 %v11832_v5 }
 0x12f   :  { %17 = vsyncpa [#allocation3], 0  ;;  %v478_v15 = vld [vmem:[%s18511_s1 + $0xd90] sm:$0xff]  ;;  %6595 = vmatpush2.bf16.msra.mxu0 %v11575_v7  ;;  %v11559_v17 = vcombine.low %v238_v2, %v246_v3  ;;  %v11815_v18 = vcombine.low %v494_v4, %v502_v6  ;;  %v11544_v19 = vcombine.high %v222_v12, %v230_v14  ;;  %v11543_v26 = vcombine.low %v222_v12, %v230_v14 }
 0x130   :  { %v486_v16 = vld [vmem:[%s18511_s1 + $0xdd0] sm:$0xff]  ;;  %6596 = vmatprep.subr.bf16.mxu0 %v11560_v10 }
 0x131   :  { %6636 = vmatpush2.bf16.msra.mxu1 %v11831_v8  ;;  %v11800_v20 = vcombine.high %v478_v15, %v486_v16  ;;  %v206_v21 = vld [vmem:[%s18511_s1 + $0x510] sm:$0xff]  ;;  %v11799_v27 = vcombine.low %v478_v15, %v486_v16 }
 0x132   :  { %6637 = vmatprep.subr.bf16.mxu1 %v11816_v11  ;;  %v214_v22 = vld [vmem:[%s18511_s1 + $0x550] sm:$0xff] }
 0x133   :  { %v462_v24 = vld [vmem:[%s18511_s1 + $0xd10] sm:$0xff]  ;;  %6597 = vmatpush2.bf16.msra.mxu0 %v11559_v17  ;;  %v11528_v28 = vcombine.high %v206_v21, %v214_v22  ;;  %v11527_v36 = vcombine.low %v206_v21, %v214_v22 }
 0x134   :  { %v470_v25 = vld [vmem:[%s18511_s1 + $0xd50] sm:$0xff]  ;;  %6598 = vmatprep.subr.bf16.mxu0 %v11544_v19 }
 0x135   :  { %6638 = vmatpush2.bf16.msra.mxu1 %v11815_v18  ;;  %v11784_v29 = vcombine.high %v462_v24, %v470_v25  ;;  %v190_v63 = vld [vmem:[%s18511_s1 + $0x490] sm:$0xff]  ;;  %v11783_v37 = vcombine.low %v462_v24, %v470_v25 }
 0x136   :  { %6639 = vmatprep.subr.bf16.mxu1 %v11800_v20  ;;  %v198_v33 = vld [vmem:[%s18511_s1 + $0x4d0] sm:$0xff] }
 0x137   :  { %v446_v34 = vld [vmem:[%s18511_s1 + $0xc90] sm:$0xff]  ;;  %6599 = vmatpush2.bf16.msra.mxu0 %v11543_v26  ;;  %v11512_v53 = vcombine.high %v190_v63, %v198_v33  ;;  %v11511_v46 = vcombine.low %v190_v63, %v198_v33 }
 0x138   :  { %v454_v35 = vld [vmem:[%s18511_s1 + $0xcd0] sm:$0xff]  ;;  %6600 = vmatprep.subr.bf16.mxu0 %v11528_v28 }
 0x139   :  { %6640 = vmatpush2.bf16.msra.mxu1 %v11799_v27  ;;  %v11768_v38 = vcombine.high %v446_v34, %v454_v35  ;;  %v174_v39 = vld [vmem:[%s18511_s1 + $0x410] sm:$0xff]  ;;  %v11767_v47 = vcombine.low %v446_v34, %v454_v35 }
 0x13a   :  { %6641 = vmatprep.subr.bf16.mxu1 %v11784_v29  ;;  %v182_v42 = vld [vmem:[%s18511_s1 + $0x450] sm:$0xff] }
 0x13b   :  { %v430_v43 = vld [vmem:[%s18511_s1 + $0xc10] sm:$0xff]  ;;  %6601 = vmatpush2.bf16.msra.mxu0 %v11527_v36  ;;  %v11496_v48 = vcombine.high %v174_v39, %v182_v42  ;;  %v11495_v57 = vcombine.low %v174_v39, %v182_v42 }
 0x13c   :  { %v438_v45 = vld [vmem:[%s18511_s1 + $0xc50] sm:$0xff]  ;;  %6602 = vmatprep.subr.bf16.mxu0 %v11512_v53 }
 0x13d   :  { %6642 = vmatpush2.bf16.msra.mxu1 %v11783_v37  ;;  %v11752_v49 = vcombine.high %v430_v43, %v438_v45  ;;  %v670_v51 = vld [vmem:[%s18511_s1 + $0x1390] sm:$0xff]  ;;  %v11751_v58 = vcombine.low %v430_v43, %v438_v45 }
 0x13e   :  { %6643 = vmatprep.subr.bf16.mxu1 %v11768_v38  ;;  %v678_v52 = vld [vmem:[%s18511_s1 + $0x13d0] sm:$0xff] }
 0x13f   :  { %v926_v55 = vld [vmem:[%s18511_s1 + $0x1b90] sm:$0xff]  ;;  %6603 = vmatpush2.bf16.msra.mxu0 %v11511_v46  ;;  %v11992_v59 = vcombine.high %v670_v51, %v678_v52  ;;  %v11991_v2 = vcombine.low %v670_v51, %v678_v52 }
 0x140   :  { %v934_v56 = vld [vmem:[%s18511_s1 + $0x1bd0] sm:$0xff]  ;;  %6604 = vmatprep.subr.bf16.mxu0 %v11496_v48 }
 0x141   :  { %6644 = vmatpush2.bf16.msra.mxu1 %v11767_v47  ;;  %v12248_v60 = vcombine.high %v926_v55, %v934_v56  ;;  %v654_v61 = vld [vmem:[%s18511_s1 + $0x1310] sm:$0xff]  ;;  %v12247_v3 = vcombine.low %v926_v55, %v934_v56 }
 0x142   :  { %6645 = vmatprep.subr.bf16.mxu1 %v11752_v49  ;;  %v662_v62 = vld [vmem:[%s18511_s1 + $0x1350] sm:$0xff] }
 0x143   :  { %v910_v0 = vld [vmem:[%s18511_s1 + $0x1b10] sm:$0xff]  ;;  %6605 = vmatpush2.bf16.msra.mxu0 %v11495_v57  ;;  %v11976_v4 = vcombine.high %v654_v61, %v662_v62  ;;  %v11975_v15 = vcombine.low %v654_v61, %v662_v62 }
 0x144   :  { %v918_v1 = vld [vmem:[%s18511_s1 + $0x1b50] sm:$0xff]  ;;  %6656 = vmatprep.subr.bf16.mxu0 %v11992_v59 }
 0x145   :  { %6646 = vmatpush2.bf16.msra.mxu1 %v11751_v58  ;;  %v12232_v5 = vcombine.high %v910_v0, %v918_v1  ;;  %v638_v6 = vld [vmem:[%s18511_s1 + $0x1290] sm:$0xff]  ;;  %v12231_v17 = vcombine.low %v910_v0, %v918_v1 }
 0x146   :  { %6697 = vmatprep.subr.bf16.mxu1 %v12248_v60  ;;  %v646_v7 = vld [vmem:[%s18511_s1 + $0x12d0] sm:$0xff]  ;;  %v6362_v8 = vpop.f32.mrf.mxu0  ;;  %6607 = vmatmul.mubr.bf16.vlgmr.msra.gmra.mxu0 %v13863_v23 }
 0x147   :  { %v894_v10 = vld [vmem:[%s18511_s1 + $0x1a90] sm:$0xff]  ;;  %v6363_v12 = vadd.f32 %v6362_v8, %v14494_v41  ;;  %6657 = vmatpush1.bf16.msra.mxu0 %v11991_v2  ;;  %v11960_v18 = vcombine.high %v638_v6, %v646_v7  ;;  %6688 = vmatprep.mubr.bf16.mxu0 %v13878_v30  ;;  %v11959_v29 = vcombine.low %v638_v6, %v646_v7 }
 0x148   :  { %v902_v11 = vld [vmem:[%s18511_s1 + $0x1ad0] sm:$0xff]  ;;  %v6403_v14 = vpop.f32.mrf.mxu1  ;;  %6648 = vmatmul.mubr.bf16.vlgmr.msra.gmra.mxu1 %v13882_v31  ;;  %v6364_v16 = vpop.f32.mrf.mxu0  ;;  %6658 = vmatprep.subr.bf16.mxu0 %v11976_v4 }
 0x149   :  { %6698 = vmatpush1.bf16.msra.mxu1 %v12247_v3  ;;  %v14695_v19 = vadd.f32 %v6403_v14, %v6363_v12  ;;  %v6365_v20 = vadd.f32 %v6364_v16, %v14509_v54  ;;  %v12216_v22 = vcombine.high %v894_v10, %v902_v11  ;;  %v622_v41 = vld [vmem:[%s18511_s1 + $0x1210] sm:$0xff]  ;;  %6729 = vmatprep.mubr.bf16.mxu1 %v13899_v40 }
 0x14a   :  { %v6405_v21 = vpop.f32.mrf.mxu1  ;;  %6699 = vmatprep.subr.bf16.mxu1 %v12232_v5  ;;  %v630_v24 = vld [vmem:[%s18511_s1 + $0x1250] sm:$0xff]  ;;  %v6366_v25 = vpop.f32.mrf.mxu0  ;;  %v12215_v33 = vcombine.low %v894_v10, %v902_v11 }
 0x14b   :  { %v878_v26 = vld [vmem:[%s18511_s1 + $0x1a10] sm:$0xff]  ;;  %v14712_v27 = vadd.f32 %v6405_v21, %v6365_v20  ;;  %6659 = vmatpush1.bf16.msra.mxu0 %v11975_v15  ;;  %v11944_v34 = vcombine.high %v622_v41, %v630_v24  ;;  %v11943_v42 = vcombine.low %v622_v41, %v630_v24 }
 0x14c   :  { %v886_v54 = vld [vmem:[%s18511_s1 + $0x1a50] sm:$0xff]  ;;  %v6407_v28 = vpop.f32.mrf.mxu1  ;;  %v6367_v63 = vpop.f32.mrf.mxu0  ;;  %6660 = vmatprep.subr.bf16.mxu0 %v11960_v18 }
 0x14d   :  { %6700 = vmatpush1.bf16.msra.mxu1 %v12231_v17  ;;  %v12200_v36 = vcombine.high %v878_v26, %v886_v54  ;;  %v606_v37 = vld [vmem:[%s18511_s1 + $0x1190] sm:$0xff]  ;;  %v12199_v43 = vcombine.low %v878_v26, %v886_v54 }
 0x14e   :  { %v6408_v35 = vpop.f32.mrf.mxu1  ;;  %6701 = vmatprep.subr.bf16.mxu1 %v12216_v22  ;;  %v614_v53 = vld [vmem:[%s18511_s1 + $0x11d0] sm:$0xff] }
 0x14f   :  { %v862_v38 = vld [vmem:[%s18511_s1 + $0x1990] sm:$0xff]  ;;  %6661 = vmatpush1.bf16.msra.mxu0 %v11959_v29  ;;  %v11928_v45 = vcombine.high %v606_v37, %v614_v53  ;;  %v11927_v52 = vcombine.low %v606_v37, %v614_v53 }
 0x150   :  { %v870_v39 = vld [vmem:[%s18511_s1 + $0x19d0] sm:$0xff]  ;;  %6662 = vmatprep.subr.bf16.mxu0 %v11944_v34 }
 0x151   :  { %6702 = vmatpush1.bf16.msra.mxu1 %v12215_v33  ;;  %v12184_v46 = vcombine.high %v862_v38, %v870_v39  ;;  %v590_v47 = vld [vmem:[%s18511_s1 + $0x1110] sm:$0xff]  ;;  %v12183_v55 = vcombine.low %v862_v38, %v870_v39 }
 0x152   :  { %6703 = vmatprep.subr.bf16.mxu1 %v12200_v36  ;;  %v598_v48 = vld [vmem:[%s18511_s1 + $0x1150] sm:$0xff] }
 0x153   :  { %v846_v49 = vld [vmem:[%s18511_s1 + $0x1910] sm:$0xff]  ;;  %6663 = vmatpush1.bf16.msra.mxu0 %v11943_v42  ;;  %v11912_v56 = vcombine.high %v590_v47, %v598_v48  ;;  %v11911_v62 = vcombine.low %v590_v47, %v598_v48 }
 0x154   :  { %v854_v51 = vld [vmem:[%s18511_s1 + $0x1950] sm:$0xff]  ;;  %6664 = vmatprep.subr.bf16.mxu0 %v11928_v45 }
 0x155   :  { %6704 = vmatpush1.bf16.msra.mxu1 %v12199_v43  ;;  %v12168_v57 = vcombine.high %v846_v49, %v854_v51  ;;  %v574_v58 = vld [vmem:[%s18511_s1 + $0x1090] sm:$0xff]  ;;  %v12167_v0 = vcombine.low %v846_v49, %v854_v51 }
 0x156   :  { %6705 = vmatprep.subr.bf16.mxu1 %v12184_v46  ;;  %v582_v59 = vld [vmem:[%s18511_s1 + $0x10d0] sm:$0xff] }
 0x157   :  { %v830_v60 = vld [vmem:[%s18511_s1 + $0x1890] sm:$0xff]  ;;  %6665 = vmatpush1.bf16.msra.mxu0 %v11927_v52  ;;  %v11896_v1 = vcombine.high %v574_v58, %v582_v59  ;;  %v11895_v7 = vcombine.low %v574_v58, %v582_v59 }
 0x158   :  { %v838_v61 = vld [vmem:[%s18511_s1 + $0x18d0] sm:$0xff]  ;;  %6666 = vmatprep.subr.bf16.mxu0 %v11912_v56 }
 0x159   :  { %6706 = vmatpush1.bf16.msra.mxu1 %v12183_v55  ;;  %v12152_v2 = vcombine.high %v830_v60, %v838_v61  ;;  %v558_v3 = vld [vmem:[%s18511_s1 + $0x1010] sm:$0xff]  ;;  %v12151_v8 = vcombine.low %v830_v60, %v838_v61 }
 0x15a   :  { %6707 = vmatprep.subr.bf16.mxu1 %v12168_v57  ;;  %v566_v4 = vld [vmem:[%s18511_s1 + $0x1050] sm:$0xff] }
 0x15b   :  { %v814_v5 = vld [vmem:[%s18511_s1 + $0x1810] sm:$0xff]  ;;  %6667 = vmatpush1.bf16.msra.mxu0 %v11911_v62  ;;  %v11880_v10 = vcombine.high %v558_v3, %v566_v4  ;;  %v11879_v17 = vcombine.low %v558_v3, %v566_v4 }
 0x15c   :  { %v822_v6 = vld [vmem:[%s18511_s1 + $0x1850] sm:$0xff]  ;;  %6668 = vmatprep.subr.bf16.mxu0 %v11896_v1 }
 0x15d   :  { %6708 = vmatpush1.bf16.msra.mxu1 %v12167_v0  ;;  %v12136_v11 = vcombine.high %v814_v5, %v822_v6  ;;  %v798_v12 = vld [vmem:[%s18511_s1 + $0x1790] sm:$0xff]  ;;  %v12135_v18 = vcombine.low %v814_v5, %v822_v6 }
 0x15e   :  { %6709 = vmatprep.subr.bf16.mxu1 %v12152_v2  ;;  %v806_v14 = vld [vmem:[%s18511_s1 + $0x17d0] sm:$0xff] }
 0x15f   :  { %v1054_v15 = vld [vmem:[%s18511_s1 + $0x1f90] sm:$0xff]  ;;  %6669 = vmatpush1.bf16.msra.mxu0 %v11895_v7  ;;  %v12120_v20 = vcombine.high %v798_v12, %v806_v14  ;;  %v12119_v26 = vcombine.low %v798_v12, %v806_v14 }
 0x160   :  { %v1062_v16 = vld [vmem:[%s18511_s1 + $0x1fd0] sm:$0xff]  ;;  %6670 = vmatprep.subr.bf16.mxu0 %v11880_v10 }
 0x161   :  { %6710 = vmatpush1.bf16.msra.mxu1 %v12151_v8  ;;  %v12376_v21 = vcombine.high %v1054_v15, %v1062_v16  ;;  %v782_v22 = vld [vmem:[%s18511_s1 + $0x1710] sm:$0xff]  ;;  %v12375_v54 = vcombine.low %v1054_v15, %v1062_v16 }
 0x162   :  { %6711 = vmatprep.subr.bf16.mxu1 %v12136_v11  ;;  %v790_v41 = vld [vmem:[%s18511_s1 + $0x1750] sm:$0xff] }
 0x163   :  { %v1038_v24 = vld [vmem:[%s18511_s1 + $0x1f10] sm:$0xff]  ;;  %6671 = vmatpush1.bf16.msra.mxu0 %v11879_v17  ;;  %v12104_v28 = vcombine.high %v782_v22, %v790_v41  ;;  %v12103_v36 = vcombine.low %v782_v22, %v790_v41 }
 0x164   :  { %v1046_v25 = vld [vmem:[%s18511_s1 + $0x1f50] sm:$0xff]  ;;  %6672 = vmatprep.subr.bf16.mxu0 %v12120_v20 }
 0x165   :  { %6712 = vmatpush1.bf16.msra.mxu1 %v12135_v18  ;;  %v12360_v29 = vcombine.high %v1038_v24, %v1046_v25  ;;  %v766_v63 = vld [vmem:[%s18511_s1 + $0x1690] sm:$0xff]  ;;  %v12359_v37 = vcombine.low %v1038_v24, %v1046_v25  ;;  %v159_v25 = vld [vmem:[%s18511_s1 + $0x398] sm:$0xff] }
 0x166   :  { %6713 = vmatprep.subr.bf16.mxu1 %v12376_v21  ;;  %v774_v33 = vld [vmem:[%s18511_s1 + $0x16d0] sm:$0xff] }
 0x167   :  { %v1022_v34 = vld [vmem:[%s18511_s1 + $0x1e90] sm:$0xff]  ;;  %6673 = vmatpush2.bf16.msra.mxu0 %v12119_v26  ;;  %v12088_v53 = vcombine.high %v766_v63, %v774_v33  ;;  %v12087_v46 = vcombine.low %v766_v63, %v774_v33  ;;  %v167_v26 = vld [vmem:[%s18511_s1 + $0x3d8] sm:$0xff] }
 0x168   :  { %v1030_v35 = vld [vmem:[%s18511_s1 + $0x1ed0] sm:$0xff]  ;;  %6674 = vmatprep.subr.bf16.mxu0 %v12104_v28  ;;  %v423_v28 = vld [vmem:[%s18511_s1 + $0xbd8] sm:$0xff]  ;;  %v11482_v33 = vcombine.high %v159_v25, %v167_v26 }
 0x169   :  { %6714 = vmatpush2.bf16.msra.mxu1 %v12375_v54  ;;  %v12344_v38 = vcombine.high %v1022_v34, %v1030_v35  ;;  %v750_v39 = vld [vmem:[%s18511_s1 + $0x1610] sm:$0xff]  ;;  %v12343_v47 = vcombine.low %v1022_v34, %v1030_v35  ;;  %v415_v54 = vld [vmem:[%s18511_s1 + $0xb98] sm:$0xff] }
 0x16a   :  { %6715 = vmatprep.subr.bf16.mxu1 %v12360_v29  ;;  %v758_v42 = vld [vmem:[%s18511_s1 + $0x1650] sm:$0xff]  ;;  %v11738_v34 = vcombine.high %v415_v54, %v423_v28  ;;  %v143_v35 = vld [vmem:[%s18511_s1 + $0x318] sm:$0xff] }
 0x16b   :  { %v1006_v43 = vld [vmem:[%s18511_s1 + $0x1e10] sm:$0xff]  ;;  %6675 = vmatpush2.bf16.msra.mxu0 %v12103_v36  ;;  %v12072_v48 = vcombine.high %v750_v39, %v758_v42  ;;  %v12071_v57 = vcombine.low %v750_v39, %v758_v42  ;;  %v151_v36 = vld [vmem:[%s18511_s1 + $0x358] sm:$0xff]  ;;  %v11737_v39 = vcombine.low %v415_v54, %v423_v28 }
 0x16c   :  { %v1014_v45 = vld [vmem:[%s18511_s1 + $0x1e50] sm:$0xff]  ;;  %6676 = vmatprep.subr.bf16.mxu0 %v12088_v53  ;;  %v407_v53 = vld [vmem:[%s18511_s1 + $0xb58] sm:$0xff]  ;;  %v11466_v42 = vcombine.high %v143_v35, %v151_v36 }
 0x16d   :  { %6716 = vmatpush2.bf16.msra.mxu1 %v12359_v37  ;;  %v12328_v49 = vcombine.high %v1006_v43, %v1014_v45  ;;  %v734_v51 = vld [vmem:[%s18511_s1 + $0x1590] sm:$0xff]  ;;  %v12327_v58 = vcombine.low %v1006_v43, %v1014_v45  ;;  %v399_v37 = vld [vmem:[%s18511_s1 + $0xb18] sm:$0xff] }
 0x16e   :  { %6717 = vmatprep.subr.bf16.mxu1 %v12344_v38  ;;  %v742_v52 = vld [vmem:[%s18511_s1 + $0x15d0] sm:$0xff]  ;;  %v11481_v38 = vcombine.low %v159_v25, %v167_v26  ;;  %v11722_v43 = vcombine.high %v399_v37, %v407_v53  ;;  %v127_v45 = vld [vmem:[%s18511_s1 + $0x298] sm:$0xff] }
 0x16f   :  { %v990_v55 = vld [vmem:[%s18511_s1 + $0x1d90] sm:$0xff]  ;;  %6677 = vmatpush2.bf16.msra.mxu0 %v12087_v46  ;;  %v12056_v59 = vcombine.high %v734_v51, %v742_v52  ;;  %v12055_v2 = vcombine.low %v734_v51, %v742_v52  ;;  %v135_v46 = vld [vmem:[%s18511_s1 + $0x2d8] sm:$0xff]  ;;  %v11465_v52 = vcombine.low %v143_v35, %v151_v36 }
 0x170   :  { %v998_v56 = vld [vmem:[%s18511_s1 + $0x1dd0] sm:$0xff]  ;;  %6678 = vmatprep.subr.bf16.mxu0 %v12072_v48  ;;  %v383_v48 = vld [vmem:[%s18511_s1 + $0xa98] sm:$0xff] }
 0x171   :  { %6718 = vmatpush2.bf16.msra.mxu1 %v12343_v47  ;;  %v12312_v60 = vcombine.high %v990_v55, %v998_v56  ;;  %v718_v61 = vld [vmem:[%s18511_s1 + $0x1510] sm:$0xff]  ;;  %v12311_v3 = vcombine.low %v990_v55, %v998_v56  ;;  %v343_v25 = vld [vmem:[%s18511_s1 + $0x958] sm:$0xff] }
 0x172   :  { %6719 = vmatprep.subr.bf16.mxu1 %v12328_v49  ;;  %v726_v62 = vld [vmem:[%s18511_s1 + $0x1550] sm:$0xff]  ;;  %v391_v49 = vld [vmem:[%s18511_s1 + $0xad8] sm:$0xff] }
 0x173   :  { %v974_v0 = vld [vmem:[%s18511_s1 + $0x1d10] sm:$0xff]  ;;  %6679 = vmatpush2.bf16.msra.mxu0 %v12071_v57  ;;  %v12040_v4 = vcombine.high %v718_v61, %v726_v62  ;;  %v12039_v11 = vcombine.low %v718_v61, %v726_v62  ;;  %v11721_v57 = vcombine.low %v399_v37, %v407_v53  ;;  %v111_v61 = vld [vmem:[%s18511_s1 + $0x218] sm:$0xff] }
 0x174   :  { %v982_v1 = vld [vmem:[%s18511_s1 + $0x1d50] sm:$0xff]  ;;  %6680 = vmatprep.subr.bf16.mxu0 %v12056_v59  ;;  %v119_v62 = vld [vmem:[%s18511_s1 + $0x258] sm:$0xff] }
 0x175   :  { %6720 = vmatpush2.bf16.msra.mxu1 %v12327_v58  ;;  %v12296_v5 = vcombine.high %v974_v0, %v982_v1  ;;  %v702_v6 = vld [vmem:[%s18511_s1 + $0x1490] sm:$0xff]  ;;  %v12295_v12 = vcombine.low %v974_v0, %v982_v1  ;;  %v11450_v58 = vcombine.high %v127_v45, %v135_v46  ;;  %v327_v35 = vld [vmem:[%s18511_s1 + $0x8d8] sm:$0xff] }
 0x176   :  { %6721 = vmatprep.subr.bf16.mxu1 %v12312_v60  ;;  %v710_v7 = vld [vmem:[%s18511_s1 + $0x14d0] sm:$0xff]  ;;  %v11706_v60 = vcombine.high %v383_v48, %v391_v49 }
 0x177   :  { %v958_v8 = vld [vmem:[%s18511_s1 + $0x1c90] sm:$0xff]  ;;  %6681 = vmatpush2.bf16.msra.mxu0 %v12055_v2  ;;  %v12024_v14 = vcombine.high %v702_v6, %v710_v7  ;;  %v12023_v21 = vcombine.low %v702_v6, %v710_v7  ;;  %v367_v2 = vld [vmem:[%s18511_s1 + $0xa18] sm:$0xff]  ;;  %v11705_v7 = vcombine.low %v383_v48, %v391_v49 }
 0x178   :  { %v966_v10 = vld [vmem:[%s18511_s1 + $0x1cd0] sm:$0xff]  ;;  %6682 = vmatprep.subr.bf16.mxu0 %v12040_v4 }
 0x179   :  { %6722 = vmatpush2.bf16.msra.mxu1 %v12311_v3  ;;  %v12280_v15 = vcombine.high %v958_v8, %v966_v10  ;;  %v686_v16 = vld [vmem:[%s18511_s1 + $0x1410] sm:$0xff]  ;;  %v12279_v22 = vcombine.low %v958_v8, %v966_v10  ;;  %v375_v3 = vld [vmem:[%s18511_s1 + $0xa58] sm:$0xff]  ;;  %v11434_v8 = vcombine.high %v111_v61, %v119_v62 }
 0x17a   :  { %6723 = vmatprep.subr.bf16.mxu1 %v12296_v5  ;;  %v694_v17 = vld [vmem:[%s18511_s1 + $0x1450] sm:$0xff]  ;;  %v11449_v5 = vcombine.low %v127_v45, %v135_v46  ;;  %v311_v45 = vld [vmem:[%s18511_s1 + $0x858] sm:$0xff] }
 0x17b   :  { %v942_v18 = vld [vmem:[%s18511_s1 + $0x1c10] sm:$0xff]  ;;  %6683 = vmatpush2.bf16.msra.mxu0 %v12039_v11  ;;  %v12008_v41 = vcombine.high %v686_v16, %v694_v17  ;;  %v12007_v29 = vcombine.low %v686_v16, %v694_v17  ;;  %v11690_v11 = vcombine.high %v367_v2, %v375_v3  ;;  %v359_v16 = vld [vmem:[%s18511_s1 + $0x9d8] sm:$0xff]  ;;  %v11433_v17 = vcombine.low %v111_v61, %v119_v62 }
 0x17c   :  { %v950_v20 = vld [vmem:[%s18511_s1 + $0x1c50] sm:$0xff]  ;;  %6684 = vmatprep.subr.bf16.mxu0 %v12024_v14  ;;  %v103_v14 = vld [vmem:[%s18511_s1 + $0x1d8] sm:$0xff] }
 0x17d   :  { %6724 = vmatpush2.bf16.msra.mxu1 %v12295_v12  ;;  %v12264_v24 = vcombine.high %v942_v18, %v950_v20  ;;  %v12263_v63 = vcombine.low %v942_v18, %v950_v20  ;;  %v95_v12 = vld [vmem:[%s18511_s1 + $0x198] sm:$0xff]  ;;  %v11689_v18 = vcombine.low %v367_v2, %v375_v3 }
 0x17e   :  { %6725 = vmatprep.subr.bf16.mxu1 %v12280_v15  ;;  %v351_v15 = vld [vmem:[%s18511_s1 + $0x998] sm:$0xff]  ;;  %v11418_v20 = vcombine.high %v95_v12, %v103_v14  ;;  %v11417_v26 = vcombine.low %v95_v12, %v103_v14 }
 0x17f   :  { %6685 = vmatpush2.bf16.msra.mxu0 %v12023_v21  ;;  %v11674_v21 = vcombine.high %v351_v15, %v359_v16  ;;  %v11673_v54 = vcombine.low %v351_v15, %v359_v16  ;;  %v271_v62 = vld [vmem:[%s18511_s1 + $0x718] sm:$0xff] }
 0x180   :  { %6686 = vmatprep.subr.bf16.mxu0 %v12008_v41  ;;  %v87_v41 = vld [vmem:[%s18511_s1 + $0x158] sm:$0xff] }
 0x181   :  { %6726 = vmatpush2.bf16.msra.mxu1 %v12279_v22  ;;  %v79_v22 = vld [vmem:[%s18511_s1 + $0x118] sm:$0xff] }
 0x182   :  { %6727 = vmatprep.subr.bf16.mxu1 %v12264_v24  ;;  %v335_v24 = vld [vmem:[%s18511_s1 + $0x918] sm:$0xff]  ;;  %v11402_v28 = vcombine.high %v79_v22, %v87_v41  ;;  %v11401_v36 = vcombine.low %v79_v22, %v87_v41 }
 0x183   :  { %6687 = vmatpush2.bf16.msra.mxu0 %v12007_v29  ;;  %v11658_v29 = vcombine.high %v335_v24, %v343_v25  ;;  %v11657_v37 = vcombine.low %v335_v24, %v343_v25  ;;  %v527_v2 = vld [vmem:[%s18511_s1 + $0xf18] sm:$0xff] }
 0x184   :  { %6738 = vmatprep.subr.bf16.mxu0 %v11482_v33  ;;  %v71_v33 = vld [vmem:[%s18511_s1 + $0xd8] sm:$0xff] }
 0x185   :  { %6728 = vmatpush2.bf16.msra.mxu1 %v12263_v63  ;;  %v63_v63 = vld [vmem:[%s18511_s1 + $0x98] sm:$0xff] }
 0x186   :  { %6779 = vmatprep.subr.bf16.mxu1 %v11738_v34  ;;  %v6444_v47 = vpop.f32.mrf.mxu0  ;;  %6689 = vmatmul.mubr.bf16.vlgmr.msra.gmra.mxu0 %v13785_v32  ;;  %v319_v34 = vld [vmem:[%s18511_s1 + $0x898] sm:$0xff]  ;;  %v11386_v53 = vcombine.high %v63_v63, %v71_v33  ;;  %v11385_v46 = vcombine.low %v63_v63, %v71_v33 }
 0x187   :  { %6739 = vmatpush1.bf16.msra.mxu0 %v11481_v38  ;;  %6770 = vmatprep.mubr.bf16.mxu0 %v13742_v9  ;;  %v11642_v38 = vcombine.high %v319_v34, %v327_v35  ;;  %v535_v3 = vld [vmem:[%s18511_s1 + $0xf58] sm:$0xff] }
 0x188   :  { %v6485_v51 = vpop.f32.mrf.mxu1  ;;  %6730 = vmatmul.mubr.bf16.vlgmr.msra.gmra.mxu1 %v14086_v50  ;;  %v6446_v56 = vpop.f32.mrf.mxu0  ;;  %6740 = vmatprep.subr.bf16.mxu0 %v11466_v42  ;;  %v55_v42 = vld [vmem:[%s18511_s1 + $0x58] sm:$0xff]  ;;  %v11849_v15 = vcombine.low %v527_v2, %v535_v3 }
 0x189   :  { %v14896_v55 = vadd.f32 %v6485_v51, %v6444_v47  ;;  %6780 = vmatpush1.bf16.msra.mxu1 %v11737_v39  ;;  %6811 = vmatprep.mubr.bf16.mxu1 %v13753_v13  ;;  %v47_v39 = vld [vmem:[%s18511_s1 + $0x18] sm:$0xff]  ;;  %v11641_v47 = vcombine.low %v319_v34, %v327_v35 }
 0x18a   :  { %v6487_v59 = vpop.f32.mrf.mxu1  ;;  %6781 = vmatprep.subr.bf16.mxu1 %v11722_v43  ;;  %v6448_v1 = vpop.f32.mrf.mxu0  ;;  %v303_v43 = vld [vmem:[%s18511_s1 + $0x818] sm:$0xff]  ;;  %v11370_v48 = vcombine.high %v47_v39, %v55_v42 }
 0x18b   :  { %v14905_v0 = vadd.f32 %v6487_v59, %v6446_v56  ;;  %6741 = vmatpush1.bf16.msra.mxu0 %v11465_v52  ;;  %v11626_v49 = vcombine.high %v303_v43, %v311_v45  ;;  %v287_v51 = vld [vmem:[%s18511_s1 + $0x798] sm:$0xff]  ;;  %v11625_v59 = vcombine.low %v303_v43, %v311_v45 }
 0x18c   :  { %v6489_v4 = vpop.f32.mrf.mxu1  ;;  %v6449_v6 = vpop.f32.mrf.mxu0  ;;  %6742 = vmatprep.subr.bf16.mxu0 %v11450_v58  ;;  %v295_v52 = vld [vmem:[%s18511_s1 + $0x7d8] sm:$0xff]  ;;  %v11369_v58 = vcombine.low %v47_v39, %v55_v42 }
 0x18d   :  { %6782 = vmatpush1.bf16.msra.mxu1 %v11721_v57  ;;  %v543_v56 = vld [vmem:[%s18511_s1 + $0xf98] sm:$0xff]  ;;  %v11609_v4 = vcombine.low %v287_v51, %v295_v52 }
 0x18e   :  { %v6490_v10 = vpop.f32.mrf.mxu1  ;;  %6783 = vmatprep.subr.bf16.mxu1 %v11706_v60  ;;  %v551_v57 = vld [vmem:[%s18511_s1 + $0xfd8] sm:$0xff]  ;;  %v11610_v60 = vcombine.high %v287_v51, %v295_v52 }
 0x18f   :  { %6743 = vmatpush1.bf16.msra.mxu0 %v11449_v5  ;;  %v11866_v61 = vcombine.high %v543_v56, %v551_v57  ;;  %v279_v1 = vld [vmem:[%s18511_s1 + $0x758] sm:$0xff]  ;;  %v11865_v5 = vcombine.low %v543_v56, %v551_v57 }
 0x190   :  { %6744 = vmatprep.subr.bf16.mxu0 %v11434_v8  ;;  %v11594_v6 = vcombine.high %v271_v62, %v279_v1  ;;  %v255_v8 = vld [vmem:[%s18511_s1 + $0x698] sm:$0xff]  ;;  %v11593_v14 = vcombine.low %v271_v62, %v279_v1 }
 0x191   :  { %6784 = vmatpush1.bf16.msra.mxu1 %v11705_v7  ;;  %v11850_v7 = vcombine.high %v527_v2, %v535_v3  ;;  %v263_v10 = vld [vmem:[%s18511_s1 + $0x6d8] sm:$0xff] }
 0x192   :  { %6785 = vmatprep.subr.bf16.mxu1 %v11690_v11  ;;  %v511_v11 = vld [vmem:[%s18511_s1 + $0xe98] sm:$0xff]  ;;  %v11578_v16 = vcombine.high %v255_v8, %v263_v10  ;;  %v11577_v41 = vcombine.low %v255_v8, %v263_v10 }
 0x193   :  { %6745 = vmatpush1.bf16.msra.mxu0 %v11433_v17  ;;  %v519_v12 = vld [vmem:[%s18511_s1 + $0xed8] sm:$0xff] }
 0x194   :  { %6746 = vmatprep.subr.bf16.mxu0 %v11418_v20  ;;  %v11834_v17 = vcombine.high %v511_v11, %v519_v12  ;;  %v247_v20 = vld [vmem:[%s18511_s1 + $0x658] sm:$0xff]  ;;  %v11833_v24 = vcombine.low %v511_v11, %v519_v12 }
 0x195   :  { %6786 = vmatpush1.bf16.msra.mxu1 %v11689_v18  ;;  %v239_v18 = vld [vmem:[%s18511_s1 + $0x618] sm:$0xff] }
 0x196   :  { %6787 = vmatprep.subr.bf16.mxu1 %v11674_v21  ;;  %v495_v21 = vld [vmem:[%s18511_s1 + $0xe18] sm:$0xff]  ;;  %v11562_v25 = vcombine.high %v239_v18, %v247_v20  ;;  %v11561_v33 = vcombine.low %v239_v18, %v247_v20 }
 0x197   :  { %6747 = vmatpush1.bf16.msra.mxu0 %v11417_v26  ;;  %v503_v22 = vld [vmem:[%s18511_s1 + $0xe58] sm:$0xff] }
 0x198   :  { %6748 = vmatprep.subr.bf16.mxu0 %v11402_v28  ;;  %v11818_v26 = vcombine.high %v495_v21, %v503_v22  ;;  %v231_v28 = vld [vmem:[%s18511_s1 + $0x5d8] sm:$0xff]  ;;  %v11817_v34 = vcombine.low %v495_v21, %v503_v22 }
 0x199   :  { %6788 = vmatpush1.bf16.msra.mxu1 %v11673_v54  ;;  %v223_v54 = vld [vmem:[%s18511_s1 + $0x598] sm:$0xff] }
 0x19a   :  { %6789 = vmatprep.subr.bf16.mxu1 %v11658_v29  ;;  %v479_v29 = vld [vmem:[%s18511_s1 + $0xd98] sm:$0xff]  ;;  %v11546_v35 = vcombine.high %v223_v54, %v231_v28  ;;  %v11545_v42 = vcombine.low %v223_v54, %v231_v28 }
 0x19b   :  { %6749 = vmatpush1.bf16.msra.mxu0 %v11401_v36  ;;  %v487_v63 = vld [vmem:[%s18511_s1 + $0xdd8] sm:$0xff] }
 0x19c   :  { %6750 = vmatprep.subr.bf16.mxu0 %v11386_v53  ;;  %v11802_v36 = vcombine.high %v479_v29, %v487_v63  ;;  %v215_v53 = vld [vmem:[%s18511_s1 + $0x558] sm:$0xff]  ;;  %v11801_v43 = vcombine.low %v479_v29, %v487_v63 }
 0x19d   :  { %6790 = vmatpush1.bf16.msra.mxu1 %v11657_v37  ;;  %v207_v37 = vld [vmem:[%s18511_s1 + $0x518] sm:$0xff] }
 0x19e   :  { %6791 = vmatprep.subr.bf16.mxu1 %v11642_v38  ;;  %v463_v38 = vld [vmem:[%s18511_s1 + $0xd18] sm:$0xff]  ;;  %v11530_v45 = vcombine.high %v207_v37, %v215_v53  ;;  %v11529_v52 = vcombine.low %v207_v37, %v215_v53 }
 0x19f   :  { %6751 = vmatpush1.bf16.msra.mxu0 %v11385_v46  ;;  %v471_v39 = vld [vmem:[%s18511_s1 + $0xd58] sm:$0xff] }
 0x1a0   :  { %6752 = vmatprep.subr.bf16.mxu0 %v11370_v48  ;;  %v11786_v46 = vcombine.high %v463_v38, %v471_v39  ;;  %v199_v48 = vld [vmem:[%s18511_s1 + $0x4d8] sm:$0xff]  ;;  %v11785_v56 = vcombine.low %v463_v38, %v471_v39 }
 0x1a1   :  { %6792 = vmatpush1.bf16.msra.mxu1 %v11641_v47  ;;  %v191_v47 = vld [vmem:[%s18511_s1 + $0x498] sm:$0xff] }
 0x1a2   :  { %6793 = vmatprep.subr.bf16.mxu1 %v11626_v49  ;;  %v447_v49 = vld [vmem:[%s18511_s1 + $0xc98] sm:$0xff]  ;;  %v11514_v57 = vcombine.high %v191_v47, %v199_v48  ;;  %v11513_v1 = vcombine.low %v191_v47, %v199_v48 }
 0x1a3   :  { %6753 = vmatpush1.bf16.msra.mxu0 %v11369_v58  ;;  %v455_v51 = vld [vmem:[%s18511_s1 + $0xcd8] sm:$0xff] }
 0x1a4   :  { %6754 = vmatprep.subr.bf16.mxu0 %v11610_v60  ;;  %v11770_v58 = vcombine.high %v447_v49, %v455_v51  ;;  %v183_v60 = vld [vmem:[%s18511_s1 + $0x458] sm:$0xff]  ;;  %v11769_v2 = vcombine.low %v447_v49, %v455_v51 }
 0x1a5   :  { %6794 = vmatpush1.bf16.msra.mxu1 %v11625_v59  ;;  %v175_v59 = vld [vmem:[%s18511_s1 + $0x418] sm:$0xff] }
 0x1a6   :  { %6795 = vmatprep.subr.bf16.mxu1 %v11866_v61  ;;  %v431_v61 = vld [vmem:[%s18511_s1 + $0xc18] sm:$0xff]  ;;  %v11498_v3 = vcombine.high %v175_v59, %v183_v60  ;;  %v11497_v10 = vcombine.low %v175_v59, %v183_v60 }
 0x1a7   :  { %6755 = vmatpush2.bf16.msra.mxu0 %v11609_v4  ;;  %v439_v62 = vld [vmem:[%s18511_s1 + $0xc58] sm:$0xff] }
 0x1a8   :  { %6756 = vmatprep.subr.bf16.mxu0 %v11594_v6  ;;  %v11754_v4 = vcombine.high %v431_v61, %v439_v62  ;;  %v679_v6 = vld [vmem:[%s18511_s1 + $0x13d8] sm:$0xff]  ;;  %v11753_v11 = vcombine.low %v431_v61, %v439_v62 }
 0x1a9   :  { %6796 = vmatpush2.bf16.msra.mxu1 %v11865_v5  ;;  %v671_v5 = vld [vmem:[%s18511_s1 + $0x1398] sm:$0xff] }
 0x1aa   :  { %6797 = vmatprep.subr.bf16.mxu1 %v11850_v7  ;;  %v927_v7 = vld [vmem:[%s18511_s1 + $0x1b98] sm:$0xff]  ;;  %v11994_v12 = vcombine.high %v671_v5, %v679_v6  ;;  %v11993_v20 = vcombine.low %v671_v5, %v679_v6 }
 0x1ab   :  { %6757 = vmatpush2.bf16.msra.mxu0 %v11593_v14  ;;  %v935_v8 = vld [vmem:[%s18511_s1 + $0x1bd8] sm:$0xff] }
 0x1ac   :  { %6758 = vmatprep.subr.bf16.mxu0 %v11578_v16  ;;  %v12250_v14 = vcombine.high %v927_v7, %v935_v8  ;;  %v663_v16 = vld [vmem:[%s18511_s1 + $0x1358] sm:$0xff]  ;;  %v12249_v21 = vcombine.low %v927_v7, %v935_v8 }
 0x1ad   :  { %6798 = vmatpush2.bf16.msra.mxu1 %v11849_v15  ;;  %v655_v15 = vld [vmem:[%s18511_s1 + $0x1318] sm:$0xff] }
 0x1ae   :  { %6799 = vmatprep.subr.bf16.mxu1 %v11834_v17  ;;  %v911_v17 = vld [vmem:[%s18511_s1 + $0x1b18] sm:$0xff]  ;;  %v11978_v22 = vcombine.high %v655_v15, %v663_v16 }
 0x1af   :  { %6759 = vmatpush2.bf16.msra.mxu0 %v11577_v41  ;;  %v919_v18 = vld [vmem:[%s18511_s1 + $0x1b58] sm:$0xff] }
 0x1b0   :  { %6760 = vmatprep.subr.bf16.mxu0 %v11562_v25  ;;  %v12234_v41 = vcombine.high %v911_v17, %v919_v18  ;;  %v647_v25 = vld [vmem:[%s18511_s1 + $0x12d8] sm:$0xff] }
 0x1b1   :  { %6800 = vmatpush2.bf16.msra.mxu1 %v11833_v24  ;;  %v639_v24 = vld [vmem:[%s18511_s1 + $0x1298] sm:$0xff] }
 0x1b2   :  { %6801 = vmatprep.subr.bf16.mxu1 %v11818_v26  ;;  %v895_v54 = vld [vmem:[%s18511_s1 + $0x1a98] sm:$0xff]  ;;  %v11961_v48 = vcombine.low %v639_v24, %v647_v25 }
 0x1b3   :  { %6761 = vmatpush2.bf16.msra.mxu0 %v11561_v33  ;;  %v903_v28 = vld [vmem:[%s18511_s1 + $0x1ad8] sm:$0xff]  ;;  %v11977_v33 = vcombine.low %v655_v15, %v663_v16 }
 0x1b4   :  { %6762 = vmatprep.subr.bf16.mxu0 %v11546_v35  ;;  %v12233_v35 = vcombine.low %v911_v17, %v919_v18  ;;  %v12218_v39 = vcombine.high %v895_v54, %v903_v28  ;;  %v12217_v51 = vcombine.low %v895_v54, %v903_v28  ;;  %v615_v59 = vld [vmem:[%s18511_s1 + $0x11d8] sm:$0xff] }
 0x1b5   :  { %6802 = vmatpush2.bf16.msra.mxu1 %v11817_v34  ;;  %v863_v60 = vld [vmem:[%s18511_s1 + $0x1998] sm:$0xff] }
 0x1b6   :  { %6803 = vmatprep.subr.bf16.mxu1 %v11802_v36  ;;  %v11962_v36 = vcombine.high %v639_v24, %v647_v25  ;;  %v871_v61 = vld [vmem:[%s18511_s1 + $0x19d8] sm:$0xff] }
 0x1b7   :  { %6763 = vmatpush2.bf16.msra.mxu0 %v11545_v42  ;;  %v631_v42 = vld [vmem:[%s18511_s1 + $0x1258] sm:$0xff] }
 0x1b8   :  { %6764 = vmatprep.subr.bf16.mxu0 %v11530_v45  ;;  %v879_v45 = vld [vmem:[%s18511_s1 + $0x1a18] sm:$0xff] }
 0x1b9   :  { %6804 = vmatpush2.bf16.msra.mxu1 %v11801_v43  ;;  %v599_v5 = vld [vmem:[%s18511_s1 + $0x1158] sm:$0xff] }
 0x1ba   :  { %6805 = vmatprep.subr.bf16.mxu1 %v11786_v46  ;;  %v847_v6 = vld [vmem:[%s18511_s1 + $0x1918] sm:$0xff] }
 0x1bb   :  { %6765 = vmatpush2.bf16.msra.mxu0 %v11529_v52  ;;  %v855_v7 = vld [vmem:[%s18511_s1 + $0x1958] sm:$0xff] }
 0x1bc   :  { %6766 = vmatprep.subr.bf16.mxu0 %v11514_v57  ;;  %v583_v15 = vld [vmem:[%s18511_s1 + $0x10d8] sm:$0xff] }
 0x1bd   :  { %6806 = vmatpush2.bf16.msra.mxu1 %v11785_v56  ;;  %v831_v16 = vld [vmem:[%s18511_s1 + $0x1898] sm:$0xff] }
 0x1be   :  { %6807 = vmatprep.subr.bf16.mxu1 %v11770_v58  ;;  %v607_v58 = vld [vmem:[%s18511_s1 + $0x1198] sm:$0xff] }
 0x1bf   :  { %6767 = vmatpush2.bf16.msra.mxu0 %v11513_v1  ;;  %v11929_v8 = vcombine.low %v607_v58, %v615_v59  ;;  %v839_v17 = vld [vmem:[%s18511_s1 + $0x18d8] sm:$0xff] }
 0x1c0   :  { %6768 = vmatprep.subr.bf16.mxu0 %v11498_v3  ;;  %v12186_v3 = vcombine.high %v863_v60, %v871_v61  ;;  %v567_v24 = vld [vmem:[%s18511_s1 + $0x1058] sm:$0xff]  ;;  %v12153_v28 = vcombine.low %v831_v16, %v839_v17 }
 0x1c1   :  { %6808 = vmatpush2.bf16.msra.mxu1 %v11769_v2  ;;  %v11930_v2 = vcombine.high %v607_v58, %v615_v59  ;;  %v815_v25 = vld [vmem:[%s18511_s1 + $0x1818] sm:$0xff] }
 0x1c2   :  { %6809 = vmatprep.subr.bf16.mxu1 %v11754_v4  ;;  %v591_v4 = vld [vmem:[%s18511_s1 + $0x1118] sm:$0xff] }
 0x1c3   :  { %6769 = vmatpush2.bf16.msra.mxu0 %v11497_v10  ;;  %v12185_v10 = vcombine.low %v863_v60, %v871_v61  ;;  %v11913_v18 = vcombine.low %v591_v4, %v599_v5  ;;  %v1031_v58 = vld [vmem:[%s18511_s1 + $0x1ed8] sm:$0xff] }
 0x1c4   :  { %6820 = vmatprep.subr.bf16.mxu0 %v11994_v12  ;;  %v12170_v12 = vcombine.high %v847_v6, %v855_v7 }
 0x1c5   :  { %6810 = vmatpush2.bf16.msra.mxu1 %v11753_v11  ;;  %v11914_v11 = vcombine.high %v591_v4, %v599_v5  ;;  %v1015_v4 = vld [vmem:[%s18511_s1 + $0x1e58] sm:$0xff] }
 0x1c6   :  { %6861 = vmatprep.subr.bf16.mxu1 %v12250_v14  ;;  %v6526_v26 = vpop.f32.mrf.mxu0  ;;  %6771 = vmatmul.mubr.bf16.vlgmr.msra.gmra.mxu0 %v13863_v23  ;;  %v575_v14 = vld [vmem:[%s18511_s1 + $0x1098] sm:$0xff] }
 0x1c7   :  { %v6527_v29 = vadd.f32 %v6526_v26, %v14896_v55  ;;  %6821 = vmatpush1.bf16.msra.mxu0 %v11993_v20  ;;  %v623_v55 = vld [vmem:[%s18511_s1 + $0x1218] sm:$0xff]  ;;  %6852 = vmatprep.mubr.bf16.mxu0 %v13878_v30  ;;  %v12169_v20 = vcombine.low %v847_v6, %v855_v7  ;;  %v11897_v54 = vcombine.low %v575_v14, %v583_v15 }
 0x1c8   :  { %v6567_v63 = vpop.f32.mrf.mxu1  ;;  %6812 = vmatmul.mubr.bf16.vlgmr.msra.gmra.mxu1 %v13882_v31  ;;  %v6528_v34 = vpop.f32.mrf.mxu0  ;;  %6822 = vmatprep.subr.bf16.mxu0 %v11978_v22  ;;  %v11946_v52 = vcombine.high %v623_v55, %v631_v42  ;;  %v11945_v62 = vcombine.low %v623_v55, %v631_v42  ;;  %v12154_v22 = vcombine.high %v831_v16, %v839_v17  ;;  %v823_v26 = vld [vmem:[%s18511_s1 + $0x1858] sm:$0xff] }
 0x1c9   :  { %6862 = vmatpush1.bf16.msra.mxu1 %v12249_v21  ;;  %v15097_v37 = vadd.f32 %v6567_v63, %v6527_v29  ;;  %v6529_v53 = vadd.f32 %v6528_v34, %v14905_v0  ;;  %v887_v0 = vld [vmem:[%s18511_s1 + $0x1a58] sm:$0xff]  ;;  %6893 = vmatprep.mubr.bf16.mxu1 %v13899_v40  ;;  %v11898_v21 = vcombine.high %v575_v14, %v583_v15 }
 0x1ca   :  { %v6569_v38 = vpop.f32.mrf.mxu1  ;;  %6863 = vmatprep.subr.bf16.mxu1 %v12234_v41  ;;  %v6530_v43 = vpop.f32.mrf.mxu0  ;;  %v12202_v57 = vcombine.high %v879_v45, %v887_v0  ;;  %v12201_v1 = vcombine.low %v879_v45, %v887_v0  ;;  %v559_v41 = vld [vmem:[%s18511_s1 + $0x1018] sm:$0xff]  ;;  %v12138_v63 = vcombine.high %v815_v25, %v823_v26 }
 0x1cb   :  { %v15114_v46 = vadd.f32 %v6569_v38, %v6529_v53  ;;  %6823 = vmatpush1.bf16.msra.mxu0 %v11977_v33  ;;  %v11882_v29 = vcombine.high %v559_v41, %v567_v24  ;;  %v799_v33 = vld [vmem:[%s18511_s1 + $0x1798] sm:$0xff]  ;;  %v11881_v53 = vcombine.low %v559_v41, %v567_v24  ;;  %v12137_v38 = vcombine.low %v815_v25, %v823_v26 }
 0x1cc   :  { %v6571_v47 = vpop.f32.mrf.mxu1  ;;  %v6531_v49 = vpop.f32.mrf.mxu0  ;;  %6824 = vmatprep.subr.bf16.mxu0 %v11962_v36  ;;  %v807_v34 = vld [vmem:[%s18511_s1 + $0x17d8] sm:$0xff] }
 0x1cd   :  { %6864 = vmatpush1.bf16.msra.mxu1 %v12233_v35  ;;  %v1055_v35 = vld [vmem:[%s18511_s1 + $0x1f98] sm:$0xff]  ;;  %v12121_v47 = vcombine.low %v799_v33, %v807_v34 }
 0x1ce   :  { %v6572_v56 = vpop.f32.mrf.mxu1  ;;  %6865 = vmatprep.subr.bf16.mxu1 %v12218_v39  ;;  %v1063_v36 = vld [vmem:[%s18511_s1 + $0x1fd8] sm:$0xff]  ;;  %v12122_v39 = vcombine.high %v799_v33, %v807_v34 }
 0x1cf   :  { %6825 = vmatpush1.bf16.msra.mxu0 %v11961_v48  ;;  %v12378_v55 = vcombine.high %v1055_v35, %v1063_v36  ;;  %v783_v42 = vld [vmem:[%s18511_s1 + $0x1718] sm:$0xff]  ;;  %v12377_v48 = vcombine.low %v1055_v35, %v1063_v36 }
 0x1d0   :  { %6826 = vmatprep.subr.bf16.mxu0 %v11946_v52  ;;  %v791_v43 = vld [vmem:[%s18511_s1 + $0x1758] sm:$0xff] }
 0x1d1   :  { %6866 = vmatpush1.bf16.msra.mxu1 %v12217_v51  ;;  %v1039_v45 = vld [vmem:[%s18511_s1 + $0x1f18] sm:$0xff]  ;;  %v12106_v49 = vcombine.high %v783_v42, %v791_v43  ;;  %v12105_v59 = vcombine.low %v783_v42, %v791_v43 }
 0x1d2   :  { %6867 = vmatprep.subr.bf16.mxu1 %v12202_v57  ;;  %v1047_v0 = vld [vmem:[%s18511_s1 + $0x1f58] sm:$0xff] }
 0x1d3   :  { %6827 = vmatpush1.bf16.msra.mxu0 %v11945_v62  ;;  %v12362_v51 = vcombine.high %v1039_v45, %v1047_v0  ;;  %v767_v52 = vld [vmem:[%s18511_s1 + $0x1698] sm:$0xff]  ;;  %v12361_v60 = vcombine.low %v1039_v45, %v1047_v0 }
 0x1d4   :  { %6828 = vmatprep.subr.bf16.mxu0 %v11930_v2  ;;  %v775_v56 = vld [vmem:[%s18511_s1 + $0x16d8] sm:$0xff] }
 0x1d5   :  { %6868 = vmatpush1.bf16.msra.mxu1 %v12201_v1  ;;  %v1023_v57 = vld [vmem:[%s18511_s1 + $0x1e98] sm:$0xff]  ;;  %v12090_v61 = vcombine.high %v767_v52, %v775_v56  ;;  %v12089_v5 = vcombine.low %v767_v52, %v775_v56  ;;  %v424_v52 = vld [vmem:[%s18511_s1 + $0xbe0] sm:$0xff] }
 0x1d6   :  { %6869 = vmatprep.subr.bf16.mxu1 %v12186_v3  ;;  %v12346_v62 = vcombine.high %v1023_v57, %v1031_v58  ;;  %v751_v1 = vld [vmem:[%s18511_s1 + $0x1618] sm:$0xff]  ;;  %v12345_v6 = vcombine.low %v1023_v57, %v1031_v58 }
 0x1d7   :  { %6829 = vmatpush1.bf16.msra.mxu0 %v11929_v8  ;;  %v759_v2 = vld [vmem:[%s18511_s1 + $0x1658] sm:$0xff] }
 0x1d8   :  { %6830 = vmatprep.subr.bf16.mxu0 %v11914_v11  ;;  %v1007_v3 = vld [vmem:[%s18511_s1 + $0x1e18] sm:$0xff]  ;;  %v12074_v7 = vcombine.high %v751_v1, %v759_v2  ;;  %v12073_v15 = vcombine.low %v751_v1, %v759_v2  ;;  %v408_v1 = vld [vmem:[%s18511_s1 + $0xb60] sm:$0xff] }
 0x1d9   :  { %6870 = vmatpush1.bf16.msra.mxu1 %v12185_v10  ;;  %v12330_v8 = vcombine.high %v1007_v3, %v1015_v4  ;;  %v735_v10 = vld [vmem:[%s18511_s1 + $0x1598] sm:$0xff]  ;;  %v12329_v16 = vcombine.low %v1007_v3, %v1015_v4 }
 0x1da   :  { %6871 = vmatprep.subr.bf16.mxu1 %v12170_v12  ;;  %v743_v11 = vld [vmem:[%s18511_s1 + $0x15d8] sm:$0xff] }
 0x1db   :  { %6831 = vmatpush1.bf16.msra.mxu0 %v11913_v18  ;;  %v991_v12 = vld [vmem:[%s18511_s1 + $0x1d98] sm:$0xff]  ;;  %v12058_v17 = vcombine.high %v735_v10, %v743_v11  ;;  %v12057_v24 = vcombine.low %v735_v10, %v743_v11  ;;  %v384_v10 = vld [vmem:[%s18511_s1 + $0xaa0] sm:$0xff] }
 0x1dc   :  { %6832 = vmatprep.subr.bf16.mxu0 %v11898_v21  ;;  %v999_v14 = vld [vmem:[%s18511_s1 + $0x1dd8] sm:$0xff]  ;;  %v392_v11 = vld [vmem:[%s18511_s1 + $0xae0] sm:$0xff] }
 0x1dd   :  { %6872 = vmatpush1.bf16.msra.mxu1 %v12169_v20  ;;  %v12314_v18 = vcombine.high %v991_v12, %v999_v14  ;;  %v719_v20 = vld [vmem:[%s18511_s1 + $0x1518] sm:$0xff]  ;;  %v12313_v25 = vcombine.low %v991_v12, %v999_v14 }
 0x1de   :  { %6873 = vmatprep.subr.bf16.mxu1 %v12154_v22  ;;  %v727_v21 = vld [vmem:[%s18511_s1 + $0x1558] sm:$0xff] }
 0x1df   :  { %6833 = vmatpush1.bf16.msra.mxu0 %v11897_v54  ;;  %v975_v22 = vld [vmem:[%s18511_s1 + $0x1d18] sm:$0xff]  ;;  %v12042_v26 = vcombine.high %v719_v20, %v727_v21  ;;  %v12041_v34 = vcombine.low %v719_v20, %v727_v21  ;;  %v11708_v21 = vcombine.high %v384_v10, %v392_v11 }
 0x1e0   :  { %6834 = vmatprep.subr.bf16.mxu0 %v11882_v29  ;;  %v983_v41 = vld [vmem:[%s18511_s1 + $0x1d58] sm:$0xff] }
 0x1e1   :  { %6874 = vmatpush1.bf16.msra.mxu1 %v12153_v28  ;;  %v12298_v54 = vcombine.high %v975_v22, %v983_v41  ;;  %v703_v28 = vld [vmem:[%s18511_s1 + $0x1498] sm:$0xff]  ;;  %v12297_v35 = vcombine.low %v975_v22, %v983_v41  ;;  %v112_v22 = vld [vmem:[%s18511_s1 + $0x220] sm:$0xff] }
 0x1e2   :  { %6875 = vmatprep.subr.bf16.mxu1 %v12138_v63  ;;  %v711_v29 = vld [vmem:[%s18511_s1 + $0x14d8] sm:$0xff]  ;;  %v120_v41 = vld [vmem:[%s18511_s1 + $0x260] sm:$0xff] }
 0x1e3   :  { %6835 = vmatpush1.bf16.msra.mxu0 %v11881_v53  ;;  %v959_v63 = vld [vmem:[%s18511_s1 + $0x1c98] sm:$0xff]  ;;  %v12026_v36 = vcombine.high %v703_v28, %v711_v29  ;;  %v12025_v43 = vcombine.low %v703_v28, %v711_v29 }
 0x1e4   :  { %6836 = vmatprep.subr.bf16.mxu0 %v12122_v39  ;;  %v967_v33 = vld [vmem:[%s18511_s1 + $0x1cd8] sm:$0xff] }
 0x1e5   :  { %6876 = vmatpush1.bf16.msra.mxu1 %v12137_v38  ;;  %v12282_v53 = vcombine.high %v959_v63, %v967_v33  ;;  %v687_v38 = vld [vmem:[%s18511_s1 + $0x1418] sm:$0xff]  ;;  %v12281_v45 = vcombine.low %v959_v63, %v967_v33  ;;  %v11707_v33 = vcombine.low %v384_v10, %v392_v11 }
 0x1e6   :  { %6877 = vmatprep.subr.bf16.mxu1 %v12378_v55  ;;  %v695_v39 = vld [vmem:[%s18511_s1 + $0x1458] sm:$0xff] }
 0x1e7   :  { %6837 = vmatpush2.bf16.msra.mxu0 %v12121_v47  ;;  %v943_v55 = vld [vmem:[%s18511_s1 + $0x1c18] sm:$0xff]  ;;  %v12010_v0 = vcombine.high %v687_v38, %v695_v39  ;;  %v12009_v56 = vcombine.low %v687_v38, %v695_v39  ;;  %v104_v38 = vld [vmem:[%s18511_s1 + $0x1e0] sm:$0xff] }
 0x1e8   :  { %6838 = vmatprep.subr.bf16.mxu0 %v12106_v49  ;;  %v951_v42 = vld [vmem:[%s18511_s1 + $0x1c58] sm:$0xff]  ;;  %v168_v49 = vld [vmem:[%s18511_s1 + $0x3e0] sm:$0xff] }
 0x1e9   :  { %6878 = vmatpush2.bf16.msra.mxu1 %v12377_v48  ;;  %v12266_v47 = vcombine.high %v943_v55, %v951_v42  ;;  %v160_v48 = vld [vmem:[%s18511_s1 + $0x3a0] sm:$0xff]  ;;  %v12265_v57 = vcombine.low %v943_v55, %v951_v42  ;;  %v11435_v42 = vcombine.low %v112_v22, %v120_v41 }
 0x1ea   :  { %6879 = vmatprep.subr.bf16.mxu1 %v12362_v51  ;;  %v416_v51 = vld [vmem:[%s18511_s1 + $0xba0] sm:$0xff]  ;;  %v11484_v58 = vcombine.high %v160_v48, %v168_v49  ;;  %v11483_v2 = vcombine.low %v160_v48, %v168_v49 }
 0x1eb   :  { %6839 = vmatpush2.bf16.msra.mxu0 %v12105_v59  ;;  %v11740_v59 = vcombine.high %v416_v51, %v424_v52  ;;  %v11739_v3 = vcombine.low %v416_v51, %v424_v52  ;;  %v352_v39 = vld [vmem:[%s18511_s1 + $0x9a0] sm:$0xff] }
 0x1ec   :  { %6840 = vmatprep.subr.bf16.mxu0 %v12090_v61  ;;  %v152_v61 = vld [vmem:[%s18511_s1 + $0x360] sm:$0xff] }
 0x1ed   :  { %6880 = vmatpush2.bf16.msra.mxu1 %v12361_v60  ;;  %v144_v60 = vld [vmem:[%s18511_s1 + $0x320] sm:$0xff] }
 0x1ee   :  { %6881 = vmatprep.subr.bf16.mxu1 %v12346_v62  ;;  %v400_v62 = vld [vmem:[%s18511_s1 + $0xb20] sm:$0xff]  ;;  %v11468_v4 = vcombine.high %v144_v60, %v152_v61  ;;  %v11467_v14 = vcombine.low %v144_v60, %v152_v61 }
 0x1ef   :  { %6841 = vmatpush2.bf16.msra.mxu0 %v12089_v5  ;;  %v11724_v5 = vcombine.high %v400_v62, %v408_v1  ;;  %v360_v55 = vld [vmem:[%s18511_s1 + $0x9e0] sm:$0xff] }
 0x1f0   :  { %6842 = vmatprep.subr.bf16.mxu0 %v12074_v7  ;;  %v136_v7 = vld [vmem:[%s18511_s1 + $0x2e0] sm:$0xff] }
 0x1f1   :  { %6882 = vmatpush2.bf16.msra.mxu1 %v12345_v6  ;;  %v128_v6 = vld [vmem:[%s18511_s1 + $0x2a0] sm:$0xff] }
 0x1f2   :  { %6883 = vmatprep.subr.bf16.mxu1 %v12330_v8  ;;  %v11451_v29 = vcombine.low %v128_v6, %v136_v7  ;;  %v88_v48 = vld [vmem:[%s18511_s1 + $0x160] sm:$0xff] }
 0x1f3   :  { %6843 = vmatpush2.bf16.msra.mxu0 %v12073_v15  ;;  %v336_v49 = vld [vmem:[%s18511_s1 + $0x920] sm:$0xff] }
 0x1f4   :  { %6844 = vmatprep.subr.bf16.mxu0 %v12058_v17  ;;  %v11723_v17 = vcombine.low %v400_v62, %v408_v1  ;;  %v344_v51 = vld [vmem:[%s18511_s1 + $0x960] sm:$0xff] }
 0x1f5   :  { %6884 = vmatpush2.bf16.msra.mxu1 %v12329_v16  ;;  %v72_v60 = vld [vmem:[%s18511_s1 + $0xe0] sm:$0xff] }
 0x1f6   :  { %6885 = vmatprep.subr.bf16.mxu1 %v12314_v18  ;;  %v11452_v18 = vcombine.high %v128_v6, %v136_v7  ;;  %v320_v61 = vld [vmem:[%s18511_s1 + $0x8a0] sm:$0xff] }
 0x1f7   :  { %6845 = vmatpush2.bf16.msra.mxu0 %v12057_v24  ;;  %v328_v62 = vld [vmem:[%s18511_s1 + $0x8e0] sm:$0xff] }
 0x1f8   :  { %6846 = vmatprep.subr.bf16.mxu0 %v12042_v26  ;;  %v368_v26 = vld [vmem:[%s18511_s1 + $0xa20] sm:$0xff]  ;;  %v11643_v11 = vcombine.low %v320_v61, %v328_v62 }
 0x1f9   :  { %6886 = vmatpush2.bf16.msra.mxu1 %v12313_v25  ;;  %v56_v6 = vld [vmem:[%s18511_s1 + $0x60] sm:$0xff] }
 0x1fa   :  { %6887 = vmatprep.subr.bf16.mxu1 %v12298_v54  ;;  %v376_v54 = vld [vmem:[%s18511_s1 + $0xa60] sm:$0xff] }
 0x1fb   :  { %6847 = vmatpush2.bf16.msra.mxu0 %v12041_v34  ;;  %v11436_v34 = vcombine.high %v112_v22, %v120_v41  ;;  %v304_v7 = vld [vmem:[%s18511_s1 + $0x820] sm:$0xff] }
 0x1fc   :  { %6848 = vmatprep.subr.bf16.mxu0 %v12026_v36  ;;  %v11692_v36 = vcombine.high %v368_v26, %v376_v54 }
 0x1fd   :  { %6888 = vmatpush2.bf16.msra.mxu1 %v12297_v35 }
 0x1fe   :  { %6889 = vmatprep.subr.bf16.mxu1 %v12282_v53  ;;  %v96_v53 = vld [vmem:[%s18511_s1 + $0x1a0] sm:$0xff] }
 0x1ff   :  { %6849 = vmatpush2.bf16.msra.mxu0 %v12025_v43  ;;  %v11691_v43 = vcombine.low %v368_v26, %v376_v54  ;;  %v11419_v52 = vcombine.low %v96_v53, %v104_v38  ;;  %v272_v26 = vld [vmem:[%s18511_s1 + $0x720] sm:$0xff] }
 0x200   :  { %6850 = vmatprep.subr.bf16.mxu0 %v12010_v0  ;;  %v11676_v0 = vcombine.high %v352_v39, %v360_v55  ;;  %v280_v54 = vld [vmem:[%s18511_s1 + $0x760] sm:$0xff] }
 0x201   :  { %6890 = vmatpush2.bf16.msra.mxu1 %v12281_v45  ;;  %v11420_v45 = vcombine.high %v96_v53, %v104_v38  ;;  %v264_v53 = vld [vmem:[%s18511_s1 + $0x6e0] sm:$0xff] }
 0x202   :  { %6891 = vmatprep.subr.bf16.mxu1 %v12266_v47  ;;  %v80_v47 = vld [vmem:[%s18511_s1 + $0x120] sm:$0xff] }
 0x203   :  { %6851 = vmatpush2.bf16.msra.mxu0 %v12009_v56  ;;  %v11675_v56 = vcombine.low %v352_v39, %v360_v55  ;;  %v11403_v1 = vcombine.low %v80_v47, %v88_v48  ;;  %v512_v38 = vld [vmem:[%s18511_s1 + $0xea0] sm:$0xff]  ;;  %v11595_v55 = vcombine.low %v272_v26, %v280_v54 }
 0x204   :  { %6902 = vmatprep.subr.bf16.mxu0 %v11484_v58  ;;  %v11660_v58 = vcombine.high %v336_v49, %v344_v51  ;;  %v520_v39 = vld [vmem:[%s18511_s1 + $0xee0] sm:$0xff] }
 0x205   :  { %6892 = vmatpush2.bf16.msra.mxu1 %v12265_v57  ;;  %v11404_v57 = vcombine.high %v80_v47, %v88_v48  ;;  %v248_v47 = vld [vmem:[%s18511_s1 + $0x660] sm:$0xff] }
 0x206   :  { %6943 = vmatprep.subr.bf16.mxu1 %v11740_v59  ;;  %v6608_v8 = vpop.f32.mrf.mxu0  ;;  %6853 = vmatmul.mubr.bf16.vlgmr.msra.gmra.mxu0 %v13785_v32  ;;  %v64_v59 = vld [vmem:[%s18511_s1 + $0xa0] sm:$0xff] }
 0x207   :  { %6903 = vmatpush1.bf16.msra.mxu0 %v11483_v2  ;;  %6934 = vmatprep.mubr.bf16.mxu0 %v13742_v9  ;;  %v11659_v2 = vcombine.low %v336_v49, %v344_v51  ;;  %v11387_v10 = vcombine.low %v64_v59, %v72_v60  ;;  %v496_v48 = vld [vmem:[%s18511_s1 + $0xe20] sm:$0xff] }
 0x208   :  { %v6649_v12 = vpop.f32.mrf.mxu1  ;;  %6894 = vmatmul.mubr.bf16.vlgmr.msra.gmra.mxu1 %v14086_v50  ;;  %v6610_v16 = vpop.f32.mrf.mxu0  ;;  %6904 = vmatprep.subr.bf16.mxu0 %v11468_v4  ;;  %v11644_v4 = vcombine.high %v320_v61, %v328_v62  ;;  %v504_v49 = vld [vmem:[%s18511_s1 + $0xe60] sm:$0xff] }
 0x209   :  { %v15298_v15 = vadd.f32 %v6649_v12, %v6608_v8  ;;  %6944 = vmatpush1.bf16.msra.mxu1 %v11739_v3  ;;  %6975 = vmatprep.mubr.bf16.mxu1 %v13753_v13  ;;  %v11388_v3 = vcombine.high %v64_v59, %v72_v60  ;;  %v312_v8 = vld [vmem:[%s18511_s1 + $0x860] sm:$0xff] }
 0x20a   :  { %v6651_v20 = vpop.f32.mrf.mxu1  ;;  %6945 = vmatprep.subr.bf16.mxu1 %v11724_v5  ;;  %v6612_v25 = vpop.f32.mrf.mxu0  ;;  %v48_v5 = vld [vmem:[%s18511_s1 + $0x20] sm:$0xff]  ;;  %v11627_v22 = vcombine.low %v304_v7, %v312_v8 }
 0x20b   :  { %v15307_v24 = vadd.f32 %v6651_v20, %v6610_v16  ;;  %6905 = vmatpush1.bf16.msra.mxu0 %v11467_v14  ;;  %v11372_v12 = vcombine.high %v48_v5, %v56_v6  ;;  %v11628_v14 = vcombine.high %v304_v7, %v312_v8  ;;  %v288_v16 = vld [vmem:[%s18511_s1 + $0x7a0] sm:$0xff] }
 0x20c   :  { %v6653_v28 = vpop.f32.mrf.mxu1  ;;  %v6613_v63 = vpop.f32.mrf.mxu0  ;;  %6906 = vmatprep.subr.bf16.mxu0 %v11452_v18  ;;  %v544_v18 = vld [vmem:[%s18511_s1 + $0xfa0] sm:$0xff] }
 0x20d   :  { %6946 = vmatpush1.bf16.msra.mxu1 %v11723_v17  ;;  %v296_v17 = vld [vmem:[%s18511_s1 + $0x7e0] sm:$0xff] }
 0x20e   :  { %v6654_v35 = vpop.f32.mrf.mxu1  ;;  %6947 = vmatprep.subr.bf16.mxu1 %v11708_v21  ;;  %v552_v20 = vld [vmem:[%s18511_s1 + $0xfe0] sm:$0xff]  ;;  %v11371_v21 = vcombine.low %v48_v5, %v56_v6  ;;  %v11612_v41 = vcombine.high %v288_v16, %v296_v17  ;;  %v11611_v63 = vcombine.low %v288_v16, %v296_v17 }
 0x20f   :  { %6907 = vmatpush1.bf16.msra.mxu0 %v11451_v29  ;;  %v11868_v25 = vcombine.high %v544_v18, %v552_v20  ;;  %v528_v28 = vld [vmem:[%s18511_s1 + $0xf20] sm:$0xff] }
 0x210   :  { %6908 = vmatprep.subr.bf16.mxu0 %v11436_v34  ;;  %v536_v29 = vld [vmem:[%s18511_s1 + $0xf60] sm:$0xff]  ;;  %v11596_v34 = vcombine.high %v272_v26, %v280_v54 }
 0x211   :  { %6948 = vmatpush1.bf16.msra.mxu1 %v11707_v33  ;;  %v11867_v33 = vcombine.low %v544_v18, %v552_v20  ;;  %v11852_v35 = vcombine.high %v528_v28, %v536_v29  ;;  %v232_v59 = vld [vmem:[%s18511_s1 + $0x5e0] sm:$0xff] }
 0x212   :  { %6949 = vmatprep.subr.bf16.mxu1 %v11692_v36  ;;  %v256_v36 = vld [vmem:[%s18511_s1 + $0x6a0] sm:$0xff] }
 0x213   :  { %6909 = vmatpush1.bf16.msra.mxu0 %v11435_v42  ;;  %v11851_v42 = vcombine.low %v528_v28, %v536_v29  ;;  %v11579_v51 = vcombine.low %v256_v36, %v264_v53  ;;  %v480_v60 = vld [vmem:[%s18511_s1 + $0xda0] sm:$0xff] }
 0x214   :  { %6910 = vmatprep.subr.bf16.mxu0 %v11420_v45  ;;  %v11836_v45 = vcombine.high %v512_v38, %v520_v39  ;;  %v488_v61 = vld [vmem:[%s18511_s1 + $0xde0] sm:$0xff] }
 0x215   :  { %6950 = vmatpush1.bf16.msra.mxu1 %v11691_v43  ;;  %v11580_v43 = vcombine.high %v256_v36, %v264_v53  ;;  %v216_v5 = vld [vmem:[%s18511_s1 + $0x560] sm:$0xff]  ;;  %v15467_v53 = vsub.s32 0, %v13692_v44 }
 0x216   :  { %6951 = vmatprep.subr.bf16.mxu1 %v11676_v0  ;;  %v240_v0 = vld [vmem:[%s18511_s1 + $0x620] sm:$0xff] }
 0x217   :  { %6911 = vmatpush1.bf16.msra.mxu0 %v11419_v52  ;;  %v11835_v52 = vcombine.low %v512_v38, %v520_v39  ;;  %v11563_v62 = vcombine.low %v240_v0, %v248_v47  ;;  %v464_v6 = vld [vmem:[%s18511_s1 + $0xd20] sm:$0xff]  ;;  %v15470_v38 = vsub.s32 1, %v13692_v44 }
 0x218   :  { %6912 = vmatprep.subr.bf16.mxu0 %v11404_v57  ;;  %v11820_v57 = vcombine.high %v496_v48, %v504_v49  ;;  %v472_v7 = vld [vmem:[%s18511_s1 + $0xd60] sm:$0xff] }
 0x219   :  { %6952 = vmatpush1.bf16.msra.mxu1 %v11675_v56  ;;  %v11564_v56 = vcombine.high %v240_v0, %v248_v47  ;;  %v200_v16 = vld [vmem:[%s18511_s1 + $0x4e0] sm:$0xff] }
 0x21a   :  { %6953 = vmatprep.subr.bf16.mxu1 %v11660_v58  ;;  %v224_v58 = vld [vmem:[%s18511_s1 + $0x5a0] sm:$0xff] }
 0x21b   :  { %6913 = vmatpush1.bf16.msra.mxu0 %v11403_v1  ;;  %v11819_v1 = vcombine.low %v496_v48, %v504_v49  ;;  %v11547_v8 = vcombine.low %v224_v58, %v232_v59  ;;  %v448_v17 = vld [vmem:[%s18511_s1 + $0xca0] sm:$0xff] }
 0x21c   :  { %6914 = vmatprep.subr.bf16.mxu0 %v11388_v3  ;;  %v11804_v3 = vcombine.high %v480_v60, %v488_v61  ;;  %v456_v18 = vld [vmem:[%s18511_s1 + $0xce0] sm:$0xff] }
 0x21d   :  { %6954 = vmatpush1.bf16.msra.mxu1 %v11659_v2  ;;  %v11548_v2 = vcombine.high %v224_v58, %v232_v59  ;;  %v184_v26 = vld [vmem:[%s18511_s1 + $0x460] sm:$0xff] }
 0x21e   :  { %6955 = vmatprep.subr.bf16.mxu1 %v11644_v4  ;;  %v208_v4 = vld [vmem:[%s18511_s1 + $0x520] sm:$0xff] }
 0x21f   :  { %6915 = vmatpush1.bf16.msra.mxu0 %v11387_v10  ;;  %v11803_v10 = vcombine.low %v480_v60, %v488_v61  ;;  %v11531_v20 = vcombine.low %v208_v4, %v216_v5  ;;  %v432_v54 = vld [vmem:[%s18511_s1 + $0xc20] sm:$0xff] }
 0x220   :  { %6916 = vmatprep.subr.bf16.mxu0 %v11372_v12  ;;  %v11788_v12 = vcombine.high %v464_v6, %v472_v7  ;;  %v440_v28 = vld [vmem:[%s18511_s1 + $0xc60] sm:$0xff] }
 0x221   :  { %6956 = vmatpush1.bf16.msra.mxu1 %v11643_v11  ;;  %v11532_v11 = vcombine.high %v208_v4, %v216_v5  ;;  %v680_v36 = vld [vmem:[%s18511_s1 + $0x13e0] sm:$0xff] }
 0x222   :  { %6957 = vmatprep.subr.bf16.mxu1 %v11628_v14  ;;  %v192_v14 = vld [vmem:[%s18511_s1 + $0x4a0] sm:$0xff] }
 0x223   :  { %6917 = vmatpush1.bf16.msra.mxu0 %v11371_v21  ;;  %v11787_v21 = vcombine.low %v464_v6, %v472_v7  ;;  %v11515_v29 = vcombine.low %v192_v14, %v200_v16  ;;  %v928_v39 = vld [vmem:[%s18511_s1 + $0x1ba0] sm:$0xff] }
 0x224   :  { %6918 = vmatprep.subr.bf16.mxu0 %v11612_v41  ;;  %v11772_v41 = vcombine.high %v448_v17, %v456_v18  ;;  %v656_v48 = vld [vmem:[%s18511_s1 + $0x1320] sm:$0xff] }
 0x225   :  { %6958 = vmatpush1.bf16.msra.mxu1 %v11627_v22  ;;  %v11516_v22 = vcombine.high %v192_v14, %v200_v16  ;;  %v664_v49 = vld [vmem:[%s18511_s1 + $0x1360] sm:$0xff] }
 0x226   :  { %6959 = vmatprep.subr.bf16.mxu1 %v11868_v25  ;;  %v176_v25 = vld [vmem:[%s18511_s1 + $0x420] sm:$0xff]  ;;  %v11979_v16 = vcombine.low %v656_v48, %v664_v49 }
 0x227   :  { %6919 = vmatpush2.bf16.msra.mxu0 %v11611_v63  ;;  %v11771_v63 = vcombine.low %v448_v17, %v456_v18  ;;  %v912_v58 = vld [vmem:[%s18511_s1 + $0x1b20] sm:$0xff] }
 0x228   :  { %6920 = vmatprep.subr.bf16.mxu0 %v11596_v34  ;;  %v11756_v34 = vcombine.high %v432_v54, %v440_v28  ;;  %v920_v59 = vld [vmem:[%s18511_s1 + $0x1b60] sm:$0xff] }
 0x229   :  { %6960 = vmatpush2.bf16.msra.mxu1 %v11867_v33  ;;  %v11500_v33 = vcombine.high %v176_v25, %v184_v26  ;;  %v640_v4 = vld [vmem:[%s18511_s1 + $0x12a0] sm:$0xff]  ;;  %v12235_v17 = vcombine.low %v912_v58, %v920_v59 }
 0x22a   :  { %6961 = vmatprep.subr.bf16.mxu1 %v11852_v35  ;;  %v672_v35 = vld [vmem:[%s18511_s1 + $0x13a0] sm:$0xff] }
 0x22b   :  { %6921 = vmatpush2.bf16.msra.mxu0 %v11595_v55  ;;  %v936_v55 = vld [vmem:[%s18511_s1 + $0x1be0] sm:$0xff]  ;;  %v11996_v0 = vcombine.high %v672_v35, %v680_v36  ;;  %v11995_v60 = vcombine.low %v672_v35, %v680_v36 }
 0x22c   :  { %6922 = vmatprep.subr.bf16.mxu0 %v11580_v43  ;;  %v11499_v43 = vcombine.low %v176_v25, %v184_v26  ;;  %v12252_v47 = vcombine.high %v928_v39, %v936_v55  ;;  %v12251_v61 = vcombine.low %v928_v39, %v936_v55  ;;  %v648_v5 = vld [vmem:[%s18511_s1 + $0x12e0] sm:$0xff] }
 0x22d   :  { %6962 = vmatpush2.bf16.msra.mxu1 %v11851_v42  ;;  %v15481_v42 = vld [vmem:[%s18512_s2] sm:$0xff]  ;;  %v11963_v55 = vcombine.low %v640_v4, %v648_v5 }
 0x22e   :  { %6963 = vmatprep.subr.bf16.mxu1 %v11836_v45  ;;  %v11755_v45 = vcombine.low %v432_v54, %v440_v28  ;;  %v904_v14 = vld [vmem:[%s18511_s1 + $0x1ae0] sm:$0xff] }
 0x22f   :  { %6923 = vmatpush2.bf16.msra.mxu0 %v11579_v51  ;;  %v7565_v51 = vrot.slane %v15481_v42, %v15467_v53  ;;  %v624_v54 = vld [vmem:[%s18511_s1 + $0x1220] sm:$0xff] }
 0x230   :  { %6924 = vmatprep.subr.bf16.mxu0 %v11564_v56  ;;  %v7569_v56 = vrot.slane %v15481_v42, %v15470_v38  ;;  %v632_v28 = vld [vmem:[%s18511_s1 + $0x1260] sm:$0xff] }
 0x231   :  { %6964 = vmatpush2.bf16.msra.mxu1 %v11835_v52  ;;  %v15494_v52 = vld [vmem:[%s18513_s3] sm:$0xff]  ;;  %v7642_v6 = vmul.f32 %v7565_v51, %v14695_v19 }
 0x232   :  { %6965 = vmatprep.subr.bf16.mxu1 %v11820_v57  ;;  %v15499_v57 = vsub.s32 4, %v13692_v44  ;;  %v7643_v7 = vmul.f32 %v7569_v56, %v14712_v27 }
 0x233   :  { %6925 = vmatpush2.bf16.msra.mxu0 %v11563_v62  ;;  %v15508_v62 = vsub.s32 5, %v13692_v44 }
 0x234   :  { %6926 = vmatprep.subr.bf16.mxu0 %v11548_v2  ;;  %v7665_v2 = vrot.slane %v15494_v52, %v15467_v53  ;;  %v7681_v18 = vrot.slane %v15494_v52, %v15499_v57 }
 0x235   :  { %6966 = vmatpush2.bf16.msra.mxu1 %v11819_v1  ;;  %v11980_v1 = vcombine.high %v656_v48, %v664_v49  ;;  %v7685_v36 = vrot.slane %v15494_v52, %v15508_v62 }
 0x236   :  { %6967 = vmatprep.subr.bf16.mxu1 %v11804_v3  ;;  %v12236_v3 = vcombine.high %v912_v58, %v920_v59  ;;  %v608_v58 = vld [vmem:[%s18511_s1 + $0x11a0] sm:$0xff] }
 0x237   :  { %6927 = vmatpush2.bf16.msra.mxu0 %v11547_v8  ;;  %v7669_v8 = vrot.slane %v15494_v52, %v15470_v38  ;;  %v616_v59 = vld [vmem:[%s18511_s1 + $0x11e0] sm:$0xff] }
 0x238   :  { %6928 = vmatprep.subr.bf16.mxu0 %v11532_v11  ;;  %v7581_v11 = vrot.slane %v15481_v42, %v15499_v57 }
 0x239   :  { %6968 = vmatpush2.bf16.msra.mxu1 %v11803_v10 }
 0x23a   :  { %6969 = vmatprep.subr.bf16.mxu1 %v11788_v12  ;;  %v896_v12 = vld [vmem:[%s18511_s1 + $0x1aa0] sm:$0xff] }
 0x23b   :  { %6929 = vmatpush2.bf16.msra.mxu0 %v11531_v20  ;;  %v12220_v26 = vcombine.high %v896_v12, %v904_v14 }
 0x23c   :  { %6930 = vmatprep.subr.bf16.mxu0 %v11516_v22  ;;  %v11964_v22 = vcombine.high %v640_v4, %v648_v5  ;;  %v11947_v4 = vcombine.low %v624_v54, %v632_v28 }
 0x23d   :  { %6970 = vmatpush2.bf16.msra.mxu1 %v11787_v21  ;;  %v7585_v21 = vrot.slane %v15481_v42, %v15508_v62 }
 0x23e   :  { %6971 = vmatprep.subr.bf16.mxu1 %v11772_v41 }
 0x23f   :  { %6931 = vmatpush2.bf16.msra.mxu0 %v11515_v29  ;;  %v7742_v29 = vadd.f32 %v7665_v2, %v7642_v6  ;;  %v11932_v6 = vcombine.high %v608_v58, %v616_v59 }
 0x240   :  { %6932 = vmatprep.subr.bf16.mxu0 %v11500_v33  ;;  %v880_v33 = vld [vmem:[%s18511_s1 + $0x1a20] sm:$0xff] }
 0x241   :  { %6972 = vmatpush2.bf16.msra.mxu1 %v11771_v63 }
 0x242   :  { %6973 = vmatprep.subr.bf16.mxu1 %v11756_v34 }
 0x243   :  { %6933 = vmatpush2.bf16.msra.mxu0 %v11499_v43 }
 0x244   :  { %6984 = vmatprep.subr.bf16.mxu0 %v11996_v0  ;;  %v11948_v0 = vcombine.high %v624_v54, %v632_v28 }
 0x245   :  { %6974 = vmatpush2.bf16.msra.mxu1 %v11755_v45  ;;  %v12219_v45 = vcombine.low %v896_v12, %v904_v14  ;;  %v592_v12 = vld [vmem:[%s18511_s1 + $0x1120] sm:$0xff] }
 0x246   :  { %7025 = vmatprep.subr.bf16.mxu1 %v12252_v47  ;;  %v6690_v10 = vpop.f32.mrf.mxu0  ;;  %6935 = vmatmul.mubr.bf16.vlgmr.msra.gmra.mxu0 %v13863_v23  ;;  %v7743_v47 = vadd.f32 %v7669_v8, %v7643_v7  ;;  %v600_v14 = vld [vmem:[%s18511_s1 + $0x1160] sm:$0xff] }
 0x247   :  { %v6691_v19 = vadd.f32 %v6690_v10, %v15298_v15  ;;  %6985 = vmatpush1.bf16.msra.mxu0 %v11995_v60  ;;  %7016 = vmatprep.mubr.bf16.mxu0 %v13878_v30  ;;  %v864_v60 = vld [vmem:[%s18511_s1 + $0x19a0] sm:$0xff] }
 0x248   :  { %v6731_v27 = vpop.f32.mrf.mxu1  ;;  %6976 = vmatmul.mubr.bf16.vlgmr.msra.gmra.mxu1 %v13882_v31  ;;  %v6692_v20 = vpop.f32.mrf.mxu0  ;;  %6986 = vmatprep.subr.bf16.mxu0 %v11980_v1  ;;  %v7758_v1 = vmax.f32 %v7742_v29, 0.0  ;;  %v7759_v7 = vmax.f32 %v7743_v47, 0.0  ;;  %v1064_v47 = vld [vmem:[%s18511_s1 + $0x1fe0] sm:$0xff] }
 0x249   :  { %7026 = vmatpush1.bf16.msra.mxu1 %v12251_v61  ;;  %v6732_v41 = vadd.f32 %v6731_v27, %v6691_v19  ;;  %v6693_v25 = vadd.f32 %v6692_v20, %v15307_v24  ;;  %v888_v24 = vld [vmem:[%s18511_s1 + $0x1a60] sm:$0xff]  ;;  %7057 = vmatprep.mubr.bf16.mxu1 %v13899_v40  ;;  %v11916_v20 = vcombine.high %v592_v12, %v600_v14 }
 0x24a   :  { %v6733_v15 = vpop.f32.mrf.mxu1  ;;  %7027 = vmatprep.subr.bf16.mxu1 %v12236_v3  ;;  %v6694_v63 = vpop.f32.mrf.mxu0  ;;  %v12204_v56 = vcombine.high %v880_v33, %v888_v24  ;;  %v872_v61 = vld [vmem:[%s18511_s1 + $0x19e0] sm:$0xff]  ;;  %v12203_v5 = vcombine.low %v880_v33, %v888_v24 }
 0x24b   :  { %v7646_v34 = vmul.f32 %v7581_v11, %v6732_v41  ;;  %v6734_v35 = vadd.f32 %v6733_v15, %v6693_v25  ;;  %6987 = vmatpush1.bf16.msra.mxu0 %v11979_v16  ;;  %v12188_v11 = vcombine.high %v864_v60, %v872_v61  ;;  %v848_v19 = vld [vmem:[%s18511_s1 + $0x1920] sm:$0xff] }
 0x24c   :  { %v6735_v39 = vpop.f32.mrf.mxu1  ;;  %v6695_v43 = vpop.f32.mrf.mxu0  ;;  %6988 = vmatprep.subr.bf16.mxu0 %v11964_v22  ;;  %v856_v27 = vld [vmem:[%s18511_s1 + $0x1960] sm:$0xff] }
 0x24d   :  { %7028 = vmatpush1.bf16.msra.mxu1 %v12235_v17  ;;  %v7746_v48 = vadd.f32 %v7681_v18, %v7646_v34  ;;  %v7647_v49 = vmul.f32 %v7585_v21, %v6734_v35  ;;  %v11931_v17 = vcombine.low %v608_v58, %v616_v59  ;;  %v12187_v18 = vcombine.low %v864_v60, %v872_v61  ;;  %v576_v22 = vld [vmem:[%s18511_s1 + $0x10a0] sm:$0xff] }
 0x24e   :  { %v6736_v51 = vpop.f32.mrf.mxu1  ;;  %7029 = vmatprep.subr.bf16.mxu1 %v12220_v26  ;;  %v12172_v21 = vcombine.high %v848_v19, %v856_v27  ;;  %v584_v41 = vld [vmem:[%s18511_s1 + $0x10e0] sm:$0xff]  ;;  %v11915_v26 = vcombine.low %v592_v12, %v600_v14  ;;  %v12171_v54 = vcombine.low %v848_v19, %v856_v27 }
 0x24f   :  { %v7762_v2 = vmax.f32 %v7746_v48, 0.0  ;;  %v7747_v3 = vadd.f32 %v7685_v36, %v7647_v49  ;;  %6989 = vmatpush1.bf16.msra.mxu0 %v11963_v55  ;;  %v832_v25 = vld [vmem:[%s18511_s1 + $0x18a0] sm:$0xff]  ;;  %v11900_v28 = vcombine.high %v576_v22, %v584_v41  ;;  %v11899_v35 = vcombine.low %v576_v22, %v584_v41 }
 0x250   :  { %6990 = vmatprep.subr.bf16.mxu0 %v11948_v0  ;;  %v840_v15 = vld [vmem:[%s18511_s1 + $0x18e0] sm:$0xff] }
 0x251   :  { %7030 = vmatpush1.bf16.msra.mxu1 %v12219_v45  ;;  %v15566_v8 = vmax.f32 %v7758_v1, %v7762_v2  ;;  %v7763_v10 = vmax.f32 %v7747_v3, 0.0  ;;  %v12156_v29 = vcombine.high %v832_v25, %v840_v15  ;;  %v560_v63 = vld [vmem:[%s18511_s1 + $0x1020] sm:$0xff]  ;;  %v12155_v36 = vcombine.low %v832_v25, %v840_v15 }
 0x252   :  { %7031 = vmatprep.subr.bf16.mxu1 %v12204_v56  ;;  %v568_v33 = vld [vmem:[%s18511_s1 + $0x1060] sm:$0xff] }
 0x253   :  { %v15580_v16 = vmax.f32 %v7759_v7, %v7763_v10  ;;  %6991 = vmatpush1.bf16.msra.mxu0 %v11947_v4  ;;  %v816_v24 = vld [vmem:[%s18511_s1 + $0x1820] sm:$0xff]  ;;  %v11884_v39 = vcombine.high %v560_v63, %v568_v33  ;;  %v11883_v48 = vcombine.low %v560_v63, %v568_v33 }
 0x254   :  { %6992 = vmatprep.subr.bf16.mxu0 %v11932_v6  ;;  %v824_v34 = vld [vmem:[%s18511_s1 + $0x1860] sm:$0xff] }
 0x255   :  { %7032 = vmatpush1.bf16.msra.mxu1 %v12203_v5  ;;  %v12140_v55 = vcombine.high %v816_v24, %v824_v34  ;;  %v800_v43 = vld [vmem:[%s18511_s1 + $0x17a0] sm:$0xff]  ;;  %v12139_v49 = vcombine.low %v816_v24, %v824_v34 }
 0x256   :  { %7033 = vmatprep.subr.bf16.mxu1 %v12188_v11  ;;  %v808_v45 = vld [vmem:[%s18511_s1 + $0x17e0] sm:$0xff] }
 0x257   :  { %6993 = vmatpush1.bf16.msra.mxu0 %v11931_v17  ;;  %v1056_v0 = vld [vmem:[%s18511_s1 + $0x1fa0] sm:$0xff]  ;;  %v12124_v51 = vcombine.high %v800_v43, %v808_v45  ;;  %v12123_v1 = vcombine.low %v800_v43, %v808_v45 }
 0x258   :  { %6994 = vmatprep.subr.bf16.mxu0 %v11916_v20  ;;  %v12380_v56 = vcombine.high %v1056_v0, %v1064_v47  ;;  %v784_v58 = vld [vmem:[%s18511_s1 + $0x1720] sm:$0xff]  ;;  %v12379_v2 = vcombine.low %v1056_v0, %v1064_v47 }
 0x259   :  { %7034 = vmatpush1.bf16.msra.mxu1 %v12187_v18  ;;  %v792_v59 = vld [vmem:[%s18511_s1 + $0x1760] sm:$0xff] }
 0x25a   :  { %7035 = vmatprep.subr.bf16.mxu1 %v12172_v21  ;;  %v1040_v60 = vld [vmem:[%s18511_s1 + $0x1f20] sm:$0xff]  ;;  %v12108_v3 = vcombine.high %v784_v58, %v792_v59  ;;  %v12107_v11 = vcombine.low %v784_v58, %v792_v59 }
 0x25b   :  { %6995 = vmatpush1.bf16.msra.mxu0 %v11915_v26  ;;  %v1048_v61 = vld [vmem:[%s18511_s1 + $0x1f60] sm:$0xff] }
 0x25c   :  { %6996 = vmatprep.subr.bf16.mxu0 %v11900_v28  ;;  %v12364_v4 = vcombine.high %v1040_v60, %v1048_v61  ;;  %v768_v5 = vld [vmem:[%s18511_s1 + $0x16a0] sm:$0xff]  ;;  %v12363_v12 = vcombine.low %v1040_v60, %v1048_v61 }
 0x25d   :  { %7036 = vmatpush1.bf16.msra.mxu1 %v12171_v54  ;;  %v776_v6 = vld [vmem:[%s18511_s1 + $0x16e0] sm:$0xff] }
 0x25e   :  { %7037 = vmatprep.subr.bf16.mxu1 %v12156_v29  ;;  %v1024_v7 = vld [vmem:[%s18511_s1 + $0x1ea0] sm:$0xff]  ;;  %v12092_v14 = vcombine.high %v768_v5, %v776_v6  ;;  %v12091_v21 = vcombine.low %v768_v5, %v776_v6 }
 0x25f   :  { %6997 = vmatpush1.bf16.msra.mxu0 %v11899_v35  ;;  %v1032_v10 = vld [vmem:[%s18511_s1 + $0x1ee0] sm:$0xff] }
 0x260   :  { %6998 = vmatprep.subr.bf16.mxu0 %v11884_v39  ;;  %v12348_v19 = vcombine.high %v1024_v7, %v1032_v10  ;;  %v752_v27 = vld [vmem:[%s18511_s1 + $0x1620] sm:$0xff]  ;;  %v12347_v22 = vcombine.low %v1024_v7, %v1032_v10  ;;  %v161_v10 = vld [vmem:[%s18511_s1 + $0x3a8] sm:$0xff] }
 0x261   :  { %7038 = vmatpush1.bf16.msra.mxu1 %v12155_v36  ;;  %v760_v17 = vld [vmem:[%s18511_s1 + $0x1660] sm:$0xff] }
 0x262   :  { %7039 = vmatprep.subr.bf16.mxu1 %v12140_v55  ;;  %v1008_v18 = vld [vmem:[%s18511_s1 + $0x1e20] sm:$0xff]  ;;  %v12076_v41 = vcombine.high %v752_v27, %v760_v17  ;;  %v12075_v29 = vcombine.low %v752_v27, %v760_v17 }
 0x263   :  { %6999 = vmatpush1.bf16.msra.mxu0 %v11883_v48  ;;  %v1016_v20 = vld [vmem:[%s18511_s1 + $0x1e60] sm:$0xff] }
 0x264   :  { %7000 = vmatprep.subr.bf16.mxu0 %v12124_v51  ;;  %v12332_v25 = vcombine.high %v1008_v18, %v1016_v20  ;;  %v736_v15 = vld [vmem:[%s18511_s1 + $0x15a0] sm:$0xff]  ;;  %v12331_v63 = vcombine.low %v1008_v18, %v1016_v20  ;;  %v145_v20 = vld [vmem:[%s18511_s1 + $0x328] sm:$0xff] }
 0x265   :  { %7040 = vmatpush1.bf16.msra.mxu1 %v12139_v49  ;;  %v744_v26 = vld [vmem:[%s18511_s1 + $0x15e0] sm:$0xff] }
 0x266   :  { %7041 = vmatprep.subr.bf16.mxu1 %v12380_v56  ;;  %v992_v54 = vld [vmem:[%s18511_s1 + $0x1da0] sm:$0xff]  ;;  %v12060_v33 = vcombine.high %v736_v15, %v744_v26  ;;  %v12059_v55 = vcombine.low %v736_v15, %v744_v26 }
 0x267   :  { %7001 = vmatpush2.bf16.msra.mxu0 %v12123_v1  ;;  %v1000_v28 = vld [vmem:[%s18511_s1 + $0x1de0] sm:$0xff] }
 0x268   :  { %7002 = vmatprep.subr.bf16.mxu0 %v12108_v3  ;;  %v12316_v24 = vcombine.high %v992_v54, %v1000_v28  ;;  %v720_v34 = vld [vmem:[%s18511_s1 + $0x1520] sm:$0xff]  ;;  %v12315_v43 = vcombine.low %v992_v54, %v1000_v28  ;;  %v129_v28 = vld [vmem:[%s18511_s1 + $0x2a8] sm:$0xff] }
 0x269   :  { %7042 = vmatpush2.bf16.msra.mxu1 %v12379_v2  ;;  %v728_v35 = vld [vmem:[%s18511_s1 + $0x1560] sm:$0xff] }
 0x26a   :  { %7043 = vmatprep.subr.bf16.mxu1 %v12364_v4  ;;  %v976_v36 = vld [vmem:[%s18511_s1 + $0x1d20] sm:$0xff]  ;;  %v12044_v45 = vcombine.high %v720_v34, %v728_v35  ;;  %v12043_v56 = vcombine.low %v720_v34, %v728_v35 }
 0x26b   :  { %7003 = vmatpush2.bf16.msra.mxu0 %v12107_v11  ;;  %v984_v39 = vld [vmem:[%s18511_s1 + $0x1d60] sm:$0xff]  ;;  %v169_v11 = vld [vmem:[%s18511_s1 + $0x3e8] sm:$0xff] }
 0x26c   :  { %7004 = vmatprep.subr.bf16.mxu0 %v12092_v14  ;;  %v12300_v0 = vcombine.high %v976_v36, %v984_v39  ;;  %v704_v47 = vld [vmem:[%s18511_s1 + $0x14a0] sm:$0xff]  ;;  %v12299_v58 = vcombine.low %v976_v36, %v984_v39  ;;  %v425_v14 = vld [vmem:[%s18511_s1 + $0xbe8] sm:$0xff]  ;;  %v11486_v17 = vcombine.high %v161_v10, %v169_v11 }
 0x26d   :  { %7044 = vmatpush2.bf16.msra.mxu1 %v12363_v12  ;;  %v712_v48 = vld [vmem:[%s18511_s1 + $0x14e0] sm:$0xff]  ;;  %v417_v12 = vld [vmem:[%s18511_s1 + $0xba8] sm:$0xff] }
 0x26e   :  { %7045 = vmatprep.subr.bf16.mxu1 %v12348_v19  ;;  %v960_v49 = vld [vmem:[%s18511_s1 + $0x1ca0] sm:$0xff]  ;;  %v12028_v59 = vcombine.high %v704_v47, %v712_v48  ;;  %v12027_v4 = vcombine.low %v704_v47, %v712_v48  ;;  %v11742_v18 = vcombine.high %v417_v12, %v425_v14  ;;  %v11741_v15 = vcombine.low %v417_v12, %v425_v14  ;;  %v113_v47 = vld [vmem:[%s18511_s1 + $0x228] sm:$0xff] }
 0x26f   :  { %7005 = vmatpush2.bf16.msra.mxu0 %v12091_v21  ;;  %v968_v51 = vld [vmem:[%s18511_s1 + $0x1ce0] sm:$0xff]  ;;  %v153_v21 = vld [vmem:[%s18511_s1 + $0x368] sm:$0xff] }
 0x270   :  { %7006 = vmatprep.subr.bf16.mxu0 %v12076_v41  ;;  %v12284_v60 = vcombine.high %v960_v49, %v968_v51  ;;  %v688_v61 = vld [vmem:[%s18511_s1 + $0x1420] sm:$0xff]  ;;  %v12283_v5 = vcombine.low %v960_v49, %v968_v51  ;;  %v409_v41 = vld [vmem:[%s18511_s1 + $0xb68] sm:$0xff]  ;;  %v11470_v26 = vcombine.high %v145_v20, %v153_v21  ;;  %v11469_v35 = vcombine.low %v145_v20, %v153_v21 }
 0x271   :  { %7046 = vmatpush2.bf16.msra.mxu1 %v12347_v22  ;;  %v696_v1 = vld [vmem:[%s18511_s1 + $0x1460] sm:$0xff]  ;;  %v401_v22 = vld [vmem:[%s18511_s1 + $0xb28] sm:$0xff] }
 0x272   :  { %7047 = vmatprep.subr.bf16.mxu1 %v12332_v25  ;;  %v944_v2 = vld [vmem:[%s18511_s1 + $0x1c20] sm:$0xff]  ;;  %v12012_v6 = vcombine.high %v688_v61, %v696_v1  ;;  %v12011_v19 = vcombine.low %v688_v61, %v696_v1  ;;  %v11485_v25 = vcombine.low %v161_v10, %v169_v11  ;;  %v11726_v54 = vcombine.high %v401_v22, %v409_v41  ;;  %v121_v48 = vld [vmem:[%s18511_s1 + $0x268] sm:$0xff] }
 0x273   :  { %7007 = vmatpush2.bf16.msra.mxu0 %v12075_v29  ;;  %v952_v3 = vld [vmem:[%s18511_s1 + $0x1c60] sm:$0xff]  ;;  %v137_v29 = vld [vmem:[%s18511_s1 + $0x2e8] sm:$0xff]  ;;  %v11437_v11 = vcombine.low %v113_v47, %v121_v48 }
 0x274   :  { %7008 = vmatprep.subr.bf16.mxu0 %v12060_v33  ;;  %v12268_v7 = vcombine.high %v944_v2, %v952_v3  ;;  %v12267_v27 = vcombine.low %v944_v2, %v952_v3  ;;  %v385_v33 = vld [vmem:[%s18511_s1 + $0xaa8] sm:$0xff]  ;;  %v11438_v2 = vcombine.high %v113_v47, %v121_v48 }
 0x275   :  { %7048 = vmatpush2.bf16.msra.mxu1 %v12331_v63  ;;  %v361_v10 = vld [vmem:[%s18511_s1 + $0x9e8] sm:$0xff] }
 0x276   :  { %7049 = vmatprep.subr.bf16.mxu1 %v12316_v24  ;;  %v393_v24 = vld [vmem:[%s18511_s1 + $0xae8] sm:$0xff] }
 0x277   :  { %7009 = vmatpush2.bf16.msra.mxu0 %v12059_v55  ;;  %v11725_v55 = vcombine.low %v401_v22, %v409_v41  ;;  %v11709_v1 = vcombine.low %v385_v33, %v393_v24  ;;  %v345_v20 = vld [vmem:[%s18511_s1 + $0x968] sm:$0xff] }
 0x278   :  { %7010 = vmatprep.subr.bf16.mxu0 %v12044_v45  ;;  %v289_v48 = vld [vmem:[%s18511_s1 + $0x7a8] sm:$0xff] }
 0x279   :  { %7050 = vmatpush2.bf16.msra.mxu1 %v12315_v43  ;;  %v11454_v43 = vcombine.high %v129_v28, %v137_v29 }
 0x27a   :  { %7051 = vmatprep.subr.bf16.mxu1 %v12300_v0  ;;  %v11710_v0 = vcombine.high %v385_v33, %v393_v24 }
 0x27b   :  { %7011 = vmatpush2.bf16.msra.mxu0 %v12043_v56  ;;  %v369_v56 = vld [vmem:[%s18511_s1 + $0xa28] sm:$0xff] }
 0x27c   :  { %7012 = vmatprep.subr.bf16.mxu0 %v12028_v59 }
 0x27d   :  { %7052 = vmatpush2.bf16.msra.mxu1 %v12299_v58  ;;  %v377_v58 = vld [vmem:[%s18511_s1 + $0xa68] sm:$0xff] }
 0x27e   :  { %7053 = vmatprep.subr.bf16.mxu1 %v12284_v60  ;;  %v11453_v60 = vcombine.low %v129_v28, %v137_v29  ;;  %v11693_v12 = vcombine.low %v369_v56, %v377_v58  ;;  %v329_v28 = vld [vmem:[%s18511_s1 + $0x8e8] sm:$0xff] }
 0x27f   :  { %7013 = vmatpush2.bf16.msra.mxu0 %v12027_v4  ;;  %v11694_v4 = vcombine.high %v369_v56, %v377_v58  ;;  %v545_v56 = vld [vmem:[%s18511_s1 + $0xfa8] sm:$0xff] }
 0x280   :  { %7014 = vmatprep.subr.bf16.mxu0 %v12012_v6  ;;  %v105_v6 = vld [vmem:[%s18511_s1 + $0x1e8] sm:$0xff] }
 0x281   :  { %7054 = vmatpush2.bf16.msra.mxu1 %v12283_v5  ;;  %v97_v5 = vld [vmem:[%s18511_s1 + $0x1a8] sm:$0xff] }
 0x282   :  { %7055 = vmatprep.subr.bf16.mxu1 %v12268_v7  ;;  %v353_v7 = vld [vmem:[%s18511_s1 + $0x9a8] sm:$0xff]  ;;  %v11422_v14 = vcombine.high %v97_v5, %v105_v6  ;;  %v11421_v21 = vcombine.low %v97_v5, %v105_v6 }
 0x283   :  { %7015 = vmatpush2.bf16.msra.mxu0 %v12011_v19  ;;  %v11678_v19 = vcombine.high %v353_v7, %v361_v10  ;;  %v11677_v22 = vcombine.low %v353_v7, %v361_v10  ;;  %v553_v58 = vld [vmem:[%s18511_s1 + $0xfe8] sm:$0xff] }
 0x284   :  { %7066 = vmatprep.subr.bf16.mxu0 %v11486_v17  ;;  %v89_v17 = vld [vmem:[%s18511_s1 + $0x168] sm:$0xff]  ;;  %v11869_v7 = vcombine.low %v545_v56, %v553_v58 }
 0x285   :  { %7056 = vmatpush2.bf16.msra.mxu1 %v12267_v27  ;;  %v81_v27 = vld [vmem:[%s18511_s1 + $0x128] sm:$0xff] }
 0x286   :  { %7107 = vmatprep.subr.bf16.mxu1 %v11742_v18  ;;  %v6772_v63 = vpop.f32.mrf.mxu0  ;;  %7017 = vmatmul.mubr.bf16.vlgmr.msra.gmra.mxu0 %v13785_v32  ;;  %v337_v18 = vld [vmem:[%s18511_s1 + $0x928] sm:$0xff]  ;;  %v11406_v41 = vcombine.high %v81_v27, %v89_v17  ;;  %v11405_v29 = vcombine.low %v81_v27, %v89_v17 }
 0x287   :  { %7067 = vmatpush1.bf16.msra.mxu0 %v11485_v25  ;;  %7098 = vmatprep.mubr.bf16.mxu0 %v13742_v9  ;;  %v11662_v25 = vcombine.high %v337_v18, %v345_v20  ;;  %v537_v5 = vld [vmem:[%s18511_s1 + $0xf68] sm:$0xff] }
 0x288   :  { %v6813_v34 = vpop.f32.mrf.mxu1  ;;  %7058 = vmatmul.mubr.bf16.vlgmr.msra.gmra.mxu1 %v14086_v50  ;;  %v6774_v39 = vpop.f32.mrf.mxu0  ;;  %7068 = vmatprep.subr.bf16.mxu0 %v11470_v26  ;;  %v73_v26 = vld [vmem:[%s18511_s1 + $0xe8] sm:$0xff] }
 0x289   :  { %v15740_v36 = vadd.f32 %v6813_v34, %v6772_v63  ;;  %7108 = vmatpush1.bf16.msra.mxu1 %v11741_v15  ;;  %7139 = vmatprep.mubr.bf16.mxu1 %v13753_v13  ;;  %v65_v15 = vld [vmem:[%s18511_s1 + $0xa8] sm:$0xff]  ;;  %v11661_v63 = vcombine.low %v337_v18, %v345_v20 }
 0x28a   :  { %v6815_v45 = vpop.f32.mrf.mxu1  ;;  %7109 = vmatprep.subr.bf16.mxu1 %v11726_v54  ;;  %v6776_v51 = vpop.f32.mrf.mxu0  ;;  %v321_v54 = vld [vmem:[%s18511_s1 + $0x8a8] sm:$0xff]  ;;  %v11390_v33 = vcombine.high %v65_v15, %v73_v26 }
 0x28b   :  { %v15749_v49 = vadd.f32 %v6815_v45, %v6774_v39  ;;  %7069 = vmatpush1.bf16.msra.mxu0 %v11469_v35  ;;  %v11646_v24 = vcombine.high %v321_v54, %v329_v28  ;;  %v49_v34 = vld [vmem:[%s18511_s1 + $0x28] sm:$0xff]  ;;  %v11645_v45 = vcombine.low %v321_v54, %v329_v28 }
 0x28c   :  { %v6817_v59 = vpop.f32.mrf.mxu1  ;;  %v6777_v61 = vpop.f32.mrf.mxu0  ;;  %7070 = vmatprep.subr.bf16.mxu0 %v11454_v43  ;;  %v57_v35 = vld [vmem:[%s18511_s1 + $0x68] sm:$0xff]  ;;  %v11389_v43 = vcombine.low %v65_v15, %v73_v26 }
 0x28d   :  { %7110 = vmatpush1.bf16.msra.mxu1 %v11725_v55  ;;  %v305_v39 = vld [vmem:[%s18511_s1 + $0x828] sm:$0xff]  ;;  %v11373_v59 = vcombine.low %v49_v34, %v57_v35 }
 0x28e   :  { %v6818_v3 = vpop.f32.mrf.mxu1  ;;  %7111 = vmatprep.subr.bf16.mxu1 %v11710_v0  ;;  %v313_v55 = vld [vmem:[%s18511_s1 + $0x868] sm:$0xff]  ;;  %v11374_v0 = vcombine.high %v49_v34, %v57_v35 }
 0x28f   :  { %7071 = vmatpush1.bf16.msra.mxu0 %v11453_v60  ;;  %v11630_v47 = vcombine.high %v305_v39, %v313_v55  ;;  %v297_v51 = vld [vmem:[%s18511_s1 + $0x7e8] sm:$0xff]  ;;  %v11629_v60 = vcombine.low %v305_v39, %v313_v55 }
 0x290   :  { %7072 = vmatprep.subr.bf16.mxu0 %v11438_v2  ;;  %v11614_v61 = vcombine.high %v289_v48, %v297_v51  ;;  %v273_v2 = vld [vmem:[%s18511_s1 + $0x728] sm:$0xff]  ;;  %v11613_v6 = vcombine.low %v289_v48, %v297_v51 }
 0x291   :  { %7112 = vmatpush1.bf16.msra.mxu1 %v11709_v1  ;;  %v11870_v1 = vcombine.high %v545_v56, %v553_v58  ;;  %v281_v3 = vld [vmem:[%s18511_s1 + $0x768] sm:$0xff] }
 0x292   :  { %7113 = vmatprep.subr.bf16.mxu1 %v11694_v4  ;;  %v529_v4 = vld [vmem:[%s18511_s1 + $0xf28] sm:$0xff]  ;;  %v11598_v10 = vcombine.high %v273_v2, %v281_v3  ;;  %v11597_v17 = vcombine.low %v273_v2, %v281_v3 }
 0x293   :  { %7073 = vmatpush1.bf16.msra.mxu0 %v11437_v11  ;;  %v11854_v11 = vcombine.high %v529_v4, %v537_v5  ;;  %v521_v27 = vld [vmem:[%s18511_s1 + $0xee8] sm:$0xff]  ;;  %v11853_v18 = vcombine.low %v529_v4, %v537_v5 }
 0x294   :  { %7074 = vmatprep.subr.bf16.mxu0 %v11422_v14  ;;  %v265_v14 = vld [vmem:[%s18511_s1 + $0x6e8] sm:$0xff] }
 0x295   :  { %7114 = vmatpush1.bf16.msra.mxu1 %v11693_v12  ;;  %v257_v12 = vld [vmem:[%s18511_s1 + $0x6a8] sm:$0xff] }
 0x296   :  { %7115 = vmatprep.subr.bf16.mxu1 %v11678_v19  ;;  %v513_v19 = vld [vmem:[%s18511_s1 + $0xea8] sm:$0xff]  ;;  %v11582_v20 = vcombine.high %v257_v12, %v265_v14  ;;  %v11581_v26 = vcombine.low %v257_v12, %v265_v14 }
 0x297   :  { %7075 = vmatpush1.bf16.msra.mxu0 %v11421_v21  ;;  %v11838_v21 = vcombine.high %v513_v19, %v521_v27  ;;  %v505_v15 = vld [vmem:[%s18511_s1 + $0xe68] sm:$0xff]  ;;  %v11837_v54 = vcombine.low %v513_v19, %v521_v27 }
 0x298   :  { %7076 = vmatprep.subr.bf16.mxu0 %v11406_v41  ;;  %v249_v41 = vld [vmem:[%s18511_s1 + $0x668] sm:$0xff] }
 0x299   :  { %7116 = vmatpush1.bf16.msra.mxu1 %v11677_v22  ;;  %v241_v22 = vld [vmem:[%s18511_s1 + $0x628] sm:$0xff] }
 0x29a   :  { %7117 = vmatprep.subr.bf16.mxu1 %v11662_v25  ;;  %v497_v25 = vld [vmem:[%s18511_s1 + $0xe28] sm:$0xff]  ;;  %v11566_v28 = vcombine.high %v241_v22, %v249_v41  ;;  %v11565_v35 = vcombine.low %v241_v22, %v249_v41  ;;  %v15912_v22 = vsub.s32 3, %v13692_v44 }
 0x29b   :  { %7077 = vmatpush1.bf16.msra.mxu0 %v11405_v29  ;;  %v11822_v29 = vcombine.high %v497_v25, %v505_v15  ;;  %v489_v34 = vld [vmem:[%s18511_s1 + $0xde8] sm:$0xff]  ;;  %v11821_v39 = vcombine.low %v497_v25, %v505_v15 }
 0x29c   :  { %7078 = vmatprep.subr.bf16.mxu0 %v11390_v33  ;;  %v233_v33 = vld [vmem:[%s18511_s1 + $0x5e8] sm:$0xff] }
 0x29d   :  { %7118 = vmatpush1.bf16.msra.mxu1 %v11661_v63  ;;  %v225_v63 = vld [vmem:[%s18511_s1 + $0x5a8] sm:$0xff] }
 0x29e   :  { %7119 = vmatprep.subr.bf16.mxu1 %v11646_v24  ;;  %v481_v24 = vld [vmem:[%s18511_s1 + $0xda8] sm:$0xff]  ;;  %v11550_v55 = vcombine.high %v225_v63, %v233_v33  ;;  %v11549_v51 = vcombine.low %v225_v63, %v233_v33 }
 0x29f   :  { %7079 = vmatpush1.bf16.msra.mxu0 %v11389_v43  ;;  %v11806_v43 = vcombine.high %v481_v24, %v489_v34  ;;  %v473_v48 = vld [vmem:[%s18511_s1 + $0xd68] sm:$0xff]  ;;  %v11805_v56 = vcombine.low %v481_v24, %v489_v34  ;;  %v7577_v24 = vrot.slane %v15481_v42, %v15912_v22  ;;  %v15931_v34 = vsub.s32 6, %v13692_v44 }
 0x2a0   :  { %7080 = vmatprep.subr.bf16.mxu0 %v11374_v0  ;;  %v217_v0 = vld [vmem:[%s18511_s1 + $0x568] sm:$0xff] }
 0x2a1   :  { %7120 = vmatpush1.bf16.msra.mxu1 %v11645_v45  ;;  %v209_v45 = vld [vmem:[%s18511_s1 + $0x528] sm:$0xff] }
 0x2a2   :  { %7121 = vmatprep.subr.bf16.mxu1 %v11630_v47  ;;  %v465_v47 = vld [vmem:[%s18511_s1 + $0xd28] sm:$0xff]  ;;  %v11534_v58 = vcombine.high %v209_v45, %v217_v0  ;;  %v11533_v3 = vcombine.low %v209_v45, %v217_v0  ;;  %v15940_v45 = vsub.s32 7, %v13692_v44 }
 0x2a3   :  { %7081 = vmatpush1.bf16.msra.mxu0 %v11373_v59  ;;  %v11790_v59 = vcombine.high %v465_v47, %v473_v48  ;;  %v457_v2 = vld [vmem:[%s18511_s1 + $0xce8] sm:$0xff]  ;;  %v11789_v4 = vcombine.low %v465_v47, %v473_v48 }
 0x2a4   :  { %7082 = vmatprep.subr.bf16.mxu0 %v11614_v61  ;;  %v201_v61 = vld [vmem:[%s18511_s1 + $0x4e8] sm:$0xff] }
 0x2a5   :  { %7122 = vmatpush1.bf16.msra.mxu1 %v11629_v60  ;;  %v193_v60 = vld [vmem:[%s18511_s1 + $0x4a8] sm:$0xff] }
 0x2a6   :  { %7123 = vmatprep.subr.bf16.mxu1 %v11870_v1  ;;  %v449_v1 = vld [vmem:[%s18511_s1 + $0xca8] sm:$0xff]  ;;  %v11518_v5 = vcombine.high %v193_v60, %v201_v61  ;;  %v11517_v14 = vcombine.low %v193_v60, %v201_v61  ;;  %v7589_v61 = vrot.slane %v15481_v42, %v15931_v34 }
 0x2a7   :  { %7083 = vmatpush2.bf16.msra.mxu0 %v11613_v6  ;;  %v11774_v6 = vcombine.high %v449_v1, %v457_v2  ;;  %v441_v12 = vld [vmem:[%s18511_s1 + $0xc68] sm:$0xff]  ;;  %v11773_v19 = vcombine.low %v449_v1, %v457_v2 }
 0x2a8   :  { %7084 = vmatprep.subr.bf16.mxu0 %v11598_v10  ;;  %v185_v10 = vld [vmem:[%s18511_s1 + $0x468] sm:$0xff] }
 0x2a9   :  { %7124 = vmatpush2.bf16.msra.mxu1 %v11869_v7  ;;  %v177_v7 = vld [vmem:[%s18511_s1 + $0x428] sm:$0xff] }
 0x2aa   :  { %7125 = vmatprep.subr.bf16.mxu1 %v11854_v11  ;;  %v433_v11 = vld [vmem:[%s18511_s1 + $0xc28] sm:$0xff]  ;;  %v11502_v27 = vcombine.high %v177_v7, %v185_v10  ;;  %v11501_v15 = vcombine.low %v177_v7, %v185_v10  ;;  %v7593_v7 = vrot.slane %v15481_v42, %v15940_v45 }
 0x2ab   :  { %7085 = vmatpush2.bf16.msra.mxu0 %v11597_v17  ;;  %v11758_v17 = vcombine.high %v433_v11, %v441_v12  ;;  %v929_v41 = vld [vmem:[%s18511_s1 + $0x1ba8] sm:$0xff] }
 0x2ac   :  { %7086 = vmatprep.subr.bf16.mxu0 %v11582_v20  ;;  %v681_v20 = vld [vmem:[%s18511_s1 + $0x13e8] sm:$0xff] }
 0x2ad   :  { %7126 = vmatpush2.bf16.msra.mxu1 %v11853_v18  ;;  %v673_v18 = vld [vmem:[%s18511_s1 + $0x13a8] sm:$0xff] }
 0x2ae   :  { %7127 = vmatprep.subr.bf16.mxu1 %v11838_v21  ;;  %v15909_v21 = vsub.s32 2, %v13692_v44  ;;  %v937_v25 = vld [vmem:[%s18511_s1 + $0x1be8] sm:$0xff]  ;;  %v7677_v44 = vrot.slane %v15494_v52, %v15912_v22 }
 0x2af   :  { %7087 = vmatpush2.bf16.msra.mxu0 %v11581_v26  ;;  %v11757_v26 = vcombine.low %v433_v11, %v441_v12  ;;  %v665_v63 = vld [vmem:[%s18511_s1 + $0x1368] sm:$0xff] }
 0x2b0   :  { %7088 = vmatprep.subr.bf16.mxu0 %v11566_v28  ;;  %v12254_v28 = vcombine.high %v929_v41, %v937_v25  ;;  %v7573_v33 = vrot.slane %v15481_v42, %v15909_v21  ;;  %v7673_v47 = vrot.slane %v15494_v52, %v15909_v21  ;;  %v897_v1 = vld [vmem:[%s18511_s1 + $0x1aa8] sm:$0xff] }
 0x2b1   :  { %7128 = vmatpush2.bf16.msra.mxu1 %v11837_v54  ;;  %v11998_v54 = vcombine.high %v673_v18, %v681_v20  ;;  %v905_v2 = vld [vmem:[%s18511_s1 + $0x1ae8] sm:$0xff] }
 0x2b2   :  { %7129 = vmatprep.subr.bf16.mxu1 %v11822_v29  ;;  %v657_v29 = vld [vmem:[%s18511_s1 + $0x1328] sm:$0xff] }
 0x2b3   :  { %7089 = vmatpush2.bf16.msra.mxu0 %v11565_v35  ;;  %v913_v35 = vld [vmem:[%s18511_s1 + $0x1b28] sm:$0xff]  ;;  %v11982_v0 = vcombine.high %v657_v29, %v665_v63 }
 0x2b4   :  { %7090 = vmatprep.subr.bf16.mxu0 %v11550_v55  ;;  %v11997_v55 = vcombine.low %v673_v18, %v681_v20  ;;  %v881_v18 = vld [vmem:[%s18511_s1 + $0x1a28] sm:$0xff] }
 0x2b5   :  { %7130 = vmatpush2.bf16.msra.mxu1 %v11821_v39  ;;  %v921_v39 = vld [vmem:[%s18511_s1 + $0x1b68] sm:$0xff] }
 0x2b6   :  { %7131 = vmatprep.subr.bf16.mxu1 %v11806_v43  ;;  %v12253_v43 = vcombine.low %v929_v41, %v937_v25  ;;  %v12238_v48 = vcombine.high %v913_v35, %v921_v39  ;;  %v7693_v25 = vrot.slane %v15494_v52, %v15940_v45 }
 0x2b7   :  { %7091 = vmatpush2.bf16.msra.mxu0 %v11549_v51  ;;  %v641_v51 = vld [vmem:[%s18511_s1 + $0x12a8] sm:$0xff] }
 0x2b8   :  { %7092 = vmatprep.subr.bf16.mxu0 %v11534_v58  ;;  %v7644_v58 = vmul.f32 %v7573_v33, %v15097_v37 }
 0x2b9   :  { %7132 = vmatpush2.bf16.msra.mxu1 %v11805_v56  ;;  %v649_v56 = vld [vmem:[%s18511_s1 + $0x12e8] sm:$0xff] }
 0x2ba   :  { %7133 = vmatprep.subr.bf16.mxu1 %v11790_v59  ;;  %v7645_v59 = vmul.f32 %v7577_v24, %v15114_v46  ;;  %v11966_v10 = vcombine.high %v641_v51, %v649_v56 }
 0x2bb   :  { %7093 = vmatpush2.bf16.msra.mxu0 %v11533_v3  ;;  %v11981_v3 = vcombine.low %v657_v29, %v665_v63 }
 0x2bc   :  { %7094 = vmatprep.subr.bf16.mxu0 %v11518_v5  ;;  %v7689_v5 = vrot.slane %v15494_v52, %v15931_v34  ;;  %v7745_v63 = vadd.f32 %v7677_v44, %v7645_v59  ;;  %v617_v52 = vld [vmem:[%s18511_s1 + $0x11e8] sm:$0xff] }
 0x2bd   :  { %7134 = vmatpush2.bf16.msra.mxu1 %v11789_v4  ;;  %v12237_v4 = vcombine.low %v913_v35, %v921_v39 }
 0x2be   :  { %7135 = vmatprep.subr.bf16.mxu1 %v11774_v6  ;;  %v7761_v44 = vmax.f32 %v7745_v63, 0.0  ;;  %v1057_v63 = vld [vmem:[%s18511_s1 + $0x1fa8] sm:$0xff] }
 0x2bf   :  { %7095 = vmatpush2.bf16.msra.mxu0 %v11517_v14  ;;  %v12222_v14 = vcombine.high %v897_v1, %v905_v2 }
 0x2c0   :  { %7096 = vmatprep.subr.bf16.mxu0 %v11502_v27  ;;  %v633_v27 = vld [vmem:[%s18511_s1 + $0x1268] sm:$0xff] }
 0x2c1   :  { %7136 = vmatpush2.bf16.msra.mxu1 %v11773_v19  ;;  %v625_v19 = vld [vmem:[%s18511_s1 + $0x1228] sm:$0xff] }
 0x2c2   :  { %7137 = vmatprep.subr.bf16.mxu1 %v11758_v17  ;;  %v7744_v17 = vadd.f32 %v7673_v47, %v7644_v58  ;;  %v11950_v29 = vcombine.high %v625_v19, %v633_v27 }
 0x2c3   :  { %7097 = vmatpush2.bf16.msra.mxu0 %v11501_v15 }
 0x2c4   :  { %7148 = vmatprep.subr.bf16.mxu0 %v11998_v54  ;;  %v7760_v47 = vmax.f32 %v7744_v17, 0.0 }
 0x2c5   :  { %7138 = vmatpush2.bf16.msra.mxu1 %v11757_v26  ;;  %v11965_v26 = vcombine.low %v641_v51, %v649_v56  ;;  %v11949_v56 = vcombine.low %v625_v19, %v633_v27 }
 0x2c6   :  { %7189 = vmatprep.subr.bf16.mxu1 %v12254_v28  ;;  %v6854_v60 = vpop.f32.mrf.mxu0  ;;  %7099 = vmatmul.mubr.bf16.vlgmr.msra.gmra.mxu0 %v13863_v23  ;;  %v12221_v28 = vcombine.low %v897_v1, %v905_v2  ;;  %v593_v2 = vld [vmem:[%s18511_s1 + $0x1128] sm:$0xff] }
 0x2c7   :  { %v6855_v37 = vadd.f32 %v6854_v60, %v15740_v36  ;;  %7149 = vmatpush1.bf16.msra.mxu0 %v11997_v55  ;;  %7180 = vmatprep.mubr.bf16.mxu0 %v13878_v30  ;;  %v609_v55 = vld [vmem:[%s18511_s1 + $0x11a8] sm:$0xff] }
 0x2c8   :  { %v6895_v46 = vpop.f32.mrf.mxu1  ;;  %7140 = vmatmul.mubr.bf16.vlgmr.msra.gmra.mxu1 %v13882_v31  ;;  %v6856_v6 = vpop.f32.mrf.mxu0  ;;  %7150 = vmatprep.subr.bf16.mxu0 %v11982_v0  ;;  %v873_v0 = vld [vmem:[%s18511_s1 + $0x19e8] sm:$0xff]  ;;  %v11934_v59 = vcombine.high %v609_v55, %v617_v52 }
 0x2c9   :  { %7190 = vmatpush1.bf16.msra.mxu1 %v12253_v43  ;;  %v6896_v11 = vadd.f32 %v6895_v46, %v6855_v37  ;;  %v6857_v12 = vadd.f32 %v6856_v6, %v15749_v49  ;;  %v889_v49 = vld [vmem:[%s18511_s1 + $0x1a68] sm:$0xff]  ;;  %7221 = vmatprep.mubr.bf16.mxu1 %v13899_v40 }
 0x2ca   :  { %v6897_v36 = vpop.f32.mrf.mxu1  ;;  %7191 = vmatprep.subr.bf16.mxu1 %v12238_v48  ;;  %v6858_v42 = vpop.f32.mrf.mxu0  ;;  %v12206_v39 = vcombine.high %v881_v18, %v889_v49  ;;  %v865_v43 = vld [vmem:[%s18511_s1 + $0x19a8] sm:$0xff]  ;;  %v12205_v58 = vcombine.low %v881_v18, %v889_v49 }
 0x2cb   :  { %v7648_v20 = vmul.f32 %v7589_v61, %v6896_v11  ;;  %v6898_v41 = vadd.f32 %v6897_v36, %v6857_v12  ;;  %7151 = vmatpush1.bf16.msra.mxu0 %v11981_v3  ;;  %v12190_v1 = vcombine.high %v865_v43, %v873_v0  ;;  %v601_v37 = vld [vmem:[%s18511_s1 + $0x1168] sm:$0xff]  ;;  %v12189_v6 = vcombine.low %v865_v43, %v873_v0 }
 0x2cc   :  { %v6899_v15 = vpop.f32.mrf.mxu1  ;;  %v6859_v54 = vpop.f32.mrf.mxu0  ;;  %7152 = vmatprep.subr.bf16.mxu0 %v11966_v10  ;;  %v849_v46 = vld [vmem:[%s18511_s1 + $0x1928] sm:$0xff]  ;;  %v11917_v19 = vcombine.low %v593_v2, %v601_v37 }
 0x2cd   :  { %7192 = vmatpush1.bf16.msra.mxu1 %v12237_v4  ;;  %v7748_v33 = vadd.f32 %v7689_v5, %v7648_v20  ;;  %v7649_v24 = vmul.f32 %v7593_v7, %v6898_v41  ;;  %v857_v3 = vld [vmem:[%s18511_s1 + $0x1968] sm:$0xff]  ;;  %v11933_v5 = vcombine.low %v609_v55, %v617_v52  ;;  %v11918_v7 = vcombine.high %v593_v2, %v601_v37 }
 0x2ce   :  { %v6900_v35 = vpop.f32.mrf.mxu1  ;;  %7193 = vmatprep.subr.bf16.mxu1 %v12222_v14  ;;  %v12174_v10 = vcombine.high %v849_v46, %v857_v3  ;;  %v577_v11 = vld [vmem:[%s18511_s1 + $0x10a8] sm:$0xff]  ;;  %v12173_v27 = vcombine.low %v849_v46, %v857_v3 }
 0x2cf   :  { %v7764_v48 = vmax.f32 %v7748_v33, 0.0  ;;  %v7749_v51 = vadd.f32 %v7693_v25, %v7649_v24  ;;  %7153 = vmatpush1.bf16.msra.mxu0 %v11965_v26  ;;  %v585_v12 = vld [vmem:[%s18511_s1 + $0x10e8] sm:$0xff] }
 0x2d0   :  { %7154 = vmatprep.subr.bf16.mxu0 %v11950_v29  ;;  %v833_v36 = vld [vmem:[%s18511_s1 + $0x18a8] sm:$0xff]  ;;  %v11902_v17 = vcombine.high %v577_v11, %v585_v12  ;;  %v11901_v25 = vcombine.low %v577_v11, %v585_v12 }
 0x2d1   :  { %7194 = vmatpush1.bf16.msra.mxu1 %v12221_v28  ;;  %v15998_v60 = vmax.f32 %v7760_v47, %v7764_v48  ;;  %v7765_v61 = vmax.f32 %v7749_v51, 0.0  ;;  %v841_v14 = vld [vmem:[%s18511_s1 + $0x18e8] sm:$0xff] }
 0x2d2   :  { %7195 = vmatprep.subr.bf16.mxu1 %v12206_v39  ;;  %v12158_v42 = vcombine.high %v833_v36, %v841_v14  ;;  %v561_v18 = vld [vmem:[%s18511_s1 + $0x1028] sm:$0xff]  ;;  %v12157_v15 = vcombine.low %v833_v36, %v841_v14 }
 0x2d3   :  { %v16012_v4 = vmax.f32 %v7761_v44, %v7765_v61  ;;  %7155 = vmatpush1.bf16.msra.mxu0 %v11949_v56  ;;  %v569_v49 = vld [vmem:[%s18511_s1 + $0x1068] sm:$0xff] }
 0x2d4   :  { %7156 = vmatprep.subr.bf16.mxu0 %v11934_v59  ;;  %v817_v20 = vld [vmem:[%s18511_s1 + $0x1828] sm:$0xff]  ;;  %v11886_v26 = vcombine.high %v561_v18, %v569_v49  ;;  %v11885_v24 = vcombine.low %v561_v18, %v569_v49 }
 0x2d5   :  { %7196 = vmatpush1.bf16.msra.mxu1 %v12205_v58  ;;  %v825_v41 = vld [vmem:[%s18511_s1 + $0x1868] sm:$0xff] }
 0x2d6   :  { %7197 = vmatprep.subr.bf16.mxu1 %v12190_v1  ;;  %v12142_v54 = vcombine.high %v817_v20, %v825_v41  ;;  %v801_v28 = vld [vmem:[%s18511_s1 + $0x17a8] sm:$0xff]  ;;  %v12141_v35 = vcombine.low %v817_v20, %v825_v41 }
 0x2d7   :  { %7157 = vmatpush1.bf16.msra.mxu0 %v11933_v5  ;;  %v809_v29 = vld [vmem:[%s18511_s1 + $0x17e8] sm:$0xff] }
 0x2d8   :  { %7158 = vmatprep.subr.bf16.mxu0 %v11918_v7  ;;  %v1065_v33 = vld [vmem:[%s18511_s1 + $0x1fe8] sm:$0xff]  ;;  %v12126_v39 = vcombine.high %v801_v28, %v809_v29  ;;  %v12125_v48 = vcombine.low %v801_v28, %v809_v29 }
 0x2d9   :  { %7198 = vmatpush1.bf16.msra.mxu1 %v12189_v6  ;;  %v12382_v55 = vcombine.high %v1057_v63, %v1065_v33  ;;  %v785_v52 = vld [vmem:[%s18511_s1 + $0x1728] sm:$0xff]  ;;  %v12381_v51 = vcombine.low %v1057_v63, %v1065_v33 }
 0x2da   :  { %7199 = vmatprep.subr.bf16.mxu1 %v12174_v10  ;;  %v793_v43 = vld [vmem:[%s18511_s1 + $0x1768] sm:$0xff] }
 0x2db   :  { %7159 = vmatpush1.bf16.msra.mxu0 %v11917_v19  ;;  %v1041_v0 = vld [vmem:[%s18511_s1 + $0x1f28] sm:$0xff]  ;;  %v12110_v56 = vcombine.high %v785_v52, %v793_v43  ;;  %v12109_v2 = vcombine.low %v785_v52, %v793_v43 }
 0x2dc   :  { %7160 = vmatprep.subr.bf16.mxu0 %v11902_v17  ;;  %v1049_v47 = vld [vmem:[%s18511_s1 + $0x1f68] sm:$0xff] }
 0x2dd   :  { %7200 = vmatpush1.bf16.msra.mxu1 %v12173_v27  ;;  %v12366_v58 = vcombine.high %v1041_v0, %v1049_v47  ;;  %v769_v59 = vld [vmem:[%s18511_s1 + $0x16a8] sm:$0xff]  ;;  %v12365_v37 = vcombine.low %v1041_v0, %v1049_v47 }
 0x2de   :  { %7201 = vmatprep.subr.bf16.mxu1 %v12158_v42  ;;  %v777_v44 = vld [vmem:[%s18511_s1 + $0x16e8] sm:$0xff] }
 0x2df   :  { %7161 = vmatpush1.bf16.msra.mxu0 %v11901_v25  ;;  %v1025_v61 = vld [vmem:[%s18511_s1 + $0x1ea8] sm:$0xff]  ;;  %v12094_v46 = vcombine.high %v769_v59, %v777_v44  ;;  %v12093_v11 = vcombine.low %v769_v59, %v777_v44 }
 0x2e0   :  { %7162 = vmatprep.subr.bf16.mxu0 %v11886_v26  ;;  %v1033_v1 = vld [vmem:[%s18511_s1 + $0x1ee8] sm:$0xff] }
 0x2e1   :  { %7202 = vmatpush1.bf16.msra.mxu1 %v12157_v15  ;;  %v12350_v3 = vcombine.high %v1025_v61, %v1033_v1  ;;  %v753_v5 = vld [vmem:[%s18511_s1 + $0x1628] sm:$0xff]  ;;  %v12349_v12 = vcombine.low %v1025_v61, %v1033_v1 }
 0x2e2   :  { %7203 = vmatprep.subr.bf16.mxu1 %v12142_v54  ;;  %v761_v6 = vld [vmem:[%s18511_s1 + $0x1668] sm:$0xff] }
 0x2e3   :  { %7163 = vmatpush1.bf16.msra.mxu0 %v11885_v24  ;;  %v1009_v7 = vld [vmem:[%s18511_s1 + $0x1e28] sm:$0xff]  ;;  %v12078_v36 = vcombine.high %v753_v5, %v761_v6  ;;  %v12077_v18 = vcombine.low %v753_v5, %v761_v6 }
 0x2e4   :  { %7164 = vmatprep.subr.bf16.mxu0 %v12126_v39  ;;  %v1017_v10 = vld [vmem:[%s18511_s1 + $0x1e68] sm:$0xff] }
 0x2e5   :  { %7204 = vmatpush1.bf16.msra.mxu1 %v12141_v35  ;;  %v12334_v14 = vcombine.high %v1009_v7, %v1017_v10  ;;  %v737_v19 = vld [vmem:[%s18511_s1 + $0x15a8] sm:$0xff]  ;;  %v12333_v49 = vcombine.low %v1009_v7, %v1017_v10 }
 0x2e6   :  { %7205 = vmatprep.subr.bf16.mxu1 %v12382_v55  ;;  %v745_v27 = vld [vmem:[%s18511_s1 + $0x15e8] sm:$0xff] }
 0x2e7   :  { %7165 = vmatpush2.bf16.msra.mxu0 %v12125_v48  ;;  %v993_v17 = vld [vmem:[%s18511_s1 + $0x1da8] sm:$0xff]  ;;  %v12062_v20 = vcombine.high %v737_v19, %v745_v27  ;;  %v12061_v28 = vcombine.low %v737_v19, %v745_v27 }
 0x2e8   :  { %7166 = vmatprep.subr.bf16.mxu0 %v12110_v56  ;;  %v1001_v42 = vld [vmem:[%s18511_s1 + $0x1de8] sm:$0xff] }
 0x2e9   :  { %7206 = vmatpush2.bf16.msra.mxu1 %v12381_v51  ;;  %v12318_v41 = vcombine.high %v993_v17, %v1001_v42  ;;  %v721_v25 = vld [vmem:[%s18511_s1 + $0x1528] sm:$0xff]  ;;  %v12317_v29 = vcombine.low %v993_v17, %v1001_v42 }
 0x2ea   :  { %7207 = vmatprep.subr.bf16.mxu1 %v12366_v58  ;;  %v729_v15 = vld [vmem:[%s18511_s1 + $0x1568] sm:$0xff] }
 0x2eb   :  { %7167 = vmatpush2.bf16.msra.mxu0 %v12109_v2  ;;  %v977_v26 = vld [vmem:[%s18511_s1 + $0x1d28] sm:$0xff]  ;;  %v12046_v63 = vcombine.high %v721_v25, %v729_v15  ;;  %v12045_v52 = vcombine.low %v721_v25, %v729_v15  ;;  %v162_v2 = vld [vmem:[%s18511_s1 + $0x3b0] sm:$0xff] }
 0x2ec   :  { %7168 = vmatprep.subr.bf16.mxu0 %v12094_v46  ;;  %v985_v54 = vld [vmem:[%s18511_s1 + $0x1d68] sm:$0xff]  ;;  %v418_v46 = vld [vmem:[%s18511_s1 + $0xbb0] sm:$0xff] }
 0x2ed   :  { %7208 = vmatpush2.bf16.msra.mxu1 %v12365_v37  ;;  %v12302_v33 = vcombine.high %v977_v26, %v985_v54  ;;  %v705_v24 = vld [vmem:[%s18511_s1 + $0x14a8] sm:$0xff]  ;;  %v12301_v43 = vcombine.low %v977_v26, %v985_v54  ;;  %v170_v37 = vld [vmem:[%s18511_s1 + $0x3f0] sm:$0xff] }
 0x2ee   :  { %7209 = vmatprep.subr.bf16.mxu1 %v12350_v3  ;;  %v713_v35 = vld [vmem:[%s18511_s1 + $0x14e8] sm:$0xff]  ;;  %v426_v3 = vld [vmem:[%s18511_s1 + $0xbf0] sm:$0xff]  ;;  %v11488_v7 = vcombine.high %v162_v2, %v170_v37  ;;  %v11487_v19 = vcombine.low %v162_v2, %v170_v37 }
 0x2ef   :  { %7169 = vmatpush2.bf16.msra.mxu0 %v12093_v11  ;;  %v961_v39 = vld [vmem:[%s18511_s1 + $0x1ca8] sm:$0xff]  ;;  %v12030_v0 = vcombine.high %v705_v24, %v713_v35  ;;  %v12029_v59 = vcombine.low %v705_v24, %v713_v35  ;;  %v11744_v10 = vcombine.high %v418_v46, %v426_v3  ;;  %v146_v11 = vld [vmem:[%s18511_s1 + $0x330] sm:$0xff]  ;;  %v11743_v27 = vcombine.low %v418_v46, %v426_v3 }
 0x2f0   :  { %7170 = vmatprep.subr.bf16.mxu0 %v12078_v36  ;;  %v969_v55 = vld [vmem:[%s18511_s1 + $0x1ce8] sm:$0xff]  ;;  %v402_v36 = vld [vmem:[%s18511_s1 + $0xb30] sm:$0xff] }
 0x2f1   :  { %7210 = vmatpush2.bf16.msra.mxu1 %v12349_v12  ;;  %v12286_v47 = vcombine.high %v961_v39, %v969_v55  ;;  %v689_v48 = vld [vmem:[%s18511_s1 + $0x1428] sm:$0xff]  ;;  %v12285_v44 = vcombine.low %v961_v39, %v969_v55  ;;  %v154_v12 = vld [vmem:[%s18511_s1 + $0x370] sm:$0xff] }
 0x2f2   :  { %7211 = vmatprep.subr.bf16.mxu1 %v12334_v14  ;;  %v697_v51 = vld [vmem:[%s18511_s1 + $0x1468] sm:$0xff]  ;;  %v410_v14 = vld [vmem:[%s18511_s1 + $0xb70] sm:$0xff]  ;;  %v11472_v17 = vcombine.high %v146_v11, %v154_v12  ;;  %v11471_v26 = vcombine.low %v146_v11, %v154_v12 }
 0x2f3   :  { %7171 = vmatpush2.bf16.msra.mxu0 %v12077_v18  ;;  %v945_v56 = vld [vmem:[%s18511_s1 + $0x1c28] sm:$0xff]  ;;  %v12014_v61 = vcombine.high %v689_v48, %v697_v51  ;;  %v12013_v5 = vcombine.low %v689_v48, %v697_v51  ;;  %v11728_v42 = vcombine.high %v402_v36, %v410_v14  ;;  %v130_v18 = vld [vmem:[%s18511_s1 + $0x2b0] sm:$0xff] }
 0x2f4   :  { %7172 = vmatprep.subr.bf16.mxu0 %v12062_v20  ;;  %v953_v58 = vld [vmem:[%s18511_s1 + $0x1c68] sm:$0xff]  ;;  %v394_v25 = vld [vmem:[%s18511_s1 + $0xaf0] sm:$0xff] }
 0x2f5   :  { %7212 = vmatpush2.bf16.msra.mxu1 %v12333_v49  ;;  %v12270_v1 = vcombine.high %v945_v56, %v953_v58  ;;  %v12269_v6 = vcombine.low %v945_v56, %v953_v58  ;;  %v138_v49 = vld [vmem:[%s18511_s1 + $0x2f0] sm:$0xff] }
 0x2f6   :  { %7213 = vmatprep.subr.bf16.mxu1 %v12318_v41  ;;  %v386_v41 = vld [vmem:[%s18511_s1 + $0xab0] sm:$0xff]  ;;  %v11455_v48 = vcombine.low %v130_v18, %v138_v49 }
 0x2f7   :  { %7173 = vmatpush2.bf16.msra.mxu0 %v12061_v28  ;;  %v11712_v24 = vcombine.high %v386_v41, %v394_v25  ;;  %v114_v35 = vld [vmem:[%s18511_s1 + $0x230] sm:$0xff]  ;;  %v11711_v56 = vcombine.low %v386_v41, %v394_v25 }
 0x2f8   :  { %7174 = vmatprep.subr.bf16.mxu0 %v12046_v63  ;;  %v11456_v63 = vcombine.high %v130_v18, %v138_v49  ;;  %v122_v39 = vld [vmem:[%s18511_s1 + $0x270] sm:$0xff] }
 0x2f9   :  { %7214 = vmatpush2.bf16.msra.mxu1 %v12317_v29  ;;  %v11727_v29 = vcombine.low %v402_v36, %v410_v14  ;;  %v11440_v58 = vcombine.high %v114_v35, %v122_v39  ;;  %v354_v2 = vld [vmem:[%s18511_s1 + $0x9b0] sm:$0xff]  ;;  %v11439_v46 = vcombine.low %v114_v35, %v122_v39 }
 0x2fa   :  { %7215 = vmatprep.subr.bf16.mxu1 %v12302_v33  ;;  %v362_v37 = vld [vmem:[%s18511_s1 + $0x9f0] sm:$0xff] }
 0x2fb   :  { %7175 = vmatpush2.bf16.msra.mxu0 %v12045_v52  ;;  %v338_v11 = vld [vmem:[%s18511_s1 + $0x930] sm:$0xff]  ;;  %v11679_v14 = vcombine.low %v354_v2, %v362_v37 }
 0x2fc   :  { %7176 = vmatprep.subr.bf16.mxu0 %v12030_v0  ;;  %v378_v0 = vld [vmem:[%s18511_s1 + $0xa70] sm:$0xff] }
 0x2fd   :  { %7216 = vmatpush2.bf16.msra.mxu1 %v12301_v43  ;;  %v370_v43 = vld [vmem:[%s18511_s1 + $0xa30] sm:$0xff] }
 0x2fe   :  { %7217 = vmatprep.subr.bf16.mxu1 %v12286_v47  ;;  %v11695_v3 = vcombine.low %v370_v43, %v378_v0  ;;  %v346_v12 = vld [vmem:[%s18511_s1 + $0x970] sm:$0xff] }
 0x2ff   :  { %7177 = vmatpush2.bf16.msra.mxu0 %v12029_v59  ;;  %v322_v18 = vld [vmem:[%s18511_s1 + $0x8b0] sm:$0xff]  ;;  %v11663_v41 = vcombine.low %v338_v11, %v346_v12 }
 0x300   :  { %7178 = vmatprep.subr.bf16.mxu0 %v12014_v61  ;;  %v98_v61 = vld [vmem:[%s18511_s1 + $0x1b0] sm:$0xff] }
 0x301   :  { %7218 = vmatpush2.bf16.msra.mxu1 %v12285_v44  ;;  %v11696_v44 = vcombine.high %v370_v43, %v378_v0  ;;  %v330_v49 = vld [vmem:[%s18511_s1 + $0x8f0] sm:$0xff] }
 0x302   :  { %7219 = vmatprep.subr.bf16.mxu1 %v12270_v1  ;;  %v106_v1 = vld [vmem:[%s18511_s1 + $0x1f0] sm:$0xff] }
 0x303   :  { %7179 = vmatpush2.bf16.msra.mxu0 %v12013_v5  ;;  %v11424_v5 = vcombine.high %v98_v61, %v106_v1  ;;  %v11423_v36 = vcombine.low %v98_v61, %v106_v1  ;;  %v298_v43 = vld [vmem:[%s18511_s1 + $0x7f0] sm:$0xff] }
 0x304   :  { %7230 = vmatprep.subr.bf16.mxu0 %v11488_v7  ;;  %v82_v7 = vld [vmem:[%s18511_s1 + $0x130] sm:$0xff] }
 0x305   :  { %7220 = vmatpush2.bf16.msra.mxu1 %v12269_v6  ;;  %v11680_v6 = vcombine.high %v354_v2, %v362_v37  ;;  %v546_v0 = vld [vmem:[%s18511_s1 + $0xfb0] sm:$0xff] }
 0x306   :  { %7271 = vmatprep.subr.bf16.mxu1 %v11744_v10  ;;  %v6936_v20 = vpop.f32.mrf.mxu0  ;;  %7181 = vmatmul.mubr.bf16.vlgmr.msra.gmra.mxu0 %v13785_v32  ;;  %v90_v10 = vld [vmem:[%s18511_s1 + $0x170] sm:$0xff] }
 0x307   :  { %7231 = vmatpush1.bf16.msra.mxu0 %v11487_v19  ;;  %7262 = vmatprep.mubr.bf16.mxu0 %v13742_v9  ;;  %v11408_v19 = vcombine.high %v82_v7, %v90_v10  ;;  %v530_v61 = vld [vmem:[%s18511_s1 + $0xf30] sm:$0xff] }
 0x308   :  { %v6977_v15 = vpop.f32.mrf.mxu1  ;;  %7222 = vmatmul.mubr.bf16.vlgmr.msra.gmra.mxu1 %v14086_v50  ;;  %v6938_v28 = vpop.f32.mrf.mxu0  ;;  %7232 = vmatprep.subr.bf16.mxu0 %v11472_v17  ;;  %v66_v17 = vld [vmem:[%s18511_s1 + $0xb0] sm:$0xff] }
 0x309   :  { %v16172_v54 = vadd.f32 %v6977_v15, %v6936_v20  ;;  %7272 = vmatpush1.bf16.msra.mxu1 %v11743_v27  ;;  %7303 = vmatprep.mubr.bf16.mxu1 %v13753_v13  ;;  %v11664_v27 = vcombine.high %v338_v11, %v346_v12  ;;  %v11407_v20 = vcombine.low %v82_v7, %v90_v10  ;;  %v538_v1 = vld [vmem:[%s18511_s1 + $0xf70] sm:$0xff] }
 0x30a   :  { %v6979_v33 = vpop.f32.mrf.mxu1  ;;  %7273 = vmatprep.subr.bf16.mxu1 %v11728_v42  ;;  %v6940_v52 = vpop.f32.mrf.mxu0  ;;  %v74_v42 = vld [vmem:[%s18511_s1 + $0xf0] sm:$0xff]  ;;  %v11648_v15 = vcombine.high %v322_v18, %v330_v49  ;;  %v11855_v12 = vcombine.low %v530_v61, %v538_v1 }
 0x30b   :  { %v16181_v55 = vadd.f32 %v6979_v33, %v6938_v28  ;;  %7233 = vmatpush1.bf16.msra.mxu0 %v11471_v26  ;;  %v11392_v25 = vcombine.high %v66_v17, %v74_v42  ;;  %v50_v26 = vld [vmem:[%s18511_s1 + $0x30] sm:$0xff]  ;;  %v11391_v33 = vcombine.low %v66_v17, %v74_v42 }
 0x30c   :  { %v6981_v47 = vpop.f32.mrf.mxu1  ;;  %v6941_v51 = vpop.f32.mrf.mxu0  ;;  %7234 = vmatprep.subr.bf16.mxu0 %v11456_v63  ;;  %v58_v28 = vld [vmem:[%s18511_s1 + $0x70] sm:$0xff] }
 0x30d   :  { %7274 = vmatpush1.bf16.msra.mxu1 %v11727_v29  ;;  %v306_v29 = vld [vmem:[%s18511_s1 + $0x830] sm:$0xff]  ;;  %v11376_v35 = vcombine.high %v50_v26, %v58_v28 }
 0x30e   :  { %v6982_v59 = vpop.f32.mrf.mxu1  ;;  %7275 = vmatprep.subr.bf16.mxu1 %v11712_v24  ;;  %v314_v63 = vld [vmem:[%s18511_s1 + $0x870] sm:$0xff]  ;;  %v11647_v24 = vcombine.low %v322_v18, %v330_v49 }
 0x30f   :  { %7235 = vmatpush1.bf16.msra.mxu0 %v11455_v48  ;;  %v11632_v39 = vcombine.high %v306_v29, %v314_v63  ;;  %v290_v52 = vld [vmem:[%s18511_s1 + $0x7b0] sm:$0xff]  ;;  %v11375_v48 = vcombine.low %v50_v26, %v58_v28  ;;  %v11631_v51 = vcombine.low %v306_v29, %v314_v63 }
 0x310   :  { %7236 = vmatprep.subr.bf16.mxu0 %v11440_v58  ;;  %v554_v47 = vld [vmem:[%s18511_s1 + $0xff0] sm:$0xff]  ;;  %v11615_v2 = vcombine.low %v290_v52, %v298_v43 }
 0x311   :  { %7276 = vmatpush1.bf16.msra.mxu1 %v11711_v56  ;;  %v11616_v56 = vcombine.high %v290_v52, %v298_v43  ;;  %v11872_v58 = vcombine.high %v546_v0, %v554_v47  ;;  %v274_v59 = vld [vmem:[%s18511_s1 + $0x730] sm:$0xff]  ;;  %v11871_v37 = vcombine.low %v546_v0, %v554_v47 }
 0x312   :  { %7277 = vmatprep.subr.bf16.mxu1 %v11696_v44  ;;  %v282_v44 = vld [vmem:[%s18511_s1 + $0x770] sm:$0xff] }
 0x313   :  { %7237 = vmatpush1.bf16.msra.mxu0 %v11439_v46  ;;  %v11600_v46 = vcombine.high %v274_v59, %v282_v44  ;;  %v514_v7 = vld [vmem:[%s18511_s1 + $0xeb0] sm:$0xff]  ;;  %v11599_v11 = vcombine.low %v274_v59, %v282_v44 }
 0x314   :  { %7238 = vmatprep.subr.bf16.mxu0 %v11424_v5  ;;  %v258_v5 = vld [vmem:[%s18511_s1 + $0x6b0] sm:$0xff] }
 0x315   :  { %7278 = vmatpush1.bf16.msra.mxu1 %v11695_v3  ;;  %v11856_v3 = vcombine.high %v530_v61, %v538_v1  ;;  %v522_v10 = vld [vmem:[%s18511_s1 + $0xef0] sm:$0xff] }
 0x316   :  { %7279 = vmatprep.subr.bf16.mxu1 %v11680_v6  ;;  %v266_v6 = vld [vmem:[%s18511_s1 + $0x6f0] sm:$0xff]  ;;  %v11839_v49 = vcombine.low %v514_v7, %v522_v10 }
 0x317   :  { %7239 = vmatpush1.bf16.msra.mxu0 %v11423_v36  ;;  %v11584_v36 = vcombine.high %v258_v5, %v266_v6  ;;  %v498_v17 = vld [vmem:[%s18511_s1 + $0xe30] sm:$0xff]  ;;  %v11583_v18 = vcombine.low %v258_v5, %v266_v6 }
 0x318   :  { %7240 = vmatprep.subr.bf16.mxu0 %v11408_v19  ;;  %v242_v19 = vld [vmem:[%s18511_s1 + $0x630] sm:$0xff] }
 0x319   :  { %7280 = vmatpush1.bf16.msra.mxu1 %v11679_v14  ;;  %v11840_v14 = vcombine.high %v514_v7, %v522_v10  ;;  %v506_v42 = vld [vmem:[%s18511_s1 + $0xe70] sm:$0xff] }
 0x31a   :  { %7281 = vmatprep.subr.bf16.mxu1 %v11664_v27  ;;  %v250_v27 = vld [vmem:[%s18511_s1 + $0x670] sm:$0xff]  ;;  %v11823_v63 = vcombine.low %v498_v17, %v506_v42 }
 0x31b   :  { %7241 = vmatpush1.bf16.msra.mxu0 %v11407_v20  ;;  %v11568_v20 = vcombine.high %v242_v19, %v250_v27  ;;  %v482_v26 = vld [vmem:[%s18511_s1 + $0xdb0] sm:$0xff]  ;;  %v11567_v29 = vcombine.low %v242_v19, %v250_v27 }
 0x31c   :  { %7242 = vmatprep.subr.bf16.mxu0 %v11392_v25  ;;  %v226_v25 = vld [vmem:[%s18511_s1 + $0x5b0] sm:$0xff] }
 0x31d   :  { %7282 = vmatpush1.bf16.msra.mxu1 %v11663_v41  ;;  %v11824_v41 = vcombine.high %v498_v17, %v506_v42  ;;  %v490_v28 = vld [vmem:[%s18511_s1 + $0xdf0] sm:$0xff] }
 0x31e   :  { %7283 = vmatprep.subr.bf16.mxu1 %v11648_v15  ;;  %v234_v15 = vld [vmem:[%s18511_s1 + $0x5f0] sm:$0xff]  ;;  %v11807_v47 = vcombine.low %v482_v26, %v490_v28 }
 0x31f   :  { %7243 = vmatpush1.bf16.msra.mxu0 %v11391_v33  ;;  %v11552_v33 = vcombine.high %v226_v25, %v234_v15  ;;  %v466_v52 = vld [vmem:[%s18511_s1 + $0xd30] sm:$0xff]  ;;  %v11551_v0 = vcombine.low %v226_v25, %v234_v15 }
 0x320   :  { %7244 = vmatprep.subr.bf16.mxu0 %v11376_v35  ;;  %v210_v35 = vld [vmem:[%s18511_s1 + $0x530] sm:$0xff] }
 0x321   :  { %7284 = vmatpush1.bf16.msra.mxu1 %v11647_v24  ;;  %v11808_v24 = vcombine.high %v482_v26, %v490_v28  ;;  %v474_v43 = vld [vmem:[%s18511_s1 + $0xd70] sm:$0xff] }
 0x322   :  { %7285 = vmatprep.subr.bf16.mxu1 %v11632_v39  ;;  %v218_v39 = vld [vmem:[%s18511_s1 + $0x570] sm:$0xff]  ;;  %v11791_v1 = vcombine.low %v466_v52, %v474_v43 }
 0x323   :  { %7245 = vmatpush1.bf16.msra.mxu0 %v11375_v48  ;;  %v11536_v48 = vcombine.high %v210_v35, %v218_v39  ;;  %v450_v59 = vld [vmem:[%s18511_s1 + $0xcb0] sm:$0xff]  ;;  %v11535_v61 = vcombine.low %v210_v35, %v218_v39 }
 0x324   :  { %7246 = vmatprep.subr.bf16.mxu0 %v11616_v56  ;;  %v194_v56 = vld [vmem:[%s18511_s1 + $0x4b0] sm:$0xff] }
 0x325   :  { %7286 = vmatpush1.bf16.msra.mxu1 %v11631_v51  ;;  %v11792_v51 = vcombine.high %v466_v52, %v474_v43  ;;  %v458_v44 = vld [vmem:[%s18511_s1 + $0xcf0] sm:$0xff] }
 0x326   :  { %7287 = vmatprep.subr.bf16.mxu1 %v11872_v58  ;;  %v202_v58 = vld [vmem:[%s18511_s1 + $0x4f0] sm:$0xff]  ;;  %v11775_v10 = vcombine.low %v450_v59, %v458_v44 }
 0x327   :  { %7247 = vmatpush2.bf16.msra.mxu0 %v11615_v2  ;;  %v11520_v2 = vcombine.high %v194_v56, %v202_v58  ;;  %v434_v5 = vld [vmem:[%s18511_s1 + $0xc30] sm:$0xff]  ;;  %v11519_v7 = vcombine.low %v194_v56, %v202_v58 }
 0x328   :  { %7248 = vmatprep.subr.bf16.mxu0 %v11600_v46  ;;  %v178_v46 = vld [vmem:[%s18511_s1 + $0x430] sm:$0xff] }
 0x329   :  { %7288 = vmatpush2.bf16.msra.mxu1 %v11871_v37  ;;  %v11776_v37 = vcombine.high %v450_v59, %v458_v44  ;;  %v442_v6 = vld [vmem:[%s18511_s1 + $0xc70] sm:$0xff] }
 0x32a   :  { %7289 = vmatprep.subr.bf16.mxu1 %v11856_v3  ;;  %v186_v3 = vld [vmem:[%s18511_s1 + $0x470] sm:$0xff]  ;;  %v11759_v42 = vcombine.low %v434_v5, %v442_v6 }
 0x32b   :  { %7249 = vmatpush2.bf16.msra.mxu0 %v11599_v11  ;;  %v11504_v11 = vcombine.high %v178_v46, %v186_v3  ;;  %v930_v19 = vld [vmem:[%s18511_s1 + $0x1bb0] sm:$0xff]  ;;  %v11503_v17 = vcombine.low %v178_v46, %v186_v3 }
 0x32c   :  { %7250 = vmatprep.subr.bf16.mxu0 %v11584_v36  ;;  %v674_v36 = vld [vmem:[%s18511_s1 + $0x13b0] sm:$0xff] }
 0x32d   :  { %7290 = vmatpush2.bf16.msra.mxu1 %v11855_v12  ;;  %v11760_v12 = vcombine.high %v434_v5, %v442_v6  ;;  %v938_v27 = vld [vmem:[%s18511_s1 + $0x1bf0] sm:$0xff] }
 0x32e   :  { %7291 = vmatprep.subr.bf16.mxu1 %v11840_v14  ;;  %v682_v14 = vld [vmem:[%s18511_s1 + $0x13f0] sm:$0xff]  ;;  %v12255_v28 = vcombine.low %v930_v19, %v938_v27 }
 0x32f   :  { %7251 = vmatpush2.bf16.msra.mxu0 %v11583_v18  ;;  %v12000_v18 = vcombine.high %v674_v36, %v682_v14  ;;  %v914_v25 = vld [vmem:[%s18511_s1 + $0x1b30] sm:$0xff]  ;;  %v11999_v26 = vcombine.low %v674_v36, %v682_v14 }
 0x330   :  { %7252 = vmatprep.subr.bf16.mxu0 %v11568_v20  ;;  %v658_v20 = vld [vmem:[%s18511_s1 + $0x1330] sm:$0xff] }
 0x331   :  { %7292 = vmatpush2.bf16.msra.mxu1 %v11839_v49  ;;  %v12256_v49 = vcombine.high %v930_v19, %v938_v27  ;;  %v922_v15 = vld [vmem:[%s18511_s1 + $0x1b70] sm:$0xff] }
 0x332   :  { %7293 = vmatprep.subr.bf16.mxu1 %v11824_v41  ;;  %v666_v41 = vld [vmem:[%s18511_s1 + $0x1370] sm:$0xff] }
 0x333   :  { %7253 = vmatpush2.bf16.msra.mxu0 %v11567_v29  ;;  %v11984_v29 = vcombine.high %v658_v20, %v666_v41  ;;  %v898_v39 = vld [vmem:[%s18511_s1 + $0x1ab0] sm:$0xff] }
 0x334   :  { %7254 = vmatprep.subr.bf16.mxu0 %v11552_v33  ;;  %v642_v33 = vld [vmem:[%s18511_s1 + $0x12b0] sm:$0xff] }
 0x335   :  { %7294 = vmatpush2.bf16.msra.mxu1 %v11823_v63  ;;  %v12240_v63 = vcombine.high %v914_v25, %v922_v15  ;;  %v906_v52 = vld [vmem:[%s18511_s1 + $0x1af0] sm:$0xff] }
 0x336   :  { %7295 = vmatprep.subr.bf16.mxu1 %v11808_v24  ;;  %v650_v24 = vld [vmem:[%s18511_s1 + $0x12f0] sm:$0xff] }
 0x337   :  { %7255 = vmatpush2.bf16.msra.mxu0 %v11551_v0  ;;  %v11968_v56 = vcombine.high %v642_v33, %v650_v24  ;;  %v11967_v5 = vcombine.low %v642_v33, %v650_v24  ;;  %v610_v36 = vld [vmem:[%s18511_s1 + $0x11b0] sm:$0xff] }
 0x338   :  { %7256 = vmatprep.subr.bf16.mxu0 %v11536_v48  ;;  %v618_v14 = vld [vmem:[%s18511_s1 + $0x11f0] sm:$0xff] }
 0x339   :  { %7296 = vmatpush2.bf16.msra.mxu1 %v11807_v47  ;;  %v11983_v47 = vcombine.low %v658_v20, %v666_v41  ;;  %v866_v19 = vld [vmem:[%s18511_s1 + $0x19b0] sm:$0xff] }
 0x33a   :  { %7297 = vmatprep.subr.bf16.mxu1 %v11792_v51  ;;  %v12239_v51 = vcombine.low %v914_v25, %v922_v15  ;;  %v874_v27 = vld [vmem:[%s18511_s1 + $0x19f0] sm:$0xff] }
 0x33b   :  { %7257 = vmatpush2.bf16.msra.mxu0 %v11535_v61  ;;  %v12224_v61 = vcombine.high %v898_v39, %v906_v52  ;;  %v594_v20 = vld [vmem:[%s18511_s1 + $0x1130] sm:$0xff] }
 0x33c   :  { %7258 = vmatprep.subr.bf16.mxu0 %v11520_v2  ;;  %v602_v41 = vld [vmem:[%s18511_s1 + $0x1170] sm:$0xff] }
 0x33d   :  { %7298 = vmatpush2.bf16.msra.mxu1 %v11791_v1  ;;  %v634_v1 = vld [vmem:[%s18511_s1 + $0x1270] sm:$0xff] }
 0x33e   :  { %7299 = vmatprep.subr.bf16.mxu1 %v11776_v37  ;;  %v882_v37 = vld [vmem:[%s18511_s1 + $0x1a30] sm:$0xff] }
 0x33f   :  { %7259 = vmatpush2.bf16.msra.mxu0 %v11519_v7  ;;  %v12223_v7 = vcombine.low %v898_v39, %v906_v52  ;;  %v850_v25 = vld [vmem:[%s18511_s1 + $0x1930] sm:$0xff]  ;;  %v11919_v52 = vcombine.low %v594_v20, %v602_v41 }
 0x340   :  { %7260 = vmatprep.subr.bf16.mxu0 %v11504_v11  ;;  %v858_v15 = vld [vmem:[%s18511_s1 + $0x1970] sm:$0xff] }
 0x341   :  { %7300 = vmatpush2.bf16.msra.mxu1 %v11775_v10  ;;  %v578_v33 = vld [vmem:[%s18511_s1 + $0x10b0] sm:$0xff] }
 0x342   :  { %7301 = vmatprep.subr.bf16.mxu1 %v11760_v12  ;;  %v586_v24 = vld [vmem:[%s18511_s1 + $0x10f0] sm:$0xff] }
 0x343   :  { %7261 = vmatpush2.bf16.msra.mxu0 %v11503_v17  ;;  %v842_v39 = vld [vmem:[%s18511_s1 + $0x18f0] sm:$0xff] }
 0x344   :  { %7312 = vmatprep.subr.bf16.mxu0 %v12000_v18  ;;  %v11936_v18 = vcombine.high %v610_v36, %v618_v14 }
 0x345   :  { %7302 = vmatpush2.bf16.msra.mxu1 %v11759_v42 }
 0x346   :  { %7353 = vmatprep.subr.bf16.mxu1 %v12256_v49  ;;  %v7018_v35 = vpop.f32.mrf.mxu0  ;;  %7263 = vmatmul.mubr.bf16.vlgmr.msra.gmra.mxu0 %v13863_v23  ;;  %v12192_v49 = vcombine.high %v866_v19, %v874_v27 }
 0x347   :  { %v7019_v43 = vadd.f32 %v7018_v35, %v16172_v54  ;;  %7313 = vmatpush1.bf16.msra.mxu0 %v11999_v26  ;;  %v626_v54 = vld [vmem:[%s18511_s1 + $0x1230] sm:$0xff]  ;;  %7344 = vmatprep.mubr.bf16.mxu0 %v13878_v30  ;;  %v11935_v26 = vcombine.low %v610_v36, %v618_v14 }
 0x348   :  { %v7059_v0 = vpop.f32.mrf.mxu1  ;;  %7304 = vmatmul.mubr.bf16.vlgmr.msra.gmra.mxu1 %v13882_v31  ;;  %v7020_v48 = vpop.f32.mrf.mxu0  ;;  %7314 = vmatprep.subr.bf16.mxu0 %v11984_v29  ;;  %v11952_v10 = vcombine.high %v626_v54, %v634_v1  ;;  %v11951_v17 = vcombine.low %v626_v54, %v634_v1  ;;  %v11920_v29 = vcombine.high %v594_v20, %v602_v41  ;;  %v834_v35 = vld [vmem:[%s18511_s1 + $0x18b0] sm:$0xff] }
 0x349   :  { %7354 = vmatpush1.bf16.msra.mxu1 %v12255_v28  ;;  %v16373_v58 = vadd.f32 %v7059_v0, %v7019_v43  ;;  %v7021_v59 = vadd.f32 %v7020_v48, %v16181_v55  ;;  %v890_v55 = vld [vmem:[%s18511_s1 + $0x1a70] sm:$0xff]  ;;  %7385 = vmatprep.mubr.bf16.mxu1 %v13899_v40  ;;  %v12191_v28 = vcombine.low %v866_v19, %v874_v27 }
 0x34a   :  { %v7061_v44 = vpop.f32.mrf.mxu1  ;;  %7355 = vmatprep.subr.bf16.mxu1 %v12240_v63  ;;  %v7022_v2 = vpop.f32.mrf.mxu0  ;;  %v12208_v12 = vcombine.high %v882_v37, %v890_v55  ;;  %v12207_v42 = vcombine.low %v882_v37, %v890_v55  ;;  %v12176_v63 = vcombine.high %v850_v25, %v858_v15  ;;  %v12175_v43 = vcombine.low %v850_v25, %v858_v15  ;;  %v562_v48 = vld [vmem:[%s18511_s1 + $0x1030] sm:$0xff] }
 0x34b   :  { %v16390_v46 = vadd.f32 %v7061_v44, %v7021_v59  ;;  %7315 = vmatpush1.bf16.msra.mxu0 %v11983_v47  ;;  %v11904_v0 = vcombine.high %v578_v33, %v586_v24  ;;  %v12160_v47 = vcombine.high %v834_v35, %v842_v39  ;;  %v826_v59 = vld [vmem:[%s18511_s1 + $0x1870] sm:$0xff]  ;;  %v11903_v44 = vcombine.low %v578_v33, %v586_v24 }
 0x34c   :  { %v7063_v3 = vpop.f32.mrf.mxu1  ;;  %v7023_v6 = vpop.f32.mrf.mxu0  ;;  %7316 = vmatprep.subr.bf16.mxu0 %v11968_v56  ;;  %v818_v56 = vld [vmem:[%s18511_s1 + $0x1830] sm:$0xff] }
 0x34d   :  { %7356 = vmatpush1.bf16.msra.mxu1 %v12239_v51  ;;  %v570_v51 = vld [vmem:[%s18511_s1 + $0x1070] sm:$0xff]  ;;  %v12144_v1 = vcombine.high %v818_v56, %v826_v59  ;;  %v12143_v6 = vcombine.low %v818_v56, %v826_v59 }
 0x34e   :  { %v7064_v11 = vpop.f32.mrf.mxu1  ;;  %7357 = vmatprep.subr.bf16.mxu1 %v12224_v61  ;;  %v12159_v61 = vcombine.low %v834_v35, %v842_v39  ;;  %v11888_v54 = vcombine.high %v562_v48, %v570_v51  ;;  %v802_v2 = vld [vmem:[%s18511_s1 + $0x17b0] sm:$0xff] }
 0x34f   :  { %7317 = vmatpush1.bf16.msra.mxu0 %v11967_v5  ;;  %v810_v37 = vld [vmem:[%s18511_s1 + $0x17f0] sm:$0xff]  ;;  %v11887_v5 = vcombine.low %v562_v48, %v570_v51 }
 0x350   :  { %7318 = vmatprep.subr.bf16.mxu0 %v11952_v10  ;;  %v1058_v55 = vld [vmem:[%s18511_s1 + $0x1fb0] sm:$0xff]  ;;  %v12127_v19 = vcombine.low %v802_v2, %v810_v37 }
 0x351   :  { %7358 = vmatpush1.bf16.msra.mxu1 %v12223_v7  ;;  %v1066_v3 = vld [vmem:[%s18511_s1 + $0x1ff0] sm:$0xff]  ;;  %v12128_v7 = vcombine.high %v802_v2, %v810_v37 }
 0x352   :  { %7359 = vmatprep.subr.bf16.mxu1 %v12208_v12  ;;  %v12384_v10 = vcombine.high %v1058_v55, %v1066_v3  ;;  %v786_v11 = vld [vmem:[%s18511_s1 + $0x1730] sm:$0xff]  ;;  %v12383_v27 = vcombine.low %v1058_v55, %v1066_v3 }
 0x353   :  { %7319 = vmatpush1.bf16.msra.mxu0 %v11951_v17  ;;  %v794_v12 = vld [vmem:[%s18511_s1 + $0x1770] sm:$0xff] }
 0x354   :  { %7320 = vmatprep.subr.bf16.mxu0 %v11936_v18  ;;  %v1042_v36 = vld [vmem:[%s18511_s1 + $0x1f30] sm:$0xff]  ;;  %v12112_v17 = vcombine.high %v786_v11, %v794_v12  ;;  %v12111_v25 = vcombine.low %v786_v11, %v794_v12 }
 0x355   :  { %7360 = vmatpush1.bf16.msra.mxu1 %v12207_v42  ;;  %v1050_v14 = vld [vmem:[%s18511_s1 + $0x1f70] sm:$0xff] }
 0x356   :  { %7361 = vmatprep.subr.bf16.mxu1 %v12192_v49  ;;  %v12368_v42 = vcombine.high %v1042_v36, %v1050_v14  ;;  %v770_v18 = vld [vmem:[%s18511_s1 + $0x16b0] sm:$0xff]  ;;  %v12367_v15 = vcombine.low %v1042_v36, %v1050_v14 }
 0x357   :  { %7321 = vmatpush1.bf16.msra.mxu0 %v11935_v26  ;;  %v778_v49 = vld [vmem:[%s18511_s1 + $0x16f0] sm:$0xff] }
 0x358   :  { %7322 = vmatprep.subr.bf16.mxu0 %v11920_v29  ;;  %v1026_v20 = vld [vmem:[%s18511_s1 + $0x1eb0] sm:$0xff]  ;;  %v12096_v26 = vcombine.high %v770_v18, %v778_v49  ;;  %v12095_v35 = vcombine.low %v770_v18, %v778_v49 }
 0x359   :  { %7362 = vmatpush1.bf16.msra.mxu1 %v12191_v28  ;;  %v1034_v41 = vld [vmem:[%s18511_s1 + $0x1ef0] sm:$0xff] }
 0x35a   :  { %7363 = vmatprep.subr.bf16.mxu1 %v12176_v63  ;;  %v12352_v28 = vcombine.high %v1026_v20, %v1034_v41  ;;  %v754_v29 = vld [vmem:[%s18511_s1 + $0x1630] sm:$0xff]  ;;  %v12351_v39 = vcombine.low %v1026_v20, %v1034_v41 }
 0x35b   :  { %7323 = vmatpush1.bf16.msra.mxu0 %v11919_v52  ;;  %v762_v63 = vld [vmem:[%s18511_s1 + $0x1670] sm:$0xff] }
 0x35c   :  { %7324 = vmatprep.subr.bf16.mxu0 %v11904_v0  ;;  %v1010_v33 = vld [vmem:[%s18511_s1 + $0x1e30] sm:$0xff]  ;;  %v12080_v52 = vcombine.high %v754_v29, %v762_v63  ;;  %v12079_v56 = vcombine.low %v754_v29, %v762_v63  ;;  %v419_v29 = vld [vmem:[%s18511_s1 + $0xbb8] sm:$0xff] }
 0x35d   :  { %7364 = vmatpush1.bf16.msra.mxu1 %v12175_v43  ;;  %v1018_v24 = vld [vmem:[%s18511_s1 + $0x1e70] sm:$0xff]  ;;  %v427_v63 = vld [vmem:[%s18511_s1 + $0xbf8] sm:$0xff] }
 0x35e   :  { %7365 = vmatprep.subr.bf16.mxu1 %v12160_v47  ;;  %v12336_v43 = vcombine.high %v1010_v33, %v1018_v24  ;;  %v738_v0 = vld [vmem:[%s18511_s1 + $0x15b0] sm:$0xff]  ;;  %v12335_v59 = vcombine.low %v1010_v33, %v1018_v24 }
 0x35f   :  { %7325 = vmatpush1.bf16.msra.mxu0 %v11903_v44  ;;  %v746_v47 = vld [vmem:[%s18511_s1 + $0x15f0] sm:$0xff] }
 0x360   :  { %7326 = vmatprep.subr.bf16.mxu0 %v11888_v54  ;;  %v994_v48 = vld [vmem:[%s18511_s1 + $0x1db0] sm:$0xff]  ;;  %v12064_v44 = vcombine.high %v738_v0, %v746_v47  ;;  %v12063_v55 = vcombine.low %v738_v0, %v746_v47  ;;  %v403_v0 = vld [vmem:[%s18511_s1 + $0xb38] sm:$0xff] }
 0x361   :  { %7366 = vmatpush1.bf16.msra.mxu1 %v12159_v61  ;;  %v1002_v51 = vld [vmem:[%s18511_s1 + $0x1df0] sm:$0xff]  ;;  %v411_v47 = vld [vmem:[%s18511_s1 + $0xb78] sm:$0xff] }
 0x362   :  { %7367 = vmatprep.subr.bf16.mxu1 %v12144_v1  ;;  %v12320_v61 = vcombine.high %v994_v48, %v1002_v51  ;;  %v722_v54 = vld [vmem:[%s18511_s1 + $0x1530] sm:$0xff]  ;;  %v12319_v3 = vcombine.low %v994_v48, %v1002_v51  ;;  %v11745_v51 = vcombine.low %v419_v29, %v427_v63 }
 0x363   :  { %7327 = vmatpush1.bf16.msra.mxu0 %v11887_v5  ;;  %v730_v1 = vld [vmem:[%s18511_s1 + $0x1570] sm:$0xff] }
 0x364   :  { %7328 = vmatprep.subr.bf16.mxu0 %v12128_v7  ;;  %v978_v2 = vld [vmem:[%s18511_s1 + $0x1d30] sm:$0xff]  ;;  %v12048_v5 = vcombine.high %v722_v54, %v730_v1  ;;  %v12047_v36 = vcombine.low %v722_v54, %v730_v1  ;;  %v387_v1 = vld [vmem:[%s18511_s1 + $0xab8] sm:$0xff] }
 0x365   :  { %7368 = vmatpush1.bf16.msra.mxu1 %v12143_v6  ;;  %v986_v37 = vld [vmem:[%s18511_s1 + $0x1d70] sm:$0xff] }
 0x366   :  { %7369 = vmatprep.subr.bf16.mxu1 %v12384_v10  ;;  %v12304_v6 = vcombine.high %v978_v2, %v986_v37  ;;  %v706_v7 = vld [vmem:[%s18511_s1 + $0x14b0] sm:$0xff]  ;;  %v12303_v14 = vcombine.low %v978_v2, %v986_v37  ;;  %v395_v2 = vld [vmem:[%s18511_s1 + $0xaf8] sm:$0xff] }
 0x367   :  { %7329 = vmatpush2.bf16.msra.mxu0 %v12127_v19  ;;  %v714_v10 = vld [vmem:[%s18511_s1 + $0x14f0] sm:$0xff] }
 0x368   :  { %7330 = vmatprep.subr.bf16.mxu0 %v12112_v17  ;;  %v962_v11 = vld [vmem:[%s18511_s1 + $0x1cb0] sm:$0xff]  ;;  %v12032_v19 = vcombine.high %v706_v7, %v714_v10  ;;  %v12031_v20 = vcombine.low %v706_v7, %v714_v10 }
 0x369   :  { %7370 = vmatpush2.bf16.msra.mxu1 %v12383_v27  ;;  %v970_v12 = vld [vmem:[%s18511_s1 + $0x1cf0] sm:$0xff] }
 0x36a   :  { %7371 = vmatprep.subr.bf16.mxu1 %v12368_v42  ;;  %v12288_v27 = vcombine.high %v962_v11, %v970_v12  ;;  %v690_v17 = vld [vmem:[%s18511_s1 + $0x1430] sm:$0xff]  ;;  %v12287_v41 = vcombine.low %v962_v11, %v970_v12  ;;  %v11714_v11 = vcombine.high %v387_v1, %v395_v2  ;;  %v115_v12 = vld [vmem:[%s18511_s1 + $0x238] sm:$0xff] }
 0x36b   :  { %7331 = vmatpush2.bf16.msra.mxu0 %v12111_v25  ;;  %v698_v42 = vld [vmem:[%s18511_s1 + $0x1470] sm:$0xff] }
 0x36c   :  { %7332 = vmatprep.subr.bf16.mxu0 %v12096_v26  ;;  %v946_v18 = vld [vmem:[%s18511_s1 + $0x1c30] sm:$0xff]  ;;  %v12016_v25 = vcombine.high %v690_v17, %v698_v42  ;;  %v163_v26 = vld [vmem:[%s18511_s1 + $0x3b8] sm:$0xff]  ;;  %v12015_v33 = vcombine.low %v690_v17, %v698_v42 }
 0x36d   :  { %7372 = vmatpush2.bf16.msra.mxu1 %v12367_v15  ;;  %v954_v49 = vld [vmem:[%s18511_s1 + $0x1c70] sm:$0xff]  ;;  %v379_v17 = vld [vmem:[%s18511_s1 + $0xa78] sm:$0xff] }
 0x36e   :  { %7373 = vmatprep.subr.bf16.mxu1 %v12352_v28  ;;  %v12272_v15 = vcombine.high %v946_v18, %v954_v49  ;;  %v171_v28 = vld [vmem:[%s18511_s1 + $0x3f8] sm:$0xff]  ;;  %v12271_v24 = vcombine.low %v946_v18, %v954_v49 }
 0x36f   :  { %7333 = vmatpush2.bf16.msra.mxu0 %v12095_v35  ;;  %v11490_v35 = vcombine.high %v163_v26, %v171_v28  ;;  %v11489_v48 = vcombine.low %v163_v26, %v171_v28  ;;  %v107_v26 = vld [vmem:[%s18511_s1 + $0x1f8] sm:$0xff] }
 0x370   :  { %7334 = vmatprep.subr.bf16.mxu0 %v12080_v52  ;;  %v147_v52 = vld [vmem:[%s18511_s1 + $0x338] sm:$0xff] }
 0x371   :  { %7374 = vmatpush2.bf16.msra.mxu1 %v12351_v39  ;;  %v11746_v39 = vcombine.high %v419_v29, %v427_v63  ;;  %v363_v28 = vld [vmem:[%s18511_s1 + $0x9f8] sm:$0xff] }
 0x372   :  { %7375 = vmatprep.subr.bf16.mxu1 %v12336_v43  ;;  %v155_v43 = vld [vmem:[%s18511_s1 + $0x378] sm:$0xff] }
 0x373   :  { %7335 = vmatpush2.bf16.msra.mxu0 %v12079_v56  ;;  %v11474_v56 = vcombine.high %v147_v52, %v155_v43 }
 0x374   :  { %7336 = vmatprep.subr.bf16.mxu0 %v12064_v44  ;;  %v131_v44 = vld [vmem:[%s18511_s1 + $0x2b8] sm:$0xff] }
 0x375   :  { %7376 = vmatpush2.bf16.msra.mxu1 %v12335_v59  ;;  %v11730_v59 = vcombine.high %v403_v0, %v411_v47 }
 0x376   :  { %7377 = vmatprep.subr.bf16.mxu1 %v12320_v61  ;;  %v139_v61 = vld [vmem:[%s18511_s1 + $0x2f8] sm:$0xff] }
 0x377   :  { %7337 = vmatpush2.bf16.msra.mxu0 %v12063_v55  ;;  %v11473_v55 = vcombine.low %v147_v52, %v155_v43  ;;  %v11458_v7 = vcombine.high %v131_v44, %v139_v61  ;;  %v11457_v18 = vcombine.low %v131_v44, %v139_v61  ;;  %v339_v52 = vld [vmem:[%s18511_s1 + $0x938] sm:$0xff] }
 0x378   :  { %7338 = vmatprep.subr.bf16.mxu0 %v12048_v5  ;;  %v347_v43 = vld [vmem:[%s18511_s1 + $0x978] sm:$0xff] }
 0x379   :  { %7378 = vmatpush2.bf16.msra.mxu1 %v12319_v3  ;;  %v323_v44 = vld [vmem:[%s18511_s1 + $0x8b8] sm:$0xff] }
 0x37a   :  { %7379 = vmatprep.subr.bf16.mxu1 %v12304_v6  ;;  %v11729_v6 = vcombine.low %v403_v0, %v411_v47  ;;  %v331_v61 = vld [vmem:[%s18511_s1 + $0x8f8] sm:$0xff] }
 0x37b   :  { %7339 = vmatpush2.bf16.msra.mxu0 %v12047_v36  ;;  %v123_v36 = vld [vmem:[%s18511_s1 + $0x278] sm:$0xff] }
 0x37c   :  { %7340 = vmatprep.subr.bf16.mxu0 %v12032_v19  ;;  %v11441_v29 = vcombine.low %v115_v12, %v123_v36 }
 0x37d   :  { %7380 = vmatpush2.bf16.msra.mxu1 %v12303_v14 }
 0x37e   :  { %7381 = vmatprep.subr.bf16.mxu1 %v12288_v27  ;;  %v371_v27 = vld [vmem:[%s18511_s1 + $0xa38] sm:$0xff] }
 0x37f   :  { %7341 = vmatpush2.bf16.msra.mxu0 %v12031_v20  ;;  %v11442_v20 = vcombine.high %v115_v12, %v123_v36  ;;  %v11697_v63 = vcombine.low %v371_v27, %v379_v17 }
 0x380   :  { %7342 = vmatprep.subr.bf16.mxu0 %v12016_v25  ;;  %v11698_v25 = vcombine.high %v371_v27, %v379_v17  ;;  %v299_v27 = vld [vmem:[%s18511_s1 + $0x7f8] sm:$0xff] }
 0x381   :  { %7382 = vmatpush2.bf16.msra.mxu1 %v12287_v41  ;;  %v547_v17 = vld [vmem:[%s18511_s1 + $0xfb8] sm:$0xff] }
 0x382   :  { %7383 = vmatprep.subr.bf16.mxu1 %v12272_v15  ;;  %v99_v15 = vld [vmem:[%s18511_s1 + $0x1b8] sm:$0xff] }
 0x383   :  { %7343 = vmatpush2.bf16.msra.mxu0 %v12015_v33  ;;  %v11426_v33 = vcombine.high %v99_v15, %v107_v26  ;;  %v11425_v0 = vcombine.low %v99_v15, %v107_v26  ;;  %v531_v15 = vld [vmem:[%s18511_s1 + $0xf38] sm:$0xff] }
 0x384   :  { %7394 = vmatprep.subr.bf16.mxu0 %v11490_v35  ;;  %v83_v35 = vld [vmem:[%s18511_s1 + $0x138] sm:$0xff] }
 0x385   :  { %7384 = vmatpush2.bf16.msra.mxu1 %v12271_v24  ;;  %v539_v26 = vld [vmem:[%s18511_s1 + $0xf78] sm:$0xff] }
 0x386   :  { %7435 = vmatprep.subr.bf16.mxu1 %v11746_v39  ;;  %v7100_v54 = vpop.f32.mrf.mxu0  ;;  %7345 = vmatmul.mubr.bf16.vlgmr.msra.gmra.mxu0 %v13785_v32  ;;  %v91_v39 = vld [vmem:[%s18511_s1 + $0x178] sm:$0xff] }
 0x387   :  { %7395 = vmatpush1.bf16.msra.mxu0 %v11489_v48  ;;  %7426 = vmatprep.mubr.bf16.mxu0 %v13742_v9  ;;  %v11713_v9 = vcombine.low %v387_v1, %v395_v2  ;;  %v11410_v48 = vcombine.high %v83_v35, %v91_v39  ;;  %v11665_v1 = vcombine.low %v339_v52, %v347_v43 }
 0x388   :  { %v7141_v37 = vpop.f32.mrf.mxu1  ;;  %7386 = vmatmul.mubr.bf16.vlgmr.msra.gmra.mxu1 %v14086_v50  ;;  %v7102_v5 = vpop.f32.mrf.mxu0  ;;  %7396 = vmatprep.subr.bf16.mxu0 %v11474_v56  ;;  %v67_v56 = vld [vmem:[%s18511_s1 + $0xb8] sm:$0xff] }
 0x389   :  { %v16574_v3 = vadd.f32 %v7141_v37, %v7100_v54  ;;  %7436 = vmatpush1.bf16.msra.mxu1 %v11745_v51  ;;  %7467 = vmatprep.mubr.bf16.mxu1 %v13753_v13  ;;  %v355_v13 = vld [vmem:[%s18511_s1 + $0x9b8] sm:$0xff]  ;;  %v11666_v51 = vcombine.high %v339_v52, %v347_v43  ;;  %v11409_v54 = vcombine.low %v83_v35, %v91_v39 }
 0x38a   :  { %v7143_v10 = vpop.f32.mrf.mxu1  ;;  %7437 = vmatprep.subr.bf16.mxu1 %v11730_v59  ;;  %v7104_v19 = vpop.f32.mrf.mxu0  ;;  %v11682_v24 = vcombine.high %v355_v13, %v363_v28  ;;  %v11681_v47 = vcombine.low %v355_v13, %v363_v28  ;;  %v75_v59 = vld [vmem:[%s18511_s1 + $0xf8] sm:$0xff]  ;;  %v11650_v37 = vcombine.high %v323_v44, %v331_v61  ;;  %v11857_v43 = vcombine.low %v531_v15, %v539_v26 }
 0x38b   :  { %v16583_v14 = vadd.f32 %v7143_v10, %v7102_v5  ;;  %7397 = vmatpush1.bf16.msra.mxu0 %v11473_v55  ;;  %v11394_v2 = vcombine.high %v67_v56, %v75_v59  ;;  %v51_v55 = vld [vmem:[%s18511_s1 + $0x38] sm:$0xff]  ;;  %v11393_v10 = vcombine.low %v67_v56, %v75_v59 }
 0x38c   :  { %v7145_v42 = vpop.f32.mrf.mxu1  ;;  %v7105_v49 = vpop.f32.mrf.mxu0  ;;  %7398 = vmatprep.subr.bf16.mxu0 %v11458_v7  ;;  %v59_v5 = vld [vmem:[%s18511_s1 + $0x78] sm:$0xff] }
 0x38d   :  { %7438 = vmatpush1.bf16.msra.mxu1 %v11729_v6  ;;  %v307_v6 = vld [vmem:[%s18511_s1 + $0x838] sm:$0xff]  ;;  %v11378_v12 = vcombine.high %v51_v55, %v59_v5 }
 0x38e   :  { %v7146_v41 = vpop.f32.mrf.mxu1  ;;  %7439 = vmatprep.subr.bf16.mxu1 %v11714_v11  ;;  %v315_v7 = vld [vmem:[%s18511_s1 + $0x878] sm:$0xff]  ;;  %v11649_v11 = vcombine.low %v323_v44, %v331_v61 }
 0x38f   :  { %7399 = vmatpush1.bf16.msra.mxu0 %v11457_v18  ;;  %v11634_v36 = vcombine.high %v307_v6, %v315_v7  ;;  %v291_v19 = vld [vmem:[%s18511_s1 + $0x7b8] sm:$0xff]  ;;  %v11377_v18 = vcombine.low %v51_v55, %v59_v5  ;;  %v11633_v49 = vcombine.low %v307_v6, %v315_v7 }
 0x390   :  { %7400 = vmatprep.subr.bf16.mxu0 %v11442_v20  ;;  %v555_v42 = vld [vmem:[%s18511_s1 + $0xff8] sm:$0xff]  ;;  %v11617_v13 = vcombine.low %v291_v19, %v299_v27 }
 0x391   :  { %7440 = vmatpush1.bf16.msra.mxu1 %v11713_v9  ;;  %v11618_v9 = vcombine.high %v291_v19, %v299_v27  ;;  %v11874_v20 = vcombine.high %v547_v17, %v555_v42  ;;  %v275_v41 = vld [vmem:[%s18511_s1 + $0x738] sm:$0xff]  ;;  %v11873_v28 = vcombine.low %v547_v17, %v555_v42 }
 0x392   :  { %7441 = vmatprep.subr.bf16.mxu1 %v11698_v25  ;;  %v283_v25 = vld [vmem:[%s18511_s1 + $0x778] sm:$0xff] }
 0x393   :  { %7401 = vmatpush1.bf16.msra.mxu0 %v11441_v29  ;;  %v11602_v29 = vcombine.high %v275_v41, %v283_v25  ;;  %v515_v35 = vld [vmem:[%s18511_s1 + $0xeb8] sm:$0xff]  ;;  %v11601_v52 = vcombine.low %v275_v41, %v283_v25 }
 0x394   :  { %7402 = vmatprep.subr.bf16.mxu0 %v11426_v33  ;;  %v259_v33 = vld [vmem:[%s18511_s1 + $0x6b8] sm:$0xff] }
 0x395   :  { %7442 = vmatpush1.bf16.msra.mxu1 %v11697_v63  ;;  %v11858_v63 = vcombine.high %v531_v15, %v539_v26  ;;  %v523_v39 = vld [vmem:[%s18511_s1 + $0xef8] sm:$0xff] }
 0x396   :  { %7443 = vmatprep.subr.bf16.mxu1 %v11682_v24  ;;  %v267_v24 = vld [vmem:[%s18511_s1 + $0x6f8] sm:$0xff]  ;;  %v11841_v61 = vcombine.low %v515_v35, %v523_v39 }
 0x397   :  { %7403 = vmatpush1.bf16.msra.mxu0 %v11425_v0  ;;  %v11586_v0 = vcombine.high %v259_v33, %v267_v24  ;;  %v499_v56 = vld [vmem:[%s18511_s1 + $0xe38] sm:$0xff]  ;;  %v11585_v44 = vcombine.low %v259_v33, %v267_v24 }
 0x398   :  { %7404 = vmatprep.subr.bf16.mxu0 %v11410_v48  ;;  %v243_v48 = vld [vmem:[%s18511_s1 + $0x638] sm:$0xff] }
 0x399   :  { %7444 = vmatpush1.bf16.msra.mxu1 %v11681_v47  ;;  %v11842_v47 = vcombine.high %v515_v35, %v523_v39  ;;  %v507_v59 = vld [vmem:[%s18511_s1 + $0xe78] sm:$0xff] }
 0x39a   :  { %7445 = vmatprep.subr.bf16.mxu1 %v11666_v51  ;;  %v251_v51 = vld [vmem:[%s18511_s1 + $0x678] sm:$0xff]  ;;  %v11825_v7 = vcombine.low %v499_v56, %v507_v59 }
 0x39b   :  { %7405 = vmatpush1.bf16.msra.mxu0 %v11409_v54  ;;  %v11570_v54 = vcombine.high %v243_v48, %v251_v51  ;;  %v483_v55 = vld [vmem:[%s18511_s1 + $0xdb8] sm:$0xff]  ;;  %v11569_v6 = vcombine.low %v243_v48, %v251_v51 }
 0x39c   :  { %7406 = vmatprep.subr.bf16.mxu0 %v11394_v2  ;;  %v227_v2 = vld [vmem:[%s18511_s1 + $0x5b8] sm:$0xff] }
 0x39d   :  { %7446 = vmatpush1.bf16.msra.mxu1 %v11665_v1  ;;  %v11826_v1 = vcombine.high %v499_v56, %v507_v59  ;;  %v491_v5 = vld [vmem:[%s18511_s1 + $0xdf8] sm:$0xff] }
 0x39e   :  { %7447 = vmatprep.subr.bf16.mxu1 %v11650_v37  ;;  %v235_v37 = vld [vmem:[%s18511_s1 + $0x5f8] sm:$0xff]  ;;  %v11809_v42 = vcombine.low %v483_v55, %v491_v5 }
 0x39f   :  { %7407 = vmatpush1.bf16.msra.mxu0 %v11393_v10  ;;  %v11554_v10 = vcombine.high %v227_v2, %v235_v37  ;;  %v467_v19 = vld [vmem:[%s18511_s1 + $0xd38] sm:$0xff]  ;;  %v11553_v17 = vcombine.low %v227_v2, %v235_v37 }
 0x3a0   :  { %7408 = vmatprep.subr.bf16.mxu0 %v11378_v12  ;;  %v211_v12 = vld [vmem:[%s18511_s1 + $0x538] sm:$0xff] }
 0x3a1   :  { %7448 = vmatpush1.bf16.msra.mxu1 %v11649_v11  ;;  %v11810_v11 = vcombine.high %v483_v55, %v491_v5  ;;  %v475_v27 = vld [vmem:[%s18511_s1 + $0xd78] sm:$0xff] }
 0x3a2   :  { %7449 = vmatprep.subr.bf16.mxu1 %v11634_v36  ;;  %v219_v36 = vld [vmem:[%s18511_s1 + $0x578] sm:$0xff]  ;;  %v11793_v26 = vcombine.low %v467_v19, %v475_v27 }
 0x3a3   :  { %7409 = vmatpush1.bf16.msra.mxu0 %v11377_v18  ;;  %v11538_v18 = vcombine.high %v211_v12, %v219_v36  ;;  %v451_v41 = vld [vmem:[%s18511_s1 + $0xcb8] sm:$0xff]  ;;  %v11537_v15 = vcombine.low %v211_v12, %v219_v36 }
 0x3a4   :  { %7410 = vmatprep.subr.bf16.mxu0 %v11618_v9  ;;  %v195_v9 = vld [vmem:[%s18511_s1 + $0x4b8] sm:$0xff] }
 0x3a5   :  { %7450 = vmatpush1.bf16.msra.mxu1 %v11633_v49  ;;  %v11794_v49 = vcombine.high %v467_v19, %v475_v27  ;;  %v459_v25 = vld [vmem:[%s18511_s1 + $0xcf8] sm:$0xff] }
 0x3a6   :  { %7451 = vmatprep.subr.bf16.mxu1 %v11874_v20  ;;  %v203_v20 = vld [vmem:[%s18511_s1 + $0x4f8] sm:$0xff]  ;;  %v11777_v39 = vcombine.low %v451_v41, %v459_v25 }
 0x3a7   :  { %7411 = vmatpush2.bf16.msra.mxu0 %v11617_v13  ;;  %v11522_v13 = vcombine.high %v195_v9, %v203_v20  ;;  %v435_v33 = vld [vmem:[%s18511_s1 + $0xc38] sm:$0xff]  ;;  %v11521_v35 = vcombine.low %v195_v9, %v203_v20 }
 0x3a8   :  { %7412 = vmatprep.subr.bf16.mxu0 %v11602_v29  ;;  %v179_v29 = vld [vmem:[%s18511_s1 + $0x438] sm:$0xff] }
 0x3a9   :  { %7452 = vmatpush2.bf16.msra.mxu1 %v11873_v28  ;;  %v11778_v28 = vcombine.high %v451_v41, %v459_v25  ;;  %v443_v24 = vld [vmem:[%s18511_s1 + $0xc78] sm:$0xff] }
 0x3aa   :  { %7453 = vmatprep.subr.bf16.mxu1 %v11858_v63  ;;  %v187_v63 = vld [vmem:[%s18511_s1 + $0x478] sm:$0xff]  ;;  %v11761_v59 = vcombine.low %v435_v33, %v443_v24 }
 0x3ab   :  { %7413 = vmatpush2.bf16.msra.mxu0 %v11601_v52  ;;  %v11506_v52 = vcombine.high %v179_v29, %v187_v63  ;;  %v931_v48 = vld [vmem:[%s18511_s1 + $0x1bb8] sm:$0xff]  ;;  %v11505_v56 = vcombine.low %v179_v29, %v187_v63 }
 0x3ac   :  { %7414 = vmatprep.subr.bf16.mxu0 %v11586_v0  ;;  %v675_v0 = vld [vmem:[%s18511_s1 + $0x13b8] sm:$0xff] }
 0x3ad   :  { %7454 = vmatpush2.bf16.msra.mxu1 %v11857_v43  ;;  %v11762_v43 = vcombine.high %v435_v33, %v443_v24  ;;  %v939_v51 = vld [vmem:[%s18511_s1 + $0x1bf8] sm:$0xff] }
 0x3ae   :  { %7455 = vmatprep.subr.bf16.mxu1 %v11842_v47  ;;  %v683_v47 = vld [vmem:[%s18511_s1 + $0x13f8] sm:$0xff]  ;;  %v12257_v5 = vcombine.low %v931_v48, %v939_v51 }
 0x3af   :  { %7415 = vmatpush2.bf16.msra.mxu0 %v11585_v44  ;;  %v12002_v44 = vcombine.high %v675_v0, %v683_v47  ;;  %v915_v2 = vld [vmem:[%s18511_s1 + $0x1b38] sm:$0xff]  ;;  %v12001_v55 = vcombine.low %v675_v0, %v683_v47 }
 0x3b0   :  { %7416 = vmatprep.subr.bf16.mxu0 %v11570_v54  ;;  %v659_v54 = vld [vmem:[%s18511_s1 + $0x1338] sm:$0xff] }
 0x3b1   :  { %7456 = vmatpush2.bf16.msra.mxu1 %v11841_v61  ;;  %v12258_v61 = vcombine.high %v931_v48, %v939_v51  ;;  %v923_v37 = vld [vmem:[%s18511_s1 + $0x1b78] sm:$0xff] }
 0x3b2   :  { %7457 = vmatprep.subr.bf16.mxu1 %v11826_v1  ;;  %v667_v1 = vld [vmem:[%s18511_s1 + $0x1378] sm:$0xff] }
 0x3b3   :  { %7417 = vmatpush2.bf16.msra.mxu0 %v11569_v6  ;;  %v11986_v6 = vcombine.high %v659_v54, %v667_v1  ;;  %v899_v36 = vld [vmem:[%s18511_s1 + $0x1ab8] sm:$0xff] }
 0x3b4   :  { %7418 = vmatprep.subr.bf16.mxu0 %v11554_v10  ;;  %v643_v10 = vld [vmem:[%s18511_s1 + $0x12b8] sm:$0xff] }
 0x3b5   :  { %7458 = vmatpush2.bf16.msra.mxu1 %v11825_v7  ;;  %v12242_v7 = vcombine.high %v915_v2, %v923_v37  ;;  %v907_v19 = vld [vmem:[%s18511_s1 + $0x1af8] sm:$0xff] }
 0x3b6   :  { %7459 = vmatprep.subr.bf16.mxu1 %v11810_v11  ;;  %v651_v11 = vld [vmem:[%s18511_s1 + $0x12f8] sm:$0xff]  ;;  %v12226_v25 = vcombine.high %v899_v36, %v907_v19 }
 0x3b7   :  { %7419 = vmatpush2.bf16.msra.mxu0 %v11553_v17  ;;  %v11969_v29 = vcombine.low %v643_v10, %v651_v11 }
 0x3b8   :  { %7420 = vmatprep.subr.bf16.mxu0 %v11538_v18 }
 0x3b9   :  { %7460 = vmatpush2.bf16.msra.mxu1 %v11809_v42  ;;  %v11985_v42 = vcombine.low %v659_v54, %v667_v1 }
 0x3ba   :  { %7461 = vmatprep.subr.bf16.mxu1 %v11794_v49  ;;  %v12241_v49 = vcombine.low %v915_v2, %v923_v37 }
 0x3bb   :  { %7421 = vmatpush2.bf16.msra.mxu0 %v11537_v15 }
 0x3bc   :  { %7422 = vmatprep.subr.bf16.mxu0 %v11522_v13 }
 0x3bd   :  { %7462 = vmatpush2.bf16.msra.mxu1 %v11793_v26  ;;  %v883_v26 = vld [vmem:[%s18511_s1 + $0x1a38] sm:$0xff] }
 0x3be   :  { %7463 = vmatprep.subr.bf16.mxu1 %v11778_v28 }
 0x3bf   :  { %7423 = vmatpush2.bf16.msra.mxu0 %v11521_v35 }
 0x3c0   :  { %7424 = vmatprep.subr.bf16.mxu0 %v11506_v52  ;;  %v867_v52 = vld [vmem:[%s18511_s1 + $0x19b8] sm:$0xff] }
 0x3c1   :  { %7464 = vmatpush2.bf16.msra.mxu1 %v11777_v39  ;;  %v611_v39 = vld [vmem:[%s18511_s1 + $0x11b8] sm:$0xff] }
 0x3c2   :  { %7465 = vmatprep.subr.bf16.mxu1 %v11762_v43  ;;  %v875_v43 = vld [vmem:[%s18511_s1 + $0x19f8] sm:$0xff] }
 0x3c3   :  { %7425 = vmatpush2.bf16.msra.mxu0 %v11505_v56  ;;  %v12194_v51 = vcombine.high %v867_v52, %v875_v43  ;;  %v595_v56 = vld [vmem:[%s18511_s1 + $0x1138] sm:$0xff]  ;;  %v12193_v1 = vcombine.low %v867_v52, %v875_v43 }
 0x3c4   :  { %7476 = vmatprep.subr.bf16.mxu0 %v12002_v44  ;;  %v851_v44 = vld [vmem:[%s18511_s1 + $0x1938] sm:$0xff] }
 0x3c5   :  { %7466 = vmatpush2.bf16.msra.mxu1 %v11761_v59  ;;  %v603_v59 = vld [vmem:[%s18511_s1 + $0x1178] sm:$0xff] }
 0x3c6   :  { %7517 = vmatprep.subr.bf16.mxu1 %v12258_v61  ;;  %v7182_v12 = vpop.f32.mrf.mxu0  ;;  %7427 = vmatmul.mubr.bf16.vlgmr.msra.gmra.mxu0 %v13863_v23  ;;  %v11970_v23 = vcombine.high %v643_v10, %v651_v11  ;;  %v859_v61 = vld [vmem:[%s18511_s1 + $0x1978] sm:$0xff]  ;;  %v11922_v2 = vcombine.high %v595_v56, %v603_v59  ;;  %v11921_v10 = vcombine.low %v595_v56, %v603_v59 }
 0x3c7   :  { %v7183_v27 = vadd.f32 %v7182_v12, %v16574_v3  ;;  %7477 = vmatpush1.bf16.msra.mxu0 %v12001_v55  ;;  %v627_v3 = vld [vmem:[%s18511_s1 + $0x1238] sm:$0xff]  ;;  %7508 = vmatprep.mubr.bf16.mxu0 %v13878_v30  ;;  %v12225_v30 = vcombine.low %v899_v36, %v907_v19  ;;  %v12178_v37 = vcombine.high %v851_v44, %v859_v61 }
 0x3c8   :  { %v7223_v17 = vpop.f32.mrf.mxu1  ;;  %7468 = vmatmul.mubr.bf16.vlgmr.msra.gmra.mxu1 %v13882_v31  ;;  %v7184_v18 = vpop.f32.mrf.mxu0  ;;  %7478 = vmatprep.subr.bf16.mxu0 %v11986_v6  ;;  %v635_v31 = vld [vmem:[%s18511_s1 + $0x1278] sm:$0xff]  ;;  %v12177_v11 = vcombine.low %v851_v44, %v859_v61 }
 0x3c9   :  { %7518 = vmatpush1.bf16.msra.mxu1 %v12257_v5  ;;  %v16775_v9 = vadd.f32 %v7223_v17, %v7183_v27  ;;  %v7185_v20 = vadd.f32 %v7184_v18, %v16583_v14  ;;  %v891_v14 = vld [vmem:[%s18511_s1 + $0x1a78] sm:$0xff]  ;;  %7549 = vmatprep.mubr.bf16.mxu1 %v13899_v40  ;;  %v11954_v33 = vcombine.high %v627_v3, %v635_v31 }
 0x3ca   :  { %v7225_v41 = vpop.f32.mrf.mxu1  ;;  %7519 = vmatprep.subr.bf16.mxu1 %v12242_v7  ;;  %v7186_v15 = vpop.f32.mrf.mxu0  ;;  %v12210_v35 = vcombine.high %v883_v26, %v891_v14  ;;  %v619_v40 = vld [vmem:[%s18511_s1 + $0x11f8] sm:$0xff]  ;;  %v11953_v0 = vcombine.low %v627_v3, %v635_v31  ;;  %v12209_v47 = vcombine.low %v883_v26, %v891_v14 }
 0x3cb   :  { %v16792_v13 = vadd.f32 %v7225_v41, %v7185_v20  ;;  %7479 = vmatpush1.bf16.msra.mxu0 %v11985_v42  ;;  %v11938_v48 = vcombine.high %v611_v39, %v619_v40  ;;  %v11937_v54 = vcombine.low %v611_v39, %v619_v40  ;;  %v579_v55 = vld [vmem:[%s18511_s1 + $0x10b8] sm:$0xff] }
 0x3cc   :  { %v7227_v28 = vpop.f32.mrf.mxu1  ;;  %v7187_v63 = vpop.f32.mrf.mxu0  ;;  %7480 = vmatprep.subr.bf16.mxu0 %v11970_v23  ;;  %v587_v5 = vld [vmem:[%s18511_s1 + $0x10f8] sm:$0xff] }
 0x3cd   :  { %7520 = vmatpush1.bf16.msra.mxu1 %v12241_v49  ;;  %v835_v6 = vld [vmem:[%s18511_s1 + $0x18b8] sm:$0xff]  ;;  %v11906_v12 = vcombine.high %v579_v55, %v587_v5  ;;  %v11905_v18 = vcombine.low %v579_v55, %v587_v5 }
 0x3ce   :  { %v7228_v24 = vpop.f32.mrf.mxu1  ;;  %7521 = vmatprep.subr.bf16.mxu1 %v12226_v25  ;;  %v843_v7 = vld [vmem:[%s18511_s1 + $0x18f8] sm:$0xff] }
 0x3cf   :  { %7481 = vmatpush1.bf16.msra.mxu0 %v11969_v29  ;;  %v12162_v36 = vcombine.high %v835_v6, %v843_v7  ;;  %v563_v19 = vld [vmem:[%s18511_s1 + $0x1038] sm:$0xff]  ;;  %v12161_v49 = vcombine.low %v835_v6, %v843_v7 }
 0x3d0   :  { %7482 = vmatprep.subr.bf16.mxu0 %v11954_v33  ;;  %v571_v27 = vld [vmem:[%s18511_s1 + $0x1078] sm:$0xff] }
 0x3d1   :  { %7522 = vmatpush1.bf16.msra.mxu1 %v12225_v30  ;;  %v819_v17 = vld [vmem:[%s18511_s1 + $0x1838] sm:$0xff]  ;;  %v11890_v23 = vcombine.high %v563_v19, %v571_v27  ;;  %v11889_v15 = vcombine.low %v563_v19, %v571_v27 }
 0x3d2   :  { %7523 = vmatprep.subr.bf16.mxu1 %v12210_v35  ;;  %v827_v42 = vld [vmem:[%s18511_s1 + $0x1878] sm:$0xff] }
 0x3d3   :  { %7483 = vmatpush1.bf16.msra.mxu0 %v11953_v0  ;;  %v12146_v20 = vcombine.high %v819_v17, %v827_v42  ;;  %v803_v41 = vld [vmem:[%s18511_s1 + $0x17b8] sm:$0xff]  ;;  %v12145_v26 = vcombine.low %v819_v17, %v827_v42 }
 0x3d4   :  { %7484 = vmatprep.subr.bf16.mxu0 %v11938_v48  ;;  %v811_v25 = vld [vmem:[%s18511_s1 + $0x17f8] sm:$0xff] }
 0x3d5   :  { %7524 = vmatpush1.bf16.msra.mxu1 %v12209_v47  ;;  %v1059_v3 = vld [vmem:[%s18511_s1 + $0x1fb8] sm:$0xff]  ;;  %v12130_v14 = vcombine.high %v803_v41, %v811_v25  ;;  %v12129_v24 = vcombine.low %v803_v41, %v811_v25 }
 0x3d6   :  { %7525 = vmatprep.subr.bf16.mxu1 %v12194_v51  ;;  %v1067_v31 = vld [vmem:[%s18511_s1 + $0x1ff8] sm:$0xff] }
 0x3d7   :  { %7485 = vmatpush1.bf16.msra.mxu0 %v11937_v54  ;;  %v12386_v28 = vcombine.high %v1059_v3, %v1067_v31  ;;  %v787_v29 = vld [vmem:[%s18511_s1 + $0x1738] sm:$0xff]  ;;  %v12385_v35 = vcombine.low %v1059_v3, %v1067_v31 }
 0x3d8   :  { %7486 = vmatprep.subr.bf16.mxu0 %v11922_v2  ;;  %v795_v63 = vld [vmem:[%s18511_s1 + $0x1778] sm:$0xff] }
 0x3d9   :  { %7526 = vmatpush1.bf16.msra.mxu1 %v12193_v1  ;;  %v1043_v30 = vld [vmem:[%s18511_s1 + $0x1f38] sm:$0xff]  ;;  %v12114_v39 = vcombine.high %v787_v29, %v795_v63  ;;  %v12113_v48 = vcombine.low %v787_v29, %v795_v63 }
 0x3da   :  { %7527 = vmatprep.subr.bf16.mxu1 %v12178_v37  ;;  %v1051_v33 = vld [vmem:[%s18511_s1 + $0x1f78] sm:$0xff] }
 0x3db   :  { %7487 = vmatpush1.bf16.msra.mxu0 %v11921_v10  ;;  %v12370_v40 = vcombine.high %v1043_v30, %v1051_v33  ;;  %v771_v52 = vld [vmem:[%s18511_s1 + $0x16b8] sm:$0xff]  ;;  %v12369_v51 = vcombine.low %v1043_v30, %v1051_v33 }
 0x3dc   :  { %7488 = vmatprep.subr.bf16.mxu0 %v11906_v12  ;;  %v779_v43 = vld [vmem:[%s18511_s1 + $0x16f8] sm:$0xff] }
 0x3dd   :  { %7528 = vmatpush1.bf16.msra.mxu1 %v12177_v11  ;;  %v1027_v0 = vld [vmem:[%s18511_s1 + $0x1eb8] sm:$0xff]  ;;  %v12098_v56 = vcombine.high %v771_v52, %v779_v43  ;;  %v12097_v2 = vcombine.low %v771_v52, %v779_v43 }
 0x3de   :  { %7529 = vmatprep.subr.bf16.mxu1 %v12162_v36  ;;  %v1035_v47 = vld [vmem:[%s18511_s1 + $0x1ef8] sm:$0xff] }
 0x3df   :  { %7489 = vmatpush1.bf16.msra.mxu0 %v11905_v18  ;;  %v12354_v59 = vcombine.high %v1027_v0, %v1035_v47  ;;  %v755_v44 = vld [vmem:[%s18511_s1 + $0x1638] sm:$0xff]  ;;  %v12353_v37 = vcombine.low %v1027_v0, %v1035_v47 }
 0x3e0   :  { %7490 = vmatprep.subr.bf16.mxu0 %v11890_v23  ;;  %v763_v61 = vld [vmem:[%s18511_s1 + $0x1678] sm:$0xff] }
 0x3e1   :  { %7530 = vmatpush1.bf16.msra.mxu1 %v12161_v49  ;;  %v1011_v54 = vld [vmem:[%s18511_s1 + $0x1e38] sm:$0xff]  ;;  %v12082_v55 = vcombine.high %v755_v44, %v763_v61  ;;  %v12081_v12 = vcombine.low %v755_v44, %v763_v61  ;;  %v12865_v61 = vld [vmem:[%s18514_s4 + $0x240] ss:$48 sps:$4 sm:$0xff]  }
 0x3e2   :  { %7531 = vmatprep.subr.bf16.mxu1 %v12146_v20  ;;  %v1019_v1 = vld [vmem:[%s18511_s1 + $0x1e78] sm:$0xff] }
 0x3e3   :  { %7491 = vmatpush1.bf16.msra.mxu0 %v11889_v15  ;;  %v12338_v5 = vcombine.high %v1011_v54, %v1019_v1  ;;  %v739_v6 = vld [vmem:[%s18511_s1 + $0x15b8] sm:$0xff]  ;;  %v12337_v36 = vcombine.low %v1011_v54, %v1019_v1 }
 0x3e4   :  { %7492 = vmatprep.subr.bf16.mxu0 %v12130_v14  ;;  %v747_v7 = vld [vmem:[%s18511_s1 + $0x15f8] sm:$0xff] }
 0x3e5   :  { %7532 = vmatpush1.bf16.msra.mxu1 %v12145_v26  ;;  %v995_v10 = vld [vmem:[%s18511_s1 + $0x1db8] sm:$0xff]  ;;  %v12066_v19 = vcombine.high %v739_v6, %v747_v7  ;;  %v12065_v23 = vcombine.low %v739_v6, %v747_v7  ;;  %v12873_v6 = vld [vmem:[%s18514_s4 + $0x184] ss:$48 sps:$4 sm:$0xff]  }
 0x3e6   :  { %7533 = vmatprep.subr.bf16.mxu1 %v12386_v28  ;;  %v1003_v11 = vld [vmem:[%s18511_s1 + $0x1df8] sm:$0xff] }
 0x3e7   :  { %7493 = vmatpush2.bf16.msra.mxu0 %v12129_v24  ;;  %v12322_v27 = vcombine.high %v995_v10, %v1003_v11  ;;  %v723_v17 = vld [vmem:[%s18511_s1 + $0x1538] sm:$0xff]  ;;  %v12321_v20 = vcombine.low %v995_v10, %v1003_v11  ;;  %v12871_v10 = vld [vmem:[%s18514_s4 + $0x180] ss:$48 sps:$4 sm:$0xff]   ;;  %v12876_v11 = vld [vmem:[%s18514_s4 + $0x124] ss:$48 sps:$4 sm:$0xff]  }
 0x3e8   :  { %7494 = vmatprep.subr.bf16.mxu0 %v12114_v39  ;;  %v731_v42 = vld [vmem:[%s18511_s1 + $0x1578] sm:$0xff] }
 0x3e9   :  { %7534 = vmatpush2.bf16.msra.mxu1 %v12385_v35  ;;  %v979_v18 = vld [vmem:[%s18511_s1 + $0x1d38] sm:$0xff]  ;;  %v12050_v41 = vcombine.high %v723_v17, %v731_v42  ;;  %v12049_v14 = vcombine.low %v723_v17, %v731_v42  ;;  %v12960_v17 = vld [vmem:[%s18514_s4 + $0x8a4] ss:$48 sps:$4 sm:$0xff]  }
 0x3ea   :  { %7535 = vmatprep.subr.bf16.mxu1 %v12370_v40  ;;  %v987_v49 = vld [vmem:[%s18511_s1 + $0x1d78] sm:$0xff]  ;;  %v12882_v42 = vld [vmem:[%s18514_s4 + $0x64] ss:$48 sps:$4 sm:$0xff]  }
 0x3eb   :  { %7495 = vmatpush2.bf16.msra.mxu0 %v12113_v48  ;;  %v12306_v25 = vcombine.high %v979_v18, %v987_v49  ;;  %v707_v3 = vld [vmem:[%s18511_s1 + $0x14b8] sm:$0xff]  ;;  %v12305_v28 = vcombine.low %v979_v18, %v987_v49  ;;  %v12864_v48 = vld [vmem:[%s18514_s4 + $0x2a4] ss:$48 sps:$4 sm:$0xff]   ;;  %v12880_v18 = vld [vmem:[%s18514_s4 + $0x60] ss:$48 sps:$4 sm:$0xff]  }
 0x3ec   :  { %7496 = vmatprep.subr.bf16.mxu0 %v12098_v56  ;;  %v715_v31 = vld [vmem:[%s18511_s1 + $0x14f8] sm:$0xff]  ;;  %v12867_v56 = vld [vmem:[%s18514_s4 + $0x244] ss:$48 sps:$4 sm:$0xff]   ;;  %v12964_v49 = vld [vmem:[%s18514_s4 + $0x840] ss:$48 sps:$4 sm:$0xff]  }
 0x3ed   :  { %7536 = vmatpush2.bf16.msra.mxu1 %v12369_v51  ;;  %v963_v15 = vld [vmem:[%s18511_s1 + $0x1cb8] sm:$0xff]  ;;  %v12034_v29 = vcombine.high %v707_v3, %v715_v31  ;;  %v12033_v39 = vcombine.low %v707_v3, %v715_v31  ;;  %v12862_v51 = vld [vmem:[%s18514_s4 + $0x2a0] ss:$48 sps:$4 sm:$0xff]   ;;  %v12972_v3 = vld [vmem:[%s18514_s4 + $0x7e4] ss:$48 sps:$4 sm:$0xff]  }
 0x3ee   :  { %7537 = vmatprep.subr.bf16.mxu1 %v12354_v59  ;;  %v971_v26 = vld [vmem:[%s18511_s1 + $0x1cf8] sm:$0xff]  ;;  %v12888_v31 = vld [vmem:[%s18514_s4 + $0x5a4] ss:$48 sps:$4 sm:$0xff]  }
 0x3ef   :  { %7497 = vmatpush2.bf16.msra.mxu0 %v12097_v2  ;;  %v12290_v63 = vcombine.high %v963_v15, %v971_v26  ;;  %v691_v30 = vld [vmem:[%s18511_s1 + $0x1438] sm:$0xff]  ;;  %v12289_v40 = vcombine.low %v963_v15, %v971_v26  ;;  %v12870_v2 = vld [vmem:[%s18514_s4 + $0x1e4] ss:$48 sps:$4 sm:$0xff]   ;;  %v12886_v15 = vld [vmem:[%s18514_s4 + $0x5a0] ss:$48 sps:$4 sm:$0xff]  }
 0x3f0   :  { %7498 = vmatprep.subr.bf16.mxu0 %v12082_v55  ;;  %v699_v33 = vld [vmem:[%s18511_s1 + $0x1478] sm:$0xff]  ;;  %v12976_v26 = vld [vmem:[%s18514_s4 + $0x780] ss:$48 sps:$4 sm:$0xff]  }
 0x3f1   :  { %7538 = vmatpush2.bf16.msra.mxu1 %v12353_v37  ;;  %v947_v24 = vld [vmem:[%s18511_s1 + $0x1c38] sm:$0xff]  ;;  %v12018_v52 = vcombine.high %v691_v30, %v699_v33  ;;  %v12017_v0 = vcombine.low %v691_v30, %v699_v33  ;;  %v12984_v30 = vld [vmem:[%s18514_s4 + $0x724] ss:$48 sps:$4 sm:$0xff]  }
 0x3f2   :  { %7539 = vmatprep.subr.bf16.mxu1 %v12338_v5  ;;  %v955_v35 = vld [vmem:[%s18511_s1 + $0x1c78] sm:$0xff]  ;;  %v12894_v33 = vld [vmem:[%s18514_s4 + $0x4e4] ss:$48 sps:$4 sm:$0xff]  }
 0x3f3   :  { %7499 = vmatpush2.bf16.msra.mxu0 %v12081_v12  ;;  %v12274_v43 = vcombine.high %v947_v24, %v955_v35  ;;  %v12273_v47 = vcombine.low %v947_v24, %v955_v35  ;;  %v12874_v12 = vld [vmem:[%s18514_s4 + $0x120] ss:$48 sps:$4 sm:$0xff]  }
 0x3f4   :  { %7500 = vmatprep.subr.bf16.mxu0 %v12066_v19  ;;  %v12877_v19 = vld [vmem:[%s18514_s4 + $0xc0] ss:$48 sps:$4 sm:$0xff]  }
 0x3f5   :  { %7540 = vmatpush2.bf16.msra.mxu1 %v12337_v36  ;;  %v12879_v36 = vld [vmem:[%s18514_s4 + $0xc4] ss:$48 sps:$4 sm:$0xff]   ;;  %v12892_v24 = vld [vmem:[%s18514_s4 + $0x4e0] ss:$48 sps:$4 sm:$0xff]  }
 0x3f6   :  { %7541 = vmatprep.subr.bf16.mxu1 %v12322_v27  ;;  %v12958_v27 = vld [vmem:[%s18514_s4 + $0x8a0] ss:$48 sps:$4 sm:$0xff]  }
 0x3f7   :  { %7501 = vmatpush2.bf16.msra.mxu0 %v12065_v23  ;;  %v12966_v23 = vld [vmem:[%s18514_s4 + $0x844] ss:$48 sps:$4 sm:$0xff]   ;;  %v12988_v35 = vld [vmem:[%s18514_s4 + $0x6c0] ss:$48 sps:$4 sm:$0xff]  }
 0x3f8   :  { %7502 = vmatprep.subr.bf16.mxu0 %v12050_v41  ;;  %v12883_v41 = vld [vmem:[%s18514_s4] ss:$48 sps:$4 sm:$0xff]  }
 0x3f9   :  { %7542 = vmatpush2.bf16.msra.mxu1 %v12321_v20  ;;  %v12885_v20 = vld [vmem:[%s18514_s4 + $0x4] ss:$48 sps:$4 sm:$0xff]  }
 0x3fa   :  { %7543 = vmatprep.subr.bf16.mxu1 %v12306_v25  ;;  %v12970_v25 = vld [vmem:[%s18514_s4 + $0x7e0] ss:$48 sps:$4 sm:$0xff]  }
 0x3fb   :  { %7503 = vmatpush2.bf16.msra.mxu0 %v12049_v14  ;;  %v12978_v14 = vld [vmem:[%s18514_s4 + $0x784] ss:$48 sps:$4 sm:$0xff]  }
 0x3fc   :  { %7504 = vmatprep.subr.bf16.mxu0 %v12034_v29  ;;  %v12889_v29 = vld [vmem:[%s18514_s4 + $0x540] ss:$48 sps:$4 sm:$0xff]  }
 0x3fd   :  { %7544 = vmatpush2.bf16.msra.mxu1 %v12305_v28  ;;  %v12891_v28 = vld [vmem:[%s18514_s4 + $0x544] ss:$48 sps:$4 sm:$0xff]  }
 0x3fe   :  { %7545 = vmatprep.subr.bf16.mxu1 %v12290_v63  ;;  %v12982_v63 = vld [vmem:[%s18514_s4 + $0x720] ss:$48 sps:$4 sm:$0xff]  }
 0x3ff   :  { %7505 = vmatpush2.bf16.msra.mxu0 %v12033_v39  ;;  %v12990_v39 = vld [vmem:[%s18514_s4 + $0x6c4] ss:$48 sps:$4 sm:$0xff]  }
 0x400   :  { %7506 = vmatprep.subr.bf16.mxu0 %v12018_v52  ;;  %v12895_v52 = vld [vmem:[%s18514_s4 + $0x480] ss:$48 sps:$4 sm:$0xff]  }
 0x401   :  { %7546 = vmatpush2.bf16.msra.mxu1 %v12289_v40  ;;  %v12897_v40 = vld [vmem:[%s18514_s4 + $0x484] ss:$48 sps:$4 sm:$0xff]  }
 0x402   :  { %7547 = vmatprep.subr.bf16.mxu1 %v12274_v43  ;;  %v12994_v43 = vld [vmem:[%s18514_s4 + $0x660] ss:$48 sps:$4 sm:$0xff]  }
 0x403   :  { %7507 = vmatpush2.bf16.msra.mxu0 %v12017_v0  ;;  %v12996_v0 = vld [vmem:[%s18514_s4 + $0x664] ss:$48 sps:$4 sm:$0xff]  }
 0x404   :  { %10094 = vmatprep.subr.bf16.mxu0 %v12864_v48  ;;  %v12898_v48 = vld [vmem:[%s18514_s4 + $0x420] ss:$48 sps:$4 sm:$0xff]  }
 0x405   :  { %7548 = vmatpush2.bf16.msra.mxu1 %v12273_v47  ;;  %v12900_v47 = vld [vmem:[%s18514_s4 + $0x424] ss:$48 sps:$4 sm:$0xff]  }
 0x406   :  { %v7264_v59 = vpop.f32.mrf.mxu0  ;;  %7509 = vmatmul.mubr.bf16.vlgmr.msra.gmra.mxu0 %v13785_v32  ;;  %10135 = vmatprep.subr.bf16.mxu1 %v12960_v17  ;;  %v13024_v17 = vld [vmem:[%s18514_s4 + $0xa80] ss:$48 sps:$4 sm:$0xff]  }
 0x407   :  { %10095 = vmatpush1.bf16.msra.mxu0 %v12862_v51  ;;  %v13000_v51 = vld [vmem:[%s18514_s4 + $0x600] ss:$48 sps:$4 sm:$0xff]  }
 0x408   :  { %v7305_v44 = vpop.f32.mrf.mxu1  ;;  %7550 = vmatmul.mubr.bf16.vlgmr.msra.gmra.mxu1 %v14086_v50  ;;  %v16954_v1 = vpop.f32.mrf.mxu0  ;;  %10096 = vmatprep.subr.bf16.mxu0 %v12867_v56  ;;  %v12868_v50 = vld [vmem:[%s18514_s4 + $0x1e0] ss:$48 sps:$4 sm:$0xff]   ;;  %v13002_v56 = vld [vmem:[%s18514_s4 + $0x604] ss:$48 sps:$4 sm:$0xff]  }
 0x409   :  { %v16952_v54 = vadd.f32 %v7305_v44, %v7264_v59  ;;  %10136 = vmatpush1.bf16.msra.mxu1 %v12958_v27  ;;  %v12903_v59 = vld [vmem:[%s18514_s4 + $0x3c4] ss:$48 sps:$4 sm:$0xff]   ;;  %v12901_v44 = vld [vmem:[%s18514_s4 + $0x3c0] ss:$48 sps:$4 sm:$0xff]   ;;  %v17121_v27 = vld [vmem:[%s18513_s3 + $0x8] sm:$0xff] }
 0x40a   :  { %v16959_v37 = vpop.f32.mrf.mxu1  ;;  %v7268_v32 = vpop.f32.mrf.mxu0  ;;  %10137 = vmatprep.subr.bf16.mxu1 %v12966_v23 }
 0x40b   :  { %10097 = vmatpush1.bf16.msra.mxu0 %v12865_v61  ;;  %v13006_v61 = vld [vmem:[%s18514_s4 + $0xba0] ss:$48 sps:$4 sm:$0xff]   ;;  %v12906_v32 = vld [vmem:[%s18514_s4 + $0x364] ss:$48 sps:$4 sm:$0xff]  }
 0x40c   :  { %v7309_v55 = vpop.f32.mrf.mxu1  ;;  %v7269_v5 = vpop.f32.mrf.mxu0  ;;  %10098 = vmatprep.subr.bf16.mxu0 %v12870_v2  ;;  %v13008_v2 = vld [vmem:[%s18514_s4 + $0xba4] ss:$48 sps:$4 sm:$0xff]  }
 0x40d   :  { %10138 = vmatpush1.bf16.msra.mxu1 %v12964_v49  ;;  %v12904_v55 = vld [vmem:[%s18514_s4 + $0x360] ss:$48 sps:$4 sm:$0xff]   ;;  %v13014_v5 = vld [vmem:[%s18514_s4 + $0xb44] ss:$48 sps:$4 sm:$0xff]   ;;  %v7697_v49 = vrot.slane %v17121_v27, %v15467_v53 }
 0x40e   :  { %v7310_v7 = vpop.f32.mrf.mxu1  ;;  %10139 = vmatprep.subr.bf16.mxu1 %v12972_v3 }
 0x40f   :  { %10099 = vmatpush1.bf16.msra.mxu0 %v12868_v50  ;;  %v13012_v50 = vld [vmem:[%s18514_s4 + $0xb40] ss:$48 sps:$4 sm:$0xff]  }
 0x410   :  { %10100 = vmatprep.subr.bf16.mxu0 %v12873_v6  ;;  %v12909_v6 = vld [vmem:[%s18514_s4 + $0x304] ss:$48 sps:$4 sm:$0xff]   ;;  %v12907_v7 = vld [vmem:[%s18514_s4 + $0x300] ss:$48 sps:$4 sm:$0xff]  }
 0x411   :  { %10140 = vmatpush1.bf16.msra.mxu1 %v12970_v25 }
 0x412   :  { %10141 = vmatprep.subr.bf16.mxu1 %v12978_v14 }
 0x413   :  { %10101 = vmatpush1.bf16.msra.mxu0 %v12871_v10  ;;  %v13018_v10 = vld [vmem:[%s18514_s4 + $0xae0] ss:$48 sps:$4 sm:$0xff]  }
 0x414   :  { %10102 = vmatprep.subr.bf16.mxu0 %v12876_v11  ;;  %v13020_v11 = vld [vmem:[%s18514_s4 + $0xae4] ss:$48 sps:$4 sm:$0xff]  }
 0x415   :  { %10142 = vmatpush1.bf16.msra.mxu1 %v12976_v26  ;;  %v7701_v26 = vrot.slane %v17121_v27, %v15470_v38 }
 0x416   :  { %10143 = vmatprep.subr.bf16.mxu1 %v12984_v30 }
 0x417   :  { %10103 = vmatpush1.bf16.msra.mxu0 %v12874_v12  ;;  %v17111_v12 = vld [vmem:[%s18512_s2 + $0x8] sm:$0xff] }
 0x418   :  { %10104 = vmatprep.subr.bf16.mxu0 %v12879_v36  ;;  %v12912_v36 = vld [vmem:[%s18514_s4 + $0x2ac] ss:$48 sps:$4 sm:$0xff]  }
 0x419   :  { %10144 = vmatpush1.bf16.msra.mxu1 %v12982_v63 }
 0x41a   :  { %10145 = vmatprep.subr.bf16.mxu1 %v12990_v39 }
 0x41b   :  { %10105 = vmatpush1.bf16.msra.mxu0 %v12877_v19  ;;  %v7597_v19 = vrot.slane %v17111_v12, %v15467_v53 }
 0x41c   :  { %10106 = vmatprep.subr.bf16.mxu0 %v12882_v42  ;;  %v13026_v42 = vld [vmem:[%s18514_s4 + $0xa84] ss:$48 sps:$4 sm:$0xff]  }
 0x41d   :  { %10146 = vmatpush1.bf16.msra.mxu1 %v12988_v35  ;;  %v7717_v35 = vrot.slane %v17121_v27, %v15508_v62 }
 0x41e   :  { %10147 = vmatprep.subr.bf16.mxu1 %v12996_v0 }
 0x41f   :  { %10107 = vmatpush1.bf16.msra.mxu0 %v12880_v18  ;;  %v7601_v18 = vrot.slane %v17111_v12, %v15470_v38 }
 0x420   :  { %10108 = vmatprep.subr.bf16.mxu0 %v12885_v20  ;;  %v7650_v20 = vmul.f32 %v7597_v19, %v16373_v58  ;;  %v12910_v19 = vld [vmem:[%s18514_s4 + $0x2a8] ss:$48 sps:$4 sm:$0xff]  }
 0x421   :  { %10148 = vmatpush1.bf16.msra.mxu1 %v12994_v43 }
 0x422   :  { %10149 = vmatprep.subr.bf16.mxu1 %v13002_v56  ;;  %v7750_v30 = vadd.f32 %v7697_v49, %v7650_v20  ;;  %v12916_v49 = vld [vmem:[%s18514_s4 + $0x1e8] ss:$48 sps:$4 sm:$0xff]  }
 0x423   :  { %10109 = vmatpush1.bf16.msra.mxu0 %v12883_v41  ;;  %v7308_v41 = vadd.f32 %v16959_v37, %v16954_v1  ;;  %v7713_v1 = vrot.slane %v17121_v27, %v15499_v57  ;;  %v12919_v20 = vld [vmem:[%s18514_s4 + $0x188] ss:$48 sps:$4 sm:$0xff]  }
 0x424   :  { %10110 = vmatprep.subr.bf16.mxu0 %v12888_v31  ;;  %v7613_v31 = vrot.slane %v17111_v12, %v15499_v57  ;;  %v7766_v56 = vmax.f32 %v7750_v30, 0.0  ;;  %v12943_v30 = vld [vmem:[%s18514_s4 + $0x488] ss:$48 sps:$4 sm:$0xff]  }
 0x425   :  { %10150 = vmatpush1.bf16.msra.mxu1 %v13000_v51  ;;  %v13036_v51 = vld [vmem:[%s18514_s4 + $0x9c0] ss:$48 sps:$4 sm:$0xff]  }
 0x426   :  { %10151 = vmatprep.subr.bf16.mxu1 %v13008_v2 }
 0x427   :  { %10111 = vmatpush2.bf16.msra.mxu0 %v12886_v15  ;;  %v7651_v15 = vmul.f32 %v7601_v18, %v16390_v46  ;;  %v13030_v46 = vld [vmem:[%s18514_s4 + $0xa20] ss:$48 sps:$4 sm:$0xff]   ;;  %v12918_v18 = vld [vmem:[%s18514_s4 + $0x1ec] ss:$48 sps:$4 sm:$0xff]  }
 0x428   :  { %10112 = vmatprep.subr.bf16.mxu0 %v12891_v28  ;;  %v13032_v28 = vld [vmem:[%s18514_s4 + $0xa24] ss:$48 sps:$4 sm:$0xff]  }
 0x429   :  { %10152 = vmatpush2.bf16.msra.mxu1 %v13006_v61  ;;  %v7751_v43 = vadd.f32 %v7701_v26, %v7651_v15  ;;  %v13044_v61 = vld [vmem:[%s18514_s4 + $0x964] ss:$48 sps:$4 sm:$0xff]   ;;  %v12930_v15 = vld [vmem:[%s18514_s4 + $0x6c] ss:$48 sps:$4 sm:$0xff]   ;;  %v12928_v26 = vld [vmem:[%s18514_s4 + $0x68] ss:$48 sps:$4 sm:$0xff]  }
 0x42a   :  { %10153 = vmatprep.subr.bf16.mxu1 %v13014_v5 }
 0x42b   :  { %10113 = vmatpush2.bf16.msra.mxu0 %v12889_v29  ;;  %v7617_v29 = vrot.slane %v17111_v12, %v15508_v62  ;;  %v7767_v2 = vmax.f32 %v7751_v43, 0.0  ;;  %v12951_v43 = vld [vmem:[%s18514_s4 + $0x3cc] ss:$48 sps:$4 sm:$0xff]  }
 0x42c   :  { %10114 = vmatprep.subr.bf16.mxu0 %v12894_v33 }
 0x42d   :  { %10154 = vmatpush2.bf16.msra.mxu1 %v13012_v50  ;;  %v13042_v50 = vld [vmem:[%s18514_s4 + $0x960] ss:$48 sps:$4 sm:$0xff]  }
 0x42e   :  { %10155 = vmatprep.subr.bf16.mxu1 %v13020_v11  ;;  %v13048_v11 = vld [vmem:[%s18514_s4 + $0x900] ss:$48 sps:$4 sm:$0xff]  }
 0x42f   :  { %10115 = vmatpush2.bf16.msra.mxu0 %v12892_v24 }
 0x430   :  { %10116 = vmatprep.subr.bf16.mxu0 %v12897_v40 }
 0x431   :  { %10156 = vmatpush2.bf16.msra.mxu1 %v13018_v10 }
 0x432   :  { %10157 = vmatprep.subr.bf16.mxu1 %v13026_v42  ;;  %v12913_v42 = vld [vmem:[%s18514_s4 + $0x248] ss:$48 sps:$4 sm:$0xff]  }
 0x433   :  { %10117 = vmatpush2.bf16.msra.mxu0 %v12895_v52  ;;  %v13038_v52 = vld [vmem:[%s18514_s4 + $0x9c4] ss:$48 sps:$4 sm:$0xff]  }
 0x434   :  { %10118 = vmatprep.subr.bf16.mxu0 %v12900_v47 }
 0x435   :  { %10158 = vmatpush2.bf16.msra.mxu1 %v13024_v17  ;;  %v12915_v17 = vld [vmem:[%s18514_s4 + $0x24c] ss:$48 sps:$4 sm:$0xff]  }
 0x436   :  { %10159 = vmatprep.subr.bf16.mxu1 %v13032_v28  ;;  %v12931_v28 = vld [vmem:[%s18514_s4 + $0x8] ss:$48 sps:$4 sm:$0xff]  }
 0x437   :  { %10119 = vmatpush2.bf16.msra.mxu0 %v12898_v48 }
 0x438   :  { %10120 = vmatprep.subr.bf16.mxu0 %v12903_v59 }
 0x439   :  { %10160 = vmatpush2.bf16.msra.mxu1 %v13030_v46  ;;  %v12940_v46 = vld [vmem:[%s18514_s4 + $0x4e8] ss:$48 sps:$4 sm:$0xff]  }
 0x43a   :  { %10161 = vmatprep.subr.bf16.mxu1 %v13038_v52 }
 0x43b   :  { %10121 = vmatpush2.bf16.msra.mxu0 %v12901_v44 }
 0x43c   :  { %10122 = vmatprep.subr.bf16.mxu0 %v12906_v32 }
 0x43d   :  { %10162 = vmatpush2.bf16.msra.mxu1 %v13036_v51  ;;  %v12949_v51 = vld [vmem:[%s18514_s4 + $0x3c8] ss:$48 sps:$4 sm:$0xff]  }
 0x43e   :  { %10163 = vmatprep.subr.bf16.mxu1 %v13044_v61  ;;  %v12952_v61 = vld [vmem:[%s18514_s4 + $0x368] ss:$48 sps:$4 sm:$0xff]  }
 0x43f   :  { %10123 = vmatpush2.bf16.msra.mxu0 %v12904_v55 }
 0x440   :  { %10124 = vmatprep.subr.bf16.mxu0 %v12909_v6 }
 0x441   :  { %10164 = vmatpush2.bf16.msra.mxu1 %v13042_v50  ;;  %v12961_v50 = vld [vmem:[%s18514_s4 + $0x2b0] ss:$48 sps:$4 sm:$0xff]  }
 0x443   :  { %10125 = vmatpush2.bf16.msra.mxu0 %v12907_v7  ;;  %v13050_v7 = vld [vmem:[%s18514_s4 + $0x904] ss:$48 sps:$4 sm:$0xff]  }
 0x444   :  { %10176 = vmatprep.subr.bf16.mxu0 %v12912_v36  ;;  %10165 = vmatprep.subr.bf16.mxu1 %v13050_v7  ;;  %v12975_v7 = vld [vmem:[%s18514_s4 + $0x1f4] ss:$48 sps:$4 sm:$0xff]  }
 0x445   :  { %10166 = vmatpush2.bf16.msra.mxu1 %v13048_v11  ;;  %v12981_v11 = vld [vmem:[%s18514_s4 + $0x194] ss:$48 sps:$4 sm:$0xff]  }
 0x446   :  { %v7346_v23 = vpop.f32.mrf.mxu0 }
 0x447   :  { %v7347_v25 = vadd.f32 %v7346_v23, %v16952_v54  ;;  %v12921_v23 = vld [vmem:[%s18514_s4 + $0x18c] ss:$48 sps:$4 sm:$0xff]  }
 0x448   :  { %v7387_v3 = vpop.f32.mrf.mxu1  ;;  %v7348_v14 = vpop.f32.mrf.mxu0 }
 0x449   :  { %v7388_v58 = vadd.f32 %v7387_v3, %v7347_v25  ;;  %v7349_v37 = vadd.f32 %v7348_v14, %v7308_v41  ;;  %v12924_v41 = vld [vmem:[%s18514_s4 + $0x12c] ss:$48 sps:$4 sm:$0xff]   ;;  %v12922_v25 = vld [vmem:[%s18514_s4 + $0x128] ss:$48 sps:$4 sm:$0xff]  }
 0x44a   :  { %v7389_v54 = vpop.f32.mrf.mxu1  ;;  %v7350_v63 = vpop.f32.mrf.mxu0  ;;  %v12927_v3 = vld [vmem:[%s18514_s4 + $0xcc] ss:$48 sps:$4 sm:$0xff]  }
 0x44b   :  { %v7654_v33 = vmul.f32 %v7613_v31, %v7388_v58  ;;  %v7390_v24 = vadd.f32 %v7389_v54, %v7349_v37  ;;  %v12925_v31 = vld [vmem:[%s18514_s4 + $0xc8] ss:$48 sps:$4 sm:$0xff]   ;;  %v12933_v14 = vld [vmem:[%s18514_s4 + $0xc] ss:$48 sps:$4 sm:$0xff]  }
 0x44c   :  { %v7391_v39 = vpop.f32.mrf.mxu1  ;;  %v7351_v40 = vpop.f32.mrf.mxu0  ;;  %v12936_v58 = vld [vmem:[%s18514_s4 + $0x5ac] ss:$48 sps:$4 sm:$0xff]   ;;  %v12937_v54 = vld [vmem:[%s18514_s4 + $0x548] ss:$48 sps:$4 sm:$0xff]  }
 0x44d   :  { %v7754_v0 = vadd.f32 %v7713_v1, %v7654_v33  ;;  %v7655_v47 = vmul.f32 %v7617_v29, %v7390_v24  ;;  %v12934_v1 = vld [vmem:[%s18514_s4 + $0x5a8] ss:$48 sps:$4 sm:$0xff]   ;;  %v12939_v37 = vld [vmem:[%s18514_s4 + $0x54c] ss:$48 sps:$4 sm:$0xff]  }
 0x44e   :  { %v7392_v48 = vpop.f32.mrf.mxu1  ;;  %v12942_v29 = vld [vmem:[%s18514_s4 + $0x4ec] ss:$48 sps:$4 sm:$0xff]   ;;  %v12946_v39 = vld [vmem:[%s18514_s4 + $0x428] ss:$48 sps:$4 sm:$0xff]  }
 0x44f   :  { %v7770_v59 = vmax.f32 %v7754_v0, 0.0  ;;  %v7755_v44 = vadd.f32 %v7717_v35, %v7655_v47  ;;  %v12945_v63 = vld [vmem:[%s18514_s4 + $0x48c] ss:$48 sps:$4 sm:$0xff]  }
 0x450   :  { %v12948_v33 = vld [vmem:[%s18514_s4 + $0x42c] ss:$48 sps:$4 sm:$0xff]  }
 0x451   :  { %v7778_v32 = vmax.f32 %v7766_v56, %v7770_v59  ;;  %v7771_v55 = vmax.f32 %v7755_v44, 0.0  ;;  %v12954_v59 = vld [vmem:[%s18514_s4 + $0x36c] ss:$48 sps:$4 sm:$0xff]  }
 0x453   :  { %v7782_v5 = vmax.f32 %v15566_v8, %v7778_v32  ;;  %v7779_v6 = vmax.f32 %v7767_v2, %v7771_v55  ;;  %v12957_v2 = vld [vmem:[%s18514_s4 + $0x30c] ss:$48 sps:$4 sm:$0xff]   ;;  %v12955_v32 = vld [vmem:[%s18514_s4 + $0x308] ss:$48 sps:$4 sm:$0xff]   ;;  %v12963_v55 = vld [vmem:[%s18514_s4 + $0x2b4] ss:$48 sps:$4 sm:$0xff]  }
 0x455   :  { %v7783_v10 = vmax.f32 %v15580_v16, %v7779_v6  ;;  %v17179_v8 = vpack.c.bf16 %v7782_v5, %v7782_v5  ;;  %v13056_v16 = vld [vmem:[%s18514_s4 + $0x8ac] ss:$48 sps:$4 sm:$0xff]   ;;  %v12969_v5 = vld [vmem:[%s18514_s4 + $0x254] ss:$48 sps:$4 sm:$0xff]   ;;  %v12967_v6 = vld [vmem:[%s18514_s4 + $0x250] ss:$48 sps:$4 sm:$0xff]  }
 0x456   :  { %10217 = vmatprep.subr.bf16.mxu1 %v13056_v16  ;;  %v12985_v16 = vld [vmem:[%s18514_s4 + $0x130] ss:$48 sps:$4 sm:$0xff]  }
 0x457   :  { %v17174_v36 = vpack.c.bf16 %v7783_v10, %v7783_v10  ;;  %v12973_v10 = vld [vmem:[%s18514_s4 + $0x1f0] ss:$48 sps:$4 sm:$0xff]  }
 0x459   :  { %10126 = vmatprep.mubr.bf16.mxu0 %v17174_v36 }
 0x45a   :  { %10127 = vmatmul.mubr.bf16.vlgmr.msra.gmra.mxu0 %v17179_v8 }
 0x45b   :  { %10177 = vmatpush1.bf16.msra.mxu0 %v12910_v19  ;;  %10208 = vmatprep.mubr.bf16.mxu0 %v17174_v36  ;;  %v12979_v19 = vld [vmem:[%s18514_s4 + $0x190] ss:$48 sps:$4 sm:$0xff]  }
 0x45c   :  { %10178 = vmatprep.subr.bf16.mxu0 %v12915_v17  ;;  %v12987_v17 = vld [vmem:[%s18514_s4 + $0x134] ss:$48 sps:$4 sm:$0xff]  }
 0x45f   :  { %10179 = vmatpush1.bf16.msra.mxu0 %v12913_v42  ;;  %v12993_v42 = vld [vmem:[%s18514_s4 + $0xd4] ss:$48 sps:$4 sm:$0xff]  }
 0x460   :  { %10180 = vmatprep.subr.bf16.mxu0 %v12918_v18  ;;  %v12991_v18 = vld [vmem:[%s18514_s4 + $0xd0] ss:$48 sps:$4 sm:$0xff]  }
 0x463   :  { %10181 = vmatpush1.bf16.msra.mxu0 %v12916_v49  ;;  %v12999_v49 = vld [vmem:[%s18514_s4 + $0x74] ss:$48 sps:$4 sm:$0xff]  }
 0x464   :  { %10182 = vmatprep.subr.bf16.mxu0 %v12921_v23  ;;  %v12997_v23 = vld [vmem:[%s18514_s4 + $0x70] ss:$48 sps:$4 sm:$0xff]  }
 0x467   :  { %10183 = vmatpush1.bf16.msra.mxu0 %v12919_v20  ;;  %v13005_v20 = vld [vmem:[%s18514_s4 + $0x14] ss:$48 sps:$4 sm:$0xff]  }
 0x468   :  { %10184 = vmatprep.subr.bf16.mxu0 %v12924_v41  ;;  %v13003_v41 = vld [vmem:[%s18514_s4 + $0x10] ss:$48 sps:$4 sm:$0xff]  }
 0x46b   :  { %10185 = vmatpush1.bf16.msra.mxu0 %v12922_v25  ;;  %v13011_v25 = vld [vmem:[%s18514_s4 + $0x5b4] ss:$48 sps:$4 sm:$0xff]  }
 0x46c   :  { %10186 = vmatprep.subr.bf16.mxu0 %v12927_v3  ;;  %v13009_v3 = vld [vmem:[%s18514_s4 + $0x5b0] ss:$48 sps:$4 sm:$0xff]  }
 0x46f   :  { %10187 = vmatpush1.bf16.msra.mxu0 %v12925_v31  ;;  %v13017_v31 = vld [vmem:[%s18514_s4 + $0x554] ss:$48 sps:$4 sm:$0xff]  }
 0x470   :  { %10188 = vmatprep.subr.bf16.mxu0 %v12930_v15  ;;  %v13015_v15 = vld [vmem:[%s18514_s4 + $0x550] ss:$48 sps:$4 sm:$0xff]  }
 0x473   :  { %10189 = vmatpush1.bf16.msra.mxu0 %v12928_v26  ;;  %v13023_v26 = vld [vmem:[%s18514_s4 + $0x4f4] ss:$48 sps:$4 sm:$0xff]  }
 0x474   :  { %10190 = vmatprep.subr.bf16.mxu0 %v12933_v14  ;;  %v13021_v14 = vld [vmem:[%s18514_s4 + $0x4f0] ss:$48 sps:$4 sm:$0xff]  }
 0x477   :  { %10191 = vmatpush1.bf16.msra.mxu0 %v12931_v28  ;;  %v13029_v28 = vld [vmem:[%s18514_s4 + $0x494] ss:$48 sps:$4 sm:$0xff]  }
 0x478   :  { %10192 = vmatprep.subr.bf16.mxu0 %v12936_v58  ;;  %v7605_v58 = vrot.slane %v17111_v12, %v15909_v21 }
 0x47b   :  { %10193 = vmatpush2.bf16.msra.mxu0 %v12934_v1  ;;  %v13027_v1 = vld [vmem:[%s18514_s4 + $0x490] ss:$48 sps:$4 sm:$0xff]  }
 0x47c   :  { %10194 = vmatprep.subr.bf16.mxu0 %v12939_v37  ;;  %v7609_v37 = vrot.slane %v17111_v12, %v15912_v22 }
 0x47f   :  { %10195 = vmatpush2.bf16.msra.mxu0 %v12937_v54  ;;  %v13035_v54 = vld [vmem:[%s18514_s4 + $0x434] ss:$48 sps:$4 sm:$0xff]  }
 0x480   :  { %10196 = vmatprep.subr.bf16.mxu0 %v12942_v29  ;;  %v7705_v29 = vrot.slane %v17121_v27, %v15909_v21 }
 0x483   :  { %10197 = vmatpush2.bf16.msra.mxu0 %v12940_v46 }
 0x484   :  { %10198 = vmatprep.subr.bf16.mxu0 %v12945_v63  ;;  %v7652_v63 = vmul.f32 %v7605_v58, %v16775_v9  ;;  %v13063_v58 = vld [vmem:[%s18514_s4 + $0x258] ss:$48 sps:$4 sm:$0xff]  }
 0x486   :  { %v7428_v24 = vpop.f32.mrf.mxu0 }
 0x487   :  { %10199 = vmatpush2.bf16.msra.mxu0 %v12943_v30 }
 0x488   :  { %v7469_v35 = vpop.f32.mrf.mxu1  ;;  %v17261_v52 = vpop.f32.mrf.mxu0  ;;  %10200 = vmatprep.subr.bf16.mxu0 %v12948_v33 }
 0x489   :  { %v17259_v40 = vadd.f32 %v7469_v35, %v7428_v24  ;;  %v7621_v35 = vrot.slane %v17111_v12, %v15931_v34 }
 0x48a   :  { %v17266_v0 = vpop.f32.mrf.mxu1  ;;  %v7432_v47 = vpop.f32.mrf.mxu0 }
 0x48b   :  { %10201 = vmatpush2.bf16.msra.mxu0 %v12946_v39  ;;  %v7472_v30 = vadd.f32 %v17266_v0, %v17261_v52  ;;  %v13033_v39 = vld [vmem:[%s18514_s4 + $0x430] ss:$48 sps:$4 sm:$0xff]   ;;  %v7709_v47 = vrot.slane %v17121_v27, %v15912_v22  ;;  %v7721_v0 = vrot.slane %v17121_v27, %v15931_v34 }
 0x48c   :  { %v7473_v48 = vpop.f32.mrf.mxu1  ;;  %v7433_v56 = vpop.f32.mrf.mxu0  ;;  %10202 = vmatprep.subr.bf16.mxu0 %v12951_v43  ;;  %v7653_v43 = vmul.f32 %v7609_v37, %v16792_v13  ;;  %v7752_v13 = vadd.f32 %v7705_v29, %v7652_v63  ;;  %v13071_v37 = vld [vmem:[%s18514_s4 + $0x1fc] ss:$48 sps:$4 sm:$0xff]   ;;  %v13069_v29 = vld [vmem:[%s18514_s4 + $0x1f8] ss:$48 sps:$4 sm:$0xff]  }
 0x48d   :  { %v7625_v56 = vrot.slane %v17111_v12, %v15940_v45  ;;  %v13077_v63 = vld [vmem:[%s18514_s4 + $0x19c] ss:$48 sps:$4 sm:$0xff]  }
 0x48e   :  { %v7474_v44 = vpop.f32.mrf.mxu1  ;;  %v7753_v12 = vadd.f32 %v7709_v47, %v7653_v43  ;;  %v13081_v43 = vld [vmem:[%s18514_s4 + $0x138] ss:$48 sps:$4 sm:$0xff]   ;;  %v13086_v47 = vld [vmem:[%s18514_s4 + $0x6cc] ss:$48 sps:$4 sm:$0xff]  }
 0x48f   :  { %10203 = vmatpush2.bf16.msra.mxu0 %v12949_v51 }
 0x490   :  { %10204 = vmatprep.subr.bf16.mxu0 %v12954_v59 }
 0x493   :  { %10205 = vmatpush2.bf16.msra.mxu0 %v12952_v61 }
 0x494   :  { %10206 = vmatprep.subr.bf16.mxu0 %v12957_v2  ;;  %v7725_v2 = vrot.slane %v17121_v27, %v15940_v45  ;;  %v13045_v27 = vld [vmem:[%s18514_s4 + $0x370] ss:$48 sps:$4 sm:$0xff]  }
 0x497   :  { %10207 = vmatpush2.bf16.msra.mxu0 %v12955_v32 }
 0x498   :  { %10258 = vmatprep.subr.bf16.mxu0 %v12963_v55  ;;  %v13039_v55 = vld [vmem:[%s18514_s4 + $0x3d0] ss:$48 sps:$4 sm:$0xff]  }
 0x49a   :  { %10209 = vmatmul.mubr.bf16.vlgmr.msra.gmra.mxu0 %v17179_v8 }
 0x49b   :  { %10259 = vmatpush1.bf16.msra.mxu0 %v12961_v50  ;;  %10290 = vmatprep.mubr.bf16.mxu0 %v17174_v36 }
 0x49c   :  { %10260 = vmatprep.subr.bf16.mxu0 %v12969_v5  ;;  %v13047_v5 = vld [vmem:[%s18514_s4 + $0x374] ss:$48 sps:$4 sm:$0xff]  }
 0x49f   :  { %10261 = vmatpush1.bf16.msra.mxu0 %v12967_v6 }
 0x4a0   :  { %10262 = vmatprep.subr.bf16.mxu0 %v12975_v7 }
 0x4a3   :  { %10263 = vmatpush1.bf16.msra.mxu0 %v12973_v10 }
 0x4a4   :  { %10264 = vmatprep.subr.bf16.mxu0 %v12981_v11  ;;  %v7768_v11 = vmax.f32 %v7752_v13, 0.0  ;;  %v13101_v13 = vld [vmem:[%s18514_s4 + $0x1c] ss:$48 sps:$4 sm:$0xff]  }
 0x4a7   :  { %10265 = vmatpush1.bf16.msra.mxu0 %v12979_v19 }
 0x4a8   :  { %10266 = vmatprep.subr.bf16.mxu0 %v12987_v17 }
 0x4ab   :  { %10267 = vmatpush1.bf16.msra.mxu0 %v12985_v16  ;;  %v13053_v16 = vld [vmem:[%s18514_s4 + $0x314] ss:$48 sps:$4 sm:$0xff]  }
 0x4ac   :  { %10268 = vmatprep.subr.bf16.mxu0 %v12993_v42  ;;  %v7769_v42 = vmax.f32 %v7753_v12, 0.0  ;;  %v13113_v12 = vld [vmem:[%s18514_s4 + $0x55c] ss:$48 sps:$4 sm:$0xff]  }
 0x4af   :  { %10269 = vmatpush1.bf16.msra.mxu0 %v12991_v18 }
 0x4b0   :  { %10270 = vmatprep.subr.bf16.mxu0 %v12999_v49 }
 0x4b3   :  { %10271 = vmatpush1.bf16.msra.mxu0 %v12997_v23 }
 0x4b4   :  { %10272 = vmatprep.subr.bf16.mxu0 %v13005_v20 }
 0x4b7   :  { %10273 = vmatpush1.bf16.msra.mxu0 %v13003_v41  ;;  %v13051_v41 = vld [vmem:[%s18514_s4 + $0x310] ss:$48 sps:$4 sm:$0xff]  }
 0x4b8   :  { %10274 = vmatprep.subr.bf16.mxu0 %v13011_v25  ;;  %v13059_v25 = vld [vmem:[%s18514_s4 + $0x2bc] ss:$48 sps:$4 sm:$0xff]  }
 0x4bb   :  { %10275 = vmatpush2.bf16.msra.mxu0 %v13009_v3 }
 0x4bc   :  { %10276 = vmatprep.subr.bf16.mxu0 %v13017_v31 }
 0x4bf   :  { %10277 = vmatpush2.bf16.msra.mxu0 %v13015_v15  ;;  %v13057_v15 = vld [vmem:[%s18514_s4 + $0x2b8] ss:$48 sps:$4 sm:$0xff]  }
 0x4c0   :  { %10278 = vmatprep.subr.bf16.mxu0 %v13023_v26 }
 0x4c3   :  { %10279 = vmatpush2.bf16.msra.mxu0 %v13021_v14  ;;  %v13065_v14 = vld [vmem:[%s18514_s4 + $0x25c] ss:$48 sps:$4 sm:$0xff]  }
 0x4c4   :  { %10280 = vmatprep.subr.bf16.mxu0 %v13029_v28  ;;  %v13060_v28 = vld [vmem:[%s18514_s4 + $0x848] ss:$48 sps:$4 sm:$0xff]  }
 0x4c6   :  { %v7510_v46 = vpop.f32.mrf.mxu0 }
 0x4c7   :  { %v7511_v33 = vadd.f32 %v7510_v46, %v17259_v40  ;;  %10281 = vmatpush2.bf16.msra.mxu0 %v13027_v1  ;;  %v13041_v40 = vld [vmem:[%s18514_s4 + $0x3d4] ss:$48 sps:$4 sm:$0xff]   ;;  %v13068_v1 = vld [vmem:[%s18514_s4 + $0x7ec] ss:$48 sps:$4 sm:$0xff]  }
 0x4c8   :  { %v7551_v24 = vpop.f32.mrf.mxu1  ;;  %v7512_v9 = vpop.f32.mrf.mxu0  ;;  %10282 = vmatprep.subr.bf16.mxu0 %v13035_v54  ;;  %v13066_v54 = vld [vmem:[%s18514_s4 + $0x7e8] ss:$48 sps:$4 sm:$0xff]   ;;  %v13074_v46 = vld [vmem:[%s18514_s4 + $0x78c] ss:$48 sps:$4 sm:$0xff]  }
 0x4c9   :  { %v7552_v52 = vadd.f32 %v7551_v24, %v7511_v33  ;;  %v7513_v48 = vadd.f32 %v7512_v9, %v7472_v30  ;;  %v13072_v30 = vld [vmem:[%s18514_s4 + $0x788] ss:$48 sps:$4 sm:$0xff]   ;;  %v13080_v24 = vld [vmem:[%s18514_s4 + $0x72c] ss:$48 sps:$4 sm:$0xff]  }
 0x4ca   :  { %v7553_v51 = vpop.f32.mrf.mxu1  ;;  %v7514_v59 = vpop.f32.mrf.mxu0  ;;  %v13075_v33 = vld [vmem:[%s18514_s4 + $0x198] ss:$48 sps:$4 sm:$0xff]   ;;  %v13089_v9 = vld [vmem:[%s18514_s4 + $0xdc] ss:$48 sps:$4 sm:$0xff]  }
 0x4cb   :  { %v7656_v44 = vmul.f32 %v7621_v35, %v7552_v52  ;;  %v7554_v61 = vadd.f32 %v7553_v51, %v7513_v48  ;;  %10283 = vmatpush2.bf16.msra.mxu0 %v13033_v39  ;;  %v13083_v35 = vld [vmem:[%s18514_s4 + $0x13c] ss:$48 sps:$4 sm:$0xff]   ;;  %v13078_v39 = vld [vmem:[%s18514_s4 + $0x728] ss:$48 sps:$4 sm:$0xff]  }
 0x4cc   :  { %v7555_v32 = vpop.f32.mrf.mxu1  ;;  %v7515_v50 = vpop.f32.mrf.mxu0  ;;  %10284 = vmatprep.subr.bf16.mxu0 %v13041_v40  ;;  %v13084_v40 = vld [vmem:[%s18514_s4 + $0x6c8] ss:$48 sps:$4 sm:$0xff]   ;;  %v13095_v48 = vld [vmem:[%s18514_s4 + $0x7c] ss:$48 sps:$4 sm:$0xff]  }
 0x4cd   :  { %v7756_v6 = vadd.f32 %v7721_v0, %v7656_v44  ;;  %v7657_v7 = vmul.f32 %v7625_v56, %v7554_v61  ;;  %v13087_v52 = vld [vmem:[%s18514_s4 + $0xd8] ss:$48 sps:$4 sm:$0xff]   ;;  %v13092_v0 = vld [vmem:[%s18514_s4 + $0x66c] ss:$48 sps:$4 sm:$0xff]  }
 0x4ce   :  { %v7556_v10 = vpop.f32.mrf.mxu1  ;;  %v13090_v51 = vld [vmem:[%s18514_s4 + $0x668] ss:$48 sps:$4 sm:$0xff]   ;;  %v13098_v59 = vld [vmem:[%s18514_s4 + $0x60c] ss:$48 sps:$4 sm:$0xff]  }
 0x4cf   :  { %v7772_v19 = vmax.f32 %v7756_v6, 0.0  ;;  %v7757_v17 = vadd.f32 %v7725_v2, %v7657_v7  ;;  %10285 = vmatpush2.bf16.msra.mxu0 %v13039_v55  ;;  %v13093_v56 = vld [vmem:[%s18514_s4 + $0x78] ss:$48 sps:$4 sm:$0xff]   ;;  %v13104_v2 = vld [vmem:[%s18514_s4 + $0xbac] ss:$48 sps:$4 sm:$0xff]  }
 0x4d0   :  { %10286 = vmatprep.subr.bf16.mxu0 %v13047_v5  ;;  %v13096_v44 = vld [vmem:[%s18514_s4 + $0x608] ss:$48 sps:$4 sm:$0xff]   ;;  %v13107_v32 = vld [vmem:[%s18514_s4 + $0x5bc] ss:$48 sps:$4 sm:$0xff]  }
 0x4d1   :  { %v7780_v18 = vmax.f32 %v7768_v11, %v7772_v19  ;;  %v7773_v49 = vmax.f32 %v7757_v17, 0.0  ;;  %v13099_v61 = vld [vmem:[%s18514_s4 + $0x18] ss:$48 sps:$4 sm:$0xff]   ;;  %v13110_v5 = vld [vmem:[%s18514_s4 + $0xb4c] ss:$48 sps:$4 sm:$0xff]  }
 0x4d2   :  { %v13102_v55 = vld [vmem:[%s18514_s4 + $0xba8] ss:$48 sps:$4 sm:$0xff]   ;;  %v13116_v10 = vld [vmem:[%s18514_s4 + $0xaec] ss:$48 sps:$4 sm:$0xff]  }
 0x4d3   :  { %v7784_v23 = vmax.f32 %v15998_v60, %v7780_v18  ;;  %v7781_v20 = vmax.f32 %v7769_v42, %v7773_v49  ;;  %10287 = vmatpush2.bf16.msra.mxu0 %v13045_v27  ;;  %v13054_v60 = vld [vmem:[%s18514_s4 + $0x8a8] ss:$48 sps:$4 sm:$0xff]   ;;  %v13119_v11 = vld [vmem:[%s18514_s4 + $0x4fc] ss:$48 sps:$4 sm:$0xff]  }
 0x4d4   :  { %10288 = vmatprep.subr.bf16.mxu0 %v13053_v16  ;;  %v13105_v50 = vld [vmem:[%s18514_s4 + $0x5b8] ss:$48 sps:$4 sm:$0xff]   ;;  %v13122_v27 = vld [vmem:[%s18514_s4 + $0xa8c] ss:$48 sps:$4 sm:$0xff]  }
 0x4d5   :  { %v7785_v3 = vmax.f32 %v16012_v4, %v7781_v20  ;;  %v17415_v26 = vpack.c.bf16 %v7784_v23, %v7784_v23  ;;  %v13062_v4 = vld [vmem:[%s18514_s4 + $0x84c] ss:$48 sps:$4 sm:$0xff]   ;;  %v13108_v6 = vld [vmem:[%s18514_s4 + $0xb48] ss:$48 sps:$4 sm:$0xff]  }
 0x4d6   :  { %v13111_v7 = vld [vmem:[%s18514_s4 + $0x558] ss:$48 sps:$4 sm:$0xff]   ;;  %v13125_v16 = vld [vmem:[%s18514_s4 + $0x49c] ss:$48 sps:$4 sm:$0xff]  }
 0x4d7   :  { %v17407_v31 = vpack.c.bf16 %v7785_v3, %v7785_v3  ;;  %10289 = vmatpush2.bf16.msra.mxu0 %v13051_v41  ;;  %v13114_v19 = vld [vmem:[%s18514_s4 + $0xae8] ss:$48 sps:$4 sm:$0xff]   ;;  %v13128_v49 = vld [vmem:[%s18514_s4 + $0xa2c] ss:$48 sps:$4 sm:$0xff]  }
 0x4d8   :  { %10340 = vmatprep.subr.bf16.mxu0 %v13059_v25  ;;  %v13117_v17 = vld [vmem:[%s18514_s4 + $0x4f8] ss:$48 sps:$4 sm:$0xff]   ;;  %v13131_v23 = vld [vmem:[%s18514_s4 + $0x43c] ss:$48 sps:$4 sm:$0xff]  }
 0x4d9   :  { %10167 = vmatprep.mubr.bf16.mxu1 %v17407_v31  ;;  %v13120_v42 = vld [vmem:[%s18514_s4 + $0xa88] ss:$48 sps:$4 sm:$0xff]   ;;  %v13134_v25 = vld [vmem:[%s18514_s4 + $0x9cc] ss:$48 sps:$4 sm:$0xff]  }
 0x4da   :  { %10291 = vmatmul.mubr.bf16.vlgmr.msra.gmra.mxu0 %v17179_v8  ;;  %10168 = vmatmul.mubr.bf16.vlgmr.msra.gmra.mxu1 %v17415_v26  ;;  %v13123_v18 = vld [vmem:[%s18514_s4 + $0x498] ss:$48 sps:$4 sm:$0xff]   ;;  %v13137_v3 = vld [vmem:[%s18514_s4 + $0x3dc] ss:$48 sps:$4 sm:$0xff]  }
 0x4db   :  { %10218 = vmatpush1.bf16.msra.mxu1 %v13054_v60  ;;  %10341 = vmatpush1.bf16.msra.mxu0 %v13057_v15  ;;  %v13126_v20 = vld [vmem:[%s18514_s4 + $0xa28] ss:$48 sps:$4 sm:$0xff]  }
 0x4dc   :  { %10372 = vmatprep.mubr.bf16.mxu0 %v17174_v36  ;;  %10249 = vmatprep.mubr.bf16.mxu1 %v17407_v31  ;;  %v13129_v41 = vld [vmem:[%s18514_s4 + $0x438] ss:$48 sps:$4 sm:$0xff]  }
 0x4dd   :  { %10219 = vmatprep.subr.bf16.mxu1 %v13062_v4  ;;  %10342 = vmatprep.subr.bf16.mxu0 %v13065_v14  ;;  %v13132_v60 = vld [vmem:[%s18514_s4 + $0x9c8] ss:$48 sps:$4 sm:$0xff]   ;;  %v13140_v4 = vld [vmem:[%s18514_s4 + $0x96c] ss:$48 sps:$4 sm:$0xff]  }
 0x4de   :  { %v13135_v15 = vld [vmem:[%s18514_s4 + $0x3d8] ss:$48 sps:$4 sm:$0xff]   ;;  %v13143_v14 = vld [vmem:[%s18514_s4 + $0x37c] ss:$48 sps:$4 sm:$0xff]  }
 0x4df   :  { %10220 = vmatpush1.bf16.msra.mxu1 %v13060_v28  ;;  %10343 = vmatpush1.bf16.msra.mxu0 %v13063_v58  ;;  %v13138_v28 = vld [vmem:[%s18514_s4 + $0x968] ss:$48 sps:$4 sm:$0xff]  }
 0x4e0   :  { %10221 = vmatprep.subr.bf16.mxu1 %v13068_v1  ;;  %10344 = vmatprep.subr.bf16.mxu0 %v13071_v37  ;;  %v13141_v58 = vld [vmem:[%s18514_s4 + $0x378] ss:$48 sps:$4 sm:$0xff]   ;;  %v13146_v1 = vld [vmem:[%s18514_s4 + $0x90c] ss:$48 sps:$4 sm:$0xff]  }
 0x4e1   :  { %v13149_v37 = vld [vmem:[%s18514_s4 + $0x31c] ss:$48 sps:$4 sm:$0xff]  }
 0x4e3   :  { %10222 = vmatpush1.bf16.msra.mxu1 %v13066_v54  ;;  %10345 = vmatpush1.bf16.msra.mxu0 %v13069_v29  ;;  %v13144_v54 = vld [vmem:[%s18514_s4 + $0x908] ss:$48 sps:$4 sm:$0xff]  }
 0x4e4   :  { %10223 = vmatprep.subr.bf16.mxu1 %v13074_v46  ;;  %10346 = vmatprep.subr.bf16.mxu0 %v13077_v63  ;;  %v13147_v29 = vld [vmem:[%s18514_s4 + $0x318] ss:$48 sps:$4 sm:$0xff]   ;;  %v13152_v46 = vld [vmem:[%s18514_s4 + $0x8b4] ss:$48 sps:$4 sm:$0xff]  }
 0x4e5   :  { %v13155_v63 = vld [vmem:[%s18514_s4 + $0x2c4] ss:$48 sps:$4 sm:$0xff]  }
 0x4e7   :  { %10224 = vmatpush1.bf16.msra.mxu1 %v13072_v30  ;;  %10347 = vmatpush1.bf16.msra.mxu0 %v13075_v33  ;;  %v13150_v30 = vld [vmem:[%s18514_s4 + $0x8b0] ss:$48 sps:$4 sm:$0xff]  }
 0x4e8   :  { %10225 = vmatprep.subr.bf16.mxu1 %v13080_v24  ;;  %10348 = vmatprep.subr.bf16.mxu0 %v13083_v35  ;;  %v13153_v33 = vld [vmem:[%s18514_s4 + $0x2c0] ss:$48 sps:$4 sm:$0xff]   ;;  %v13158_v24 = vld [vmem:[%s18514_s4 + $0x854] ss:$48 sps:$4 sm:$0xff]  }
 0x4e9   :  { %v13161_v35 = vld [vmem:[%s18514_s4 + $0x264] ss:$48 sps:$4 sm:$0xff]  }
 0x4eb   :  { %10226 = vmatpush1.bf16.msra.mxu1 %v13078_v39  ;;  %10349 = vmatpush1.bf16.msra.mxu0 %v13081_v43  ;;  %v13156_v43 = vld [vmem:[%s18514_s4 + $0x850] ss:$48 sps:$4 sm:$0xff]  }
 0x4ec   :  { %10227 = vmatprep.subr.bf16.mxu1 %v13086_v47  ;;  %10350 = vmatprep.subr.bf16.mxu0 %v13089_v9  ;;  %v13159_v9 = vld [vmem:[%s18514_s4 + $0x260] ss:$48 sps:$4 sm:$0xff]  }
 0x4ef   :  { %10228 = vmatpush1.bf16.msra.mxu1 %v13084_v40  ;;  %10351 = vmatpush1.bf16.msra.mxu0 %v13087_v52  ;;  %v13164_v40 = vld [vmem:[%s18514_s4 + $0x7f4] ss:$48 sps:$4 sm:$0xff]  }
 0x4f0   :  { %10229 = vmatprep.subr.bf16.mxu1 %v13092_v0  ;;  %10352 = vmatprep.subr.bf16.mxu0 %v13095_v48  ;;  %v13167_v52 = vld [vmem:[%s18514_s4 + $0x204] ss:$48 sps:$4 sm:$0xff]   ;;  %v13162_v48 = vld [vmem:[%s18514_s4 + $0x7f0] ss:$48 sps:$4 sm:$0xff]  }
 0x4f3   :  { %10230 = vmatpush1.bf16.msra.mxu1 %v13090_v51  ;;  %10353 = vmatpush1.bf16.msra.mxu0 %v13093_v56  ;;  %v13165_v56 = vld [vmem:[%s18514_s4 + $0x200] ss:$48 sps:$4 sm:$0xff]  }
 0x4f4   :  { %10231 = vmatprep.subr.bf16.mxu1 %v13098_v59  ;;  %10354 = vmatprep.subr.bf16.mxu0 %v13101_v13  ;;  %v13170_v59 = vld [vmem:[%s18514_s4 + $0x794] ss:$48 sps:$4 sm:$0xff]  }
 0x4f5   :  { %v13173_v13 = vld [vmem:[%s18514_s4 + $0x1a4] ss:$48 sps:$4 sm:$0xff]  }
 0x4f7   :  { %10232 = vmatpush1.bf16.msra.mxu1 %v13096_v44  ;;  %10355 = vmatpush1.bf16.msra.mxu0 %v13099_v61  ;;  %v13168_v44 = vld [vmem:[%s18514_s4 + $0x790] ss:$48 sps:$4 sm:$0xff]  }
 0x4f8   :  { %10233 = vmatprep.subr.bf16.mxu1 %v13104_v2  ;;  %10356 = vmatprep.subr.bf16.mxu0 %v13107_v32  ;;  %v13171_v61 = vld [vmem:[%s18514_s4 + $0x1a0] ss:$48 sps:$4 sm:$0xff]   ;;  %v13176_v2 = vld [vmem:[%s18514_s4 + $0x734] ss:$48 sps:$4 sm:$0xff]  }
 0x4f9   :  { %v13179_v32 = vld [vmem:[%s18514_s4 + $0x144] ss:$48 sps:$4 sm:$0xff]  }
 0x4fb   :  { %10234 = vmatpush2.bf16.msra.mxu1 %v13102_v55  ;;  %10357 = vmatpush2.bf16.msra.mxu0 %v13105_v50  ;;  %v13174_v55 = vld [vmem:[%s18514_s4 + $0x730] ss:$48 sps:$4 sm:$0xff]  }
 0x4fc   :  { %10235 = vmatprep.subr.bf16.mxu1 %v13110_v5  ;;  %10358 = vmatprep.subr.bf16.mxu0 %v13113_v12  ;;  %v13177_v50 = vld [vmem:[%s18514_s4 + $0x140] ss:$48 sps:$4 sm:$0xff]   ;;  %v13182_v5 = vld [vmem:[%s18514_s4 + $0x6d4] ss:$48 sps:$4 sm:$0xff]  }
 0x4fd   :  { %v13185_v12 = vld [vmem:[%s18514_s4 + $0xe4] ss:$48 sps:$4 sm:$0xff]  }
 0x4ff   :  { %10236 = vmatpush2.bf16.msra.mxu1 %v13108_v6  ;;  %10359 = vmatpush2.bf16.msra.mxu0 %v13111_v7  ;;  %v13180_v6 = vld [vmem:[%s18514_s4 + $0x6d0] ss:$48 sps:$4 sm:$0xff]  }
 0x500   :  { %10237 = vmatprep.subr.bf16.mxu1 %v13116_v10  ;;  %10360 = vmatprep.subr.bf16.mxu0 %v13119_v11  ;;  %v13183_v7 = vld [vmem:[%s18514_s4 + $0xe0] ss:$48 sps:$4 sm:$0xff]   ;;  %v13188_v10 = vld [vmem:[%s18514_s4 + $0x674] ss:$48 sps:$4 sm:$0xff]  }
 0x501   :  { %v13191_v11 = vld [vmem:[%s18514_s4 + $0x84] ss:$48 sps:$4 sm:$0xff]  }
 0x503   :  { %10238 = vmatpush2.bf16.msra.mxu1 %v13114_v19  ;;  %10361 = vmatpush2.bf16.msra.mxu0 %v13117_v17  ;;  %v13186_v19 = vld [vmem:[%s18514_s4 + $0x670] ss:$48 sps:$4 sm:$0xff]  }
 0x504   :  { %10239 = vmatprep.subr.bf16.mxu1 %v13122_v27  ;;  %10362 = vmatprep.subr.bf16.mxu0 %v13125_v16  ;;  %v13189_v17 = vld [vmem:[%s18514_s4 + $0x80] ss:$48 sps:$4 sm:$0xff]   ;;  %v13194_v27 = vld [vmem:[%s18514_s4 + $0x614] ss:$48 sps:$4 sm:$0xff]  }
 0x505   :  { %v13197_v16 = vld [vmem:[%s18514_s4 + $0x24] ss:$48 sps:$4 sm:$0xff]  }
 0x507   :  { %10240 = vmatpush2.bf16.msra.mxu1 %v13120_v42  ;;  %10363 = vmatpush2.bf16.msra.mxu0 %v13123_v18  ;;  %v13192_v42 = vld [vmem:[%s18514_s4 + $0x610] ss:$48 sps:$4 sm:$0xff]  }
 0x508   :  { %10241 = vmatprep.subr.bf16.mxu1 %v13128_v49  ;;  %10364 = vmatprep.subr.bf16.mxu0 %v13131_v23  ;;  %v13195_v18 = vld [vmem:[%s18514_s4 + $0x20] ss:$48 sps:$4 sm:$0xff]   ;;  %v13200_v49 = vld [vmem:[%s18514_s4 + $0xbb4] ss:$48 sps:$4 sm:$0xff]  }
 0x509   :  { %v13203_v23 = vld [vmem:[%s18514_s4 + $0x5c4] ss:$48 sps:$4 sm:$0xff]  }
 0x50b   :  { %10242 = vmatpush2.bf16.msra.mxu1 %v13126_v20  ;;  %10365 = vmatpush2.bf16.msra.mxu0 %v13129_v41  ;;  %v13198_v20 = vld [vmem:[%s18514_s4 + $0xbb0] ss:$48 sps:$4 sm:$0xff]  }
 0x50c   :  { %10243 = vmatprep.subr.bf16.mxu1 %v13134_v25  ;;  %10366 = vmatprep.subr.bf16.mxu0 %v13137_v3  ;;  %v13201_v41 = vld [vmem:[%s18514_s4 + $0x5c0] ss:$48 sps:$4 sm:$0xff]   ;;  %v13206_v25 = vld [vmem:[%s18514_s4 + $0xb54] ss:$48 sps:$4 sm:$0xff]  }
 0x50d   :  { %v13209_v3 = vld [vmem:[%s18514_s4 + $0x564] ss:$48 sps:$4 sm:$0xff]  }
 0x50f   :  { %10244 = vmatpush2.bf16.msra.mxu1 %v13132_v60  ;;  %10367 = vmatpush2.bf16.msra.mxu0 %v13135_v15  ;;  %v13204_v60 = vld [vmem:[%s18514_s4 + $0xb50] ss:$48 sps:$4 sm:$0xff]  }
 0x510   :  { %10245 = vmatprep.subr.bf16.mxu1 %v13140_v4  ;;  %10368 = vmatprep.subr.bf16.mxu0 %v13143_v14  ;;  %v13207_v15 = vld [vmem:[%s18514_s4 + $0x560] ss:$48 sps:$4 sm:$0xff]   ;;  %v13212_v4 = vld [vmem:[%s18514_s4 + $0xaf4] ss:$48 sps:$4 sm:$0xff]  }
 0x511   :  { %v13215_v14 = vld [vmem:[%s18514_s4 + $0x504] ss:$48 sps:$4 sm:$0xff]  }
 0x513   :  { %10246 = vmatpush2.bf16.msra.mxu1 %v13138_v28  ;;  %10369 = vmatpush2.bf16.msra.mxu0 %v13141_v58  ;;  %v13210_v28 = vld [vmem:[%s18514_s4 + $0xaf0] ss:$48 sps:$4 sm:$0xff]  }
 0x514   :  { %10247 = vmatprep.subr.bf16.mxu1 %v13146_v1  ;;  %10370 = vmatprep.subr.bf16.mxu0 %v13149_v37  ;;  %v13213_v58 = vld [vmem:[%s18514_s4 + $0x500] ss:$48 sps:$4 sm:$0xff]   ;;  %v13218_v1 = vld [vmem:[%s18514_s4 + $0xa94] ss:$48 sps:$4 sm:$0xff]  }
 0x515   :  { %v13221_v37 = vld [vmem:[%s18514_s4 + $0x4a4] ss:$48 sps:$4 sm:$0xff]  }
 0x517   :  { %10248 = vmatpush2.bf16.msra.mxu1 %v13144_v54  ;;  %10371 = vmatpush2.bf16.msra.mxu0 %v13147_v29  ;;  %v13216_v54 = vld [vmem:[%s18514_s4 + $0xa90] ss:$48 sps:$4 sm:$0xff]  }
 0x518   :  { %10299 = vmatprep.subr.bf16.mxu1 %v13152_v46  ;;  %10422 = vmatprep.subr.bf16.mxu0 %v13155_v63  ;;  %v13219_v29 = vld [vmem:[%s18514_s4 + $0x4a0] ss:$48 sps:$4 sm:$0xff]   ;;  %v13224_v46 = vld [vmem:[%s18514_s4 + $0xa34] ss:$48 sps:$4 sm:$0xff]  }
 0x519   :  { %v13227_v63 = vld [vmem:[%s18514_s4 + $0x444] ss:$48 sps:$4 sm:$0xff]  }
 0x51a   :  { %10250 = vmatmul.mubr.bf16.vlgmr.msra.gmra.mxu1 %v17415_v26  ;;  %10373 = vmatmul.mubr.bf16.vlgmr.msra.gmra.mxu0 %v17179_v8  ;;  %v17622_v39 = vpop.f32.mrf.mxu0 }
 0x51b   :  { %10300 = vmatpush1.bf16.msra.mxu1 %v13150_v30  ;;  %10331 = vmatprep.mubr.bf16.mxu1 %v17407_v31  ;;  %v13222_v30 = vld [vmem:[%s18514_s4 + $0xa30] ss:$48 sps:$4 sm:$0xff]  }
 0x51c   :  { %10423 = vmatpush1.bf16.msra.mxu0 %v13153_v33  ;;  %10454 = vmatprep.mubr.bf16.mxu0 %v17174_v36  ;;  %v17629_v47 = vpop.f32.mrf.mxu0  ;;  %v13225_v33 = vld [vmem:[%s18514_s4 + $0x440] ss:$48 sps:$4 sm:$0xff]  }
 0x51d   :  { %10301 = vmatprep.subr.bf16.mxu1 %v13158_v24  ;;  %10424 = vmatprep.subr.bf16.mxu0 %v13161_v35  ;;  %v13230_v24 = vld [vmem:[%s18514_s4 + $0x9d4] ss:$48 sps:$4 sm:$0xff]  }
 0x51e   :  { %v10132_v0 = vpop.f32.mrf.mxu0  ;;  %v13233_v35 = vld [vmem:[%s18514_s4 + $0x3e4] ss:$48 sps:$4 sm:$0xff]  }
 0x51f   :  { %10302 = vmatpush1.bf16.msra.mxu1 %v13156_v43  ;;  %v13228_v43 = vld [vmem:[%s18514_s4 + $0x9d0] ss:$48 sps:$4 sm:$0xff]  }
 0x520   :  { %10425 = vmatpush1.bf16.msra.mxu0 %v13159_v9  ;;  %v10133_v51 = vpop.f32.mrf.mxu0  ;;  %10303 = vmatprep.subr.bf16.mxu1 %v13164_v40  ;;  %v13231_v9 = vld [vmem:[%s18514_s4 + $0x3e0] ss:$48 sps:$4 sm:$0xff]   ;;  %v13236_v40 = vld [vmem:[%s18514_s4 + $0x974] ss:$48 sps:$4 sm:$0xff]  }
 0x521   :  { %10426 = vmatprep.subr.bf16.mxu0 %v13167_v52  ;;  %v13239_v52 = vld [vmem:[%s18514_s4 + $0x384] ss:$48 sps:$4 sm:$0xff]   ;;  %v13234_v0 = vld [vmem:[%s18514_s4 + $0x970] ss:$48 sps:$4 sm:$0xff]  }
 0x522   :  { %v13242_v51 = vld [vmem:[%s18514_s4 + $0x914] ss:$48 sps:$4 sm:$0xff]  }
 0x523   :  { %10304 = vmatpush1.bf16.msra.mxu1 %v13162_v48  ;;  %v13237_v48 = vld [vmem:[%s18514_s4 + $0x380] ss:$48 sps:$4 sm:$0xff]  }
 0x524   :  { %10427 = vmatpush1.bf16.msra.mxu0 %v13165_v56  ;;  %10305 = vmatprep.subr.bf16.mxu1 %v13170_v59  ;;  %v13245_v56 = vld [vmem:[%s18514_s4 + $0x324] ss:$48 sps:$4 sm:$0xff]   ;;  %v13240_v59 = vld [vmem:[%s18514_s4 + $0x910] ss:$48 sps:$4 sm:$0xff]  }
 0x525   :  { %10428 = vmatprep.subr.bf16.mxu0 %v13173_v13  ;;  %v13243_v13 = vld [vmem:[%s18514_s4 + $0x320] ss:$48 sps:$4 sm:$0xff]  }
 0x527   :  { %10306 = vmatpush1.bf16.msra.mxu1 %v13168_v44  ;;  %v13248_v44 = vld [vmem:[%s18514_s4 + $0x8bc] ss:$48 sps:$4 sm:$0xff]  }
 0x528   :  { %10429 = vmatpush1.bf16.msra.mxu0 %v13171_v61  ;;  %10307 = vmatprep.subr.bf16.mxu1 %v13176_v2  ;;  %v13251_v61 = vld [vmem:[%s18514_s4 + $0x2cc] ss:$48 sps:$4 sm:$0xff]   ;;  %v13246_v2 = vld [vmem:[%s18514_s4 + $0x8b8] ss:$48 sps:$4 sm:$0xff]  }
 0x529   :  { %10430 = vmatprep.subr.bf16.mxu0 %v13179_v32  ;;  %v13249_v32 = vld [vmem:[%s18514_s4 + $0x2c8] ss:$48 sps:$4 sm:$0xff]  }
 0x52b   :  { %10308 = vmatpush1.bf16.msra.mxu1 %v13174_v55  ;;  %v13254_v55 = vld [vmem:[%s18514_s4 + $0x85c] ss:$48 sps:$4 sm:$0xff]  }
 0x52c   :  { %10431 = vmatpush1.bf16.msra.mxu0 %v13177_v50  ;;  %10309 = vmatprep.subr.bf16.mxu1 %v13182_v5  ;;  %v13257_v5 = vld [vmem:[%s18514_s4 + $0x26c] ss:$48 sps:$4 sm:$0xff]  }
 0x52d   :  { %10432 = vmatprep.subr.bf16.mxu0 %v13185_v12  ;;  %v13252_v12 = vld [vmem:[%s18514_s4 + $0x858] ss:$48 sps:$4 sm:$0xff]  }
 0x52f   :  { %10310 = vmatpush1.bf16.msra.mxu1 %v13180_v6 }
 0x530   :  { %10433 = vmatpush1.bf16.msra.mxu0 %v13183_v7  ;;  %10311 = vmatprep.subr.bf16.mxu1 %v13188_v10  ;;  %v13255_v7 = vld [vmem:[%s18514_s4 + $0x268] ss:$48 sps:$4 sm:$0xff]   ;;  %v13260_v10 = vld [vmem:[%s18514_s4 + $0x7fc] ss:$48 sps:$4 sm:$0xff]  }
 0x531   :  { %10434 = vmatprep.subr.bf16.mxu0 %v13191_v11  ;;  %v13263_v11 = vld [vmem:[%s18514_s4 + $0x20c] ss:$48 sps:$4 sm:$0xff]  }
 0x533   :  { %10312 = vmatpush1.bf16.msra.mxu1 %v13186_v19 }
 0x534   :  { %10435 = vmatpush1.bf16.msra.mxu0 %v13189_v17  ;;  %10313 = vmatprep.subr.bf16.mxu1 %v13194_v27  ;;  %v13258_v17 = vld [vmem:[%s18514_s4 + $0x7f8] ss:$48 sps:$4 sm:$0xff]  }
 0x535   :  { %10436 = vmatprep.subr.bf16.mxu0 %v13197_v16  ;;  %v13261_v16 = vld [vmem:[%s18514_s4 + $0x208] ss:$48 sps:$4 sm:$0xff]  }
 0x537   :  { %10314 = vmatpush1.bf16.msra.mxu1 %v13192_v42  ;;  %v13269_v42 = vld [vmem:[%s18514_s4 + $0x1ac] ss:$48 sps:$4 sm:$0xff]  }
 0x538   :  { %10437 = vmatpush1.bf16.msra.mxu0 %v13195_v18  ;;  %10315 = vmatprep.subr.bf16.mxu1 %v13200_v49  ;;  %v13264_v18 = vld [vmem:[%s18514_s4 + $0x798] ss:$48 sps:$4 sm:$0xff]  }
 0x539   :  { %10438 = vmatprep.subr.bf16.mxu0 %v13203_v23  ;;  %v13267_v49 = vld [vmem:[%s18514_s4 + $0x1a8] ss:$48 sps:$4 sm:$0xff]   ;;  %v13272_v23 = vld [vmem:[%s18514_s4 + $0x73c] ss:$48 sps:$4 sm:$0xff]  }
 0x53b   :  { %10316 = vmatpush2.bf16.msra.mxu1 %v13198_v20  ;;  %v13275_v20 = vld [vmem:[%s18514_s4 + $0x14c] ss:$48 sps:$4 sm:$0xff]  }
 0x53c   :  { %10439 = vmatpush2.bf16.msra.mxu0 %v13201_v41  ;;  %10317 = vmatprep.subr.bf16.mxu1 %v13206_v25  ;;  %v13270_v41 = vld [vmem:[%s18514_s4 + $0x738] ss:$48 sps:$4 sm:$0xff]  }
 0x53d   :  { %10440 = vmatprep.subr.bf16.mxu0 %v13209_v3  ;;  %v13273_v25 = vld [vmem:[%s18514_s4 + $0x148] ss:$48 sps:$4 sm:$0xff]   ;;  %v13278_v3 = vld [vmem:[%s18514_s4 + $0x6dc] ss:$48 sps:$4 sm:$0xff]  }
 0x53f   :  { %10318 = vmatpush2.bf16.msra.mxu1 %v13204_v60  ;;  %v13281_v60 = vld [vmem:[%s18514_s4 + $0xec] ss:$48 sps:$4 sm:$0xff]  }
 0x540   :  { %10441 = vmatpush2.bf16.msra.mxu0 %v13207_v15  ;;  %10319 = vmatprep.subr.bf16.mxu1 %v13212_v4  ;;  %v13276_v15 = vld [vmem:[%s18514_s4 + $0x6d8] ss:$48 sps:$4 sm:$0xff]  }
 0x541   :  { %10442 = vmatprep.subr.bf16.mxu0 %v13215_v14  ;;  %v13279_v4 = vld [vmem:[%s18514_s4 + $0xe8] ss:$48 sps:$4 sm:$0xff]   ;;  %v13284_v14 = vld [vmem:[%s18514_s4 + $0x67c] ss:$48 sps:$4 sm:$0xff]  }
 0x543   :  { %10320 = vmatpush2.bf16.msra.mxu1 %v13210_v28  ;;  %v13287_v28 = vld [vmem:[%s18514_s4 + $0x8c] ss:$48 sps:$4 sm:$0xff]  }
 0x544   :  { %10443 = vmatpush2.bf16.msra.mxu0 %v13213_v58  ;;  %10321 = vmatprep.subr.bf16.mxu1 %v13218_v1  ;;  %v13282_v58 = vld [vmem:[%s18514_s4 + $0x678] ss:$48 sps:$4 sm:$0xff]  }
 0x545   :  { %10444 = vmatprep.subr.bf16.mxu0 %v13221_v37  ;;  %v13285_v1 = vld [vmem:[%s18514_s4 + $0x88] ss:$48 sps:$4 sm:$0xff]   ;;  %v13290_v37 = vld [vmem:[%s18514_s4 + $0x61c] ss:$48 sps:$4 sm:$0xff]  }
 0x547   :  { %10322 = vmatpush2.bf16.msra.mxu1 %v13216_v54  ;;  %v13293_v54 = vld [vmem:[%s18514_s4 + $0x2c] ss:$48 sps:$4 sm:$0xff]  }
 0x548   :  { %10445 = vmatpush2.bf16.msra.mxu0 %v13219_v29  ;;  %10323 = vmatprep.subr.bf16.mxu1 %v13224_v46  ;;  %v13288_v29 = vld [vmem:[%s18514_s4 + $0x618] ss:$48 sps:$4 sm:$0xff]  }
 0x549   :  { %10446 = vmatprep.subr.bf16.mxu0 %v13227_v63  ;;  %v13291_v46 = vld [vmem:[%s18514_s4 + $0x28] ss:$48 sps:$4 sm:$0xff]   ;;  %v13296_v63 = vld [vmem:[%s18514_s4 + $0xbbc] ss:$48 sps:$4 sm:$0xff]  }
 0x54b   :  { %10324 = vmatpush2.bf16.msra.mxu1 %v13222_v30  ;;  %v13299_v30 = vld [vmem:[%s18514_s4 + $0x5cc] ss:$48 sps:$4 sm:$0xff]  }
 0x54c   :  { %10447 = vmatpush2.bf16.msra.mxu0 %v13225_v33  ;;  %10325 = vmatprep.subr.bf16.mxu1 %v13230_v24  ;;  %v13294_v33 = vld [vmem:[%s18514_s4 + $0xbb8] ss:$48 sps:$4 sm:$0xff]  }
 0x54d   :  { %10448 = vmatprep.subr.bf16.mxu0 %v13233_v35  ;;  %v13297_v24 = vld [vmem:[%s18514_s4 + $0x5c8] ss:$48 sps:$4 sm:$0xff]   ;;  %v13302_v35 = vld [vmem:[%s18514_s4 + $0xb5c] ss:$48 sps:$4 sm:$0xff]  }
 0x54f   :  { %10326 = vmatpush2.bf16.msra.mxu1 %v13228_v43  ;;  %v13305_v43 = vld [vmem:[%s18514_s4 + $0x56c] ss:$48 sps:$4 sm:$0xff]  }
 0x550   :  { %10449 = vmatpush2.bf16.msra.mxu0 %v13231_v9  ;;  %10327 = vmatprep.subr.bf16.mxu1 %v13236_v40  ;;  %v13300_v9 = vld [vmem:[%s18514_s4 + $0xb58] ss:$48 sps:$4 sm:$0xff]  }
 0x551   :  { %10450 = vmatprep.subr.bf16.mxu0 %v13239_v52  ;;  %v13303_v40 = vld [vmem:[%s18514_s4 + $0x568] ss:$48 sps:$4 sm:$0xff]   ;;  %v13308_v52 = vld [vmem:[%s18514_s4 + $0xafc] ss:$48 sps:$4 sm:$0xff]  }
 0x553   :  { %10328 = vmatpush2.bf16.msra.mxu1 %v13234_v0  ;;  %v13311_v0 = vld [vmem:[%s18514_s4 + $0x50c] ss:$48 sps:$4 sm:$0xff]  }
 0x554   :  { %10451 = vmatpush2.bf16.msra.mxu0 %v13237_v48  ;;  %10329 = vmatprep.subr.bf16.mxu1 %v13242_v51  ;;  %v13306_v48 = vld [vmem:[%s18514_s4 + $0xaf8] ss:$48 sps:$4 sm:$0xff]  }
 0x555   :  { %10452 = vmatprep.subr.bf16.mxu0 %v13245_v56  ;;  %v13309_v51 = vld [vmem:[%s18514_s4 + $0x508] ss:$48 sps:$4 sm:$0xff]   ;;  %v13314_v56 = vld [vmem:[%s18514_s4 + $0xa9c] ss:$48 sps:$4 sm:$0xff]  }
 0x557   :  { %10330 = vmatpush2.bf16.msra.mxu1 %v13240_v59  ;;  %v13317_v59 = vld [vmem:[%s18514_s4 + $0x4ac] ss:$48 sps:$4 sm:$0xff]  }
 0x558   :  { %10453 = vmatpush2.bf16.msra.mxu0 %v13243_v13  ;;  %10381 = vmatprep.subr.bf16.mxu1 %v13248_v44  ;;  %v13312_v13 = vld [vmem:[%s18514_s4 + $0xa98] ss:$48 sps:$4 sm:$0xff]  }
 0x559   :  { %10504 = vmatprep.subr.bf16.mxu0 %v13251_v61  ;;  %v13315_v44 = vld [vmem:[%s18514_s4 + $0x4a8] ss:$48 sps:$4 sm:$0xff]   ;;  %v13320_v61 = vld [vmem:[%s18514_s4 + $0xa3c] ss:$48 sps:$4 sm:$0xff]  }
 0x55a   :  { %v17817_v50 = vpop.f32.mrf.mxu0  ;;  %10332 = vmatmul.mubr.bf16.vlgmr.msra.gmra.mxu1 %v17415_v26 }
 0x55b   :  { %10455 = vmatmul.mubr.bf16.vlgmr.msra.gmra.mxu0 %v17179_v8  ;;  %10382 = vmatpush1.bf16.msra.mxu1 %v13246_v2  ;;  %v13323_v2 = vld [vmem:[%s18514_s4 + $0x44c] ss:$48 sps:$4 sm:$0xff]  }
 0x55c   :  { %10413 = vmatprep.mubr.bf16.mxu1 %v17407_v31  ;;  %10505 = vmatpush1.bf16.msra.mxu0 %v13249_v32  ;;  %v17828_v6 = vpop.f32.mrf.mxu0  ;;  %v13318_v32 = vld [vmem:[%s18514_s4 + $0xa38] ss:$48 sps:$4 sm:$0xff]  }
 0x55d   :  { %10536 = vmatprep.mubr.bf16.mxu0 %v17174_v36  ;;  %10383 = vmatprep.subr.bf16.mxu1 %v13254_v55  ;;  %v13266_v36 = vld [vmem:[%s18514_s4 + $0x79c] ss:$48 sps:$4 sm:$0xff]   ;;  %v13321_v55 = vld [vmem:[%s18514_s4 + $0x448] ss:$48 sps:$4 sm:$0xff]  }
 0x55e   :  { %v10214_v19 = vpop.f32.mrf.mxu0  ;;  %10506 = vmatprep.subr.bf16.mxu0 %v13257_v5  ;;  %v13326_v5 = vld [vmem:[%s18514_s4 + $0x9dc] ss:$48 sps:$4 sm:$0xff]  }
 0x55f   :  { %10384 = vmatpush1.bf16.msra.mxu1 %v13252_v12  ;;  %v13329_v12 = vld [vmem:[%s18514_s4 + $0x3ec] ss:$48 sps:$4 sm:$0xff]  }
 0x560   :  { %10507 = vmatpush1.bf16.msra.mxu0 %v13255_v7  ;;  %v10215_v27 = vpop.f32.mrf.mxu0  ;;  %10385 = vmatprep.subr.bf16.mxu1 %v13260_v10  ;;  %v13324_v7 = vld [vmem:[%s18514_s4 + $0x9d8] ss:$48 sps:$4 sm:$0xff]   ;;  %v13335_v19 = vld [vmem:[%s18514_s4 + $0x38c] ss:$48 sps:$4 sm:$0xff]  }
 0x561   :  { %10508 = vmatprep.subr.bf16.mxu0 %v13263_v11  ;;  %v13327_v10 = vld [vmem:[%s18514_s4 + $0x3e8] ss:$48 sps:$4 sm:$0xff]   ;;  %v13332_v11 = vld [vmem:[%s18514_s4 + $0x97c] ss:$48 sps:$4 sm:$0xff]  }
 0x562   :  { %v13333_v27 = vld [vmem:[%s18514_s4 + $0x388] ss:$48 sps:$4 sm:$0xff]  }
 0x563   :  { %10386 = vmatpush1.bf16.msra.mxu1 %v13258_v17  ;;  %v13330_v17 = vld [vmem:[%s18514_s4 + $0x978] ss:$48 sps:$4 sm:$0xff]  }
 0x564   :  { %10509 = vmatpush1.bf16.msra.mxu0 %v13261_v16  ;;  %10387 = vmatprep.subr.bf16.mxu1 %v13266_v36  ;;  %v13338_v16 = vld [vmem:[%s18514_s4 + $0x91c] ss:$48 sps:$4 sm:$0xff]  }
 0x565   :  { %10510 = vmatprep.subr.bf16.mxu0 %v13269_v42  ;;  %v13341_v36 = vld [vmem:[%s18514_s4 + $0x32c] ss:$48 sps:$4 sm:$0xff]   ;;  %v13336_v42 = vld [vmem:[%s18514_s4 + $0x918] ss:$48 sps:$4 sm:$0xff]  }
 0x567   :  { %10388 = vmatpush1.bf16.msra.mxu1 %v13264_v18  ;;  %v13339_v18 = vld [vmem:[%s18514_s4 + $0x328] ss:$48 sps:$4 sm:$0xff]  }
 0x568   :  { %10511 = vmatpush1.bf16.msra.mxu0 %v13267_v49  ;;  %10389 = vmatprep.subr.bf16.mxu1 %v13272_v23  ;;  %v13344_v49 = vld [vmem:[%s18514_s4 + $0x8c4] ss:$48 sps:$4 sm:$0xff]   ;;  %v13342_v23 = vld [vmem:[%s18514_s4 + $0x8c0] ss:$48 sps:$4 sm:$0xff]  }
 0x569   :  { %10512 = vmatprep.subr.bf16.mxu0 %v13275_v20  ;;  %v13347_v20 = vld [vmem:[%s18514_s4 + $0x864] ss:$48 sps:$4 sm:$0xff]  }
 0x56b   :  { %10390 = vmatpush1.bf16.msra.mxu1 %v13270_v41 }
 0x56c   :  { %10513 = vmatpush1.bf16.msra.mxu0 %v13273_v25  ;;  %10391 = vmatprep.subr.bf16.mxu1 %v13278_v3  ;;  %v13345_v3 = vld [vmem:[%s18514_s4 + $0x860] ss:$48 sps:$4 sm:$0xff]  }
 0x56d   :  { %10514 = vmatprep.subr.bf16.mxu0 %v13281_v60 }
 0x56f   :  { %10392 = vmatpush1.bf16.msra.mxu1 %v13276_v15 }
 0x570   :  { %10515 = vmatpush1.bf16.msra.mxu0 %v13279_v4  ;;  %10393 = vmatprep.subr.bf16.mxu1 %v13284_v14  ;;  %v13350_v4 = vld [vmem:[%s18514_s4 + $0x804] ss:$48 sps:$4 sm:$0xff]  }
 0x571   :  { %10516 = vmatprep.subr.bf16.mxu0 %v13287_v28 }
 0x573   :  { %10394 = vmatpush1.bf16.msra.mxu1 %v13282_v58 }
 0x574   :  { %10517 = vmatpush1.bf16.msra.mxu0 %v13285_v1  ;;  %10395 = vmatprep.subr.bf16.mxu1 %v13290_v37  ;;  %v13353_v37 = vld [vmem:[%s18514_s4 + $0x7a4] ss:$48 sps:$4 sm:$0xff]  }
 0x575   :  { %10518 = vmatprep.subr.bf16.mxu0 %v13293_v54  ;;  %v13351_v54 = vld [vmem:[%s18514_s4 + $0x7a0] ss:$48 sps:$4 sm:$0xff]  }
 0x577   :  { %10396 = vmatpush1.bf16.msra.mxu1 %v13288_v29  ;;  %v13356_v29 = vld [vmem:[%s18514_s4 + $0x744] ss:$48 sps:$4 sm:$0xff]  }
 0x578   :  { %10519 = vmatpush1.bf16.msra.mxu0 %v13291_v46  ;;  %10397 = vmatprep.subr.bf16.mxu1 %v13296_v63  ;;  %v13354_v46 = vld [vmem:[%s18514_s4 + $0x740] ss:$48 sps:$4 sm:$0xff]   ;;  %v13359_v63 = vld [vmem:[%s18514_s4 + $0x6e4] ss:$48 sps:$4 sm:$0xff]  }
 0x579   :  { %10520 = vmatprep.subr.bf16.mxu0 %v13299_v30  ;;  %v13357_v30 = vld [vmem:[%s18514_s4 + $0x6e0] ss:$48 sps:$4 sm:$0xff]  }
 0x57b   :  { %10398 = vmatpush2.bf16.msra.mxu1 %v13294_v33  ;;  %v13362_v33 = vld [vmem:[%s18514_s4 + $0x684] ss:$48 sps:$4 sm:$0xff]  }
 0x57c   :  { %10521 = vmatpush2.bf16.msra.mxu0 %v13297_v24  ;;  %10399 = vmatprep.subr.bf16.mxu1 %v13302_v35  ;;  %v13360_v24 = vld [vmem:[%s18514_s4 + $0x680] ss:$48 sps:$4 sm:$0xff]   ;;  %v13365_v35 = vld [vmem:[%s18514_s4 + $0x624] ss:$48 sps:$4 sm:$0xff]  }
 0x57d   :  { %10522 = vmatprep.subr.bf16.mxu0 %v13305_v43  ;;  %v13363_v43 = vld [vmem:[%s18514_s4 + $0x620] ss:$48 sps:$4 sm:$0xff]  }
 0x57f   :  { %10400 = vmatpush2.bf16.msra.mxu1 %v13300_v9  ;;  %v13368_v9 = vld [vmem:[%s18514_s4 + $0xbc4] ss:$48 sps:$4 sm:$0xff]  }
 0x580   :  { %10523 = vmatpush2.bf16.msra.mxu0 %v13303_v40  ;;  %10401 = vmatprep.subr.bf16.mxu1 %v13308_v52  ;;  %v13366_v40 = vld [vmem:[%s18514_s4 + $0xbc0] ss:$48 sps:$4 sm:$0xff]   ;;  %v13371_v52 = vld [vmem:[%s18514_s4 + $0xb64] ss:$48 sps:$4 sm:$0xff]  }
 0x581   :  { %10524 = vmatprep.subr.bf16.mxu0 %v13311_v0  ;;  %v13369_v0 = vld [vmem:[%s18514_s4 + $0xb60] ss:$48 sps:$4 sm:$0xff]  }
 0x583   :  { %10402 = vmatpush2.bf16.msra.mxu1 %v13306_v48  ;;  %v13374_v48 = vld [vmem:[%s18514_s4 + $0xb04] ss:$48 sps:$4 sm:$0xff]  }
 0x584   :  { %10525 = vmatpush2.bf16.msra.mxu0 %v13309_v51  ;;  %10403 = vmatprep.subr.bf16.mxu1 %v13314_v56  ;;  %v13372_v51 = vld [vmem:[%s18514_s4 + $0xb00] ss:$48 sps:$4 sm:$0xff]   ;;  %v13377_v56 = vld [vmem:[%s18514_s4 + $0xaa4] ss:$48 sps:$4 sm:$0xff]  }
 0x585   :  { %10526 = vmatprep.subr.bf16.mxu0 %v13317_v59  ;;  %v13375_v59 = vld [vmem:[%s18514_s4 + $0xaa0] ss:$48 sps:$4 sm:$0xff]  }
 0x587   :  { %10404 = vmatpush2.bf16.msra.mxu1 %v13312_v13  ;;  %v13380_v13 = vld [vmem:[%s18514_s4 + $0xa44] ss:$48 sps:$4 sm:$0xff]  }
 0x588   :  { %10527 = vmatpush2.bf16.msra.mxu0 %v13315_v44  ;;  %10405 = vmatprep.subr.bf16.mxu1 %v13320_v61  ;;  %v13378_v44 = vld [vmem:[%s18514_s4 + $0xa40] ss:$48 sps:$4 sm:$0xff]   ;;  %v13383_v61 = vld [vmem:[%s18514_s4 + $0x9e4] ss:$48 sps:$4 sm:$0xff]  }
 0x589   :  { %10528 = vmatprep.subr.bf16.mxu0 %v13323_v2  ;;  %v13381_v2 = vld [vmem:[%s18514_s4 + $0x9e0] ss:$48 sps:$4 sm:$0xff]  }
 0x58b   :  { %10406 = vmatpush2.bf16.msra.mxu1 %v13318_v32  ;;  %v13386_v32 = vld [vmem:[%s18514_s4 + $0x984] ss:$48 sps:$4 sm:$0xff]  }
 0x58c   :  { %10529 = vmatpush2.bf16.msra.mxu0 %v13321_v55  ;;  %10407 = vmatprep.subr.bf16.mxu1 %v13326_v5  ;;  %v13384_v55 = vld [vmem:[%s18514_s4 + $0x980] ss:$48 sps:$4 sm:$0xff]   ;;  %v13389_v5 = vld [vmem:[%s18514_s4 + $0x924] ss:$48 sps:$4 sm:$0xff]  }
 0x58d   :  { %10530 = vmatprep.subr.bf16.mxu0 %v13329_v12  ;;  %v13387_v12 = vld [vmem:[%s18514_s4 + $0x920] ss:$48 sps:$4 sm:$0xff]  }
 0x58f   :  { %10408 = vmatpush2.bf16.msra.mxu1 %v13324_v7  ;;  %v18112_v7 = vld [vmem:[%s18515_s5] sm:$0xff] }
 0x590   :  { %10531 = vmatpush2.bf16.msra.mxu0 %v13327_v10  ;;  %10409 = vmatprep.subr.bf16.mxu1 %v13332_v11  ;;  %v13392_v10 = vld [vmem:[%s18514_s4 + $0x8cc] ss:$48 sps:$4 sm:$0xff]  }
 0x591   :  { %10532 = vmatprep.subr.bf16.mxu0 %v13335_v19  ;;  %v10593_v19 = vrot.slane %v18112_v7, %v15467_v53 }
 0x593   :  { %10410 = vmatpush2.bf16.msra.mxu1 %v13330_v17  ;;  %v13390_v17 = vld [vmem:[%s18514_s4 + $0x8c8] ss:$48 sps:$4 sm:$0xff]  }
 0x594   :  { %10533 = vmatpush2.bf16.msra.mxu0 %v13333_v27  ;;  %10411 = vmatprep.subr.bf16.mxu1 %v13338_v16  ;;  %v18127_v27 = vld [vmem:[%s18516_s6] sm:$0xff]  ;;  %v13395_v16 = vld [vmem:[%s18514_s4 + $0x86c] ss:$48 sps:$4 sm:$0xff]  }
 0x595   :  { %10534 = vmatprep.subr.bf16.mxu0 %v13341_v36 }
 0x597   :  { %10412 = vmatpush2.bf16.msra.mxu1 %v13336_v42 }
 0x598   :  { %10535 = vmatpush2.bf16.msra.mxu0 %v13339_v18  ;;  %10463 = vmatprep.subr.bf16.mxu1 %v13344_v49  ;;  %v10669_v18 = vrot.slane %v18127_v27, %v15467_v53  ;;  %v10605_v49 = vrot.slane %v18112_v7, %v15912_v22 }
 0x59a   :  { %v18011_v41 = vpop.f32.mrf.mxu0  ;;  %10414 = vmatmul.mubr.bf16.vlgmr.msra.gmra.mxu1 %v17415_v26  ;;  %v18014_v25 = vpop.f32.mrf.mxu1 }
 0x59b   :  { %10537 = vmatmul.mubr.bf16.vlgmr.msra.gmra.mxu0 %v17179_v8  ;;  %10464 = vmatpush1.bf16.msra.mxu1 %v13342_v23  ;;  %v13348_v8 = vld [vmem:[%s18514_s4 + $0x800] ss:$48 sps:$4 sm:$0xff]   ;;  %v10170_v11 = vadd.f32 %v18014_v25, %v17622_v39  ;;  %v13393_v23 = vld [vmem:[%s18514_s4 + $0x868] ss:$48 sps:$4 sm:$0xff]  }
 0x59c   :  { %10495 = vmatprep.mubr.bf16.mxu1 %v17407_v31  ;;  %v18021_v60 = vpop.f32.mrf.mxu0  ;;  %v18023_v15 = vpop.f32.mrf.mxu1  ;;  %10465 = vmatprep.subr.bf16.mxu1 %v13347_v20 }
 0x59d   :  { %v10650_v42 = vmul.f32 %v10593_v19, %v10170_v11  ;;  %v13434_v11 = vld [vmem:[%s18514_s4 + $0x98c] ss:$48 sps:$4 sm:$0xff]   ;;  %v13432_v19 = vld [vmem:[%s18514_s4 + $0x988] ss:$48 sps:$4 sm:$0xff]  }
 0x59e   :  { %v10296_v14 = vpop.f32.mrf.mxu0  ;;  %v10173_v28 = vpop.f32.mrf.mxu1 }
 0x59f   :  { %10466 = vmatpush1.bf16.msra.mxu1 %v13345_v3  ;;  %v13398_v3 = vld [vmem:[%s18514_s4 + $0x80c] ss:$48 sps:$4 sm:$0xff]  }
 0x5a0   :  { %v10297_v58 = vpop.f32.mrf.mxu0  ;;  %v10174_v1 = vpop.f32.mrf.mxu1  ;;  %10467 = vmatprep.subr.bf16.mxu1 %v13350_v4 }
 0x5a1   :  { %v13396_v1 = vld [vmem:[%s18514_s4 + $0x808] ss:$48 sps:$4 sm:$0xff]  }
 0x5a3   :  { %10468 = vmatpush1.bf16.msra.mxu1 %v13348_v8  ;;  %v10726_v8 = vadd.f32 %v10669_v18, %v10650_v42  ;;  %v10172_v42 = vadd.f32 %v18023_v15, %v17629_v47  ;;  %v10597_v18 = vrot.slane %v18112_v7, %v15470_v38  ;;  %v10677_v47 = vrot.slane %v18127_v27, %v15909_v21 }
 0x5a4   :  { %10469 = vmatprep.subr.bf16.mxu1 %v13353_v37 }
 0x5a7   :  { %10470 = vmatpush1.bf16.msra.mxu1 %v13351_v54 }
 0x5a8   :  { %10471 = vmatprep.subr.bf16.mxu1 %v13356_v29  ;;  %v13401_v29 = vld [vmem:[%s18514_s4 + $0x7ac] ss:$48 sps:$4 sm:$0xff]  }
 0x5ab   :  { %10472 = vmatpush1.bf16.msra.mxu1 %v13354_v46  ;;  %v10738_v46 = vmax.f32 %v10726_v8, 0.0 }
 0x5ac   :  { %10473 = vmatprep.subr.bf16.mxu1 %v13359_v63 }
 0x5af   :  { %10474 = vmatpush1.bf16.msra.mxu1 %v13357_v30  ;;  %v13399_v30 = vld [vmem:[%s18514_s4 + $0x7a8] ss:$48 sps:$4 sm:$0xff]  }
 0x5b0   :  { %10475 = vmatprep.subr.bf16.mxu1 %v13362_v33  ;;  %v13404_v33 = vld [vmem:[%s18514_s4 + $0x74c] ss:$48 sps:$4 sm:$0xff]  }
 0x5b3   :  { %10476 = vmatpush1.bf16.msra.mxu1 %v13360_v24 }
 0x5b4   :  { %10477 = vmatprep.subr.bf16.mxu1 %v13365_v35  ;;  %v13402_v35 = vld [vmem:[%s18514_s4 + $0x748] ss:$48 sps:$4 sm:$0xff]  }
 0x5b7   :  { %10478 = vmatpush1.bf16.msra.mxu1 %v13363_v43  ;;  %v13407_v43 = vld [vmem:[%s18514_s4 + $0x6ec] ss:$48 sps:$4 sm:$0xff]  }
 0x5b8   :  { %10479 = vmatprep.subr.bf16.mxu1 %v13368_v9  ;;  %v13405_v9 = vld [vmem:[%s18514_s4 + $0x6e8] ss:$48 sps:$4 sm:$0xff]  }
 0x5bb   :  { %10480 = vmatpush2.bf16.msra.mxu1 %v13366_v40  ;;  %v13410_v40 = vld [vmem:[%s18514_s4 + $0x68c] ss:$48 sps:$4 sm:$0xff]  }
 0x5bc   :  { %10481 = vmatprep.subr.bf16.mxu1 %v13371_v52  ;;  %v13408_v52 = vld [vmem:[%s18514_s4 + $0x688] ss:$48 sps:$4 sm:$0xff]  }
 0x5bf   :  { %10482 = vmatpush2.bf16.msra.mxu1 %v13369_v0  ;;  %v13413_v0 = vld [vmem:[%s18514_s4 + $0x62c] ss:$48 sps:$4 sm:$0xff]  }
 0x5c0   :  { %10483 = vmatprep.subr.bf16.mxu1 %v13374_v48  ;;  %v13411_v48 = vld [vmem:[%s18514_s4 + $0x628] ss:$48 sps:$4 sm:$0xff]  }
 0x5c3   :  { %10484 = vmatpush2.bf16.msra.mxu1 %v13372_v51  ;;  %v13416_v51 = vld [vmem:[%s18514_s4 + $0xbcc] ss:$48 sps:$4 sm:$0xff]  }
 0x5c4   :  { %10485 = vmatprep.subr.bf16.mxu1 %v13377_v56  ;;  %v13414_v56 = vld [vmem:[%s18514_s4 + $0xbc8] ss:$48 sps:$4 sm:$0xff]  }
 0x5c7   :  { %10486 = vmatpush2.bf16.msra.mxu1 %v13375_v59  ;;  %v13419_v59 = vld [vmem:[%s18514_s4 + $0xb6c] ss:$48 sps:$4 sm:$0xff]  }
 0x5c8   :  { %10487 = vmatprep.subr.bf16.mxu1 %v13380_v13  ;;  %v13417_v13 = vld [vmem:[%s18514_s4 + $0xb68] ss:$48 sps:$4 sm:$0xff]  }
 0x5cb   :  { %10488 = vmatpush2.bf16.msra.mxu1 %v13378_v44  ;;  %v13422_v44 = vld [vmem:[%s18514_s4 + $0xb0c] ss:$48 sps:$4 sm:$0xff]  }
 0x5cc   :  { %10489 = vmatprep.subr.bf16.mxu1 %v13383_v61  ;;  %v13420_v61 = vld [vmem:[%s18514_s4 + $0xb08] ss:$48 sps:$4 sm:$0xff]  }
 0x5cf   :  { %10490 = vmatpush2.bf16.msra.mxu1 %v13381_v2  ;;  %v13425_v2 = vld [vmem:[%s18514_s4 + $0xaac] ss:$48 sps:$4 sm:$0xff]  }
 0x5d0   :  { %10491 = vmatprep.subr.bf16.mxu1 %v13386_v32  ;;  %v13423_v32 = vld [vmem:[%s18514_s4 + $0xaa8] ss:$48 sps:$4 sm:$0xff]  }
 0x5d3   :  { %10492 = vmatpush2.bf16.msra.mxu1 %v13384_v55  ;;  %v13428_v55 = vld [vmem:[%s18514_s4 + $0xa4c] ss:$48 sps:$4 sm:$0xff]  }
 0x5d4   :  { %10493 = vmatprep.subr.bf16.mxu1 %v13389_v5  ;;  %v13426_v5 = vld [vmem:[%s18514_s4 + $0xa48] ss:$48 sps:$4 sm:$0xff]  }
 0x5d7   :  { %10494 = vmatpush2.bf16.msra.mxu1 %v13387_v12  ;;  %v13431_v12 = vld [vmem:[%s18514_s4 + $0x9ec] ss:$48 sps:$4 sm:$0xff]  }
 0x5d8   :  { %10545 = vmatprep.subr.bf16.mxu1 %v13392_v10  ;;  %v13429_v10 = vld [vmem:[%s18514_s4 + $0x9e8] ss:$48 sps:$4 sm:$0xff]  }
 0x5da   :  { %v18132_v36 = vpop.f32.mrf.mxu1  ;;  %v18134_v39 = vpop.f32.mrf.mxu0  ;;  %10496 = vmatmul.mubr.bf16.vlgmr.msra.gmra.mxu1 %v17415_v26 }
 0x5db   :  { %10546 = vmatpush1.bf16.msra.mxu1 %v13390_v17  ;;  %10577 = vmatprep.mubr.bf16.mxu1 %v17407_v31  ;;  %v10681_v31 = vrot.slane %v18127_v27, %v15912_v22  ;;  %v13437_v17 = vld [vmem:[%s18514_s4 + $0x92c] ss:$48 sps:$4 sm:$0xff]  }
 0x5dc   :  { %v10253_v20 = vpop.f32.mrf.mxu1  ;;  %v18145_v25 = vpop.f32.mrf.mxu0  ;;  %10547 = vmatprep.subr.bf16.mxu1 %v13395_v16  ;;  %v13435_v16 = vld [vmem:[%s18514_s4 + $0x928] ss:$48 sps:$4 sm:$0xff]  }
 0x5dd   :  { %v10254_v4 = vadd.f32 %v10253_v20, %v17828_v6  ;;  %v10651_v20 = vmul.f32 %v10597_v18, %v10172_v42  ;;  %v13453_v42 = vld [vmem:[%s18517_s7 + $0x20] ss:$8 sps:$4 sm:$0xff]   ;;  %v13458_v18 = vld [vmem:[%s18517_s7 + $0x14] ss:$8 sps:$4 sm:$0xff]  }
 0x5de   :  { %v10255_v14 = vpop.f32.mrf.mxu1  ;;  %v10378_v28 = vpop.f32.mrf.mxu0 }
 0x5df   :  { %v10653_v58 = vmul.f32 %v10605_v49, %v10254_v4  ;;  %10548 = vmatpush1.bf16.msra.mxu1 %v13393_v23  ;;  %v10252_v49 = vadd.f32 %v18132_v36, %v17817_v50  ;;  %v10601_v23 = vrot.slane %v18112_v7, %v15909_v21  ;;  %v10609_v4 = vrot.slane %v18112_v7, %v15499_v57 }
 0x5e0   :  { %v10256_v37 = vpop.f32.mrf.mxu1  ;;  %v10379_v54 = vpop.f32.mrf.mxu0  ;;  %10549 = vmatprep.subr.bf16.mxu1 %v13398_v3  ;;  %v10673_v3 = vrot.slane %v18127_v27, %v15470_v38  ;;  %v10685_v36 = vrot.slane %v18127_v27, %v15499_v57  ;;  %v10613_v28 = vrot.slane %v18112_v7, %v15508_v62 }
 0x5e1   :  { %v10729_v6 = vadd.f32 %v10681_v31, %v10653_v58  ;;  %v10652_v31 = vmul.f32 %v10601_v23, %v10252_v49  ;;  %v10689_v54 = vrot.slane %v18127_v27, %v15508_v62  ;;  %v13438_v62 = vld [vmem:[%s18517_s7 + $0x70] ss:$8 sps:$4 sm:$0xff]   ;;  %v13461_v23 = vld [vmem:[%s18517_s7 + $0x4] ss:$8 sps:$4 sm:$0xff]  }
 0x5e2   :  { %v10727_v58 = vadd.f32 %v10673_v3, %v10651_v20  ;;  %v13456_v49 = vld [vmem:[%s18517_s7 + $0x10] ss:$8 sps:$4 sm:$0xff]   ;;  %v13459_v20 = vld [vmem:[%s18517_s7] ss:$8 sps:$4 sm:$0xff]   ;;  %v13464_v3 = vld [vmem:[%s18517_s7 + $0xf4] ss:$8 sps:$4 sm:$0xff]  }
 0x5e3   :  { %v10741_v63 = vmax.f32 %v10729_v6, 0.0  ;;  %10550 = vmatpush1.bf16.msra.mxu1 %v13396_v1 }
 0x5e4   :  { %10551 = vmatprep.subr.bf16.mxu1 %v13401_v29 }
 0x5e5   :  { %v18165_v24 = vmax.f32 %v10738_v46, %v10741_v63 }
 0x5e7   :  { %10552 = vmatpush1.bf16.msra.mxu1 %v13399_v30  ;;  %v10739_v30 = vmax.f32 %v10727_v58, 0.0  ;;  %v13488_v58 = vld [vmem:[%s18517_s7 + $0xb4] ss:$8 sps:$4 sm:$0xff]  }
 0x5e8   :  { %10553 = vmatprep.subr.bf16.mxu1 %v13404_v33 }
 0x5eb   :  { %10554 = vmatpush1.bf16.msra.mxu1 %v13402_v35 }
 0x5ec   :  { %10555 = vmatprep.subr.bf16.mxu1 %v13407_v43 }
 0x5ef   :  { %10556 = vmatpush1.bf16.msra.mxu1 %v13405_v9 }
 0x5f0   :  { %10557 = vmatprep.subr.bf16.mxu1 %v13410_v40 }
 0x5f3   :  { %10558 = vmatpush1.bf16.msra.mxu1 %v13408_v52 }
 0x5f4   :  { %10559 = vmatprep.subr.bf16.mxu1 %v13413_v0  ;;  %v13440_v0 = vld [vmem:[%s18517_s7 + $0x74] ss:$8 sps:$4 sm:$0xff]  }
 0x5f5   :  { %11050 = vmatprep.subr.bf16.mxu0 %v13440_v0  ;;  %v13503_v0 = vld [vmem:[%s18517_s7 + $0x114] ss:$8 sps:$4 sm:$0xff]  }
 0x5f6   :  { %11051 = vmatpush1.bf16.msra.mxu0 %v13438_v62  ;;  %v13498_v62 = vld [vmem:[%s18517_s7 + $0x90] ss:$8 sps:$4 sm:$0xff]  }
 0x5f7   :  { %10560 = vmatpush1.bf16.msra.mxu1 %v13411_v48  ;;  %v13443_v48 = vld [vmem:[%s18517_s7 + $0x64] ss:$8 sps:$4 sm:$0xff]  }
 0x5f8   :  { %10561 = vmatprep.subr.bf16.mxu1 %v13416_v51  ;;  %v13441_v51 = vld [vmem:[%s18517_s7 + $0x60] ss:$8 sps:$4 sm:$0xff]   ;;  %11052 = vmatprep.subr.bf16.mxu0 %v13443_v48  ;;  %v13501_v48 = vld [vmem:[%s18517_s7 + $0x110] ss:$8 sps:$4 sm:$0xff]  }
 0x5fa   :  { %11053 = vmatpush1.bf16.msra.mxu0 %v13441_v51  ;;  %v13504_v51 = vld [vmem:[%s18517_s7 + $0x80] ss:$8 sps:$4 sm:$0xff]  }
 0x5fb   :  { %10562 = vmatpush2.bf16.msra.mxu1 %v13414_v56  ;;  %v13446_v56 = vld [vmem:[%s18517_s7 + $0x54] ss:$8 sps:$4 sm:$0xff]  }
 0x5fc   :  { %10563 = vmatprep.subr.bf16.mxu1 %v13419_v59  ;;  %v13465_v59 = vld [vmem:[%s18517_s7 + $0x170] ss:$8 sps:$4 sm:$0xff]   ;;  %11054 = vmatprep.subr.bf16.mxu0 %v13446_v56  ;;  %v13506_v56 = vld [vmem:[%s18517_s7 + $0x84] ss:$8 sps:$4 sm:$0xff]  }
 0x5ff   :  { %10564 = vmatpush2.bf16.msra.mxu1 %v13417_v13  ;;  %v13467_v13 = vld [vmem:[%s18517_s7 + $0x174] ss:$8 sps:$4 sm:$0xff]  }
 0x600   :  { %10565 = vmatprep.subr.bf16.mxu1 %v13422_v44  ;;  %v13444_v44 = vld [vmem:[%s18517_s7 + $0x50] ss:$8 sps:$4 sm:$0xff]  }
 0x601   :  { %11055 = vmatpush1.bf16.msra.mxu0 %v13444_v44  ;;  %v13559_v44 = vmov 0  }
 0x603   :  { %10566 = vmatpush2.bf16.msra.mxu1 %v13420_v61  ;;  %v13473_v61 = vld [vmem:[%s18517_s7 + $0x164] ss:$8 sps:$4 sm:$0xff]  }
 0x604   :  { %10567 = vmatprep.subr.bf16.mxu1 %v13425_v2  ;;  %v13449_v2 = vld [vmem:[%s18517_s7 + $0x44] ss:$8 sps:$4 sm:$0xff]  }
 0x605   :  { %11056 = vmatprep.subr.bf16.mxu0 %v13449_v2  ;;  %v10617_v2 = vrot.slane %v18112_v7, %v15931_v34 }
 0x607   :  { %10568 = vmatpush2.bf16.msra.mxu1 %v13423_v32  ;;  %v13471_v32 = vld [vmem:[%s18517_s7 + $0x160] ss:$8 sps:$4 sm:$0xff]  }
 0x608   :  { %10569 = vmatprep.subr.bf16.mxu1 %v13428_v55  ;;  %v13479_v55 = vld [vmem:[%s18517_s7 + $0x154] ss:$8 sps:$4 sm:$0xff]  }
 0x60b   :  { %10570 = vmatpush2.bf16.msra.mxu1 %v13426_v5  ;;  %v13447_v5 = vld [vmem:[%s18517_s7 + $0x40] ss:$8 sps:$4 sm:$0xff]  }
 0x60c   :  { %10571 = vmatprep.subr.bf16.mxu1 %v13431_v12  ;;  %v13452_v12 = vld [vmem:[%s18517_s7 + $0x34] ss:$8 sps:$4 sm:$0xff]   ;;  %11057 = vmatpush1.bf16.msra.mxu0 %v13447_v5 }
 0x60d   :  { %11058 = vmatprep.subr.bf16.mxu0 %v13452_v12  ;;  %v10693_v12 = vrot.slane %v18127_v27, %v15931_v34 }
 0x60f   :  { %10572 = vmatpush2.bf16.msra.mxu1 %v13429_v10  ;;  %v13477_v10 = vld [vmem:[%s18517_s7 + $0x150] ss:$8 sps:$4 sm:$0xff]  }
 0x610   :  { %10573 = vmatprep.subr.bf16.mxu1 %v13434_v11  ;;  %v13485_v11 = vld [vmem:[%s18517_s7 + $0x144] ss:$8 sps:$4 sm:$0xff]  }
 0x613   :  { %10574 = vmatpush2.bf16.msra.mxu1 %v13432_v19  ;;  %v13450_v19 = vld [vmem:[%s18517_s7 + $0x30] ss:$8 sps:$4 sm:$0xff]  }
 0x614   :  { %10575 = vmatprep.subr.bf16.mxu1 %v13437_v17  ;;  %v13455_v17 = vld [vmem:[%s18517_s7 + $0x24] ss:$8 sps:$4 sm:$0xff]   ;;  %11059 = vmatpush1.bf16.msra.mxu0 %v13450_v19 }
 0x615   :  { %11060 = vmatprep.subr.bf16.mxu0 %v13455_v17 }
 0x617   :  { %10576 = vmatpush2.bf16.msra.mxu1 %v13435_v16  ;;  %v13483_v16 = vld [vmem:[%s18517_s7 + $0x140] ss:$8 sps:$4 sm:$0xff]  }
 0x618   :  { %11091 = vmatprep.subr.bf16.mxu1 %v13467_v13  ;;  %11061 = vmatpush1.bf16.msra.mxu0 %v13453_v42  ;;  %v13509_v13 = vld [vmem:[%s18517_s7 + $0x104] ss:$8 sps:$4 sm:$0xff]  }
 0x619   :  { %11062 = vmatprep.subr.bf16.mxu0 %v13458_v18 }
 0x61a   :  { %v10333_v15 = vpop.f32.mrf.mxu1  ;;  %10578 = vmatmul.mubr.bf16.vlgmr.msra.gmra.mxu1 %v17415_v26 }
 0x61b   :  { %v10334_v50 = vadd.f32 %v10333_v15, %v18011_v41  ;;  %v18254_v14 = vpop.f32.mrf.mxu0  ;;  %v10728_v41 = vadd.f32 %v10677_v47, %v10652_v31  ;;  %11092 = vmatpush1.bf16.msra.mxu1 %v13465_v59  ;;  %v13470_v47 = vld [vmem:[%s18517_s7 + $0xe4] ss:$8 sps:$4 sm:$0xff]   ;;  %v13468_v15 = vld [vmem:[%s18517_s7 + $0xe0] ss:$8 sps:$4 sm:$0xff]   ;;  %v13476_v31 = vld [vmem:[%s18517_s7 + $0xd4] ss:$8 sps:$4 sm:$0xff]   ;;  %11123 = vmatprep.mubr.bf16.mxu1 %v13559_v44 }
 0x61c   :  { %v10335_v8 = vpop.f32.mrf.mxu1  ;;  %11093 = vmatprep.subr.bf16.mxu1 %v13473_v61  ;;  %11063 = vmatpush1.bf16.msra.mxu0 %v13456_v49  ;;  %v13507_v59 = vld [vmem:[%s18517_s7 + $0x100] ss:$8 sps:$4 sm:$0xff]  }
 0x61d   :  { %v10654_v1 = vmul.f32 %v10609_v4, %v10334_v50  ;;  %v10336_v37 = vadd.f32 %v10335_v8, %v18021_v60  ;;  %v18261_v26 = vpop.f32.mrf.mxu0  ;;  %v10740_v9 = vmax.f32 %v10728_v41, 0.0  ;;  %11064 = vmatprep.subr.bf16.mxu0 %v13461_v23  ;;  %v13462_v4 = vld [vmem:[%s18517_s7 + $0xf0] ss:$8 sps:$4 sm:$0xff]   ;;  %v13516_v44 = vld [vmem:[%s18520_s10 + $0x60] sm:$0xff]  }
 0x61e   :  { %v10337_v29 = vpop.f32.mrf.mxu1  ;;  %v13474_v50 = vld [vmem:[%s18517_s7 + $0xd0] ss:$8 sps:$4 sm:$0xff]  }
 0x61f   :  { %v10730_v6 = vadd.f32 %v10685_v36, %v10654_v1  ;;  %v10655_v46 = vmul.f32 %v10613_v28, %v10336_v37  ;;  %v10460_v57 = vpop.f32.mrf.mxu0  ;;  %11094 = vmatpush1.bf16.msra.mxu1 %v13471_v32  ;;  %v13482_v36 = vld [vmem:[%s18517_s7 + $0xc4] ss:$8 sps:$4 sm:$0xff]   ;;  %v13480_v28 = vld [vmem:[%s18517_s7 + $0xc0] ss:$8 sps:$4 sm:$0xff]   ;;  %v13486_v37 = vld [vmem:[%s18517_s7 + $0xb0] ss:$8 sps:$4 sm:$0xff]  }
 0x620   :  { %v10338_v63 = vpop.f32.mrf.mxu1  ;;  %11095 = vmatprep.subr.bf16.mxu1 %v13479_v55  ;;  %11065 = vmatpush1.bf16.msra.mxu0 %v13459_v20  ;;  %v13489_v41 = vld [vmem:[%s18517_s7 + $0x130] ss:$8 sps:$4 sm:$0xff]   ;;  %v13494_v57 = vld [vmem:[%s18517_s7 + $0xa4] ss:$8 sps:$4 sm:$0xff]   ;;  %v10587_v55 = vld [vmem:[%s18515_s5 + $0x8] sm:$0xf] }
 0x621   :  { %v10742_v33 = vmax.f32 %v10730_v6, 0.0  ;;  %v10731_v35 = vadd.f32 %v10689_v54, %v10655_v46  ;;  %v10461_v43 = vpop.f32.mrf.mxu0  ;;  %11066 = vmatprep.subr.bf16.mxu0 %v13464_v3  ;;  %v13491_v54 = vld [vmem:[%s18517_s7 + $0x134] ss:$8 sps:$4 sm:$0xff]  }
 0x622   :  { %v13495_v43 = vld [vmem:[%s18517_s7 + $0x120] ss:$8 sps:$4 sm:$0xff]  }
 0x623   :  { %v10743_v40 = vmax.f32 %v10731_v35, 0.0  ;;  %v18263_v52 = vmax.f32 %v10739_v30, %v10742_v33  ;;  %11096 = vmatpush1.bf16.msra.mxu1 %v13477_v10  ;;  %v13492_v30 = vld [vmem:[%s18517_s7 + $0xa0] ss:$8 sps:$4 sm:$0xff]   ;;  %v13497_v33 = vld [vmem:[%s18517_s7 + $0x124] ss:$8 sps:$4 sm:$0xff]   ;;  %v10629_v10 = vrot.slane %v10587_v55, %v15470_v38 }
 0x624   :  { %11097 = vmatprep.subr.bf16.mxu1 %v13485_v11  ;;  %11067 = vmatpush2.bf16.msra.mxu0 %v13462_v4  ;;  %v10663_v11 = vld [vmem:[%s18516_s6 + $0x8] sm:$0xf] }
 0x625   :  { %v18265_v60 = vmax.f32 %v10740_v9, %v10743_v40  ;;  %11068 = vmatprep.subr.bf16.mxu0 %v13470_v47  ;;  %v13500_v40 = vld [vmem:[%s18517_s7 + $0x94] ss:$8 sps:$4 sm:$0xff]   ;;  %v10705_v17 = vrot.slane %v10663_v11, %v15470_v38 }
 0x627   :  { %11098 = vmatpush1.bf16.msra.mxu1 %v13483_v16 }
 0x628   :  { %11069 = vmatpush2.bf16.msra.mxu0 %v13468_v15  ;;  %11099 = vmatprep.subr.bf16.mxu1 %v13491_v54  ;;  %v10621_v15 = vrot.slane %v18112_v7, %v15940_v45  ;;  %v10637_v7 = vrot.slane %v10587_v55, %v15912_v22 }
 0x629   :  { %11070 = vmatprep.subr.bf16.mxu0 %v13476_v31 }
 0x62b   :  { %11100 = vmatpush1.bf16.msra.mxu1 %v13489_v41 }
 0x62c   :  { %11071 = vmatpush2.bf16.msra.mxu0 %v13474_v50  ;;  %11101 = vmatprep.subr.bf16.mxu1 %v13497_v33 }
 0x62d   :  { %11072 = vmatprep.subr.bf16.mxu0 %v13482_v36  ;;  %v10697_v36 = vrot.slane %v18127_v27, %v15940_v45 }
 0x62f   :  { %11102 = vmatpush1.bf16.msra.mxu1 %v13495_v43 }
 0x630   :  { %11073 = vmatpush2.bf16.msra.mxu0 %v13480_v28  ;;  %11103 = vmatprep.subr.bf16.mxu1 %v13503_v0  ;;  %v10633_v28 = vrot.slane %v10587_v55, %v15909_v21 }
 0x631   :  { %11074 = vmatprep.subr.bf16.mxu0 %v13488_v58 }
 0x633   :  { %11104 = vmatpush1.bf16.msra.mxu1 %v13501_v48 }
 0x634   :  { %11075 = vmatpush2.bf16.msra.mxu0 %v13486_v37  ;;  %11105 = vmatprep.subr.bf16.mxu1 %v13509_v13  ;;  %v13515_v13 = vld [vmem:[%s18520_s10 + $0x28] sm:$0xff]  }
 0x635   :  { %11076 = vmatprep.subr.bf16.mxu0 %v13494_v57 }
 0x637   :  { %11106 = vmatpush1.bf16.msra.mxu1 %v13507_v59  ;;  %v13514_v59 = vld [vmem:[%s18520_s10 + $0x68] sm:$0xff]  }
 0x638   :  { %11077 = vmatpush2.bf16.msra.mxu0 %v13492_v30 }
 0x639   :  { %11078 = vmatprep.subr.bf16.mxu0 %v13500_v40 }
 0x63c   :  { %11079 = vmatpush2.bf16.msra.mxu0 %v13498_v62 }
 0x63d   :  { %11080 = vmatprep.subr.bf16.mxu0 %v13506_v56  ;;  %v13511_v56 = vld [vmem:[%s18520_s10 + $0x38] sm:$0xff]  }
 0x640   :  { %11081 = vmatpush2.bf16.msra.mxu0 %v13504_v51  ;;  %v13510_v51 = vld [vmem:[%s18520_s10 + $0x78] sm:$0xff]  }
 0x641   :  { %12836 = vmatprep.subr.bf16.mxu1 %v13510_v51 }
 0x65a   :  { %v10415_v8 = vpop.f32.mrf.mxu1 }
 0x65b   :  { %v18366_v1 = vpop.f32.mrf.mxu0  ;;  %v10416_v61 = vadd.f32 %v10415_v8, %v18134_v39  ;;  %v10701_v8 = vrot.slane %v10663_v11, %v15467_v53 }
 0x65c   :  { %v10417_v29 = vpop.f32.mrf.mxu1 }
 0x65d   :  { %v18377_v6 = vpop.f32.mrf.mxu0  ;;  %v10656_v5 = vmul.f32 %v10617_v2, %v10416_v61  ;;  %v10418_v47 = vadd.f32 %v10417_v29, %v18145_v25  ;;  %v10709_v25 = vrot.slane %v10663_v11, %v15909_v21  ;;  %v13517_v61 = vld [vmem:[%s18520_s10 + $0x20] sm:$0xff]   ;;  %v13518_v2 = vld [vmem:[%s18520_s10 + $0x58] sm:$0xff]  }
 0x65e   :  { %v10419_v46 = vpop.f32.mrf.mxu1 }
 0x65f   :  { %v10542_v63 = vpop.f32.mrf.mxu0  ;;  %v10732_v42 = vadd.f32 %v10693_v12, %v10656_v5  ;;  %v10657_v50 = vmul.f32 %v10621_v15, %v10418_v47  ;;  %v10713_v46 = vrot.slane %v10663_v11, %v15912_v22  ;;  %v13521_v5 = vld [vmem:[%s18520_s10 + $0x10] sm:$0xff]   ;;  %v13522_v12 = vld [vmem:[%s18520_s10 + $0x48] sm:$0xff]   ;;  %v13524_v11 = vld [vmem:[%s18520_s10 + $0x40] sm:$0xff]  }
 0x660   :  { %v10420_v35 = vpop.f32.mrf.mxu1 }
 0x661   :  { %v10543_v9 = vpop.f32.mrf.mxu0  ;;  %v10744_v20 = vmax.f32 %v10732_v42, 0.0 }
 0x69a   :  { %v10497_v32 = vpop.f32.mrf.mxu1 }
 0x69b   :  { %v10498_v31 = vadd.f32 %v10497_v32, %v18254_v14  ;;  %v10733_v14 = vadd.f32 %v10697_v36, %v10657_v50  ;;  %v13519_v32 = vld [vmem:[%s18520_s10 + $0x18] sm:$0xff]  }
 0x69c   :  { %v10499_v19 = vpop.f32.mrf.mxu1 }
 0x69d   :  { %v10500_v39 = vadd.f32 %v10499_v19, %v18261_v26  ;;  %v10625_v26 = vrot.slane %v10587_v55, %v15467_v53  ;;  %v10745_v33 = vmax.f32 %v10733_v14, 0.0  ;;  %v13520_v55 = vld [vmem:[%s18520_s10 + $0x50] sm:$0xff]   ;;  %v13525_v19 = vld [vmem:[%s18520_s10] sm:$0xff]  }
 0x69e   :  { %v10501_v16 = vpop.f32.mrf.mxu1 }
 0x69f   :  { %v10659_v18 = vmul.f32 %v10629_v10, %v10500_v39  ;;  %v10658_v37 = vmul.f32 %v10625_v26, %v10498_v31  ;;  %v13523_v10 = vld [vmem:[%s18520_s10 + $0x8] sm:$0xff]   ;;  %v11132_v39 = vld [vmem:[%s18518_s8] sm:$0x3] }
 0x6a0   :  { %v10502_v49 = vpop.f32.mrf.mxu1  ;;  %v11137_v42 = vrot.slane %v11132_v39, %v15467_v53 }
 0x6a1   :  { %v10735_v23 = vadd.f32 %v10705_v17, %v10659_v18  ;;  %v10734_v27 = vadd.f32 %v10701_v8, %v10658_v37  ;;  %v11146_v17 = vld [vmem:[%s18519_s9] sm:$0x3] }
 0x6a2   :  { %v11155_v15 = vrot.slane %v11146_v17, %v15470_v38 }
 0x6a3   :  { %v10747_v3 = vmax.f32 %v10735_v23, 0.0  ;;  %v11151_v23 = vrot.slane %v11146_v17, %v15467_v53 }
 0x6a5   :  { %v10753_v4 = vmax.f32 %v10744_v20, %v10747_v3  ;;  %v11141_v3 = vrot.slane %v11132_v39, %v15470_v38 }
 0x6a7   :  { %v10756_v34 = vmax.f32 %v18165_v24, %v10753_v4 }
 0x6da   :  { %v10579_v58 = vpop.f32.mrf.mxu1 }
 0x6db   :  { %v10580_v24 = vadd.f32 %v10579_v58, %v18366_v1  ;;  %v10746_v1 = vmax.f32 %v10734_v27, 0.0 }
 0x6dc   :  { %v10581_v54 = vpop.f32.mrf.mxu1 }
 0x6dd   :  { %v10660_v29 = vmul.f32 %v10633_v28, %v10580_v24  ;;  %v10582_v41 = vadd.f32 %v10581_v54, %v18377_v6  ;;  %v10759_v6 = vpack.c.bf16 %v10756_v34, %v10756_v34 }
 0x6de   :  { %v10583_v45 = vpop.f32.mrf.mxu1 }
 0x6df   :  { %v10736_v57 = vadd.f32 %v10709_v25, %v10660_v29  ;;  %v10661_v63 = vmul.f32 %v10637_v7, %v10582_v41 }
 0x6e0   :  { %v10584_v30 = vpop.f32.mrf.mxu1 }
 0x6e1   :  { %v10748_v35 = vmax.f32 %v10736_v57, 0.0  ;;  %v10737_v43 = vadd.f32 %v10713_v46, %v10661_v63  ;;  %v12819_v57 = vld [vmem:[%s18521_s11] ss:$0 sm:$0xff] }
 0x6e3   :  { %v10749_v9 = vmax.f32 %v10737_v43, 0.0  ;;  %v10754_v21 = vmax.f32 %v10745_v33, %v10748_v35 }
 0x6e5   :  { %v10755_v40 = vmax.f32 %v10746_v1, %v10749_v9  ;;  %v10757_v62 = vmax.f32 %v18263_v52, %v10754_v21  ;;  %v13512_v52 = vld [vmem:[%s18520_s10 + $0x70] sm:$0xff]  }
 0x6e7   :  { %v10760_v0 = vpack.c.bf16 %v10757_v62, %v10757_v62  ;;  %v10758_v48 = vmax.f32 %v18265_v60, %v10755_v40  ;;  %v13513_v60 = vld [vmem:[%s18520_s10 + $0x30] sm:$0xff]   ;;  %s13560_s10 = smov [#allocation2]  }
 0x6e8   :  { %s11355_s0 = sshll.u32 %s13560_s10, 4  ;;  %s11356_s0 = int_to_ptr.vmem [resolvable:$true] %s11355_s0 }
 0x6e9   :  { %11082 = vmatprep.mubr.bf16.mxu0 %v10760_v0  ;;  %v10761_v22 = vpack.c.bf16 %v10758_v48, %v10758_v48  ;;  %s13536_s15 = scalar_lea.vmem %s11356_s0, 32  ;;  %p13541_p1 = scmp.lt.s32.totalorder %s11356_s0, %s11356_s0 }
 0x6ea   :  { %11083 = vmatmul.mubr.bf16.vlgmr.msra.gmra.mxu0 %v10759_v6  ;;  %p13537_p0 = scmp.ne.s32.totalorder %s11356_s0, %s13536_s15  ;;  %p13542_p2 = scmp.lt.s32.totalorder %s13536_s15, %s13536_s15 }
 0x6eb   :  { %11124 = vmatmul.mubr.bf16.vlgmr.msra.gmra.mxu1 %v10761_v22 }
 0x6ec   :  { %12837 = vmatpush3.bf16.msra.mxu1 %v13511_v56  ;;  %p13543_p3 = por %p13542_p2, %p13541_p1 }
 0x6ed   :  { %12838 = vmatprep.subr.bf16.mxu1 %v13512_v52 }
 0x6ee   :  { %p13544_p4 = pnand %p13543_p3, %p13537_p0 }
 0x6f0   :  { %12839 = vmatpush3.bf16.msra.mxu1 %v13513_v60 }
 0x6f1   :  { %12840 = vmatprep.subr.bf16.mxu1 %v13514_v59 }
 0x6f4   :  { %12841 = vmatpush3.bf16.msra.mxu1 %v13515_v13 }
 0x6f5   :  { %12842 = vmatprep.subr.bf16.mxu1 %v13516_v44 }
 0x6f8   :  { %12843 = vmatpush3.bf16.msra.mxu1 %v13517_v61 }
 0x6f9   :  { %12844 = vmatprep.subr.bf16.mxu1 %v13518_v2 }
 0x6fc   :  { %12845 = vmatpush3.bf16.msra.mxu1 %v13519_v32 }
 0x6fd   :  { %12846 = vmatprep.subr.bf16.mxu1 %v13520_v55 }
 0x700   :  { %12847 = vmatpush3.bf16.msra.mxu1 %v13521_v5 }
 0x701   :  { %12848 = vmatprep.subr.bf16.mxu1 %v13522_v12 }
 0x704   :  { %12849 = vmatpush3.bf16.msra.mxu1 %v13523_v10 }
 0x705   :  { %12850 = vmatprep.subr.bf16.mxu1 %v13524_v11 }
 0x708   :  { %12851 = vmatpush3.bf16.msra.mxu1 %v13525_v19 }
 0x7aa   :  { %v11084_v16 = vpop.f32.mrf.mxu0 }
 0x7ab   :  { %v11125_v18 = vpop.f32.mrf.mxu1 }
 0x7ac   :  { %v11126_v49 = vadd.f32 %v11125_v18, %v11084_v16  ;;  %v11086_v20 = vpop.f32.mrf.mxu0 }
 0x7ad   :  { %v11127_v4 = vpop.f32.mrf.mxu1 }
 0x7ae   :  { %v11144_v34 = vmul.f32 %v11137_v42, %v11126_v49  ;;  %v11128_v47 = vadd.f32 %v11127_v4, %v11086_v20  ;;  %v11088_v31 = vpop.f32.mrf.mxu0 }
 0x7af   :  { %v11129_v26 = vpop.f32.mrf.mxu1 }
 0x7b0   :  { %v11158_v50 = vadd.f32 %v11151_v23, %v11144_v34  ;;  %v11145_v36 = vmul.f32 %v11141_v3, %v11128_v47  ;;  %v11089_v28 = vpop.f32.mrf.mxu0 }
 0x7b1   :  { %v11130_v8 = vpop.f32.mrf.mxu1 }
 0x7b2   :  { %v11160_v58 = vsub.f32 0.0, %v11158_v50  ;;  %v11159_v37 = vadd.f32 %v11155_v15, %v11145_v36 }
 0x7b4   :  { %v11162_v24 = vmul.f32 1.442695, %v11160_v58  ;;  %v11161_v25 = vsub.f32 0.0, %v11159_v37 }
 0x7b6   :  { %13526 = vpow2.f32 %v11162_v24  ;;  %v11164_v53 = vmul.f32 1.442695, %v11161_v25 }
 0x7b8   :  { %13528 = vpow2.f32 %v11164_v53 }
 0x7c3   :  { %v13527_v7 = vpop.eup %13526 }
 0x7c4   :  { %v11166_v54 = vadd.f32 1.0, %v13527_v7 }
 0x7c5   :  { %v13529_v14 = vpop.eup %13528 }
 0x7c6   :  { %v11167_v29 = vadd.f32 1.0, %v13529_v14  ;;  %13530 = vrcp.f32 %v11166_v54 }
 0x7c8   :  { %13532 = vrcp.f32 %v11167_v29 }
 0x7d3   :  { %v13531_v38 = vpop.eup %13530 }
 0x7d4   :  { %v11170_v45 = vpack.c.bf16 %v13531_v38, %v13531_v38 }
 0x7d5   :  { %v13533_v41 = vpop.eup %13532 }
 0x7d6   :  { %v11171_v46 = vpack.c.bf16 %v13533_v41, %v13533_v41 }
 0x7d8   :  { %11339 = vmatprep.mubr.bf16.mxu1 %v11171_v46 }
 0x7d9   :  { %11340 = vmatmul.mubr.bf16.vlgmr.msra.gmra.mxu1 %v11170_v45 }
 0x899   :  { %v12852_v27 = vpop.f32.mrf.mxu1 }
 0x89b   :  { %v12853_v63 = vpop.f32.mrf.mxu1 }
 0x89c   :  { %v12854_v30 = vadd.f32 %v12853_v63, %v12852_v27 }
 0x89d   :  { %v12855_v33 = vpop.f32.mrf.mxu1 }
 0x89e   :  { %v11342_v35 = vadd.f32 %v12854_v30, %v12819_v57 }
 0x89f   :  { %v12856_v43 = vpop.f32.mrf.mxu1 }
 0x8a0   :  { %13534 = vtanh.f32 %v11342_v35 }
 0x8ad   :  { %v13535_v1 = vpop.eup %13534 }
 0x8ae   :  { %11348 = vst [vmem:[#allocation2] sm:$0x3] %v13535_v1 }
 0x8af   :  { %13547 = shalt.err (!%p13544_p4)
}
 0x8b0   :  { %11358 = dma.vmem_to_hbm [thread:$0]  %s11356_s0, 32, %s18522_s12, [#allocation3]  }
 0x8b1   :  { %13556 = dma.done.wait [#allocation3], 32  }
 0x8b2   :  { %13557 = vsyncadd [#allocation3], 4294967264 }
 0x8b3   :  { %11362 = vsyncpa [#allocation3], 1 }

</bundles_post_ra>
